<compile_context>
chip_gen: v6e
topology: v6e:2x2x1
jax: 0.10.0
libtpu: 0.0.40
codegen_flags: <defaults>
</compile_context>

<pallas_src>
import functools

import jax
import jax.numpy as jnp
from jax import lax
from jax.experimental import pallas as pl
from jax.experimental.pallas import tpu as pltpu


def _decoder_block_kernel(x_ref, w1_ref, b1_ref, w2_ref, b2_ref, mask_ref,
                          out_ref, mid_ref, *, H, W):
    # x_ref   : (Nx, Cin)        flattened zero-padded NHWC rows (row stride W+4)
    # w1_ref  : (3, 3, Cin, Cmid)   b1_ref: (1, Cmid)
    # w2_ref  : (4, 4, Cmid, Cout)  b2_ref: (1, Cout)
    # mask_ref: (N1, 1)          zeros on the padded border ring / junk columns
    # out_ref : (2, 2, N2, Cout) 4 output-parity planes (lane-dense, Cout on lanes)
    # mid_ref : (N1 + W + 4, Cmid) VMEM scratch holding the zero-ring-padded mid
    f32 = jnp.float32
    Wp4 = W + 4                 # row stride of the flattened padded input
    N1 = (H + 2) * Wp4          # stage-1 rows (conv over the padded output domain)
    N2 = H * Wp4                # stage-2 rows per parity plane (junk cols cropped later)
    Cmid = mid_ref.shape[-1]
    Cout = out_ref.shape[-1]

    # ---- Stage 1: Conv2d(3x3, pad=1) + ReLU -------------------------------
    # Each kernel tap is one contiguous slab -> one MXU matmul, f32 accumulate.
    acc1 = jnp.zeros((N1, Cmid), f32)
    for kh in range(3):
        for kw in range(3):
            slab = x_ref[pl.ds(kh * Wp4 + kw, N1), :]              # (N1, Cin)
            acc1 = acc1 + jnp.dot(slab, w1_ref[kh, kw],
                                  preferred_element_type=f32)
    # Bias + ReLU, then zero the border ring / junk columns so deconv taps that
    # fall outside the real feature map read exact zeros.
    mid = jnp.maximum(acc1 + b1_ref[...], 0.0) * mask_ref[...]
    mid_ref[pl.ds(0, N1), :] = mid
    mid_ref[pl.ds(N1, Wp4), :] = jnp.zeros((Wp4, Cmid), f32)       # guard rows

    # ---- Stage 2: ConvTranspose2d(k=4, s=2, p=1) + ReLU -------------------
    # out[2m+ph, 2n+pw] = sum_{(dh,kh) in taps[ph]} sum_{(dw,kw) in taps[pw]}
    #                       mid[m+dh, n+dw] @ W2[kh, kw]
    taps = (((0, 1), (-1, 3)),      # even output rows/cols: (offset, kernel tap)
            ((0, 2), (1, 0)))       # odd  output rows/cols
    for ph in range(2):
        for pw in range(2):
            acc2 = jnp.zeros((N2, Cout), f32)
            for dh, kh in taps[ph]:
                for dw, kw in taps[pw]:
                    start = (1 + dh) * Wp4 + (1 + dw)
                    slab = mid_ref[pl.ds(start, N2), :]            # (N2, Cmid)
                    acc2 = acc2 + jnp.dot(slab, w2_ref[kh, kw],
                                          preferred_element_type=f32)
            out_ref[ph, pw] = jnp.maximum(acc2 + b2_ref[...],
                                          0.0).astype(out_ref.dtype)


def decoder_block_v2(x, w1, b1, w2, b2):
    """DecoderBlockV2 forward (is_deconv=True).

    x : (B, Cin, H, W) NCHW float32
    w1: (Cmid, Cin, 3, 3), b1: (Cmid,)    -- Conv2d(3x3, padding=1)
    w2: (Cmid, Cout, 4, 4), b2: (Cout,)   -- ConvTranspose2d(k=4, s=2, p=1)
    returns (B, Cout, 2H, 2W) float32
    """
    B, Cin, H, W = x.shape
    Cmid = w1.shape[0]
    Cout = w2.shape[1]
    Wp4 = W + 4
    N1 = (H + 2) * Wp4
    N2 = H * Wp4
    Nx = (H + 5) * Wp4          # one extra zero guard row keeps tap slabs in-bounds

    # NCHW -> NHWC (channels on the lane axis), zero-pad spatial by 2 (+1 guard
    # row at the bottom) and flatten rows so conv taps are contiguous slabs.
    x_nhwc = jnp.transpose(x, (0, 2, 3, 1)).astype(jnp.float32)
    x_pad = jnp.pad(x_nhwc, ((0, 0), (2, 3), (2, 2), (0, 0)))
    x_flat = x_pad.reshape(B, Nx, Cin)

    # Weights as (kh, kw, C_in_of_layer, C_out_of_layer): each tap is a ready
    # (Cin, Cout) matmul operand.
    w1_t = jnp.transpose(w1, (2, 3, 1, 0)).astype(jnp.float32)     # (3,3,Cin,Cmid)
    w2_t = jnp.transpose(w2, (2, 3, 0, 1)).astype(jnp.float32)     # (4,4,Cmid,Cout)
    b1_2d = b1.reshape(1, Cmid).astype(jnp.float32)
    b2_2d = b2.reshape(1, Cout).astype(jnp.float32)

    # Mask zeroing the padded border ring (and junk columns) of stage-1 output.
    idx = jnp.arange(N1)
    r, c = idx // Wp4, idx % Wp4
    mask = ((r >= 1) & (r <= H) & (c >= 1) & (c <= W)).astype(jnp.float32)
    mask = mask.reshape(N1, 1)

    # Tile-padded VMEM estimate with headroom, capped at v7x's 64 MiB budget.
    def _padded_bytes(*shape):
        lead = 1
        for d in shape[:-2]:
            lead *= d
        sub = -(-shape[-2] // 8) * 8
        lane = -(-shape[-1] // 128) * 128
        return 4 * lead * sub * lane

    est = (2 * _padded_bytes(Nx, Cin)                 # x block, double-buffered
           + 2 * _padded_bytes(2, 2, N2, Cout)        # out block, double-buffered
           + _padded_bytes(3, 3, Cin, Cmid)
           + _padded_bytes(4, 4, Cmid, Cout)
           + _padded_bytes(N1 + Wp4, Cmid)            # mid scratch
           + 4 * _padded_bytes(N1, max(Cmid, Cout))   # live accumulators
           + _padded_bytes(N1, 1))
    vmem_limit = int(min(max(2 * est, 16 * 1024 * 1024), 64 * 1024 * 1024))

    kernel = functools.partial(_decoder_block_kernel, H=H, W=W)

    out6 = pl.pallas_call(
        kernel,
        out_shape=jax.ShapeDtypeStruct((B, 2, 2, N2, Cout), jnp.float32),
        grid=(B,),
        in_specs=[
            pl.BlockSpec((None, Nx, Cin), lambda b: (b, 0, 0)),
            pl.BlockSpec((3, 3, Cin, Cmid), lambda b: (0, 0, 0, 0)),
            pl.BlockSpec((1, Cmid), lambda b: (0, 0)),
            pl.BlockSpec((4, 4, Cmid, Cout), lambda b: (0, 0, 0, 0)),
            pl.BlockSpec((1, Cout), lambda b: (0, 0)),
            pl.BlockSpec((N1, 1), lambda b: (0, 0)),
        ],
        out_specs=pl.BlockSpec((None, 2, 2, N2, Cout),
                               lambda b: (b, 0, 0, 0, 0)),
        scratch_shapes=[pltpu.VMEM((N1 + Wp4, Cmid), jnp.float32)],
        compiler_params=pltpu.CompilerParams(
            dimension_semantics=("parallel",),
            vmem_limit_bytes=vmem_limit,
        ),
    )(x_flat, w1_t, b1_2d, w2_t, b2_2d, mask)

    # Drop junk columns and interleave the 4 parity planes -> NCHW (B, Cout, 2H, 2W).
    out = out6.reshape(B, 2, 2, H, Wp4, Cout)[:, :, :, :, :W, :]
    out = jnp.transpose(out, (0, 3, 1, 4, 2, 5)).reshape(B, 2 * H, 2 * W, Cout)
    return jnp.transpose(out, (0, 3, 1, 2))


def _reference(x, w1, b1, w2, b2):
    """Pure-XLA reference for DecoderBlockV2 (is_deconv=True)."""
    mid = lax.conv_general_dilated(
        x, w1, window_strides=(1, 1), padding=((1, 1), (1, 1)),
        dimension_numbers=("NCHW", "OIHW", "NCHW"),
        precision=lax.Precision.HIGHEST)
    mid = jnp.maximum(mid + b1[None, :, None, None], 0.0)
    # ConvTranspose2d(k=4, s=2, p=1) == lhs-dilated conv with the spatially
    # flipped, channel-swapped kernel and padding k-1-p = 2.
    w2_eq = jnp.transpose(w2, (1, 0, 2, 3))[:, :, ::-1, ::-1]
    out = lax.conv_general_dilated(
        mid, w2_eq, window_strides=(1, 1), padding=((2, 2), (2, 2)),
        lhs_dilation=(2, 2), dimension_numbers=("NCHW", "OIHW", "NCHW"),
        precision=lax.Precision.HIGHEST)
    return jnp.maximum(out + b2[None, :, None, None], 0.0)


if __name__ == "__main__":
    # Small shapes consistent with DecoderBlockV2(in=8, middle=16, out=8).
    B, Cin, H, W = 2, 8, 16, 16
    Cmid, Cout = 16, 8

    key = jax.random.PRNGKey(0)
    kx, kw1, kb1, kw2, kb2 = jax.random.split(key, 5)
    x = jax.random.normal(kx, (B, Cin, H, W), dtype=jnp.float32)
    # PyTorch parameter shapes: Conv2d (out,in,3,3); ConvTranspose2d (in,out,4,4).
    w1 = jax.random.normal(kw1, (Cmid, Cin, 3, 3), dtype=jnp.float32) * 0.1
    b1 = jax.random.normal(kb1, (Cmid,), dtype=jnp.float32) * 0.1
    w2 = jax.random.normal(kw2, (Cmid, Cout, 4, 4), dtype=jnp.float32) * 0.1
    b2 = jax.random.normal(kb2, (Cout,), dtype=jnp.float32) * 0.1

    out = decoder_block_v2(x, w1, b1, w2, b2)
    out = jax.block_until_ready(out)

    ref = _reference(x, w1, b1, w2, b2)
    assert out.shape == (B, Cout, 2 * H, 2 * W), out.shape
    max_err = float(jnp.max(jnp.abs(out - ref)))
    assert jnp.allclose(out, ref, atol=2e-3, rtol=2e-3), max_err

    print("KERNEL_OK")
</pallas_src>

<mosaic_0001>
module attributes {stable_mosaic.version = 11 : i64} {
  func.func @_decoder_block_kernel(%arg0: i32, %arg1: memref<1x420x8xf32, #tpu.memory_space<vmem>>, %arg2: memref<3x3x8x16xf32, #tpu.memory_space<vmem>>, %arg3: memref<1x16xf32, #tpu.memory_space<vmem>>, %arg4: memref<4x4x16x8xf32, #tpu.memory_space<vmem>>, %arg5: memref<1x8xf32, #tpu.memory_space<vmem>>, %arg6: memref<360x1xf32, #tpu.memory_space<vmem>>, %arg7: memref<1x2x2x320x8xf32, #tpu.memory_space<vmem>>, %arg8: memref<380x16xf32, #tpu.memory_space<vmem>>) attributes {dimension_semantics = [#tpu.dimension_semantics<parallel>], iteration_bounds = array<i64: 2>, scalar_prefetch = 0 : i64, scratch_operands = 1 : i64, tpu.core_type = #tpu.core_type<tc>, window_params = [{transform_indices = @transform_0, window_bounds = array<i64: 1, 420, 8>}, {pipeline_mode = #tpu.pipeline_mode<synchronous>, transform_indices = @transform_1, window_bounds = array<i64: 3, 3, 8, 16>}, {pipeline_mode = #tpu.pipeline_mode<synchronous>, transform_indices = @transform_2, window_bounds = array<i64: 1, 16>}, {pipeline_mode = #tpu.pipeline_mode<synchronous>, transform_indices = @transform_3, window_bounds = array<i64: 4, 4, 16, 8>}, {pipeline_mode = #tpu.pipeline_mode<synchronous>, transform_indices = @transform_4, window_bounds = array<i64: 1, 8>}, {pipeline_mode = #tpu.pipeline_mode<synchronous>, transform_indices = @transform_5, window_bounds = array<i64: 360, 1>}, {transform_indices = @transform_6, window_bounds = array<i64: 1, 2, 2, 320, 8>}]} {
    %cst = arith.constant 0.000000e+00 : f32
    %0 = vector.broadcast %cst : f32 to vector<360x16xf32>
    %c0 = arith.constant 0 : index
    %c0_0 = arith.constant 0 : index
    %c0_1 = arith.constant 0 : index
    %1 = vector.load %arg1[%c0, %c0_0, %c0_1] : memref<1x420x8xf32, #tpu.memory_space<vmem>>, vector<1x360x8xf32>
    %2 = vector.shape_cast %1 : vector<1x360x8xf32> to vector<360x8xf32>
    %c0_2 = arith.constant 0 : index
    %c0_3 = arith.constant 0 : index
    %c0_4 = arith.constant 0 : index
    %c0_5 = arith.constant 0 : index
    %3 = vector.load %arg2[%c0_2, %c0_3, %c0_4, %c0_5] : memref<3x3x8x16xf32, #tpu.memory_space<vmem>>, vector<1x1x8x16xf32>
    %4 = vector.shape_cast %3 : vector<1x1x8x16xf32> to vector<8x16xf32>
    %cst_6 = arith.constant dense<0.000000e+00> : vector<360x16xf32>
    %5 = tpu.matmul %2, %4, %cst_6 {dimension_numbers = #tpu.dot_dimension_numbers<[1], [0], [0], [1], [0, 0, 1, 1], [], []>} : vector<360x8xf32>, vector<8x16xf32>, vector<360x16xf32> -> vector<360x16xf32>
    %6 = arith.addf %0, %5 : vector<360x16xf32>
    %c0_7 = arith.constant 0 : index
    %c1 = arith.constant 1 : index
    %c0_8 = arith.constant 0 : index
    %7 = vector.load %arg1[%c0_7, %c1, %c0_8] : memref<1x420x8xf32, #tpu.memory_space<vmem>>, vector<1x360x8xf32>
    %8 = vector.shape_cast %7 : vector<1x360x8xf32> to vector<360x8xf32>
    %c0_9 = arith.constant 0 : index
    %c1_10 = arith.constant 1 : index
    %c0_11 = arith.constant 0 : index
    %c0_12 = arith.constant 0 : index
    %9 = vector.load %arg2[%c0_9, %c1_10, %c0_11, %c0_12] : memref<3x3x8x16xf32, #tpu.memory_space<vmem>>, vector<1x1x8x16xf32>
    %10 = vector.shape_cast %9 : vector<1x1x8x16xf32> to vector<8x16xf32>
    %cst_13 = arith.constant dense<0.000000e+00> : vector<360x16xf32>
    %11 = tpu.matmul %8, %10, %cst_13 {dimension_numbers = #tpu.dot_dimension_numbers<[1], [0], [0], [1], [0, 0, 1, 1], [], []>} : vector<360x8xf32>, vector<8x16xf32>, vector<360x16xf32> -> vector<360x16xf32>
    %12 = arith.addf %6, %11 : vector<360x16xf32>
    %c0_14 = arith.constant 0 : index
    %c2 = arith.constant 2 : index
    %c0_15 = arith.constant 0 : index
    %13 = vector.load %arg1[%c0_14, %c2, %c0_15] : memref<1x420x8xf32, #tpu.memory_space<vmem>>, vector<1x360x8xf32>
    %14 = vector.shape_cast %13 : vector<1x360x8xf32> to vector<360x8xf32>
    %c0_16 = arith.constant 0 : index
    %c2_17 = arith.constant 2 : index
    %c0_18 = arith.constant 0 : index
    %c0_19 = arith.constant 0 : index
    %15 = vector.load %arg2[%c0_16, %c2_17, %c0_18, %c0_19] : memref<3x3x8x16xf32, #tpu.memory_space<vmem>>, vector<1x1x8x16xf32>
    %16 = vector.shape_cast %15 : vector<1x1x8x16xf32> to vector<8x16xf32>
    %cst_20 = arith.constant dense<0.000000e+00> : vector<360x16xf32>
    %17 = tpu.matmul %14, %16, %cst_20 {dimension_numbers = #tpu.dot_dimension_numbers<[1], [0], [0], [1], [0, 0, 1, 1], [], []>} : vector<360x8xf32>, vector<8x16xf32>, vector<360x16xf32> -> vector<360x16xf32>
    %18 = arith.addf %12, %17 : vector<360x16xf32>
    %c0_21 = arith.constant 0 : index
    %c20 = arith.constant 20 : index
    %c0_22 = arith.constant 0 : index
    %19 = vector.load %arg1[%c0_21, %c20, %c0_22] : memref<1x420x8xf32, #tpu.memory_space<vmem>>, vector<1x360x8xf32>
    %20 = vector.shape_cast %19 : vector<1x360x8xf32> to vector<360x8xf32>
    %c1_23 = arith.constant 1 : index
    %c0_24 = arith.constant 0 : index
    %c0_25 = arith.constant 0 : index
    %c0_26 = arith.constant 0 : index
    %21 = vector.load %arg2[%c1_23, %c0_24, %c0_25, %c0_26] : memref<3x3x8x16xf32, #tpu.memory_space<vmem>>, vector<1x1x8x16xf32>
    %22 = vector.shape_cast %21 : vector<1x1x8x16xf32> to vector<8x16xf32>
    %cst_27 = arith.constant dense<0.000000e+00> : vector<360x16xf32>
    %23 = tpu.matmul %20, %22, %cst_27 {dimension_numbers = #tpu.dot_dimension_numbers<[1], [0], [0], [1], [0, 0, 1, 1], [], []>} : vector<360x8xf32>, vector<8x16xf32>, vector<360x16xf32> -> vector<360x16xf32>
    %24 = arith.addf %18, %23 : vector<360x16xf32>
    %c0_28 = arith.constant 0 : index
    %c21 = arith.constant 21 : index
    %c0_29 = arith.constant 0 : index
    %25 = vector.load %arg1[%c0_28, %c21, %c0_29] : memref<1x420x8xf32, #tpu.memory_space<vmem>>, vector<1x360x8xf32>
    %26 = vector.shape_cast %25 : vector<1x360x8xf32> to vector<360x8xf32>
    %c1_30 = arith.constant 1 : index
    %c1_31 = arith.constant 1 : index
    %c0_32 = arith.constant 0 : index
    %c0_33 = arith.constant 0 : index
    %27 = vector.load %arg2[%c1_30, %c1_31, %c0_32, %c0_33] : memref<3x3x8x16xf32, #tpu.memory_space<vmem>>, vector<1x1x8x16xf32>
    %28 = vector.shape_cast %27 : vector<1x1x8x16xf32> to vector<8x16xf32>
    %cst_34 = arith.constant dense<0.000000e+00> : vector<360x16xf32>
    %29 = tpu.matmul %26, %28, %cst_34 {dimension_numbers = #tpu.dot_dimension_numbers<[1], [0], [0], [1], [0, 0, 1, 1], [], []>} : vector<360x8xf32>, vector<8x16xf32>, vector<360x16xf32> -> vector<360x16xf32>
    %30 = arith.addf %24, %29 : vector<360x16xf32>
    %c0_35 = arith.constant 0 : index
    %c22 = arith.constant 22 : index
    %c0_36 = arith.constant 0 : index
    %31 = vector.load %arg1[%c0_35, %c22, %c0_36] : memref<1x420x8xf32, #tpu.memory_space<vmem>>, vector<1x360x8xf32>
    %32 = vector.shape_cast %31 : vector<1x360x8xf32> to vector<360x8xf32>
    %c1_37 = arith.constant 1 : index
    %c2_38 = arith.constant 2 : index
    %c0_39 = arith.constant 0 : index
    %c0_40 = arith.constant 0 : index
    %33 = vector.load %arg2[%c1_37, %c2_38, %c0_39, %c0_40] : memref<3x3x8x16xf32, #tpu.memory_space<vmem>>, vector<1x1x8x16xf32>
    %34 = vector.shape_cast %33 : vector<1x1x8x16xf32> to vector<8x16xf32>
    %cst_41 = arith.constant dense<0.000000e+00> : vector<360x16xf32>
    %35 = tpu.matmul %32, %34, %cst_41 {dimension_numbers = #tpu.dot_dimension_numbers<[1], [0], [0], [1], [0, 0, 1, 1], [], []>} : vector<360x8xf32>, vector<8x16xf32>, vector<360x16xf32> -> vector<360x16xf32>
    %36 = arith.addf %30, %35 : vector<360x16xf32>
    %c0_42 = arith.constant 0 : index
    %c40 = arith.constant 40 : index
    %c0_43 = arith.constant 0 : index
    %37 = vector.load %arg1[%c0_42, %c40, %c0_43] : memref<1x420x8xf32, #tpu.memory_space<vmem>>, vector<1x360x8xf32>
    %38 = vector.shape_cast %37 : vector<1x360x8xf32> to vector<360x8xf32>
    %c2_44 = arith.constant 2 : index
    %c0_45 = arith.constant 0 : index
    %c0_46 = arith.constant 0 : index
    %c0_47 = arith.constant 0 : index
    %39 = vector.load %arg2[%c2_44, %c0_45, %c0_46, %c0_47] : memref<3x3x8x16xf32, #tpu.memory_space<vmem>>, vector<1x1x8x16xf32>
    %40 = vector.shape_cast %39 : vector<1x1x8x16xf32> to vector<8x16xf32>
    %cst_48 = arith.constant dense<0.000000e+00> : vector<360x16xf32>
    %41 = tpu.matmul %38, %40, %cst_48 {dimension_numbers = #tpu.dot_dimension_numbers<[1], [0], [0], [1], [0, 0, 1, 1], [], []>} : vector<360x8xf32>, vector<8x16xf32>, vector<360x16xf32> -> vector<360x16xf32>
    %42 = arith.addf %36, %41 : vector<360x16xf32>
    %c0_49 = arith.constant 0 : index
    %c41 = arith.constant 41 : index
    %c0_50 = arith.constant 0 : index
    %43 = vector.load %arg1[%c0_49, %c41, %c0_50] : memref<1x420x8xf32, #tpu.memory_space<vmem>>, vector<1x360x8xf32>
    %44 = vector.shape_cast %43 : vector<1x360x8xf32> to vector<360x8xf32>
    %c2_51 = arith.constant 2 : index
    %c1_52 = arith.constant 1 : index
    %c0_53 = arith.constant 0 : index
    %c0_54 = arith.constant 0 : index
    %45 = vector.load %arg2[%c2_51, %c1_52, %c0_53, %c0_54] : memref<3x3x8x16xf32, #tpu.memory_space<vmem>>, vector<1x1x8x16xf32>
    %46 = vector.shape_cast %45 : vector<1x1x8x16xf32> to vector<8x16xf32>
    %cst_55 = arith.constant dense<0.000000e+00> : vector<360x16xf32>
    %47 = tpu.matmul %44, %46, %cst_55 {dimension_numbers = #tpu.dot_dimension_numbers<[1], [0], [0], [1], [0, 0, 1, 1], [], []>} : vector<360x8xf32>, vector<8x16xf32>, vector<360x16xf32> -> vector<360x16xf32>
    %48 = arith.addf %42, %47 : vector<360x16xf32>
    %c0_56 = arith.constant 0 : index
    %c42 = arith.constant 42 : index
    %c0_57 = arith.constant 0 : index
    %49 = vector.load %arg1[%c0_56, %c42, %c0_57] : memref<1x420x8xf32, #tpu.memory_space<vmem>>, vector<1x360x8xf32>
    %50 = vector.shape_cast %49 : vector<1x360x8xf32> to vector<360x8xf32>
    %c2_58 = arith.constant 2 : index
    %c2_59 = arith.constant 2 : index
    %c0_60 = arith.constant 0 : index
    %c0_61 = arith.constant 0 : index
    %51 = vector.load %arg2[%c2_58, %c2_59, %c0_60, %c0_61] : memref<3x3x8x16xf32, #tpu.memory_space<vmem>>, vector<1x1x8x16xf32>
    %52 = vector.shape_cast %51 : vector<1x1x8x16xf32> to vector<8x16xf32>
    %cst_62 = arith.constant dense<0.000000e+00> : vector<360x16xf32>
    %53 = tpu.matmul %50, %52, %cst_62 {dimension_numbers = #tpu.dot_dimension_numbers<[1], [0], [0], [1], [0, 0, 1, 1], [], []>} : vector<360x8xf32>, vector<8x16xf32>, vector<360x16xf32> -> vector<360x16xf32>
    %54 = arith.addf %48, %53 : vector<360x16xf32>
    %c0_63 = arith.constant 0 : index
    %c0_64 = arith.constant 0 : index
    %55 = vector.load %arg3[%c0_63, %c0_64] : memref<1x16xf32, #tpu.memory_space<vmem>>, vector<1x16xf32>
    %56 = vector.broadcast %55 : vector<1x16xf32> to vector<360x16xf32>
    %57 = arith.addf %54, %56 : vector<360x16xf32>
    %cst_65 = arith.constant 0.000000e+00 : f32
    %58 = vector.broadcast %cst_65 : f32 to vector<360x16xf32>
    %59 = arith.maximumf %57, %58 : vector<360x16xf32>
    %c0_66 = arith.constant 0 : index
    %c0_67 = arith.constant 0 : index
    %60 = vector.load %arg6[%c0_66, %c0_67] : memref<360x1xf32, #tpu.memory_space<vmem>>, vector<360x1xf32>
    %61 = vector.broadcast %60 : vector<360x1xf32> to vector<360x16xf32>
    %62 = arith.mulf %59, %61 : vector<360x16xf32>
    %c0_68 = arith.constant 0 : index
    %c0_69 = arith.constant 0 : index
    %63 = vector.load %arg8[%c0_68, %c0_69] : memref<380x16xf32, #tpu.memory_space<vmem>>, vector<360x16xf32>
    tpu.vector_store %arg8[%c0_68, %c0_69], %62 {strides = array<i32>} : memref<380x16xf32, #tpu.memory_space<vmem>>, vector<360x16xf32>,
    %cst_70 = arith.constant 0.000000e+00 : f32
    %64 = vector.broadcast %cst_70 : f32 to vector<20x16xf32>
    %c360 = arith.constant 360 : index
    %c0_71 = arith.constant 0 : index
    %65 = vector.load %arg8[%c360, %c0_71] : memref<380x16xf32, #tpu.memory_space<vmem>>, vector<20x16xf32>
    tpu.vector_store %arg8[%c360, %c0_71], %64 {strides = array<i32>} : memref<380x16xf32, #tpu.memory_space<vmem>>, vector<20x16xf32>,
    %cst_72 = arith.constant 0.000000e+00 : f32
    %66 = vector.broadcast %cst_72 : f32 to vector<320x8xf32>
    %c21_73 = arith.constant 21 : index
    %c0_74 = arith.constant 0 : index
    %67 = vector.load %arg8[%c21_73, %c0_74] : memref<380x16xf32, #tpu.memory_space<vmem>>, vector<320x16xf32>
    %c1_75 = arith.constant 1 : index
    %c1_76 = arith.constant 1 : index
    %c0_77 = arith.constant 0 : index
    %c0_78 = arith.constant 0 : index
    %68 = vector.load %arg4[%c1_75, %c1_76, %c0_77, %c0_78] : memref<4x4x16x8xf32, #tpu.memory_space<vmem>>, vector<1x1x16x8xf32>
    %69 = vector.shape_cast %68 : vector<1x1x16x8xf32> to vector<16x8xf32>
    %cst_79 = arith.constant dense<0.000000e+00> : vector<320x8xf32>
    %70 = tpu.matmul %67, %69, %cst_79 {dimension_numbers = #tpu.dot_dimension_numbers<[1], [0], [0], [1], [0, 0, 1, 1], [], []>} : vector<320x16xf32>, vector<16x8xf32>, vector<320x8xf32> -> vector<320x8xf32>
    %71 = arith.addf %66, %70 : vector<320x8xf32>
    %c20_80 = arith.constant 20 : index
    %c0_81 = arith.constant 0 : index
    %72 = vector.load %arg8[%c20_80, %c0_81] : memref<380x16xf32, #tpu.memory_space<vmem>>, vector<320x16xf32>
    %c1_82 = arith.constant 1 : index
    %c3 = arith.constant 3 : index
    %c0_83 = arith.constant 0 : index
    %c0_84 = arith.constant 0 : index
    %73 = vector.load %arg4[%c1_82, %c3, %c0_83, %c0_84] : memref<4x4x16x8xf32, #tpu.memory_space<vmem>>, vector<1x1x16x8xf32>
    %74 = vector.shape_cast %73 : vector<1x1x16x8xf32> to vector<16x8xf32>
    %cst_85 = arith.constant dense<0.000000e+00> : vector<320x8xf32>
    %75 = tpu.matmul %72, %74, %cst_85 {dimension_numbers = #tpu.dot_dimension_numbers<[1], [0], [0], [1], [0, 0, 1, 1], [], []>} : vector<320x16xf32>, vector<16x8xf32>, vector<320x8xf32> -> vector<320x8xf32>
    %76 = arith.addf %71, %75 : vector<320x8xf32>
    %c1_86 = arith.constant 1 : index
    %c0_87 = arith.constant 0 : index
    %77 = vector.load %arg8[%c1_86, %c0_87] : memref<380x16xf32, #tpu.memory_space<vmem>>, vector<320x16xf32>
    %c3_88 = arith.constant 3 : index
    %c1_89 = arith.constant 1 : index
    %c0_90 = arith.constant 0 : index
    %c0_91 = arith.constant 0 : index
    %78 = vector.load %arg4[%c3_88, %c1_89, %c0_90, %c0_91] : memref<4x4x16x8xf32, #tpu.memory_space<vmem>>, vector<1x1x16x8xf32>
    %79 = vector.shape_cast %78 : vector<1x1x16x8xf32> to vector<16x8xf32>
    %cst_92 = arith.constant dense<0.000000e+00> : vector<320x8xf32>
    %80 = tpu.matmul %77, %79, %cst_92 {dimension_numbers = #tpu.dot_dimension_numbers<[1], [0], [0], [1], [0, 0, 1, 1], [], []>} : vector<320x16xf32>, vector<16x8xf32>, vector<320x8xf32> -> vector<320x8xf32>
    %81 = arith.addf %76, %80 : vector<320x8xf32>
    %c0_93 = arith.constant 0 : index
    %c0_94 = arith.constant 0 : index
    %82 = vector.load %arg8[%c0_93, %c0_94] : memref<380x16xf32, #tpu.memory_space<vmem>>, vector<320x16xf32>
    %c3_95 = arith.constant 3 : index
    %c3_96 = arith.constant 3 : index
    %c0_97 = arith.constant 0 : index
    %c0_98 = arith.constant 0 : index
    %83 = vector.load %arg4[%c3_95, %c3_96, %c0_97, %c0_98] : memref<4x4x16x8xf32, #tpu.memory_space<vmem>>, vector<1x1x16x8xf32>
    %84 = vector.shape_cast %83 : vector<1x1x16x8xf32> to vector<16x8xf32>
    %cst_99 = arith.constant dense<0.000000e+00> : vector<320x8xf32>
    %85 = tpu.matmul %82, %84, %cst_99 {dimension_numbers = #tpu.dot_dimension_numbers<[1], [0], [0], [1], [0, 0, 1, 1], [], []>} : vector<320x16xf32>, vector<16x8xf32>, vector<320x8xf32> -> vector<320x8xf32>
    %86 = arith.addf %81, %85 : vector<320x8xf32>
    %c0_100 = arith.constant 0 : index
    %c0_101 = arith.constant 0 : index
    %87 = vector.load %arg5[%c0_100, %c0_101] : memref<1x8xf32, #tpu.memory_space<vmem>>, vector<1x8xf32>
    %88 = vector.broadcast %87 : vector<1x8xf32> to vector<320x8xf32>
    %89 = arith.addf %86, %88 : vector<320x8xf32>
    %cst_102 = arith.constant 0.000000e+00 : f32
    %90 = vector.broadcast %cst_102 : f32 to vector<320x8xf32>
    %91 = arith.maximumf %89, %90 : vector<320x8xf32>
    %c0_103 = arith.constant 0 : index
    %c0_104 = arith.constant 0 : index
    %c0_105 = arith.constant 0 : index
    %c0_106 = arith.constant 0 : index
    %c0_107 = arith.constant 0 : index
    %92 = vector.load %arg7[%c0_103, %c0_104, %c0_105, %c0_106, %c0_107] : memref<1x2x2x320x8xf32, #tpu.memory_space<vmem>>, vector<1x1x1x320x8xf32>
    %93 = vector.shape_cast %92 : vector<1x1x1x320x8xf32> to vector<320x8xf32>
    %94 = vector.shape_cast %91 : vector<320x8xf32> to vector<1x1x1x320x8xf32>
    tpu.vector_store %arg7[%c0_103, %c0_104, %c0_105, %c0_106, %c0_107], %94 {strides = array<i32>} : memref<1x2x2x320x8xf32, #tpu.memory_space<vmem>>, vector<1x1x1x320x8xf32>,
    %cst_108 = arith.constant 0.000000e+00 : f32
    %95 = vector.broadcast %cst_108 : f32 to vector<320x8xf32>
    %c21_109 = arith.constant 21 : index
    %c0_110 = arith.constant 0 : index
    %96 = vector.load %arg8[%c21_109, %c0_110] : memref<380x16xf32, #tpu.memory_space<vmem>>, vector<320x16xf32>
    %c1_111 = arith.constant 1 : index
    %c2_112 = arith.constant 2 : index
    %c0_113 = arith.constant 0 : index
    %c0_114 = arith.constant 0 : index
    %97 = vector.load %arg4[%c1_111, %c2_112, %c0_113, %c0_114] : memref<4x4x16x8xf32, #tpu.memory_space<vmem>>, vector<1x1x16x8xf32>
    %98 = vector.shape_cast %97 : vector<1x1x16x8xf32> to vector<16x8xf32>
    %cst_115 = arith.constant dense<0.000000e+00> : vector<320x8xf32>
    %99 = tpu.matmul %96, %98, %cst_115 {dimension_numbers = #tpu.dot_dimension_numbers<[1], [0], [0], [1], [0, 0, 1, 1], [], []>} : vector<320x16xf32>, vector<16x8xf32>, vector<320x8xf32> -> vector<320x8xf32>
    %100 = arith.addf %95, %99 : vector<320x8xf32>
    %c22_116 = arith.constant 22 : index
    %c0_117 = arith.constant 0 : index
    %101 = vector.load %arg8[%c22_116, %c0_117] : memref<380x16xf32, #tpu.memory_space<vmem>>, vector<320x16xf32>
    %c1_118 = arith.constant 1 : index
    %c0_119 = arith.constant 0 : index
    %c0_120 = arith.constant 0 : index
    %c0_121 = arith.constant 0 : index
    %102 = vector.load %arg4[%c1_118, %c0_119, %c0_120, %c0_121] : memref<4x4x16x8xf32, #tpu.memory_space<vmem>>, vector<1x1x16x8xf32>
    %103 = vector.shape_cast %102 : vector<1x1x16x8xf32> to vector<16x8xf32>
    %cst_122 = arith.constant dense<0.000000e+00> : vector<320x8xf32>
    %104 = tpu.matmul %101, %103, %cst_122 {dimension_numbers = #tpu.dot_dimension_numbers<[1], [0], [0], [1], [0, 0, 1, 1], [], []>} : vector<320x16xf32>, vector<16x8xf32>, vector<320x8xf32> -> vector<320x8xf32>
    %105 = arith.addf %100, %104 : vector<320x8xf32>
    %c1_123 = arith.constant 1 : index
    %c0_124 = arith.constant 0 : index
    %106 = vector.load %arg8[%c1_123, %c0_124] : memref<380x16xf32, #tpu.memory_space<vmem>>, vector<320x16xf32>
    %c3_125 = arith.constant 3 : index
    %c2_126 = arith.constant 2 : index
    %c0_127 = arith.constant 0 : index
    %c0_128 = arith.constant 0 : index
    %107 = vector.load %arg4[%c3_125, %c2_126, %c0_127, %c0_128] : memref<4x4x16x8xf32, #tpu.memory_space<vmem>>, vector<1x1x16x8xf32>
    %108 = vector.shape_cast %107 : vector<1x1x16x8xf32> to vector<16x8xf32>
    %cst_129 = arith.constant dense<0.000000e+00> : vector<320x8xf32>
    %109 = tpu.matmul %106, %108, %cst_129 {dimension_numbers = #tpu.dot_dimension_numbers<[1], [0], [0], [1], [0, 0, 1, 1], [], []>} : vector<320x16xf32>, vector<16x8xf32>, vector<320x8xf32> -> vector<320x8xf32>
    %110 = arith.addf %105, %109 : vector<320x8xf32>
    %c2_130 = arith.constant 2 : index
    %c0_131 = arith.constant 0 : index
    %111 = vector.load %arg8[%c2_130, %c0_131] : memref<380x16xf32, #tpu.memory_space<vmem>>, vector<320x16xf32>
    %c3_132 = arith.constant 3 : index
    %c0_133 = arith.constant 0 : index
    %c0_134 = arith.constant 0 : index
    %c0_135 = arith.constant 0 : index
    %112 = vector.load %arg4[%c3_132, %c0_133, %c0_134, %c0_135] : memref<4x4x16x8xf32, #tpu.memory_space<vmem>>, vector<1x1x16x8xf32>
    %113 = vector.shape_cast %112 : vector<1x1x16x8xf32> to vector<16x8xf32>
    %cst_136 = arith.constant dense<0.000000e+00> : vector<320x8xf32>
    %114 = tpu.matmul %111, %113, %cst_136 {dimension_numbers = #tpu.dot_dimension_numbers<[1], [0], [0], [1], [0, 0, 1, 1], [], []>} : vector<320x16xf32>, vector<16x8xf32>, vector<320x8xf32> -> vector<320x8xf32>
    %115 = arith.addf %110, %114 : vector<320x8xf32>
    %c0_137 = arith.constant 0 : index
    %c0_138 = arith.constant 0 : index
    %116 = vector.load %arg5[%c0_137, %c0_138] : memref<1x8xf32, #tpu.memory_space<vmem>>, vector<1x8xf32>
    %117 = vector.broadcast %116 : vector<1x8xf32> to vector<320x8xf32>
    %118 = arith.addf %115, %117 : vector<320x8xf32>
    %cst_139 = arith.constant 0.000000e+00 : f32
    %119 = vector.broadcast %cst_139 : f32 to vector<320x8xf32>
    %120 = arith.maximumf %118, %119 : vector<320x8xf32>
    %c0_140 = arith.constant 0 : index
    %c0_141 = arith.constant 0 : index
    %c1_142 = arith.constant 1 : index
    %c0_143 = arith.constant 0 : index
    %c0_144 = arith.constant 0 : index
    %121 = vector.load %arg7[%c0_140, %c0_141, %c1_142, %c0_143, %c0_144] : memref<1x2x2x320x8xf32, #tpu.memory_space<vmem>>, vector<1x1x1x320x8xf32>
    %122 = vector.shape_cast %121 : vector<1x1x1x320x8xf32> to vector<320x8xf32>
    %123 = vector.shape_cast %120 : vector<320x8xf32> to vector<1x1x1x320x8xf32>
    tpu.vector_store %arg7[%c0_140, %c0_141, %c1_142, %c0_143, %c0_144], %123 {strides = array<i32>} : memref<1x2x2x320x8xf32, #tpu.memory_space<vmem>>, vector<1x1x1x320x8xf32>,
    %cst_145 = arith.constant 0.000000e+00 : f32
    %124 = vector.broadcast %cst_145 : f32 to vector<320x8xf32>
    %c21_146 = arith.constant 21 : index
    %c0_147 = arith.constant 0 : index
    %125 = vector.load %arg8[%c21_146, %c0_147] : memref<380x16xf32, #tpu.memory_space<vmem>>, vector<320x16xf32>
    %c2_148 = arith.constant 2 : index
    %c1_149 = arith.constant 1 : index
    %c0_150 = arith.constant 0 : index
    %c0_151 = arith.constant 0 : index
    %126 = vector.load %arg4[%c2_148, %c1_149, %c0_150, %c0_151] : memref<4x4x16x8xf32, #tpu.memory_space<vmem>>, vector<1x1x16x8xf32>
    %127 = vector.shape_cast %126 : vector<1x1x16x8xf32> to vector<16x8xf32>
    %cst_152 = arith.constant dense<0.000000e+00> : vector<320x8xf32>
    %128 = tpu.matmul %125, %127, %cst_152 {dimension_numbers = #tpu.dot_dimension_numbers<[1], [0], [0], [1], [0, 0, 1, 1], [], []>} : vector<320x16xf32>, vector<16x8xf32>, vector<320x8xf32> -> vector<320x8xf32>
    %129 = arith.addf %124, %128 : vector<320x8xf32>
    %c20_153 = arith.constant 20 : index
    %c0_154 = arith.constant 0 : index
    %130 = vector.load %arg8[%c20_153, %c0_154] : memref<380x16xf32, #tpu.memory_space<vmem>>, vector<320x16xf32>
    %c2_155 = arith.constant 2 : index
    %c3_156 = arith.constant 3 : index
    %c0_157 = arith.constant 0 : index
    %c0_158 = arith.constant 0 : index
    %131 = vector.load %arg4[%c2_155, %c3_156, %c0_157, %c0_158] : memref<4x4x16x8xf32, #tpu.memory_space<vmem>>, vector<1x1x16x8xf32>
    %132 = vector.shape_cast %131 : vector<1x1x16x8xf32> to vector<16x8xf32>
    %cst_159 = arith.constant dense<0.000000e+00> : vector<320x8xf32>
    %133 = tpu.matmul %130, %132, %cst_159 {dimension_numbers = #tpu.dot_dimension_numbers<[1], [0], [0], [1], [0, 0, 1, 1], [], []>} : vector<320x16xf32>, vector<16x8xf32>, vector<320x8xf32> -> vector<320x8xf32>
    %134 = arith.addf %129, %133 : vector<320x8xf32>
    %c41_160 = arith.constant 41 : index
    %c0_161 = arith.constant 0 : index
    %135 = vector.load %arg8[%c41_160, %c0_161] : memref<380x16xf32, #tpu.memory_space<vmem>>, vector<320x16xf32>
    %c0_162 = arith.constant 0 : index
    %c1_163 = arith.constant 1 : index
    %c0_164 = arith.constant 0 : index
    %c0_165 = arith.constant 0 : index
    %136 = vector.load %arg4[%c0_162, %c1_163, %c0_164, %c0_165] : memref<4x4x16x8xf32, #tpu.memory_space<vmem>>, vector<1x1x16x8xf32>
    %137 = vector.shape_cast %136 : vector<1x1x16x8xf32> to vector<16x8xf32>
    %cst_166 = arith.constant dense<0.000000e+00> : vector<320x8xf32>
    %138 = tpu.matmul %135, %137, %cst_166 {dimension_numbers = #tpu.dot_dimension_numbers<[1], [0], [0], [1], [0, 0, 1, 1], [], []>} : vector<320x16xf32>, vector<16x8xf32>, vector<320x8xf32> -> vector<320x8xf32>
    %139 = arith.addf %134, %138 : vector<320x8xf32>
    %c40_167 = arith.constant 40 : index
    %c0_168 = arith.constant 0 : index
    %140 = vector.load %arg8[%c40_167, %c0_168] : memref<380x16xf32, #tpu.memory_space<vmem>>, vector<320x16xf32>
    %c0_169 = arith.constant 0 : index
    %c3_170 = arith.constant 3 : index
    %c0_171 = arith.constant 0 : index
    %c0_172 = arith.constant 0 : index
    %141 = vector.load %arg4[%c0_169, %c3_170, %c0_171, %c0_172] : memref<4x4x16x8xf32, #tpu.memory_space<vmem>>, vector<1x1x16x8xf32>
    %142 = vector.shape_cast %141 : vector<1x1x16x8xf32> to vector<16x8xf32>
    %cst_173 = arith.constant dense<0.000000e+00> : vector<320x8xf32>
    %143 = tpu.matmul %140, %142, %cst_173 {dimension_numbers = #tpu.dot_dimension_numbers<[1], [0], [0], [1], [0, 0, 1, 1], [], []>} : vector<320x16xf32>, vector<16x8xf32>, vector<320x8xf32> -> vector<320x8xf32>
    %144 = arith.addf %139, %143 : vector<320x8xf32>
    %c0_174 = arith.constant 0 : index
    %c0_175 = arith.constant 0 : index
    %145 = vector.load %arg5[%c0_174, %c0_175] : memref<1x8xf32, #tpu.memory_space<vmem>>, vector<1x8xf32>
    %146 = vector.broadcast %145 : vector<1x8xf32> to vector<320x8xf32>
    %147 = arith.addf %144, %146 : vector<320x8xf32>
    %cst_176 = arith.constant 0.000000e+00 : f32
    %148 = vector.broadcast %cst_176 : f32 to vector<320x8xf32>
    %149 = arith.maximumf %147, %148 : vector<320x8xf32>
    %c0_177 = arith.constant 0 : index
    %c1_178 = arith.constant 1 : index
    %c0_179 = arith.constant 0 : index
    %c0_180 = arith.constant 0 : index
    %c0_181 = arith.constant 0 : index
    %150 = vector.load %arg7[%c0_177, %c1_178, %c0_179, %c0_180, %c0_181] : memref<1x2x2x320x8xf32, #tpu.memory_space<vmem>>, vector<1x1x1x320x8xf32>
    %151 = vector.shape_cast %150 : vector<1x1x1x320x8xf32> to vector<320x8xf32>
    %152 = vector.shape_cast %149 : vector<320x8xf32> to vector<1x1x1x320x8xf32>
    tpu.vector_store %arg7[%c0_177, %c1_178, %c0_179, %c0_180, %c0_181], %152 {strides = array<i32>} : memref<1x2x2x320x8xf32, #tpu.memory_space<vmem>>, vector<1x1x1x320x8xf32>,
    %cst_182 = arith.constant 0.000000e+00 : f32
    %153 = vector.broadcast %cst_182 : f32 to vector<320x8xf32>
    %c21_183 = arith.constant 21 : index
    %c0_184 = arith.constant 0 : index
    %154 = vector.load %arg8[%c21_183, %c0_184] : memref<380x16xf32, #tpu.memory_space<vmem>>, vector<320x16xf32>
    %c2_185 = arith.constant 2 : index
    %c2_186 = arith.constant 2 : index
    %c0_187 = arith.constant 0 : index
    %c0_188 = arith.constant 0 : index
    %155 = vector.load %arg4[%c2_185, %c2_186, %c0_187, %c0_188] : memref<4x4x16x8xf32, #tpu.memory_space<vmem>>, vector<1x1x16x8xf32>
    %156 = vector.shape_cast %155 : vector<1x1x16x8xf32> to vector<16x8xf32>
    %cst_189 = arith.constant dense<0.000000e+00> : vector<320x8xf32>
    %157 = tpu.matmul %154, %156, %cst_189 {dimension_numbers = #tpu.dot_dimension_numbers<[1], [0], [0], [1], [0, 0, 1, 1], [], []>} : vector<320x16xf32>, vector<16x8xf32>, vector<320x8xf32> -> vector<320x8xf32>
    %158 = arith.addf %153, %157 : vector<320x8xf32>
    %c22_190 = arith.constant 22 : index
    %c0_191 = arith.constant 0 : index
    %159 = vector.load %arg8[%c22_190, %c0_191] : memref<380x16xf32, #tpu.memory_space<vmem>>, vector<320x16xf32>
    %c2_192 = arith.constant 2 : index
    %c0_193 = arith.constant 0 : index
    %c0_194 = arith.constant 0 : index
    %c0_195 = arith.constant 0 : index
    %160 = vector.load %arg4[%c2_192, %c0_193, %c0_194, %c0_195] : memref<4x4x16x8xf32, #tpu.memory_space<vmem>>, vector<1x1x16x8xf32>
    %161 = vector.shape_cast %160 : vector<1x1x16x8xf32> to vector<16x8xf32>
    %cst_196 = arith.constant dense<0.000000e+00> : vector<320x8xf32>
    %162 = tpu.matmul %159, %161, %cst_196 {dimension_numbers = #tpu.dot_dimension_numbers<[1], [0], [0], [1], [0, 0, 1, 1], [], []>} : vector<320x16xf32>, vector<16x8xf32>, vector<320x8xf32> -> vector<320x8xf32>
    %163 = arith.addf %158, %162 : vector<320x8xf32>
    %c41_197 = arith.constant 41 : index
    %c0_198 = arith.constant 0 : index
    %164 = vector.load %arg8[%c41_197, %c0_198] : memref<380x16xf32, #tpu.memory_space<vmem>>, vector<320x16xf32>
    %c0_199 = arith.constant 0 : index
    %c2_200 = arith.constant 2 : index
    %c0_201 = arith.constant 0 : index
    %c0_202 = arith.constant 0 : index
    %165 = vector.load %arg4[%c0_199, %c2_200, %c0_201, %c0_202] : memref<4x4x16x8xf32, #tpu.memory_space<vmem>>, vector<1x1x16x8xf32>
    %166 = vector.shape_cast %165 : vector<1x1x16x8xf32> to vector<16x8xf32>
    %cst_203 = arith.constant dense<0.000000e+00> : vector<320x8xf32>
    %167 = tpu.matmul %164, %166, %cst_203 {dimension_numbers = #tpu.dot_dimension_numbers<[1], [0], [0], [1], [0, 0, 1, 1], [], []>} : vector<320x16xf32>, vector<16x8xf32>, vector<320x8xf32> -> vector<320x8xf32>
    %168 = arith.addf %163, %167 : vector<320x8xf32>
    %c42_204 = arith.constant 42 : index
    %c0_205 = arith.constant 0 : index
    %169 = vector.load %arg8[%c42_204, %c0_205] : memref<380x16xf32, #tpu.memory_space<vmem>>, vector<320x16xf32>
    %c0_206 = arith.constant 0 : index
    %c0_207 = arith.constant 0 : index
    %c0_208 = arith.constant 0 : index
    %c0_209 = arith.constant 0 : index
    %170 = vector.load %arg4[%c0_206, %c0_207, %c0_208, %c0_209] : memref<4x4x16x8xf32, #tpu.memory_space<vmem>>, vector<1x1x16x8xf32>
    %171 = vector.shape_cast %170 : vector<1x1x16x8xf32> to vector<16x8xf32>
    %cst_210 = arith.constant dense<0.000000e+00> : vector<320x8xf32>
    %172 = tpu.matmul %169, %171, %cst_210 {dimension_numbers = #tpu.dot_dimension_numbers<[1], [0], [0], [1], [0, 0, 1, 1], [], []>} : vector<320x16xf32>, vector<16x8xf32>, vector<320x8xf32> -> vector<320x8xf32>
    %173 = arith.addf %168, %172 : vector<320x8xf32>
    %c0_211 = arith.constant 0 : index
    %c0_212 = arith.constant 0 : index
    %174 = vector.load %arg5[%c0_211, %c0_212] : memref<1x8xf32, #tpu.memory_space<vmem>>, vector<1x8xf32>
    %175 = vector.broadcast %174 : vector<1x8xf32> to vector<320x8xf32>
    %176 = arith.addf %173, %175 : vector<320x8xf32>
    %cst_213 = arith.constant 0.000000e+00 : f32
    %177 = vector.broadcast %cst_213 : f32 to vector<320x8xf32>
    %178 = arith.maximumf %176, %177 : vector<320x8xf32>
    %c0_214 = arith.constant 0 : index
    %c1_215 = arith.constant 1 : index
    %c1_216 = arith.constant 1 : index
    %c0_217 = arith.constant 0 : index
    %c0_218 = arith.constant 0 : index
    %179 = vector.load %arg7[%c0_214, %c1_215, %c1_216, %c0_217, %c0_218] : memref<1x2x2x320x8xf32, #tpu.memory_space<vmem>>, vector<1x1x1x320x8xf32>
    %180 = vector.shape_cast %179 : vector<1x1x1x320x8xf32> to vector<320x8xf32>
    %181 = vector.shape_cast %178 : vector<320x8xf32> to vector<1x1x1x320x8xf32>
    tpu.vector_store %arg7[%c0_214, %c1_215, %c1_216, %c0_217, %c0_218], %181 {strides = array<i32>} : memref<1x2x2x320x8xf32, #tpu.memory_space<vmem>>, vector<1x1x1x320x8xf32>,
    return
  }
  func.func @transform_0(%arg0: i32) -> (i32, i32, i32) {
    %c0_i32 = arith.constant 0 : i32
    %c0_i32_0 = arith.constant 0 : i32
    %c0_i32_1 = arith.constant 0 : i32
    return %arg0, %c0_i32, %c0_i32_0 : i32, i32, i32
  }
  func.func @transform_1(%arg0: i32) -> (i32, i32, i32, i32) {
    %c0_i32 = arith.constant 0 : i32
    %c0_i32_0 = arith.constant 0 : i32
    %c0_i32_1 = arith.constant 0 : i32
    %c0_i32_2 = arith.constant 0 : i32
    %c0_i32_3 = arith.constant 0 : i32
    return %c0_i32, %c0_i32_0, %c0_i32_1, %c0_i32_2 : i32, i32, i32, i32
  }
  func.func @transform_2(%arg0: i32) -> (i32, i32) {
    %c0_i32 = arith.constant 0 : i32
    %c0_i32_0 = arith.constant 0 : i32
    %c0_i32_1 = arith.constant 0 : i32
    return %c0_i32, %c0_i32_0 : i32, i32
  }
  func.func @transform_3(%arg0: i32) -> (i32, i32, i32, i32) {
    %c0_i32 = arith.constant 0 : i32
    %c0_i32_0 = arith.constant 0 : i32
    %c0_i32_1 = arith.constant 0 : i32
    %c0_i32_2 = arith.constant 0 : i32
    %c0_i32_3 = arith.constant 0 : i32
    return %c0_i32, %c0_i32_0, %c0_i32_1, %c0_i32_2 : i32, i32, i32, i32
  }
  func.func @transform_4(%arg0: i32) -> (i32, i32) {
    %c0_i32 = arith.constant 0 : i32
    %c0_i32_0 = arith.constant 0 : i32
    %c0_i32_1 = arith.constant 0 : i32
    return %c0_i32, %c0_i32_0 : i32, i32
  }
  func.func @transform_5(%arg0: i32) -> (i32, i32) {
    %c0_i32 = arith.constant 0 : i32
    %c0_i32_0 = arith.constant 0 : i32
    %c0_i32_1 = arith.constant 0 : i32
    return %c0_i32, %c0_i32_0 : i32, i32
  }
  func.func @transform_6(%arg0: i32) -> (i32, i32, i32, i32, i32) {
    %c0_i32 = arith.constant 0 : i32
    %c0_i32_0 = arith.constant 0 : i32
    %c0_i32_1 = arith.constant 0 : i32
    %c0_i32_2 = arith.constant 0 : i32
    %c0_i32_3 = arith.constant 0 : i32
    return %arg0, %c0_i32, %c0_i32_0, %c0_i32_1, %c0_i32_2 : i32, i32, i32, i32, i32
  }
}

</mosaic_0001>

<bundles_post_ra>
// kernel: tpu_custom_call.1
= control target key start
LH: loop header
LB: loop body
LE: loop exit
PB: predicated region body
PF: predicated region fallthrough
CT: control target
= control target key end

     0   :  { %11 = vsyncpa [#allocation4], 0  ;;  %s23461_s0 = inlined_call_operand.vmem [shape: f32[2,420,8], index: 0, kind: input, shape index: {}]   ;;  %s23462_s1 = inlined_call_operand.hbm [shape: f32[3,3,8,16], index: 1, kind: input, shape index: {}]   ;;  %s23463_s2 = inlined_call_operand.hbm [shape: f32[1,16], index: 2, kind: input, shape index: {}]   ;;  %s23464_s3 = inlined_call_operand.vmem [shape: f32[4,4,16,8], index: 3, kind: input, shape index: {}]   ;;  %s23465_s4 = inlined_call_operand.hbm [shape: f32[1,8], index: 4, kind: input, shape index: {}]   ;;  %s23466_s5 = inlined_call_operand.vmem [shape: f32[360,1], index: 5, kind: input, shape index: {}]   ;;  %s23467_s6 = inlined_call_operand.vmem [shape: f32[2,2,2,320,8], index: 6, kind: output, shape index: {}]  }
   0x1   :  { %12 = vsyncpa [#allocation6], 0  ;;  %s17827_s21 = smov 0  }
   0x2 LB: > { %s17784_s22 = smov [#allocation5]   ;;  %s17833_s24 = sadd.s32 4294967295, %s17782_s21   ;;  %s17782_s21 = sphi %s17827_s21, %s18_s21  }
   0x3   : > { %s206_s23 = sshll.u32 %s17784_s22, 4  ;;  %p13083_p0 = scmp.ge.s32.totalorder %s17782_s21, 1  ;;  %s207_s23 = int_to_ptr.vmem [resolvable:$true] %s206_s23 }
   0x4   : > { %p180_p1 = scmp.lt.s32.totalorder %s17782_s21, 3  ;;  %p23468_p2 = scmp.eq.s32.totalorder %s17833_s24, 0 }
   0x5   : > { %s17785_s26 = smov [#allocation3]   ;;  %s17786_s29 = smov [#allocation7]  }
   0x6   : > { %p17838_p3 = pnand %p13083_p0, %p180_p1  ;;  %s192_s27 = sshll.u32 %s17785_s26, 4  ;;  %s193_s27 = int_to_ptr.vmem [resolvable:$true] %s192_s27 }
   0x7   : > { %s220_s30 = sshll.u32 %s17786_s29, 4  ;;  %s17701_s7 = scalar_lea.vmem %s207_s23, 16  ;;  %s17850_s30 = int_to_ptr.vmem [resolvable:$true] %s220_s30 }
   0x8   : > { %s23475_s25 = scalar_select %p17838_p3, 1, 0 }
   0x9   : > { %p17655_p4 = pneg %p17838_p3  ;;  %p17702_p7 = scmp.ne.s32.totalorder %s207_s23, %s17701_s7 }
   0xa   : > { %s17708_s8 = scalar_lea.vmem %s207_s23, 32  ;;  %p17709_p10 = scmp.lt.s32.totalorder %s207_s23, %s207_s23 }
   0xb   : > { %p17846_p5 = pnand %p23468_p2, %p17655_p4  ;;  %p17710_p11 = scmp.lt.s32.totalorder %s17708_s8, %s17701_s7 }
   0xd   : > { %p17692_p6 = pneg %p17846_p5  ;;  %p17711_p12 = por %p17710_p11, %p17709_p10 }
   0xf   : > { %p17704_p8 = pnand %p17702_p7, %p17692_p6 }
  0x11   : > { %p17705_p9 = pneg %p17704_p8 }
  0x13   : > { %p17712_p13 = pnand %p17711_p12, %p17705_p9 }
  0x15   : > { %17715 = shalt.err (!%p17712_p13)
}
  0x16   : > { %17661 = dma.hbm_to_vmem [thread:$0]  (!%p17846_p5), %s23463_s2, 16, %s207_s23, [#allocation6]  }
  0x17   : > { %s17727_s11 = scalar_lea.vmem %s193_s27, 1152  ;;  %p17735_p7 = scmp.lt.s32.totalorder %s193_s27, %s193_s27 }
  0x18   : > { %p17728_p0 = scmp.ne.s32.totalorder %s193_s27, %s17727_s11  ;;  %p17736_p8 = scmp.lt.s32.totalorder %s17727_s11, %s17727_s11 }
  0x1a   : > { %p17730_p1 = pnand %p17728_p0, %p17692_p6  ;;  %p17737_p2 = por %p17736_p8, %p17735_p7 }
  0x1c   : > { %p17731_p4 = pneg %p17730_p1 }
  0x1e   : > { %p17738_p3 = pnand %p17737_p2, %p17731_p4 }
  0x20   : > { %17741 = shalt.err (!%p17738_p3)
}
  0x21   : > { %s17787_s12 = smov 128   ;;  %s17788_s13 = smov 8  }
  0x22   : > { %17658 = dma.hbm_to_vmem [thread:$0]  (!%p17846_p5), %s23462_s1, 1152, %s193_s27, [#allocation4], %s17787_s12, %s17787_s12, %s17788_s13  }
  0x23   : > { %s17753_s16 = scalar_lea.vmem %s17850_s30, 16  ;;  %s17760_s17 = scalar_lea.vmem %s17850_s30, 32 }
  0x24   : > { %p17754_p9 = scmp.ne.s32.totalorder %s17850_s30, %s17753_s16  ;;  %p17761_p3 = scmp.lt.s32.totalorder %s17850_s30, %s17850_s30 }
  0x25   : > { %p17762_p11 = scmp.lt.s32.totalorder %s17760_s17, %s17753_s16 }
  0x26   : > { %p17756_p10 = pnand %p17754_p9, %p17692_p6 }
  0x27   : > { %p17763_p12 = por %p17762_p11, %p17761_p3 }
  0x28   : > { %p17757_p2 = pneg %p17756_p10 }
  0x2a   : > { %p17764_p13 = pnand %p17763_p12, %p17757_p2 }
  0x2c   : > { %17767 = shalt.err (!%p17764_p13)
}
  0x2d   : > { %17664 = dma.hbm_to_vmem [thread:$0]  (!%p17846_p5), %s23465_s4, 16, %s17850_s30, [#allocation6]  }
  0x2e   : > { %p23477_p0 = scmp.ne.s32.totalorder %s23475_s25, 0 }
  0x30   : > { %244 = sbr.rel (%p23477_p0) target bundleno = 2002 (0x7d2), region = 44 }
  0x35   : > { %p23478_p6 = scmp.eq.s32.totalorder %s17833_s24, 0 }
  0x37   : > { %17773 = dma.done.wait (%p23478_p6), [#allocation4], 1152   ;;  %p23479_p1 = pmov %p23478_p6 }
  0x39   : > { %17775 = vsyncadd (%p23479_p1), [#allocation4], 4294966144  ;;  %p23480_p4 = pmov %p23479_p1 }
  0x3a   : > { %p23481_p7 = pmov %p23479_p1 }
  0x3b   : > { %17777 = dma.done.wait (%p23480_p4), [#allocation6], 32  }
  0x3c   : > { %17779 = vsyncadd (%p23481_p7), [#allocation6], 4294967264  ;;  %vm5267_vm0 = vcmask 130048   ;;  %v17789_v0 = vmov 0.0   ;;  %p282_p5 = scmp.lt.s32.totalorder %s17833_s24, 1  ;;  %vm17790_vm1 = vmmov 0  }
  0x3d   : > { %5313 = vst.msk [vmem:[#allocation2 + $0x168] sm:$0xff] %vm5267_vm0, %v17789_v0  ;;  %15382 = vmatprep.subr.mxu0 %v17789_v0  ;;  %17639 = vmatprep.subr.mxu1 %v17789_v0  ;;  %vm385_vm2 = vcmask 64512   ;;  %v384_v1 = vld [vmem:[#allocation3 + $0x8] sm:$0xff]  ;;  %v1282_v4 = vld [vmem:[#allocation3 + $0x10] sm:$0xff]  ;;  %v337_v7 = vld [vmem:[#allocation3] sm:$0xff] }
  0x3e   : > { %15384 = vmatprep.mubr.msk.f32.mxu0 %vm17790_vm1, %v17789_v0  ;;  %15513 = vmatprep.mubr.msk.f32.mxu1 %vm17790_vm1, %v17789_v0  ;;  %s24121_s24 = smov (!%p282_p5, %s17833_s24), 1  ;;  %v1799_v28 = vld [vmem:[#allocation3 + $0x18] sm:$0xff] }
  0x3f   : > { %s17641_s20 = smul.u32 424, %s24121_s24  ;;  %15383 = vmatpush3.msra.mxu0 %v384_v1  ;;  %17640 = vmatpush3.msra.mxu1 %v384_v1 }
  0x40   : > { %15656 = vmatprep.subr.mxu0 %v17789_v0  ;;  %15519 = vmatprep.subr.mxu1 %v17789_v0 }
  0x41   : > { %s17910_s25 = scalar_lea.vmem %s23461_s0, %s17641_s20 }
  0x42   : > { %v338_v2 = vld [vmem:[%s17910_s25 + $0x1] sm:$0xff]  ;;  %v381_v3 = vld [vmem:[%s17910_s25 + $0x159] sm:$0xff]  ;;  %v339_v5 = vld [vmem:[%s17910_s25 + $0x9] sm:$0xff] }
  0x43   : > { %15385 = vmatmul.mubr.msk.f32.vlgmr.msra.gmra.mxu0 %vm385_vm2, %v338_v2  ;;  %15514 = vmatmul.mubr.msk.f32.vlgmr.msra.gmra.mxu1 %vm385_vm2, %v381_v3  ;;  %v382_v6 = vld [vmem:[%s17910_s25 + $0x161] sm:$0xff]  ;;  %v340_v8 = vld [vmem:[%s17910_s25 + $0x11] sm:$0xff]  ;;  %v341_v10 = vld [vmem:[%s17910_s25 + $0x19] sm:$0xff] }
  0x44   : > { %15387 = vmatprep.mubr.msk.f32.mxu0 %vm17790_vm1, %v17789_v0  ;;  %15657 = vmatpush3.msra.mxu0 %v1282_v4  ;;  %v292_v9 = vld [vmem:[%s17910_s25] sm:$0xff]  ;;  %v293_v11 = vld [vmem:[%s17910_s25 + $0x8] sm:$0xff]  ;;  %v294_v13 = vld [vmem:[%s17910_s25 + $0x10] sm:$0xff] }
  0x45   : > { %15516 = vmatprep.mubr.msk.f32.mxu1 %vm17790_vm1, %v17789_v0  ;;  %15930 = vmatprep.subr.mxu0 %v17789_v0  ;;  %v342_v12 = vld [vmem:[%s17910_s25 + $0x21] sm:$0xff]  ;;  %v343_v14 = vld [vmem:[%s17910_s25 + $0x29] sm:$0xff]  ;;  %v295_v15 = vld [vmem:[%s17910_s25 + $0x18] sm:$0xff] }
  0x46   : > { %15520 = vmatpush3.msra.mxu1 %v337_v7  ;;  %v344_v16 = vld [vmem:[%s17910_s25 + $0x31] sm:$0xff]  ;;  %v296_v17 = vld [vmem:[%s17910_s25 + $0x20] sm:$0xff]  ;;  %v297_v19 = vld [vmem:[%s17910_s25 + $0x28] sm:$0xff] }
  0x47   : > { %15388 = vmatmul.mubr.msk.f32.gmra.mxu0 %vm385_vm2, %v339_v5  ;;  %15517 = vmatmul.mubr.msk.f32.gmra.mxu1 %vm385_vm2, %v382_v6  ;;  %v345_v18 = vld [vmem:[%s17910_s25 + $0x39] sm:$0xff]  ;;  %v346_v20 = vld [vmem:[%s17910_s25 + $0x41] sm:$0xff]  ;;  %v298_v21 = vld [vmem:[%s17910_s25 + $0x30] sm:$0xff] }
  0x48   : > { %15390 = vmatprep.mubr.msk.f32.mxu0 %vm17790_vm1, %v17789_v0  ;;  %15521 = vmatprep.mubr.msk.f32.mxu1 %vm17790_vm1, %v17789_v0  ;;  %v347_v22 = vld [vmem:[%s17910_s25 + $0x49] sm:$0xff]  ;;  %v299_v23 = vld [vmem:[%s17910_s25 + $0x38] sm:$0xff]  ;;  %v300_v25 = vld [vmem:[%s17910_s25 + $0x40] sm:$0xff] }
  0x49   : > { %15793 = vmatprep.subr.mxu1 %v17789_v0  ;;  %v348_v24 = vld [vmem:[%s17910_s25 + $0x51] sm:$0xff]  ;;  %v349_v26 = vld [vmem:[%s17910_s25 + $0x59] sm:$0xff]  ;;  %v301_v27 = vld [vmem:[%s17910_s25 + $0x48] sm:$0xff] }
  0x4a   : > { %v350_v29 = vld [vmem:[%s17910_s25 + $0x61] sm:$0xff]  ;;  %v302_v30 = vld [vmem:[%s17910_s25 + $0x50] sm:$0xff]  ;;  %v303_v32 = vld [vmem:[%s17910_s25 + $0x58] sm:$0xff] }
  0x4b   : > { %15391 = vmatmul.mubr.msk.f32.gmra.mxu0 %vm385_vm2, %v340_v8  ;;  %15522 = vmatmul.mubr.msk.f32.vlgmr.msra.gmra.mxu1 %vm385_vm2, %v292_v9  ;;  %v351_v31 = vld [vmem:[%s17910_s25 + $0x69] sm:$0xff]  ;;  %v352_v33 = vld [vmem:[%s17910_s25 + $0x71] sm:$0xff]  ;;  %v304_v34 = vld [vmem:[%s17910_s25 + $0x60] sm:$0xff] }
  0x4c   : > { %15393 = vmatprep.mubr.msk.f32.mxu0 %vm17790_vm1, %v17789_v0  ;;  %15524 = vmatprep.mubr.msk.f32.mxu1 %vm17790_vm1, %v17789_v0  ;;  %v353_v35 = vld [vmem:[%s17910_s25 + $0x79] sm:$0xff]  ;;  %v305_v36 = vld [vmem:[%s17910_s25 + $0x68] sm:$0xff]  ;;  %v306_v38 = vld [vmem:[%s17910_s25 + $0x70] sm:$0xff] }
  0x4d   : > { %15794 = vmatpush3.msra.mxu1 %v1799_v28  ;;  %v354_v37 = vld [vmem:[%s17910_s25 + $0x81] sm:$0xff]  ;;  %v355_v39 = vld [vmem:[%s17910_s25 + $0x89] sm:$0xff]  ;;  %v307_v40 = vld [vmem:[%s17910_s25 + $0x78] sm:$0xff] }
  0x4e   : > { %16067 = vmatprep.subr.mxu1 %v17789_v0  ;;  %v356_v41 = vld [vmem:[%s17910_s25 + $0x91] sm:$0xff]  ;;  %v308_v42 = vld [vmem:[%s17910_s25 + $0x80] sm:$0xff]  ;;  %v309_v44 = vld [vmem:[%s17910_s25 + $0x88] sm:$0xff] }
  0x4f   : > { %15394 = vmatmul.mubr.msk.f32.gmra.mxu0 %vm385_vm2, %v341_v10  ;;  %15525 = vmatmul.mubr.msk.f32.gmra.mxu1 %vm385_vm2, %v293_v11  ;;  %v357_v43 = vld [vmem:[%s17910_s25 + $0x99] sm:$0xff]  ;;  %v358_v45 = vld [vmem:[%s17910_s25 + $0xa1] sm:$0xff]  ;;  %v310_v46 = vld [vmem:[%s17910_s25 + $0x90] sm:$0xff] }
  0x50   : > { %15396 = vmatprep.mubr.msk.f32.mxu0 %vm17790_vm1, %v17789_v0  ;;  %15527 = vmatprep.mubr.msk.f32.mxu1 %vm17790_vm1, %v17789_v0  ;;  %v359_v47 = vld [vmem:[%s17910_s25 + $0xa9] sm:$0xff]  ;;  %v311_v48 = vld [vmem:[%s17910_s25 + $0x98] sm:$0xff]  ;;  %v312_v50 = vld [vmem:[%s17910_s25 + $0xa0] sm:$0xff] }
  0x51   : > { %v360_v49 = vld [vmem:[%s17910_s25 + $0xb1] sm:$0xff]  ;;  %v361_v51 = vld [vmem:[%s17910_s25 + $0xb9] sm:$0xff]  ;;  %v313_v52 = vld [vmem:[%s17910_s25 + $0xa8] sm:$0xff] }
  0x52   : > { %v362_v53 = vld [vmem:[%s17910_s25 + $0xc1] sm:$0xff]  ;;  %v314_v54 = vld [vmem:[%s17910_s25 + $0xb0] sm:$0xff]  ;;  %v315_v56 = vld [vmem:[%s17910_s25 + $0xb8] sm:$0xff] }
  0x53   : > { %15397 = vmatmul.mubr.msk.f32.gmra.mxu0 %vm385_vm2, %v342_v12  ;;  %15528 = vmatmul.mubr.msk.f32.gmra.mxu1 %vm385_vm2, %v294_v13  ;;  %v363_v55 = vld [vmem:[%s17910_s25 + $0xc9] sm:$0xff]  ;;  %v364_v57 = vld [vmem:[%s17910_s25 + $0xd1] sm:$0xff]  ;;  %v316_v58 = vld [vmem:[%s17910_s25 + $0xc0] sm:$0xff] }
  0x54   : > { %15399 = vmatprep.mubr.msk.f32.mxu0 %vm17790_vm1, %v17789_v0  ;;  %15530 = vmatprep.mubr.msk.f32.mxu1 %vm17790_vm1, %v17789_v0  ;;  %v365_v59 = vld [vmem:[%s17910_s25 + $0xd9] sm:$0xff]  ;;  %v317_v60 = vld [vmem:[%s17910_s25 + $0xc8] sm:$0xff]  ;;  %v318_v62 = vld [vmem:[%s17910_s25 + $0xd0] sm:$0xff] }
  0x55   : > { %v366_v61 = vld [vmem:[%s17910_s25 + $0xe1] sm:$0xff]  ;;  %v367_v63 = vld [vmem:[%s17910_s25 + $0xe9] sm:$0xff]  ;;  %v319_v1 = vld [vmem:[%s17910_s25 + $0xd8] sm:$0xff] }
  0x56   : > { %v368_v2 = vld [vmem:[%s17910_s25 + $0xf1] sm:$0xff]  ;;  %v320_v3 = vld [vmem:[%s17910_s25 + $0xe0] sm:$0xff]  ;;  %v321_v5 = vld [vmem:[%s17910_s25 + $0xe8] sm:$0xff] }
  0x57   : > { %15400 = vmatmul.mubr.msk.f32.gmra.mxu0 %vm385_vm2, %v343_v14  ;;  %15531 = vmatmul.mubr.msk.f32.gmra.mxu1 %vm385_vm2, %v295_v15  ;;  %v369_v4 = vld [vmem:[%s17910_s25 + $0xf9] sm:$0xff]  ;;  %v370_v6 = vld [vmem:[%s17910_s25 + $0x101] sm:$0xff]  ;;  %v322_v7 = vld [vmem:[%s17910_s25 + $0xf0] sm:$0xff] }
  0x58   : > { %15402 = vmatprep.mubr.msk.f32.mxu0 %vm17790_vm1, %v17789_v0  ;;  %15533 = vmatprep.mubr.msk.f32.mxu1 %vm17790_vm1, %v17789_v0  ;;  %v371_v8 = vld [vmem:[%s17910_s25 + $0x109] sm:$0xff]  ;;  %v323_v9 = vld [vmem:[%s17910_s25 + $0xf8] sm:$0xff]  ;;  %v324_v11 = vld [vmem:[%s17910_s25 + $0x100] sm:$0xff] }
  0x59   : > { %v372_v10 = vld [vmem:[%s17910_s25 + $0x111] sm:$0xff]  ;;  %v373_v12 = vld [vmem:[%s17910_s25 + $0x119] sm:$0xff]  ;;  %v325_v13 = vld [vmem:[%s17910_s25 + $0x108] sm:$0xff] }
  0x5a   : > { %v374_v14 = vld [vmem:[%s17910_s25 + $0x121] sm:$0xff]  ;;  %v326_v15 = vld [vmem:[%s17910_s25 + $0x110] sm:$0xff] }
  0x5b   : > { %15403 = vmatmul.mubr.msk.f32.gmra.mxu0 %vm385_vm2, %v344_v16  ;;  %15534 = vmatmul.mubr.msk.f32.gmra.mxu1 %vm385_vm2, %v296_v17  ;;  %v375_v16 = vld [vmem:[%s17910_s25 + $0x129] sm:$0xff]  ;;  %v327_v17 = vld [vmem:[%s17910_s25 + $0x118] sm:$0xff] }
  0x5c   : > { %15405 = vmatprep.mubr.msk.f32.mxu0 %vm17790_vm1, %v17789_v0  ;;  %15536 = vmatprep.mubr.msk.f32.mxu1 %vm17790_vm1, %v17789_v0  ;;  %v333_v28 = vld [vmem:[%s17910_s25 + $0x148] sm:$0xff] }
  0x5f   : > { %15406 = vmatmul.mubr.msk.f32.gmra.mxu0 %vm385_vm2, %v345_v18  ;;  %15537 = vmatmul.mubr.msk.f32.gmra.mxu1 %vm385_vm2, %v297_v19  ;;  %v376_v18 = vld [vmem:[%s17910_s25 + $0x131] sm:$0xff]  ;;  %v328_v19 = vld [vmem:[%s17910_s25 + $0x120] sm:$0xff] }
  0x60   : > { %15408 = vmatprep.mubr.msk.f32.mxu0 %vm17790_vm1, %v17789_v0  ;;  %15539 = vmatprep.mubr.msk.f32.mxu1 %vm17790_vm1, %v17789_v0 }
  0x63   : > { %15409 = vmatmul.mubr.msk.f32.gmra.mxu0 %vm385_vm2, %v346_v20  ;;  %15540 = vmatmul.mubr.msk.f32.gmra.mxu1 %vm385_vm2, %v298_v21  ;;  %v377_v20 = vld [vmem:[%s17910_s25 + $0x139] sm:$0xff]  ;;  %v329_v21 = vld [vmem:[%s17910_s25 + $0x128] sm:$0xff] }
  0x64   : > { %15411 = vmatprep.mubr.msk.f32.mxu0 %vm17790_vm1, %v17789_v0  ;;  %15542 = vmatprep.mubr.msk.f32.mxu1 %vm17790_vm1, %v17789_v0 }
  0x67   : > { %15412 = vmatmul.mubr.msk.f32.gmra.mxu0 %vm385_vm2, %v347_v22  ;;  %15543 = vmatmul.mubr.msk.f32.gmra.mxu1 %vm385_vm2, %v299_v23  ;;  %v378_v22 = vld [vmem:[%s17910_s25 + $0x141] sm:$0xff]  ;;  %v330_v23 = vld [vmem:[%s17910_s25 + $0x130] sm:$0xff] }
  0x68   : > { %15414 = vmatprep.mubr.msk.f32.mxu0 %vm17790_vm1, %v17789_v0  ;;  %15545 = vmatprep.mubr.msk.f32.mxu1 %vm17790_vm1, %v17789_v0 }
  0x6b   : > { %15415 = vmatmul.mubr.msk.f32.gmra.mxu0 %vm385_vm2, %v348_v24  ;;  %15546 = vmatmul.mubr.msk.f32.gmra.mxu1 %vm385_vm2, %v300_v25  ;;  %v379_v24 = vld [vmem:[%s17910_s25 + $0x149] sm:$0xff]  ;;  %v331_v25 = vld [vmem:[%s17910_s25 + $0x138] sm:$0xff] }
  0x6c   : > { %15417 = vmatprep.mubr.msk.f32.mxu0 %vm17790_vm1, %v17789_v0  ;;  %15548 = vmatprep.mubr.msk.f32.mxu1 %vm17790_vm1, %v17789_v0 }
  0x6f   : > { %15418 = vmatmul.mubr.msk.f32.gmra.mxu0 %vm385_vm2, %v349_v26  ;;  %15549 = vmatmul.mubr.msk.f32.gmra.mxu1 %vm385_vm2, %v301_v27  ;;  %v380_v26 = vld [vmem:[%s17910_s25 + $0x151] sm:$0xff]  ;;  %v332_v27 = vld [vmem:[%s17910_s25 + $0x140] sm:$0xff] }
  0x70   : > { %15420 = vmatprep.mubr.msk.f32.mxu0 %vm17790_vm1, %v17789_v0  ;;  %15551 = vmatprep.mubr.msk.f32.mxu1 %vm17790_vm1, %v17789_v0 }
  0x73   : > { %15421 = vmatmul.mubr.msk.f32.gmra.mxu0 %vm385_vm2, %v350_v29  ;;  %15552 = vmatmul.mubr.msk.f32.gmra.mxu1 %vm385_vm2, %v302_v30  ;;  %v1236_v29 = vld [vmem:[%s17910_s25 + $0x2] sm:$0xff] }
  0x74   : > { %15423 = vmatprep.mubr.msk.f32.mxu0 %vm17790_vm1, %v17789_v0  ;;  %15554 = vmatprep.mubr.msk.f32.mxu1 %vm17790_vm1, %v17789_v0  ;;  %v2316_v30 = vld [vmem:[#allocation3 + $0x20] sm:$0xff] }
  0x77   : > { %15424 = vmatmul.mubr.msk.f32.gmra.mxu0 %vm385_vm2, %v351_v31  ;;  %15555 = vmatmul.mubr.msk.f32.gmra.mxu1 %vm385_vm2, %v303_v32  ;;  %v334_v31 = vld [vmem:[%s17910_s25 + $0x150] sm:$0xff] }
  0x78   : > { %15426 = vmatprep.mubr.msk.f32.mxu0 %vm17790_vm1, %v17789_v0  ;;  %15557 = vmatprep.mubr.msk.f32.mxu1 %vm17790_vm1, %v17789_v0  ;;  %v1237_v32 = vld [vmem:[%s17910_s25 + $0xa] sm:$0xff] }
  0x7b   : > { %15427 = vmatmul.mubr.msk.f32.gmra.mxu0 %vm385_vm2, %v352_v33  ;;  %15558 = vmatmul.mubr.msk.f32.gmra.mxu1 %vm385_vm2, %v304_v34  ;;  %v335_v33 = vld [vmem:[%s17910_s25 + $0x158] sm:$0xff] }
  0x7c   : > { %15429 = vmatprep.mubr.msk.f32.mxu0 %vm17790_vm1, %v17789_v0  ;;  %15560 = vmatprep.mubr.msk.f32.mxu1 %vm17790_vm1, %v17789_v0  ;;  %v1238_v34 = vld [vmem:[%s17910_s25 + $0x12] sm:$0xff] }
  0x7f   : > { %15430 = vmatmul.mubr.msk.f32.gmra.mxu0 %vm385_vm2, %v353_v35  ;;  %15561 = vmatmul.mubr.msk.f32.gmra.mxu1 %vm385_vm2, %v305_v36  ;;  %v336_v35 = vld [vmem:[%s17910_s25 + $0x160] sm:$0xff] }
  0x80   : > { %15432 = vmatprep.mubr.msk.f32.mxu0 %vm17790_vm1, %v17789_v0  ;;  %15563 = vmatprep.mubr.msk.f32.mxu1 %vm17790_vm1, %v17789_v0  ;;  %v1239_v36 = vld [vmem:[%s17910_s25 + $0x1a] sm:$0xff] }
  0x83   : > { %15433 = vmatmul.mubr.msk.f32.gmra.mxu0 %vm385_vm2, %v354_v37  ;;  %15564 = vmatmul.mubr.msk.f32.gmra.mxu1 %vm385_vm2, %v306_v38  ;;  %v1240_v37 = vld [vmem:[%s17910_s25 + $0x22] sm:$0xff]  ;;  %v1753_v38 = vld [vmem:[%s17910_s25 + $0x14] sm:$0xff] }
  0x84   : > { %15435 = vmatprep.mubr.msk.f32.mxu0 %vm17790_vm1, %v17789_v0  ;;  %15566 = vmatprep.mubr.msk.f32.mxu1 %vm17790_vm1, %v17789_v0 }
  0x87   : > { %15436 = vmatmul.mubr.msk.f32.gmra.mxu0 %vm385_vm2, %v355_v39  ;;  %15567 = vmatmul.mubr.msk.f32.gmra.mxu1 %vm385_vm2, %v307_v40  ;;  %v1241_v39 = vld [vmem:[%s17910_s25 + $0x2a] sm:$0xff]  ;;  %v1754_v40 = vld [vmem:[%s17910_s25 + $0x1c] sm:$0xff] }
  0x88   : > { %15438 = vmatprep.mubr.msk.f32.mxu0 %vm17790_vm1, %v17789_v0  ;;  %15569 = vmatprep.mubr.msk.f32.mxu1 %vm17790_vm1, %v17789_v0 }
  0x8b   : > { %15439 = vmatmul.mubr.msk.f32.gmra.mxu0 %vm385_vm2, %v356_v41  ;;  %15570 = vmatmul.mubr.msk.f32.gmra.mxu1 %vm385_vm2, %v308_v42 }
  0x8c   : > { %15441 = vmatprep.mubr.msk.f32.mxu0 %vm17790_vm1, %v17789_v0  ;;  %15572 = vmatprep.mubr.msk.f32.mxu1 %vm17790_vm1, %v17789_v0 }
  0x8f   : > { %15442 = vmatmul.mubr.msk.f32.gmra.mxu0 %vm385_vm2, %v357_v43  ;;  %15573 = vmatmul.mubr.msk.f32.gmra.mxu1 %vm385_vm2, %v309_v44  ;;  %v1242_v43 = vld [vmem:[%s17910_s25 + $0x32] sm:$0xff]  ;;  %v1755_v44 = vld [vmem:[%s17910_s25 + $0x24] sm:$0xff] }
  0x90   : > { %15444 = vmatprep.mubr.msk.f32.mxu0 %vm17790_vm1, %v17789_v0  ;;  %15575 = vmatprep.mubr.msk.f32.mxu1 %vm17790_vm1, %v17789_v0 }
  0x93   : > { %15445 = vmatmul.mubr.msk.f32.gmra.mxu0 %vm385_vm2, %v358_v45  ;;  %15576 = vmatmul.mubr.msk.f32.gmra.mxu1 %vm385_vm2, %v310_v46 }
  0x94   : > { %15447 = vmatprep.mubr.msk.f32.mxu0 %vm17790_vm1, %v17789_v0  ;;  %15578 = vmatprep.mubr.msk.f32.mxu1 %vm17790_vm1, %v17789_v0 }
  0x97   : > { %15448 = vmatmul.mubr.msk.f32.gmra.mxu0 %vm385_vm2, %v359_v47  ;;  %15579 = vmatmul.mubr.msk.f32.gmra.mxu1 %vm385_vm2, %v311_v48 }
  0x98   : > { %15450 = vmatprep.mubr.msk.f32.mxu0 %vm17790_vm1, %v17789_v0  ;;  %15581 = vmatprep.mubr.msk.f32.mxu1 %vm17790_vm1, %v17789_v0 }
  0x9b   : > { %15451 = vmatmul.mubr.msk.f32.gmra.mxu0 %vm385_vm2, %v360_v49  ;;  %15582 = vmatmul.mubr.msk.f32.gmra.mxu1 %vm385_vm2, %v312_v50  ;;  %v1243_v49 = vld [vmem:[%s17910_s25 + $0x3a] sm:$0xff]  ;;  %v1756_v50 = vld [vmem:[%s17910_s25 + $0x2c] sm:$0xff] }
  0x9c   : > { %15453 = vmatprep.mubr.msk.f32.mxu0 %vm17790_vm1, %v17789_v0  ;;  %15584 = vmatprep.mubr.msk.f32.mxu1 %vm17790_vm1, %v17789_v0 }
  0x9f   : > { %15454 = vmatmul.mubr.msk.f32.gmra.mxu0 %vm385_vm2, %v361_v51  ;;  %15585 = vmatmul.mubr.msk.f32.gmra.mxu1 %vm385_vm2, %v313_v52 }
  0xa0   : > { %15456 = vmatprep.mubr.msk.f32.mxu0 %vm17790_vm1, %v17789_v0  ;;  %15587 = vmatprep.mubr.msk.f32.mxu1 %vm17790_vm1, %v17789_v0 }
  0xa3   : > { %15457 = vmatmul.mubr.msk.f32.gmra.mxu0 %vm385_vm2, %v362_v53  ;;  %15588 = vmatmul.mubr.msk.f32.gmra.mxu1 %vm385_vm2, %v314_v54 }
  0xa4   : > { %15459 = vmatprep.mubr.msk.f32.mxu0 %vm17790_vm1, %v17789_v0  ;;  %15590 = vmatprep.mubr.msk.f32.mxu1 %vm17790_vm1, %v17789_v0 }
  0xa7   : > { %15460 = vmatmul.mubr.msk.f32.gmra.mxu0 %vm385_vm2, %v363_v55  ;;  %15591 = vmatmul.mubr.msk.f32.gmra.mxu1 %vm385_vm2, %v315_v56  ;;  %v1244_v56 = vld [vmem:[%s17910_s25 + $0x42] sm:$0xff] }
  0xa8   : > { %15462 = vmatprep.mubr.msk.f32.mxu0 %vm17790_vm1, %v17789_v0  ;;  %15593 = vmatprep.mubr.msk.f32.mxu1 %vm17790_vm1, %v17789_v0 }
  0xab   : > { %15463 = vmatmul.mubr.msk.f32.gmra.mxu0 %vm385_vm2, %v364_v57  ;;  %15594 = vmatmul.mubr.msk.f32.gmra.mxu1 %vm385_vm2, %v316_v58  ;;  %v1757_v57 = vld [vmem:[%s17910_s25 + $0x34] sm:$0xff] }
  0xac   : > { %15465 = vmatprep.mubr.msk.f32.mxu0 %vm17790_vm1, %v17789_v0  ;;  %15596 = vmatprep.mubr.msk.f32.mxu1 %vm17790_vm1, %v17789_v0 }
  0xaf   : > { %15466 = vmatmul.mubr.msk.f32.gmra.mxu0 %vm385_vm2, %v365_v59  ;;  %15597 = vmatmul.mubr.msk.f32.gmra.mxu1 %vm385_vm2, %v317_v60 }
  0xb0   : > { %15468 = vmatprep.mubr.msk.f32.mxu0 %vm17790_vm1, %v17789_v0  ;;  %15599 = vmatprep.mubr.msk.f32.mxu1 %vm17790_vm1, %v17789_v0 }
  0xb3   : > { %15469 = vmatmul.mubr.msk.f32.gmra.mxu0 %vm385_vm2, %v366_v61  ;;  %15600 = vmatmul.mubr.msk.f32.gmra.mxu1 %vm385_vm2, %v318_v62 }
  0xb4   : > { %15471 = vmatprep.mubr.msk.f32.mxu0 %vm17790_vm1, %v17789_v0  ;;  %15602 = vmatprep.mubr.msk.f32.mxu1 %vm17790_vm1, %v17789_v0 }
  0xb7   : > { %15472 = vmatmul.mubr.msk.f32.gmra.mxu0 %vm385_vm2, %v367_v63  ;;  %15603 = vmatmul.mubr.msk.f32.gmra.mxu1 %vm385_vm2, %v319_v1  ;;  %v1245_v63 = vld [vmem:[%s17910_s25 + $0x4a] sm:$0xff]  ;;  %v1758_v1 = vld [vmem:[%s17910_s25 + $0x3c] sm:$0xff] }
  0xb8   : > { %15474 = vmatprep.mubr.msk.f32.mxu0 %vm17790_vm1, %v17789_v0  ;;  %15605 = vmatprep.mubr.msk.f32.mxu1 %vm17790_vm1, %v17789_v0 }
  0xbb   : > { %15475 = vmatmul.mubr.msk.f32.gmra.mxu0 %vm385_vm2, %v368_v2  ;;  %15606 = vmatmul.mubr.msk.f32.gmra.mxu1 %vm385_vm2, %v320_v3 }
  0xbc   : > { %15477 = vmatprep.mubr.msk.f32.mxu0 %vm17790_vm1, %v17789_v0  ;;  %15608 = vmatprep.mubr.msk.f32.mxu1 %vm17790_vm1, %v17789_v0 }
  0xbf   : > { %15478 = vmatmul.mubr.msk.f32.gmra.mxu0 %vm385_vm2, %v369_v4  ;;  %15609 = vmatmul.mubr.msk.f32.gmra.mxu1 %vm385_vm2, %v321_v5 }
  0xc0   : > { %15480 = vmatprep.mubr.msk.f32.mxu0 %vm17790_vm1, %v17789_v0  ;;  %15611 = vmatprep.mubr.msk.f32.mxu1 %vm17790_vm1, %v17789_v0 }
  0xc3   : > { %15481 = vmatmul.mubr.msk.f32.gmra.mxu0 %vm385_vm2, %v370_v6  ;;  %15612 = vmatmul.mubr.msk.f32.gmra.mxu1 %vm385_vm2, %v322_v7  ;;  %v1246_v7 = vld [vmem:[%s17910_s25 + $0x52] sm:$0xff] }
  0xc4   : > { %15483 = vmatprep.mubr.msk.f32.mxu0 %vm17790_vm1, %v17789_v0  ;;  %15614 = vmatprep.mubr.msk.f32.mxu1 %vm17790_vm1, %v17789_v0 }
  0xc7   : > { %15484 = vmatmul.mubr.msk.f32.gmra.mxu0 %vm385_vm2, %v371_v8  ;;  %15615 = vmatmul.mubr.msk.f32.gmra.mxu1 %vm385_vm2, %v323_v9  ;;  %v1759_v8 = vld [vmem:[%s17910_s25 + $0x44] sm:$0xff] }
  0xc8   : > { %15486 = vmatprep.mubr.msk.f32.mxu0 %vm17790_vm1, %v17789_v0  ;;  %15617 = vmatprep.mubr.msk.f32.mxu1 %vm17790_vm1, %v17789_v0 }
  0xcb   : > { %15487 = vmatmul.mubr.msk.f32.gmra.mxu0 %vm385_vm2, %v372_v10  ;;  %15618 = vmatmul.mubr.msk.f32.gmra.mxu1 %vm385_vm2, %v324_v11 }
  0xcc   : > { %15489 = vmatprep.mubr.msk.f32.mxu0 %vm17790_vm1, %v17789_v0  ;;  %15620 = vmatprep.mubr.msk.f32.mxu1 %vm17790_vm1, %v17789_v0 }
  0xcf   : > { %15490 = vmatmul.mubr.msk.f32.gmra.mxu0 %vm385_vm2, %v373_v12  ;;  %15621 = vmatmul.mubr.msk.f32.gmra.mxu1 %vm385_vm2, %v325_v13 }
  0xd0   : > { %15492 = vmatprep.mubr.msk.f32.mxu0 %vm17790_vm1, %v17789_v0  ;;  %15623 = vmatprep.mubr.msk.f32.mxu1 %vm17790_vm1, %v17789_v0 }
  0xd3   : > { %15493 = vmatmul.mubr.msk.f32.gmra.mxu0 %vm385_vm2, %v374_v14  ;;  %15624 = vmatmul.mubr.msk.f32.gmra.mxu1 %vm385_vm2, %v326_v15  ;;  %v1247_v14 = vld [vmem:[%s17910_s25 + $0x5a] sm:$0xff]  ;;  %v1760_v15 = vld [vmem:[%s17910_s25 + $0x4c] sm:$0xff] }
  0xd4   : > { %15495 = vmatprep.mubr.msk.f32.mxu0 %vm17790_vm1, %v17789_v0  ;;  %15626 = vmatprep.mubr.msk.f32.mxu1 %vm17790_vm1, %v17789_v0 }
  0xd7   : > { %15496 = vmatmul.mubr.msk.f32.gmra.mxu0 %vm385_vm2, %v375_v16  ;;  %15627 = vmatmul.mubr.msk.f32.gmra.mxu1 %vm385_vm2, %v327_v17 }
  0xd8   : > { %15498 = vmatprep.mubr.msk.f32.mxu0 %vm17790_vm1, %v17789_v0  ;;  %15629 = vmatprep.mubr.msk.f32.mxu1 %vm17790_vm1, %v17789_v0 }
  0xdb   : > { %15499 = vmatmul.mubr.msk.f32.gmra.mxu0 %vm385_vm2, %v376_v18  ;;  %15630 = vmatmul.mubr.msk.f32.gmra.mxu1 %vm385_vm2, %v328_v19 }
  0xdc   : > { %15501 = vmatprep.mubr.msk.f32.mxu0 %vm17790_vm1, %v17789_v0  ;;  %15632 = vmatprep.mubr.msk.f32.mxu1 %vm17790_vm1, %v17789_v0 }
  0xdf   : > { %15502 = vmatmul.mubr.msk.f32.gmra.mxu0 %vm385_vm2, %v377_v20  ;;  %15633 = vmatmul.mubr.msk.f32.gmra.mxu1 %vm385_vm2, %v329_v21  ;;  %v1248_v21 = vld [vmem:[%s17910_s25 + $0x62] sm:$0xff] }
  0xe0   : > { %15504 = vmatprep.mubr.msk.f32.mxu0 %vm17790_vm1, %v17789_v0  ;;  %15635 = vmatprep.mubr.msk.f32.mxu1 %vm17790_vm1, %v17789_v0 }
  0xe3   : > { %15505 = vmatmul.mubr.msk.f32.gmra.mxu0 %vm385_vm2, %v378_v22  ;;  %15636 = vmatmul.mubr.msk.f32.gmra.mxu1 %vm385_vm2, %v330_v23  ;;  %v1761_v22 = vld [vmem:[%s17910_s25 + $0x54] sm:$0xff] }
  0xe4   : > { %15507 = vmatprep.mubr.msk.f32.mxu0 %vm17790_vm1, %v17789_v0  ;;  %15638 = vmatprep.mubr.msk.f32.mxu1 %vm17790_vm1, %v17789_v0 }
  0xe7   : > { %15508 = vmatmul.mubr.msk.f32.gmra.mxu0 %vm385_vm2, %v379_v24  ;;  %15639 = vmatmul.mubr.msk.f32.gmra.mxu1 %vm385_vm2, %v331_v25 }
  0xe8   : > { %15510 = vmatprep.mubr.msk.f32.mxu0 %vm17790_vm1, %v17789_v0  ;;  %15641 = vmatprep.mubr.msk.f32.mxu1 %vm17790_vm1, %v17789_v0 }
  0xeb   : > { %15511 = vmatmul.mubr.msk.f32.gmra.mxu0 %vm385_vm2, %v380_v26  ;;  %15642 = vmatmul.mubr.msk.f32.gmra.mxu1 %vm385_vm2, %v332_v27 }
  0xec   : > { %15644 = vmatprep.mubr.msk.f32.mxu1 %vm17790_vm1, %v17789_v0  ;;  %15658 = vmatprep.mubr.msk.f32.mxu0 %vm17790_vm1, %v17789_v0 }
  0xef   : > { %15645 = vmatmul.mubr.msk.f32.gmra.mxu1 %vm385_vm2, %v333_v28  ;;  %15659 = vmatmul.mubr.msk.f32.vlgmr.msra.gmra.mxu0 %vm385_vm2, %v1236_v29  ;;  %v1249_v28 = vld [vmem:[%s17910_s25 + $0x6a] sm:$0xff]  ;;  %v1762_v29 = vld [vmem:[%s17910_s25 + $0x5c] sm:$0xff] }
  0xf0   : > { %15931 = vmatpush3.msra.mxu0 %v2316_v30  ;;  %15647 = vmatprep.mubr.msk.f32.mxu1 %vm17790_vm1, %v17789_v0 }
  0xf1   : > { %15661 = vmatprep.mubr.msk.f32.mxu0 %vm17790_vm1, %v17789_v0  ;;  %16204 = vmatprep.subr.mxu0 %v17789_v0 }
  0xf3   : > { %15648 = vmatmul.mubr.msk.f32.gmra.mxu1 %vm385_vm2, %v334_v31  ;;  %15662 = vmatmul.mubr.msk.f32.gmra.mxu0 %vm385_vm2, %v1237_v32  ;;  %v2833_v32 = vld [vmem:[#allocation3 + $0x28] sm:$0xff] }
  0xf4   : > { %15650 = vmatprep.mubr.msk.f32.mxu1 %vm17790_vm1, %v17789_v0  ;;  %15664 = vmatprep.mubr.msk.f32.mxu0 %vm17790_vm1, %v17789_v0 }
  0xf7   : > { %15651 = vmatmul.mubr.msk.f32.gmra.mxu1 %vm385_vm2, %v335_v33  ;;  %15665 = vmatmul.mubr.msk.f32.gmra.mxu0 %vm385_vm2, %v1238_v34 }
  0xf8   : > { %15653 = vmatprep.mubr.msk.f32.mxu1 %vm17790_vm1, %v17789_v0  ;;  %15667 = vmatprep.mubr.msk.f32.mxu0 %vm17790_vm1, %v17789_v0 }
  0xfb   : > { %15654 = vmatmul.mubr.msk.f32.gmra.mxu1 %vm385_vm2, %v336_v35  ;;  %15668 = vmatmul.mubr.msk.f32.gmra.mxu0 %vm385_vm2, %v1239_v36  ;;  %v1250_v36 = vld [vmem:[%s17910_s25 + $0x72] sm:$0xff] }
  0xfc   : > { %15670 = vmatprep.mubr.msk.f32.mxu0 %vm17790_vm1, %v17789_v0  ;;  %15795 = vmatprep.mubr.msk.f32.mxu1 %vm17790_vm1, %v17789_v0 }
  0xff   : > { %15671 = vmatmul.mubr.msk.f32.gmra.mxu0 %vm385_vm2, %v1240_v37  ;;  %15796 = vmatmul.mubr.msk.f32.vlgmr.msra.gmra.mxu1 %vm385_vm2, %v1753_v38  ;;  %v1763_v37 = vld [vmem:[%s17910_s25 + $0x64] sm:$0xff] }
 0x100   : > { %15673 = vmatprep.mubr.msk.f32.mxu0 %vm17790_vm1, %v17789_v0  ;;  %15798 = vmatprep.mubr.msk.f32.mxu1 %vm17790_vm1, %v17789_v0 }
 0x101   : > { %16068 = vmatpush3.msra.mxu1 %v2833_v32 }
 0x102   : > { %16341 = vmatprep.subr.mxu1 %v17789_v0 }
 0x103   : > { %v587_v41 = vpop.f32.mrf.mxu0  ;;  %v18304_v42 = vpop.f32.mrf.mxu1  ;;  %15674 = vmatmul.mubr.msk.f32.gmra.mxu0 %vm385_vm2, %v1241_v39  ;;  %15799 = vmatmul.mubr.msk.f32.gmra.mxu1 %vm385_vm2, %v1754_v40 }
 0x104   : > { %15676 = vmatprep.mubr.msk.f32.mxu0 %vm17790_vm1, %v17789_v0  ;;  %15801 = vmatprep.mubr.msk.f32.mxu1 %vm17790_vm1, %v17789_v0 }
 0x105   : > { %v15386_v45 = vpop.f32.mrf.mxu0  ;;  %v15515_v46 = vpop.f32.mrf.mxu1 }
 0x106   : > { %v1764_v45 = vld [vmem:[%s17910_s25 + $0x6c] sm:$0xff] }
 0x107   : > { %v592_v47 = vpop.f32.mrf.mxu0  ;;  %v18314_v48 = vpop.f32.mrf.mxu1  ;;  %15677 = vmatmul.mubr.msk.f32.gmra.mxu0 %vm385_vm2, %v1242_v43  ;;  %15802 = vmatmul.mubr.msk.f32.gmra.mxu1 %vm385_vm2, %v1755_v44  ;;  %v1251_v44 = vld [vmem:[%s17910_s25 + $0x7a] sm:$0xff] }
 0x108   : > { %15679 = vmatprep.mubr.msk.f32.mxu0 %vm17790_vm1, %v17789_v0  ;;  %15804 = vmatprep.mubr.msk.f32.mxu1 %vm17790_vm1, %v17789_v0 }
 0x109   : > { %v15389_v51 = vpop.f32.mrf.mxu0  ;;  %v15518_v52 = vpop.f32.mrf.mxu1 }
 0x10a   : > { %v1252_v52 = vld [vmem:[%s17910_s25 + $0x82] sm:$0xff] }
 0x10b   : > { %v597_v53 = vpop.f32.mrf.mxu0  ;;  %v1012_v54 = vpop.f32.mrf.mxu1  ;;  %15680 = vmatmul.mubr.msk.f32.gmra.mxu0 %vm385_vm2, %v1243_v49  ;;  %15805 = vmatmul.mubr.msk.f32.gmra.mxu1 %vm385_vm2, %v1756_v50 }
 0x10c   : > { %v18326_v55 = vadd.f32 %v1012_v54, %v587_v41  ;;  %15682 = vmatprep.mubr.msk.f32.mxu0 %vm17790_vm1, %v17789_v0  ;;  %15807 = vmatprep.mubr.msk.f32.mxu1 %vm17790_vm1, %v17789_v0 }
 0x10d   : > { %v15392_v58 = vpop.f32.mrf.mxu0  ;;  %v15523_v59 = vpop.f32.mrf.mxu1 }
 0x10f   : > { %v602_v60 = vpop.f32.mrf.mxu0  ;;  %v1017_v61 = vpop.f32.mrf.mxu1  ;;  %15683 = vmatmul.mubr.msk.f32.gmra.mxu0 %vm385_vm2, %v1244_v56  ;;  %15808 = vmatmul.mubr.msk.f32.gmra.mxu1 %vm385_vm2, %v1757_v57 }
 0x110   : > { %v18336_v62 = vadd.f32 %v1017_v61, %v592_v47  ;;  %15685 = vmatprep.mubr.msk.f32.mxu0 %vm17790_vm1, %v17789_v0  ;;  %15810 = vmatprep.mubr.msk.f32.mxu1 %vm17790_vm1, %v17789_v0  ;;  %v1766_v61 = vld [vmem:[%s17910_s25 + $0x7c] sm:$0xff] }
 0x111   : > { %v15395_v2 = vpop.f32.mrf.mxu0  ;;  %v15526_v3 = vpop.f32.mrf.mxu1 }
 0x113   : > { %v607_v4 = vpop.f32.mrf.mxu0  ;;  %v1022_v5 = vpop.f32.mrf.mxu1  ;;  %15686 = vmatmul.mubr.msk.f32.gmra.mxu0 %vm385_vm2, %v1245_v63  ;;  %15811 = vmatmul.mubr.msk.f32.gmra.mxu1 %vm385_vm2, %v1758_v1 }
 0x114   : > { %v18346_v6 = vadd.f32 %v1022_v5, %v597_v53  ;;  %15688 = vmatprep.mubr.msk.f32.mxu0 %vm17790_vm1, %v17789_v0  ;;  %15813 = vmatprep.mubr.msk.f32.mxu1 %vm17790_vm1, %v17789_v0  ;;  %v1765_v53 = vld [vmem:[%s17910_s25 + $0x74] sm:$0xff] }
 0x115   : > { %v15398_v9 = vpop.f32.mrf.mxu0  ;;  %v15529_v10 = vpop.f32.mrf.mxu1  ;;  %v1254_v5 = vld [vmem:[%s17910_s25 + $0x92] sm:$0xff] }
 0x117   : > { %v612_v11 = vpop.f32.mrf.mxu0  ;;  %v1027_v12 = vpop.f32.mrf.mxu1  ;;  %15689 = vmatmul.mubr.msk.f32.gmra.mxu0 %vm385_vm2, %v1246_v7  ;;  %15814 = vmatmul.mubr.msk.f32.gmra.mxu1 %vm385_vm2, %v1759_v8  ;;  %v1767_v7 = vld [vmem:[%s17910_s25 + $0x84] sm:$0xff] }
 0x118   : > { %v18356_v13 = vadd.f32 %v1027_v12, %v602_v60  ;;  %15691 = vmatprep.mubr.msk.f32.mxu0 %vm17790_vm1, %v17789_v0  ;;  %15816 = vmatprep.mubr.msk.f32.mxu1 %vm17790_vm1, %v17789_v0  ;;  %v1253_v60 = vld [vmem:[%s17910_s25 + $0x8a] sm:$0xff] }
 0x119   : > { %v15401_v16 = vpop.f32.mrf.mxu0  ;;  %v15532_v17 = vpop.f32.mrf.mxu1 }
 0x11b   : > { %v617_v18 = vpop.f32.mrf.mxu0  ;;  %v1032_v19 = vpop.f32.mrf.mxu1  ;;  %15692 = vmatmul.mubr.msk.f32.gmra.mxu0 %vm385_vm2, %v1247_v14  ;;  %15817 = vmatmul.mubr.msk.f32.gmra.mxu1 %vm385_vm2, %v1760_v15  ;;  %v1255_v14 = vld [vmem:[%s17910_s25 + $0x9a] sm:$0xff]  ;;  %v1768_v15 = vld [vmem:[%s17910_s25 + $0x8c] sm:$0xff] }
 0x11c   : > { %v18366_v20 = vadd.f32 %v1032_v19, %v607_v4  ;;  %15694 = vmatprep.mubr.msk.f32.mxu0 %vm17790_vm1, %v17789_v0  ;;  %15819 = vmatprep.mubr.msk.f32.mxu1 %vm17790_vm1, %v17789_v0 }
 0x11d   : > { %v15404_v23 = vpop.f32.mrf.mxu0  ;;  %v15535_v24 = vpop.f32.mrf.mxu1 }
 0x11e   : > { %v1769_v23 = vld [vmem:[%s17910_s25 + $0x94] sm:$0xff] }
 0x11f   : > { %v622_v25 = vpop.f32.mrf.mxu0  ;;  %v1037_v26 = vpop.f32.mrf.mxu1  ;;  %15695 = vmatmul.mubr.msk.f32.gmra.mxu0 %vm385_vm2, %v1248_v21  ;;  %15820 = vmatmul.mubr.msk.f32.gmra.mxu1 %vm385_vm2, %v1761_v22  ;;  %v1256_v22 = vld [vmem:[%s17910_s25 + $0xa2] sm:$0xff] }
 0x120   : > { %v18376_v27 = vadd.f32 %v1037_v26, %v612_v11  ;;  %15697 = vmatprep.mubr.msk.f32.mxu0 %vm17790_vm1, %v17789_v0  ;;  %15822 = vmatprep.mubr.msk.f32.mxu1 %vm17790_vm1, %v17789_v0 }
 0x121   : > { %v15407_v30 = vpop.f32.mrf.mxu0  ;;  %v15538_v31 = vpop.f32.mrf.mxu1 }
 0x122   : > { %v1257_v30 = vld [vmem:[%s17910_s25 + $0xaa] sm:$0xff]  ;;  %v1770_v31 = vld [vmem:[%s17910_s25 + $0x9c] sm:$0xff] }
 0x123   : > { %v627_v33 = vpop.f32.mrf.mxu0  ;;  %v1042_v34 = vpop.f32.mrf.mxu1  ;;  %15698 = vmatmul.mubr.msk.f32.gmra.mxu0 %vm385_vm2, %v1249_v28  ;;  %15823 = vmatmul.mubr.msk.f32.gmra.mxu1 %vm385_vm2, %v1762_v29 }
 0x124   : > { %v18386_v35 = vadd.f32 %v1042_v34, %v617_v18  ;;  %15700 = vmatprep.mubr.msk.f32.mxu0 %vm17790_vm1, %v17789_v0  ;;  %15825 = vmatprep.mubr.msk.f32.mxu1 %vm17790_vm1, %v17789_v0 }
 0x125   : > { %v15410_v38 = vpop.f32.mrf.mxu0  ;;  %v15541_v39 = vpop.f32.mrf.mxu1 }
 0x126   : > { %v1258_v38 = vld [vmem:[%s17910_s25 + $0xb2] sm:$0xff]  ;;  %v1771_v39 = vld [vmem:[%s17910_s25 + $0xa4] sm:$0xff] }
 0x127   : > { %v632_v40 = vpop.f32.mrf.mxu0  ;;  %v1047_v41 = vpop.f32.mrf.mxu1  ;;  %15701 = vmatmul.mubr.msk.f32.gmra.mxu0 %vm385_vm2, %v1250_v36  ;;  %15826 = vmatmul.mubr.msk.f32.gmra.mxu1 %vm385_vm2, %v1763_v37 }
 0x128   : > { %v18397_v43 = vadd.f32 %v1047_v41, %v622_v25  ;;  %15703 = vmatprep.mubr.msk.f32.mxu0 %vm17790_vm1, %v17789_v0  ;;  %15828 = vmatprep.mubr.msk.f32.mxu1 %vm17790_vm1, %v17789_v0 }
 0x129   : > { %v15413_v46 = vpop.f32.mrf.mxu0  ;;  %v15544_v47 = vpop.f32.mrf.mxu1 }
 0x12a   : > { %v1259_v47 = vld [vmem:[%s17910_s25 + $0xba] sm:$0xff] }
 0x12b   : > { %v637_v49 = vpop.f32.mrf.mxu0  ;;  %v1052_v50 = vpop.f32.mrf.mxu1  ;;  %15704 = vmatmul.mubr.msk.f32.gmra.mxu0 %vm385_vm2, %v1251_v44  ;;  %15829 = vmatmul.mubr.msk.f32.gmra.mxu1 %vm385_vm2, %v1764_v45 }
 0x12c   : > { %v18407_v51 = vadd.f32 %v1052_v50, %v627_v33  ;;  %15706 = vmatprep.mubr.msk.f32.mxu0 %vm17790_vm1, %v17789_v0  ;;  %15831 = vmatprep.mubr.msk.f32.mxu1 %vm17790_vm1, %v17789_v0 }
 0x12d   : > { %v15416_v54 = vpop.f32.mrf.mxu0  ;;  %v15547_v56 = vpop.f32.mrf.mxu1 }
 0x12f   : > { %v642_v57 = vpop.f32.mrf.mxu0  ;;  %v1057_v58 = vpop.f32.mrf.mxu1  ;;  %15707 = vmatmul.mubr.msk.f32.gmra.mxu0 %vm385_vm2, %v1252_v52  ;;  %15832 = vmatmul.mubr.msk.f32.gmra.mxu1 %vm385_vm2, %v1765_v53 }
 0x130   : > { %v18417_v59 = vadd.f32 %v1057_v58, %v632_v40  ;;  %15709 = vmatprep.mubr.msk.f32.mxu0 %vm17790_vm1, %v17789_v0  ;;  %15834 = vmatprep.mubr.msk.f32.mxu1 %vm17790_vm1, %v17789_v0  ;;  %v1773_v58 = vld [vmem:[%s17910_s25 + $0xb4] sm:$0xff] }
 0x131   : > { %v15419_v63 = vpop.f32.mrf.mxu0  ;;  %v15550_v1 = vpop.f32.mrf.mxu1 }
 0x133   : > { %v647_v2 = vpop.f32.mrf.mxu0  ;;  %v1062_v3 = vpop.f32.mrf.mxu1  ;;  %15710 = vmatmul.mubr.msk.f32.gmra.mxu0 %vm385_vm2, %v1253_v60  ;;  %15835 = vmatmul.mubr.msk.f32.gmra.mxu1 %vm385_vm2, %v1766_v61 }
 0x134   : > { %v18427_v4 = vadd.f32 %v1062_v3, %v637_v49  ;;  %15712 = vmatprep.mubr.msk.f32.mxu0 %vm17790_vm1, %v17789_v0  ;;  %15837 = vmatprep.mubr.msk.f32.mxu1 %vm17790_vm1, %v17789_v0  ;;  %v1772_v49 = vld [vmem:[%s17910_s25 + $0xac] sm:$0xff] }
 0x135   : > { %v15422_v8 = vpop.f32.mrf.mxu0  ;;  %v15553_v9 = vpop.f32.mrf.mxu1  ;;  %v1261_v3 = vld [vmem:[%s17910_s25 + $0xca] sm:$0xff] }
 0x137   : > { %v652_v10 = vpop.f32.mrf.mxu0  ;;  %v1067_v11 = vpop.f32.mrf.mxu1  ;;  %15713 = vmatmul.mubr.msk.f32.gmra.mxu0 %vm385_vm2, %v1254_v5  ;;  %15838 = vmatmul.mubr.msk.f32.gmra.mxu1 %vm385_vm2, %v1767_v7  ;;  %v1774_v5 = vld [vmem:[%s17910_s25 + $0xbc] sm:$0xff] }
 0x138   : > { %v18437_v12 = vadd.f32 %v1067_v11, %v642_v57  ;;  %15715 = vmatprep.mubr.msk.f32.mxu0 %vm17790_vm1, %v17789_v0  ;;  %15840 = vmatprep.mubr.msk.f32.mxu1 %vm17790_vm1, %v17789_v0  ;;  %v1260_v57 = vld [vmem:[%s17910_s25 + $0xc2] sm:$0xff] }
 0x139   : > { %v15425_v16 = vpop.f32.mrf.mxu0  ;;  %v15556_v17 = vpop.f32.mrf.mxu1 }
 0x13b   : > { %v657_v18 = vpop.f32.mrf.mxu0  ;;  %v1072_v19 = vpop.f32.mrf.mxu1  ;;  %15716 = vmatmul.mubr.msk.f32.gmra.mxu0 %vm385_vm2, %v1255_v14  ;;  %15841 = vmatmul.mubr.msk.f32.gmra.mxu1 %vm385_vm2, %v1768_v15  ;;  %v1262_v14 = vld [vmem:[%s17910_s25 + $0xd2] sm:$0xff]  ;;  %v1775_v15 = vld [vmem:[%s17910_s25 + $0xc4] sm:$0xff] }
 0x13c   : > { %v18447_v21 = vadd.f32 %v1072_v19, %v647_v2  ;;  %15718 = vmatprep.mubr.msk.f32.mxu0 %vm17790_vm1, %v17789_v0  ;;  %15843 = vmatprep.mubr.msk.f32.mxu1 %vm17790_vm1, %v17789_v0 }
 0x13d   : > { %v15428_v24 = vpop.f32.mrf.mxu0  ;;  %v15559_v25 = vpop.f32.mrf.mxu1 }
 0x13e   : > { %v1776_v24 = vld [vmem:[%s17910_s25 + $0xcc] sm:$0xff] }
 0x13f   : > { %v662_v26 = vpop.f32.mrf.mxu0  ;;  %v1077_v28 = vpop.f32.mrf.mxu1  ;;  %15719 = vmatmul.mubr.msk.f32.gmra.mxu0 %vm385_vm2, %v1256_v22  ;;  %15844 = vmatmul.mubr.msk.f32.gmra.mxu1 %vm385_vm2, %v1769_v23  ;;  %v1263_v23 = vld [vmem:[%s17910_s25 + $0xda] sm:$0xff] }
 0x140   : > { %v18457_v29 = vadd.f32 %v1077_v28, %v652_v10  ;;  %15721 = vmatprep.mubr.msk.f32.mxu0 %vm17790_vm1, %v17789_v0  ;;  %15846 = vmatprep.mubr.msk.f32.mxu1 %vm17790_vm1, %v17789_v0 }
 0x141   : > { %v15431_v32 = vpop.f32.mrf.mxu0  ;;  %v15562_v33 = vpop.f32.mrf.mxu1 }
 0x142   : > { %v1264_v32 = vld [vmem:[%s17910_s25 + $0xe2] sm:$0xff]  ;;  %v1777_v33 = vld [vmem:[%s17910_s25 + $0xd4] sm:$0xff] }
 0x143   : > { %v667_v34 = vpop.f32.mrf.mxu0  ;;  %v1082_v36 = vpop.f32.mrf.mxu1  ;;  %15722 = vmatmul.mubr.msk.f32.gmra.mxu0 %vm385_vm2, %v1257_v30  ;;  %15847 = vmatmul.mubr.msk.f32.gmra.mxu1 %vm385_vm2, %v1770_v31 }
 0x144   : > { %v18467_v37 = vadd.f32 %v1082_v36, %v657_v18  ;;  %15724 = vmatprep.mubr.msk.f32.mxu0 %vm17790_vm1, %v17789_v0  ;;  %15849 = vmatprep.mubr.msk.f32.mxu1 %vm17790_vm1, %v17789_v0 }
 0x145   : > { %v15434_v40 = vpop.f32.mrf.mxu0  ;;  %v15565_v41 = vpop.f32.mrf.mxu1 }
 0x146   : > { %v1265_v41 = vld [vmem:[%s17910_s25 + $0xea] sm:$0xff] }
 0x147   : > { %v672_v44 = vpop.f32.mrf.mxu0  ;;  %v1087_v45 = vpop.f32.mrf.mxu1  ;;  %15725 = vmatmul.mubr.msk.f32.gmra.mxu0 %vm385_vm2, %v1258_v38  ;;  %15850 = vmatmul.mubr.msk.f32.gmra.mxu1 %vm385_vm2, %v1771_v39 }
 0x148   : > { %v18477_v46 = vadd.f32 %v1087_v45, %v662_v26  ;;  %15727 = vmatprep.mubr.msk.f32.mxu0 %vm17790_vm1, %v17789_v0  ;;  %15852 = vmatprep.mubr.msk.f32.mxu1 %vm17790_vm1, %v17789_v0 }
 0x149   : > { %v15437_v50 = vpop.f32.mrf.mxu0  ;;  %v15568_v52 = vpop.f32.mrf.mxu1 }
 0x14b   : > { %v677_v53 = vpop.f32.mrf.mxu0  ;;  %v1092_v54 = vpop.f32.mrf.mxu1  ;;  %15728 = vmatmul.mubr.msk.f32.gmra.mxu0 %vm385_vm2, %v1259_v47  ;;  %15853 = vmatmul.mubr.msk.f32.gmra.mxu1 %vm385_vm2, %v1772_v49 }
 0x14c   : > { %v18487_v56 = vadd.f32 %v1092_v54, %v667_v34  ;;  %15730 = vmatprep.mubr.msk.f32.mxu0 %vm17790_vm1, %v17789_v0  ;;  %15855 = vmatprep.mubr.msk.f32.mxu1 %vm17790_vm1, %v17789_v0  ;;  %v1779_v54 = vld [vmem:[%s17910_s25 + $0xe4] sm:$0xff] }
 0x14d   : > { %v15440_v60 = vpop.f32.mrf.mxu0  ;;  %v15571_v61 = vpop.f32.mrf.mxu1 }
 0x14f   : > { %v682_v63 = vpop.f32.mrf.mxu0  ;;  %v1097_v1 = vpop.f32.mrf.mxu1  ;;  %15731 = vmatmul.mubr.msk.f32.gmra.mxu0 %vm385_vm2, %v1260_v57  ;;  %15856 = vmatmul.mubr.msk.f32.gmra.mxu1 %vm385_vm2, %v1773_v58 }
 0x150   : > { %v18497_v2 = vadd.f32 %v1097_v1, %v672_v44  ;;  %15733 = vmatprep.mubr.msk.f32.mxu0 %vm17790_vm1, %v17789_v0  ;;  %15858 = vmatprep.mubr.msk.f32.mxu1 %vm17790_vm1, %v17789_v0  ;;  %v1778_v44 = vld [vmem:[%s17910_s25 + $0xdc] sm:$0xff] }
 0x151   : > { %v15443_v7 = vpop.f32.mrf.mxu0  ;;  %v15574_v8 = vpop.f32.mrf.mxu1  ;;  %v1267_v1 = vld [vmem:[%s17910_s25 + $0xfa] sm:$0xff] }
 0x153   : > { %v687_v9 = vpop.f32.mrf.mxu0  ;;  %v1102_v10 = vpop.f32.mrf.mxu1  ;;  %15734 = vmatmul.mubr.msk.f32.gmra.mxu0 %vm385_vm2, %v1261_v3  ;;  %15859 = vmatmul.mubr.msk.f32.gmra.mxu1 %vm385_vm2, %v1774_v5  ;;  %v1780_v3 = vld [vmem:[%s17910_s25 + $0xec] sm:$0xff] }
 0x154   : > { %v18507_v11 = vadd.f32 %v1102_v10, %v677_v53  ;;  %15736 = vmatprep.mubr.msk.f32.mxu0 %vm17790_vm1, %v17789_v0  ;;  %15861 = vmatprep.mubr.msk.f32.mxu1 %vm17790_vm1, %v17789_v0  ;;  %v1266_v53 = vld [vmem:[%s17910_s25 + $0xf2] sm:$0xff] }
 0x155   : > { %v15446_v16 = vpop.f32.mrf.mxu0  ;;  %v15577_v17 = vpop.f32.mrf.mxu1 }
 0x157   : > { %v692_v18 = vpop.f32.mrf.mxu0  ;;  %v1107_v19 = vpop.f32.mrf.mxu1  ;;  %15737 = vmatmul.mubr.msk.f32.gmra.mxu0 %vm385_vm2, %v1262_v14  ;;  %15862 = vmatmul.mubr.msk.f32.gmra.mxu1 %vm385_vm2, %v1775_v15  ;;  %v1268_v14 = vld [vmem:[%s17910_s25 + $0x102] sm:$0xff]  ;;  %v1781_v15 = vld [vmem:[%s17910_s25 + $0xf4] sm:$0xff] }
 0x158   : > { %v18517_v22 = vadd.f32 %v1107_v19, %v682_v63  ;;  %15739 = vmatprep.mubr.msk.f32.mxu0 %vm17790_vm1, %v17789_v0  ;;  %15864 = vmatprep.mubr.msk.f32.mxu1 %vm17790_vm1, %v17789_v0 }
 0x159   : > { %v15449_v25 = vpop.f32.mrf.mxu0  ;;  %v15580_v26 = vpop.f32.mrf.mxu1 }
 0x15a   : > { %v1782_v25 = vld [vmem:[%s17910_s25 + $0xfc] sm:$0xff] }
 0x15b   : > { %v697_v28 = vpop.f32.mrf.mxu0  ;;  %v1112_v30 = vpop.f32.mrf.mxu1  ;;  %15740 = vmatmul.mubr.msk.f32.gmra.mxu0 %vm385_vm2, %v1263_v23  ;;  %15865 = vmatmul.mubr.msk.f32.gmra.mxu1 %vm385_vm2, %v1776_v24  ;;  %v1269_v24 = vld [vmem:[%s17910_s25 + $0x10a] sm:$0xff] }
 0x15c   : > { %v18527_v31 = vadd.f32 %v1112_v30, %v687_v9  ;;  %15742 = vmatprep.mubr.msk.f32.mxu0 %vm17790_vm1, %v17789_v0  ;;  %15867 = vmatprep.mubr.msk.f32.mxu1 %vm17790_vm1, %v17789_v0 }
 0x15d   : > { %v15452_v34 = vpop.f32.mrf.mxu0  ;;  %v15583_v36 = vpop.f32.mrf.mxu1 }
 0x15e   : > { %v1270_v34 = vld [vmem:[%s17910_s25 + $0x112] sm:$0xff]  ;;  %v1783_v36 = vld [vmem:[%s17910_s25 + $0x104] sm:$0xff] }
 0x15f   : > { %v702_v38 = vpop.f32.mrf.mxu0  ;;  %v1117_v39 = vpop.f32.mrf.mxu1  ;;  %15743 = vmatmul.mubr.msk.f32.gmra.mxu0 %vm385_vm2, %v1264_v32  ;;  %15868 = vmatmul.mubr.msk.f32.gmra.mxu1 %vm385_vm2, %v1777_v33 }
 0x160   : > { %v18537_v40 = vadd.f32 %v1117_v39, %v692_v18  ;;  %15745 = vmatprep.mubr.msk.f32.mxu0 %vm17790_vm1, %v17789_v0  ;;  %15870 = vmatprep.mubr.msk.f32.mxu1 %vm17790_vm1, %v17789_v0 }
 0x161   : > { %v15455_v45 = vpop.f32.mrf.mxu0  ;;  %v15586_v47 = vpop.f32.mrf.mxu1 }
 0x162   : > { %v1271_v47 = vld [vmem:[%s17910_s25 + $0x11a] sm:$0xff] }
 0x163   : > { %v707_v49 = vpop.f32.mrf.mxu0  ;;  %v1122_v50 = vpop.f32.mrf.mxu1  ;;  %15746 = vmatmul.mubr.msk.f32.gmra.mxu0 %vm385_vm2, %v1265_v41  ;;  %15871 = vmatmul.mubr.msk.f32.gmra.mxu1 %vm385_vm2, %v1778_v44 }
 0x164   : > { %v18547_v52 = vadd.f32 %v1122_v50, %v697_v28  ;;  %15748 = vmatprep.mubr.msk.f32.mxu0 %vm17790_vm1, %v17789_v0  ;;  %15873 = vmatprep.mubr.msk.f32.mxu1 %vm17790_vm1, %v17789_v0 }
 0x165   : > { %v15458_v57 = vpop.f32.mrf.mxu0  ;;  %v15589_v58 = vpop.f32.mrf.mxu1 }
 0x167   : > { %v712_v60 = vpop.f32.mrf.mxu0  ;;  %v1127_v61 = vpop.f32.mrf.mxu1  ;;  %15749 = vmatmul.mubr.msk.f32.gmra.mxu0 %vm385_vm2, %v1266_v53  ;;  %15874 = vmatmul.mubr.msk.f32.gmra.mxu1 %vm385_vm2, %v1779_v54 }
 0x168   : > { %v18557_v63 = vadd.f32 %v1127_v61, %v702_v38  ;;  %15751 = vmatprep.mubr.msk.f32.mxu0 %vm17790_vm1, %v17789_v0  ;;  %15876 = vmatprep.mubr.msk.f32.mxu1 %vm17790_vm1, %v17789_v0  ;;  %v1785_v61 = vld [vmem:[%s17910_s25 + $0x114] sm:$0xff] }
 0x169   : > { %v15461_v5 = vpop.f32.mrf.mxu0  ;;  %v15592_v7 = vpop.f32.mrf.mxu1 }
 0x16b   : > { %v717_v8 = vpop.f32.mrf.mxu0  ;;  %v1132_v9 = vpop.f32.mrf.mxu1  ;;  %15752 = vmatmul.mubr.msk.f32.gmra.mxu0 %vm385_vm2, %v1267_v1  ;;  %15877 = vmatmul.mubr.msk.f32.gmra.mxu1 %vm385_vm2, %v1780_v3 }
 0x16c   : > { %v18567_v10 = vadd.f32 %v1132_v9, %v707_v49  ;;  %15754 = vmatprep.mubr.msk.f32.mxu0 %vm17790_vm1, %v17789_v0  ;;  %15879 = vmatprep.mubr.msk.f32.mxu1 %vm17790_vm1, %v17789_v0  ;;  %v1784_v49 = vld [vmem:[%s17910_s25 + $0x10c] sm:$0xff] }
 0x16d   : > { %v15464_v16 = vpop.f32.mrf.mxu0  ;;  %v15595_v17 = vpop.f32.mrf.mxu1  ;;  %v1273_v9 = vld [vmem:[%s17910_s25 + $0x12a] sm:$0xff] }
 0x16f   : > { %v722_v18 = vpop.f32.mrf.mxu0  ;;  %v1137_v19 = vpop.f32.mrf.mxu1  ;;  %15755 = vmatmul.mubr.msk.f32.gmra.mxu0 %vm385_vm2, %v1268_v14  ;;  %15880 = vmatmul.mubr.msk.f32.gmra.mxu1 %vm385_vm2, %v1781_v15  ;;  %v1786_v14 = vld [vmem:[%s17910_s25 + $0x11c] sm:$0xff] }
 0x170   : > { %v18577_v23 = vadd.f32 %v1137_v19, %v712_v60  ;;  %15757 = vmatprep.mubr.msk.f32.mxu0 %vm17790_vm1, %v17789_v0  ;;  %15882 = vmatprep.mubr.msk.f32.mxu1 %vm17790_vm1, %v17789_v0  ;;  %v1272_v60 = vld [vmem:[%s17910_s25 + $0x122] sm:$0xff] }
 0x171   : > { %v15467_v26 = vpop.f32.mrf.mxu0  ;;  %v15598_v28 = vpop.f32.mrf.mxu1 }
 0x173   : > { %v727_v30 = vpop.f32.mrf.mxu0  ;;  %v1142_v32 = vpop.f32.mrf.mxu1  ;;  %15758 = vmatmul.mubr.msk.f32.gmra.mxu0 %vm385_vm2, %v1269_v24  ;;  %15883 = vmatmul.mubr.msk.f32.gmra.mxu1 %vm385_vm2, %v1782_v25  ;;  %v1274_v24 = vld [vmem:[%s17910_s25 + $0x132] sm:$0xff]  ;;  %v1787_v25 = vld [vmem:[%s17910_s25 + $0x124] sm:$0xff] }
 0x174   : > { %v18587_v33 = vadd.f32 %v1142_v32, %v717_v8  ;;  %15760 = vmatprep.mubr.msk.f32.mxu0 %vm17790_vm1, %v17789_v0  ;;  %15885 = vmatprep.mubr.msk.f32.mxu1 %vm17790_vm1, %v17789_v0 }
 0x175   : > { %v15470_v38 = vpop.f32.mrf.mxu0  ;;  %v15601_v39 = vpop.f32.mrf.mxu1 }
 0x176   : > { %v1788_v38 = vld [vmem:[%s17910_s25 + $0x12c] sm:$0xff] }
 0x177   : > { %v732_v41 = vpop.f32.mrf.mxu0  ;;  %v1147_v44 = vpop.f32.mrf.mxu1  ;;  %15761 = vmatmul.mubr.msk.f32.gmra.mxu0 %vm385_vm2, %v1270_v34  ;;  %15886 = vmatmul.mubr.msk.f32.gmra.mxu1 %vm385_vm2, %v1783_v36  ;;  %v1275_v36 = vld [vmem:[%s17910_s25 + $0x13a] sm:$0xff] }
 0x178   : > { %v18597_v45 = vadd.f32 %v1147_v44, %v722_v18  ;;  %15763 = vmatprep.mubr.msk.f32.mxu0 %vm17790_vm1, %v17789_v0  ;;  %15888 = vmatprep.mubr.msk.f32.mxu1 %vm17790_vm1, %v17789_v0 }
 0x179   : > { %v15473_v50 = vpop.f32.mrf.mxu0  ;;  %v15604_v53 = vpop.f32.mrf.mxu1 }
 0x17a   : > { %v1276_v50 = vld [vmem:[%s17910_s25 + $0x142] sm:$0xff]  ;;  %v1789_v53 = vld [vmem:[%s17910_s25 + $0x134] sm:$0xff] }
 0x17b   : > { %v737_v54 = vpop.f32.mrf.mxu0  ;;  %v1152_v57 = vpop.f32.mrf.mxu1  ;;  %15764 = vmatmul.mubr.msk.f32.gmra.mxu0 %vm385_vm2, %v1271_v47  ;;  %15889 = vmatmul.mubr.msk.f32.gmra.mxu1 %vm385_vm2, %v1784_v49 }
 0x17c   : > { %v18607_v58 = vadd.f32 %v1152_v57, %v727_v30  ;;  %15766 = vmatprep.mubr.msk.f32.mxu0 %vm17790_vm1, %v17789_v0  ;;  %15891 = vmatprep.mubr.msk.f32.mxu1 %vm17790_vm1, %v17789_v0 }
 0x17d   : > { %v15476_v1 = vpop.f32.mrf.mxu0  ;;  %v15607_v3 = vpop.f32.mrf.mxu1 }
 0x17e   : > { %v1277_v3 = vld [vmem:[%s17910_s25 + $0x14a] sm:$0xff] }
 0x17f   : > { %v742_v5 = vpop.f32.mrf.mxu0  ;;  %v1157_v7 = vpop.f32.mrf.mxu1  ;;  %15767 = vmatmul.mubr.msk.f32.gmra.mxu0 %vm385_vm2, %v1272_v60  ;;  %15892 = vmatmul.mubr.msk.f32.gmra.mxu1 %vm385_vm2, %v1785_v61 }
 0x180   : > { %v18617_v8 = vadd.f32 %v1157_v7, %v732_v41  ;;  %15769 = vmatprep.mubr.msk.f32.mxu0 %vm17790_vm1, %v17789_v0  ;;  %15894 = vmatprep.mubr.msk.f32.mxu1 %vm17790_vm1, %v17789_v0 }
 0x181   : > { %v15479_v15 = vpop.f32.mrf.mxu0  ;;  %v15610_v16 = vpop.f32.mrf.mxu1 }
 0x183   : > { %v747_v17 = vpop.f32.mrf.mxu0  ;;  %v1162_v18 = vpop.f32.mrf.mxu1  ;;  %15770 = vmatmul.mubr.msk.f32.gmra.mxu0 %vm385_vm2, %v1273_v9  ;;  %15895 = vmatmul.mubr.msk.f32.gmra.mxu1 %vm385_vm2, %v1786_v14 }
 0x184   : > { %v18627_v19 = vadd.f32 %v1162_v18, %v737_v54  ;;  %15772 = vmatprep.mubr.msk.f32.mxu0 %vm17790_vm1, %v17789_v0  ;;  %15897 = vmatprep.mubr.msk.f32.mxu1 %vm17790_vm1, %v17789_v0  ;;  %v1791_v18 = vld [vmem:[%s17910_s25 + $0x144] sm:$0xff] }
 0x185   : > { %v15482_v26 = vpop.f32.mrf.mxu0  ;;  %v15613_v28 = vpop.f32.mrf.mxu1 }
 0x187   : > { %v752_v30 = vpop.f32.mrf.mxu0  ;;  %v1167_v32 = vpop.f32.mrf.mxu1  ;;  %15773 = vmatmul.mubr.msk.f32.gmra.mxu0 %vm385_vm2, %v1274_v24  ;;  %15898 = vmatmul.mubr.msk.f32.gmra.mxu1 %vm385_vm2, %v1787_v25 }
 0x188   : > { %v18637_v34 = vadd.f32 %v1167_v32, %v742_v5  ;;  %15775 = vmatprep.mubr.msk.f32.mxu0 %vm17790_vm1, %v17789_v0  ;;  %15900 = vmatprep.mubr.msk.f32.mxu1 %vm17790_vm1, %v17789_v0  ;;  %v1790_v5 = vld [vmem:[%s17910_s25 + $0x13c] sm:$0xff] }
 0x189   : > { %v15485_v39 = vpop.f32.mrf.mxu0  ;;  %v15616_v41 = vpop.f32.mrf.mxu1  ;;  %v1279_v32 = vld [vmem:[%s17910_s25 + $0x15a] sm:$0xff] }
 0x18b   : > { %v757_v44 = vpop.f32.mrf.mxu0  ;;  %v1172_v47 = vpop.f32.mrf.mxu1  ;;  %15776 = vmatmul.mubr.msk.f32.gmra.mxu0 %vm385_vm2, %v1275_v36  ;;  %15901 = vmatmul.mubr.msk.f32.gmra.mxu1 %vm385_vm2, %v1788_v38  ;;  %v1792_v36 = vld [vmem:[%s17910_s25 + $0x14c] sm:$0xff] }
 0x18c   : > { %v18647_v49 = vadd.f32 %v1172_v47, %v747_v17  ;;  %15778 = vmatprep.mubr.msk.f32.mxu0 %vm17790_vm1, %v17789_v0  ;;  %15903 = vmatprep.mubr.msk.f32.mxu1 %vm17790_vm1, %v17789_v0  ;;  %v1278_v17 = vld [vmem:[%s17910_s25 + $0x152] sm:$0xff] }
 0x18d   : > { %v15488_v54 = vpop.f32.mrf.mxu0  ;;  %v15619_v57 = vpop.f32.mrf.mxu1 }
 0x18f   : > { %v762_v60 = vpop.f32.mrf.mxu0  ;;  %v1177_v61 = vpop.f32.mrf.mxu1  ;;  %15779 = vmatmul.mubr.msk.f32.gmra.mxu0 %vm385_vm2, %v1276_v50  ;;  %15904 = vmatmul.mubr.msk.f32.gmra.mxu1 %vm385_vm2, %v1789_v53  ;;  %v1280_v50 = vld [vmem:[%s17910_s25 + $0x162] sm:$0xff]  ;;  %v1793_v53 = vld [vmem:[%s17910_s25 + $0x154] sm:$0xff] }
 0x190   : > { %v18657_v1 = vadd.f32 %v1177_v61, %v752_v30  ;;  %15781 = vmatprep.mubr.msk.f32.mxu0 %vm17790_vm1, %v17789_v0  ;;  %15906 = vmatprep.mubr.msk.f32.mxu1 %vm17790_vm1, %v17789_v0 }
 0x191   : > { %v15491_v7 = vpop.f32.mrf.mxu0  ;;  %v15622_v9 = vpop.f32.mrf.mxu1 }
 0x192   : > { %v2270_v7 = vld [vmem:[%s17910_s25 + $0x15] sm:$0xff] }
 0x193   : > { %v767_v14 = vpop.f32.mrf.mxu0  ;;  %v1182_v15 = vpop.f32.mrf.mxu1  ;;  %15782 = vmatmul.mubr.msk.f32.gmra.mxu0 %vm385_vm2, %v1277_v3  ;;  %15907 = vmatmul.mubr.msk.f32.gmra.mxu1 %vm385_vm2, %v1790_v5  ;;  %v1794_v5 = vld [vmem:[%s17910_s25 + $0x15c] sm:$0xff] }
 0x194   : > { %v18667_v16 = vadd.f32 %v1182_v15, %v757_v44  ;;  %15784 = vmatprep.mubr.msk.f32.mxu0 %vm17790_vm1, %v17789_v0  ;;  %15909 = vmatprep.mubr.msk.f32.mxu1 %vm17790_vm1, %v17789_v0  ;;  %v3350_v15 = vld [vmem:[#allocation3 + $0x30] sm:$0xff] }
 0x195   : > { %v15494_v24 = vpop.f32.mrf.mxu0  ;;  %v15625_v25 = vpop.f32.mrf.mxu1 }
 0x196   : > { %v1795_v25 = vld [vmem:[%s17910_s25 + $0x164] sm:$0xff] }
 0x197   : > { %v772_v26 = vpop.f32.mrf.mxu0  ;;  %v1187_v28 = vpop.f32.mrf.mxu1  ;;  %15785 = vmatmul.mubr.msk.f32.gmra.mxu0 %vm385_vm2, %v1278_v17  ;;  %15910 = vmatmul.mubr.msk.f32.gmra.mxu1 %vm385_vm2, %v1791_v18 }
 0x198   : > { %v18677_v30 = vadd.f32 %v1187_v28, %v762_v60  ;;  %15787 = vmatprep.mubr.msk.f32.mxu0 %vm17790_vm1, %v17789_v0  ;;  %15912 = vmatprep.mubr.msk.f32.mxu1 %vm17790_vm1, %v17789_v0 }
 0x199   : > { %v15497_v38 = vpop.f32.mrf.mxu0  ;;  %v15628_v39 = vpop.f32.mrf.mxu1 }
 0x19b   : > { %v777_v41 = vpop.f32.mrf.mxu0  ;;  %v1192_v44 = vpop.f32.mrf.mxu1  ;;  %15788 = vmatmul.mubr.msk.f32.gmra.mxu0 %vm385_vm2, %v1279_v32  ;;  %15913 = vmatmul.mubr.msk.f32.gmra.mxu1 %vm385_vm2, %v1792_v36 }
 0x19c   : > { %v18687_v47 = vadd.f32 %v1192_v44, %v767_v14  ;;  %15790 = vmatprep.mubr.msk.f32.mxu0 %vm17790_vm1, %v17789_v0  ;;  %15915 = vmatprep.mubr.msk.f32.mxu1 %vm17790_vm1, %v17789_v0  ;;  %v2272_v44 = vld [vmem:[%s17910_s25 + $0x25] sm:$0xff] }
 0x19d   : > { %v15500_v54 = vpop.f32.mrf.mxu0  ;;  %v15631_v57 = vpop.f32.mrf.mxu1 }
 0x19f   : > { %v782_v60 = vpop.f32.mrf.mxu0  ;;  %v1197_v61 = vpop.f32.mrf.mxu1  ;;  %15791 = vmatmul.mubr.msk.f32.gmra.mxu0 %vm385_vm2, %v1280_v50  ;;  %15916 = vmatmul.mubr.msk.f32.gmra.mxu1 %vm385_vm2, %v1793_v53 }
 0x1a0   : > { %v18697_v3 = vadd.f32 %v1197_v61, %v772_v26  ;;  %15918 = vmatprep.mubr.msk.f32.mxu1 %vm17790_vm1, %v17789_v0  ;;  %15932 = vmatprep.mubr.msk.f32.mxu0 %vm17790_vm1, %v17789_v0  ;;  %v2271_v26 = vld [vmem:[%s17910_s25 + $0x1d] sm:$0xff] }
 0x1a1   : > { %v15503_v9 = vpop.f32.mrf.mxu0  ;;  %v15634_v14 = vpop.f32.mrf.mxu1 }
 0x1a3   : > { %v787_v17 = vpop.f32.mrf.mxu0  ;;  %v1202_v18 = vpop.f32.mrf.mxu1  ;;  %15919 = vmatmul.mubr.msk.f32.gmra.mxu1 %vm385_vm2, %v1794_v5  ;;  %15933 = vmatmul.mubr.msk.f32.vlgmr.msra.gmra.mxu0 %vm385_vm2, %v2270_v7  ;;  %v2273_v5 = vld [vmem:[%s17910_s25 + $0x2d] sm:$0xff] }
 0x1a4   : > { %v18707_v24 = vadd.f32 %v1202_v18, %v777_v41  ;;  %16205 = vmatpush3.msra.mxu0 %v3350_v15  ;;  %15921 = vmatprep.mubr.msk.f32.mxu1 %vm17790_vm1, %v17789_v0  ;;  %v1796_v41 = vld [vmem:[%s17910_s25 + $0x16c] sm:$0xff] }
 0x1a5   : > { %v15506_v28 = vpop.f32.mrf.mxu0  ;;  %v15637_v32 = vpop.f32.mrf.mxu1  ;;  %15935 = vmatprep.mubr.msk.f32.mxu0 %vm17790_vm1, %v17789_v0  ;;  %16478 = vmatprep.subr.mxu0 %v17789_v0 }
 0x1a7   : > { %v792_v36 = vpop.f32.mrf.mxu0  ;;  %v1207_v38 = vpop.f32.mrf.mxu1  ;;  %15922 = vmatmul.mubr.msk.f32.gmra.mxu1 %vm385_vm2, %v1795_v25  ;;  %15936 = vmatmul.mubr.msk.f32.gmra.mxu0 %vm385_vm2, %v2271_v26  ;;  %v2274_v25 = vld [vmem:[%s17910_s25 + $0x35] sm:$0xff] }
 0x1a8   : > { %v18718_v39 = vadd.f32 %v1207_v38, %v782_v60  ;;  %15924 = vmatprep.mubr.msk.f32.mxu1 %vm17790_vm1, %v17789_v0  ;;  %15938 = vmatprep.mubr.msk.f32.mxu0 %vm17790_vm1, %v17789_v0  ;;  %v1797_v60 = vld [vmem:[%s17910_s25 + $0x174] sm:$0xff] }
 0x1a9   : > { %v15509_v50 = vpop.f32.mrf.mxu0  ;;  %v15640_v53 = vpop.f32.mrf.mxu1  ;;  %v2787_v26 = vld [vmem:[%s17910_s25 + $0x16] sm:$0xff] }
 0x1aa   : > { %v2788_v50 = vld [vmem:[%s17910_s25 + $0x1e] sm:$0xff] }
 0x1ab   : > { %v797_v54 = vpop.f32.mrf.mxu0  ;;  %v1212_v57 = vpop.f32.mrf.mxu1  ;;  %15925 = vmatmul.mubr.msk.f32.gmra.mxu1 %vm385_vm2, %v1796_v41  ;;  %15939 = vmatmul.mubr.msk.f32.gmra.mxu0 %vm385_vm2, %v2272_v44  ;;  %v2275_v44 = vld [vmem:[%s17910_s25 + $0x3d] sm:$0xff] }
 0x1ac   : > { %v18728_v61 = vadd.f32 %v1212_v57, %v787_v17  ;;  %15927 = vmatprep.mubr.msk.f32.mxu1 %vm17790_vm1, %v17789_v0  ;;  %15941 = vmatprep.mubr.msk.f32.mxu0 %vm17790_vm1, %v17789_v0 }
 0x1ad   : > { %v15512_v7 = vpop.f32.mrf.mxu0  ;;  %v15643_v9 = vpop.f32.mrf.mxu1 }
 0x1ae   : > { %v2789_v7 = vld [vmem:[%s17910_s25 + $0x26] sm:$0xff] }
 0x1af   : > { %v1217_v14 = vpop.f32.mrf.mxu1  ;;  %v1484_v15 = vpop.f32.mrf.mxu0  ;;  %15928 = vmatmul.mubr.msk.f32.gmra.mxu1 %vm385_vm2, %v1797_v60  ;;  %15942 = vmatmul.mubr.msk.f32.gmra.mxu0 %vm385_vm2, %v2273_v5 }
 0x1b0   : > { %v18738_v18 = vadd.f32 %v1217_v14, %v792_v36  ;;  %v1708_v17 = vadd.f32 %v1484_v15, %v18326_v55  ;;  %15944 = vmatprep.mubr.msk.f32.mxu0 %vm17790_vm1, %v17789_v0  ;;  %16069 = vmatprep.mubr.msk.f32.mxu1 %vm17790_vm1, %v17789_v0 }
 0x1b1   : > { %v15646_v28 = vpop.f32.mrf.mxu1  ;;  %v15660_v32 = vpop.f32.mrf.mxu0 }
 0x1b2   : > { %v2790_v28 = vld [vmem:[%s17910_s25 + $0x2e] sm:$0xff] }
 0x1b3   : > { %v1222_v38 = vpop.f32.mrf.mxu1  ;;  %v1489_v41 = vpop.f32.mrf.mxu0  ;;  %15945 = vmatmul.mubr.msk.f32.gmra.mxu0 %vm385_vm2, %v2274_v25  ;;  %16070 = vmatmul.mubr.msk.f32.vlgmr.msra.gmra.mxu1 %vm385_vm2, %v2787_v26  ;;  %v2277_v26 = vld [vmem:[%s17910_s25 + $0x4d] sm:$0xff] }
 0x1b4   : > { %v18749_v36 = vadd.f32 %v1222_v38, %v797_v54  ;;  %v1709_v55 = vadd.f32 %v1489_v41, %v18336_v62  ;;  %15947 = vmatprep.mubr.msk.f32.mxu0 %vm17790_vm1, %v17789_v0  ;;  %16072 = vmatprep.mubr.msk.f32.mxu1 %vm17790_vm1, %v17789_v0  ;;  %v2276_v54 = vld [vmem:[%s17910_s25 + $0x45] sm:$0xff] }
 0x1b5   : > { %v15649_v53 = vpop.f32.mrf.mxu1  ;;  %v15663_v57 = vpop.f32.mrf.mxu0 }
 0x1b6   : > { %v2278_v53 = vld [vmem:[%s17910_s25 + $0x55] sm:$0xff] }
 0x1b7   : > { %v18758_v60 = vpop.f32.mrf.mxu1  ;;  %v1494_v5 = vpop.f32.mrf.mxu0  ;;  %15948 = vmatmul.mubr.msk.f32.gmra.mxu0 %vm385_vm2, %v2275_v44  ;;  %16073 = vmatmul.mubr.msk.f32.gmra.mxu1 %vm385_vm2, %v2788_v50  ;;  %v2791_v57 = vld [vmem:[%s17910_s25 + $0x36] sm:$0xff] }
 0x1b8   : > { %v1710_v62 = vadd.f32 %v1494_v5, %v18346_v6  ;;  %15950 = vmatprep.mubr.msk.f32.mxu0 %vm17790_vm1, %v17789_v0  ;;  %16075 = vmatprep.mubr.msk.f32.mxu1 %vm17790_vm1, %v17789_v0 }
 0x1b9   : > { %v15652_v9 = vpop.f32.mrf.mxu1  ;;  %v15666_v14 = vpop.f32.mrf.mxu0 }
 0x1ba   : > { %v2279_v14 = vld [vmem:[%s17910_s25 + $0x5d] sm:$0xff] }
 0x1bb   : > { %v18769_v15 = vpop.f32.mrf.mxu1  ;;  %v1499_v25 = vpop.f32.mrf.mxu0  ;;  %15951 = vmatmul.mubr.msk.f32.gmra.mxu0 %vm385_vm2, %v2276_v54  ;;  %16076 = vmatmul.mubr.msk.f32.gmra.mxu1 %vm385_vm2, %v2789_v7 }
 0x1bc   : > { %v1711_v6 = vadd.f32 %v1499_v25, %v18356_v13  ;;  %15953 = vmatprep.mubr.msk.f32.mxu0 %vm17790_vm1, %v17789_v0  ;;  %16078 = vmatprep.mubr.msk.f32.mxu1 %vm17790_vm1, %v17789_v0  ;;  %v2792_v25 = vld [vmem:[%s17910_s25 + $0x3e] sm:$0xff] }
 0x1bd   : > { %v15655_v32 = vpop.f32.mrf.mxu1  ;;  %v15669_v38 = vpop.f32.mrf.mxu0 }
 0x1bf   : > { %v1504_v41 = vpop.f32.mrf.mxu0  ;;  %v2001_v44 = vpop.f32.mrf.mxu1  ;;  %15954 = vmatmul.mubr.msk.f32.gmra.mxu0 %vm385_vm2, %v2277_v26  ;;  %16079 = vmatmul.mubr.msk.f32.gmra.mxu1 %vm385_vm2, %v2790_v28 }
 0x1c0   : > { %v1712_v50 = vadd.f32 %v1504_v41, %v18366_v20  ;;  %v18783_v13 = vadd.f32 %v2001_v44, %v1708_v17  ;;  %15956 = vmatprep.mubr.msk.f32.mxu0 %vm17790_vm1, %v17789_v0  ;;  %16081 = vmatprep.mubr.msk.f32.mxu1 %vm17790_vm1, %v17789_v0  ;;  %v2280_v41 = vld [vmem:[%s17910_s25 + $0x65] sm:$0xff] }
 0x1c1   : > { %v15672_v5 = vpop.f32.mrf.mxu0  ;;  %v15797_v54 = vpop.f32.mrf.mxu1  ;;  %v2793_v44 = vld [vmem:[%s17910_s25 + $0x46] sm:$0xff] }
 0x1c3   : > { %v1509_v7 = vpop.f32.mrf.mxu0  ;;  %v2006_v9 = vpop.f32.mrf.mxu1  ;;  %15957 = vmatmul.mubr.msk.f32.gmra.mxu0 %vm385_vm2, %v2278_v53  ;;  %16082 = vmatmul.mubr.msk.f32.gmra.mxu1 %vm385_vm2, %v2791_v57 }
 0x1c4   : > { %v1713_v20 = vadd.f32 %v1509_v7, %v18376_v27  ;;  %v18794_v17 = vadd.f32 %v2006_v9, %v1709_v55  ;;  %15959 = vmatprep.mubr.msk.f32.mxu0 %vm17790_vm1, %v17789_v0  ;;  %16084 = vmatprep.mubr.msk.f32.mxu1 %vm17790_vm1, %v17789_v0  ;;  %v2281_v7 = vld [vmem:[%s17910_s25 + $0x6d] sm:$0xff] }
 0x1c5   : > { %v15675_v26 = vpop.f32.mrf.mxu0  ;;  %v15800_v28 = vpop.f32.mrf.mxu1  ;;  %v2794_v9 = vld [vmem:[%s17910_s25 + $0x4e] sm:$0xff] }
 0x1c7   : > { %v1514_v32 = vpop.f32.mrf.mxu0  ;;  %v2011_v38 = vpop.f32.mrf.mxu1  ;;  %15960 = vmatmul.mubr.msk.f32.gmra.mxu0 %vm385_vm2, %v2279_v14  ;;  %16085 = vmatmul.mubr.msk.f32.gmra.mxu1 %vm385_vm2, %v2792_v25 }
 0x1c8   : > { %v1714_v27 = vadd.f32 %v1514_v32, %v18386_v35  ;;  %v18805_v55 = vadd.f32 %v2011_v38, %v1710_v62  ;;  %15962 = vmatprep.mubr.msk.f32.mxu0 %vm17790_vm1, %v17789_v0  ;;  %16087 = vmatprep.mubr.msk.f32.mxu1 %vm17790_vm1, %v17789_v0  ;;  %v2282_v32 = vld [vmem:[%s17910_s25 + $0x75] sm:$0xff] }
 0x1c9   : > { %v15678_v53 = vpop.f32.mrf.mxu0  ;;  %v15803_v57 = vpop.f32.mrf.mxu1  ;;  %v2795_v38 = vld [vmem:[%s17910_s25 + $0x56] sm:$0xff] }
 0x1cb   : > { %v1519_v5 = vpop.f32.mrf.mxu0  ;;  %v2016_v54 = vpop.f32.mrf.mxu1  ;;  %15963 = vmatmul.mubr.msk.f32.gmra.mxu0 %vm385_vm2, %v2280_v41  ;;  %16088 = vmatmul.mubr.msk.f32.gmra.mxu1 %vm385_vm2, %v2793_v44 }
 0x1cc   : > { %v1715_v35 = vadd.f32 %v1519_v5, %v18397_v43  ;;  %v18816_v62 = vadd.f32 %v2016_v54, %v1711_v6  ;;  %15965 = vmatprep.mubr.msk.f32.mxu0 %vm17790_vm1, %v17789_v0  ;;  %16090 = vmatprep.mubr.msk.f32.mxu1 %vm17790_vm1, %v17789_v0  ;;  %v2283_v5 = vld [vmem:[%s17910_s25 + $0x7d] sm:$0xff] }
 0x1cd   : > { %v15681_v14 = vpop.f32.mrf.mxu0  ;;  %v15806_v25 = vpop.f32.mrf.mxu1  ;;  %v2796_v54 = vld [vmem:[%s17910_s25 + $0x5e] sm:$0xff] }
 0x1ce   : > { %v3867_v14 = vld [vmem:[#allocation3 + $0x38] sm:$0xff] }
 0x1cf   : > { %v1524_v26 = vpop.f32.mrf.mxu0  ;;  %v2021_v28 = vpop.f32.mrf.mxu1  ;;  %15966 = vmatmul.mubr.msk.f32.gmra.mxu0 %vm385_vm2, %v2281_v7  ;;  %16091 = vmatmul.mubr.msk.f32.gmra.mxu1 %vm385_vm2, %v2794_v9 }
 0x1d0   : > { %v1716_v43 = vadd.f32 %v1524_v26, %v18407_v51  ;;  %v18827_v6 = vadd.f32 %v2021_v28, %v1712_v50  ;;  %15968 = vmatprep.mubr.msk.f32.mxu0 %vm17790_vm1, %v17789_v0  ;;  %16093 = vmatprep.mubr.msk.f32.mxu1 %vm17790_vm1, %v17789_v0  ;;  %v2284_v28 = vld [vmem:[%s17910_s25 + $0x85] sm:$0xff] }
 0x1d1   : > { %v15684_v41 = vpop.f32.mrf.mxu0  ;;  %v15809_v44 = vpop.f32.mrf.mxu1  ;;  %16342 = vmatpush3.msra.mxu1 %v3867_v14 }
 0x1d3   : > { %v1529_v53 = vpop.f32.mrf.mxu0  ;;  %v2026_v57 = vpop.f32.mrf.mxu1  ;;  %15969 = vmatmul.mubr.msk.f32.gmra.mxu0 %vm385_vm2, %v2282_v32  ;;  %16094 = vmatmul.mubr.msk.f32.gmra.mxu1 %vm385_vm2, %v2795_v38  ;;  %v2797_v32 = vld [vmem:[%s17910_s25 + $0x66] sm:$0xff] }
 0x1d4   : > { %v1717_v51 = vadd.f32 %v1529_v53, %v18417_v59  ;;  %v18838_v50 = vadd.f32 %v2026_v57, %v1713_v20  ;;  %15971 = vmatprep.mubr.msk.f32.mxu0 %vm17790_vm1, %v17789_v0  ;;  %16096 = vmatprep.mubr.msk.f32.mxu1 %vm17790_vm1, %v17789_v0  ;;  %v2285_v57 = vld [vmem:[%s17910_s25 + $0x8d] sm:$0xff] }
 0x1d5   : > { %v15687_v7 = vpop.f32.mrf.mxu0  ;;  %v15812_v9 = vpop.f32.mrf.mxu1 }
 0x1d7   : > { %v1534_v25 = vpop.f32.mrf.mxu0  ;;  %v2031_v26 = vpop.f32.mrf.mxu1  ;;  %15972 = vmatmul.mubr.msk.f32.gmra.mxu0 %vm385_vm2, %v2283_v5  ;;  %16097 = vmatmul.mubr.msk.f32.gmra.mxu1 %vm385_vm2, %v2796_v54  ;;  %v2798_v5 = vld [vmem:[%s17910_s25 + $0x6e] sm:$0xff] }
 0x1d8   : > { %v1718_v59 = vadd.f32 %v1534_v25, %v18427_v4  ;;  %v18849_v20 = vadd.f32 %v2031_v26, %v1714_v27  ;;  %15974 = vmatprep.mubr.msk.f32.mxu0 %vm17790_vm1, %v17789_v0  ;;  %16099 = vmatprep.mubr.msk.f32.mxu1 %vm17790_vm1, %v17789_v0  ;;  %v2286_v25 = vld [vmem:[%s17910_s25 + $0x95] sm:$0xff] }
 0x1d9   : > { %v15690_v38 = vpop.f32.mrf.mxu0  ;;  %v15815_v41 = vpop.f32.mrf.mxu1  ;;  %v2799_v26 = vld [vmem:[%s17910_s25 + $0x76] sm:$0xff] }
 0x1db   : > { %v1539_v44 = vpop.f32.mrf.mxu0  ;;  %v2036_v53 = vpop.f32.mrf.mxu1  ;;  %15975 = vmatmul.mubr.msk.f32.gmra.mxu0 %vm385_vm2, %v2284_v28  ;;  %16100 = vmatmul.mubr.msk.f32.gmra.mxu1 %vm385_vm2, %v2797_v32 }
 0x1dc   : > { %v1719_v4 = vadd.f32 %v1539_v44, %v18437_v12  ;;  %v18860_v27 = vadd.f32 %v2036_v53, %v1715_v35  ;;  %15977 = vmatprep.mubr.msk.f32.mxu0 %vm17790_vm1, %v17789_v0  ;;  %16102 = vmatprep.mubr.msk.f32.mxu1 %vm17790_vm1, %v17789_v0  ;;  %v2287_v44 = vld [vmem:[%s17910_s25 + $0x9d] sm:$0xff] }
 0x1dd   : > { %v15693_v54 = vpop.f32.mrf.mxu0  ;;  %v15818_v7 = vpop.f32.mrf.mxu1  ;;  %v2800_v53 = vld [vmem:[%s17910_s25 + $0x7e] sm:$0xff] }
 0x1df   : > { %v1544_v9 = vpop.f32.mrf.mxu0  ;;  %v2041_v14 = vpop.f32.mrf.mxu1  ;;  %15978 = vmatmul.mubr.msk.f32.gmra.mxu0 %vm385_vm2, %v2285_v57  ;;  %16103 = vmatmul.mubr.msk.f32.gmra.mxu1 %vm385_vm2, %v2798_v5 }
 0x1e0   : > { %v1720_v12 = vadd.f32 %v1544_v9, %v18447_v21  ;;  %v18871_v35 = vadd.f32 %v2041_v14, %v1716_v43  ;;  %15980 = vmatprep.mubr.msk.f32.mxu0 %vm17790_vm1, %v17789_v0  ;;  %16105 = vmatprep.mubr.msk.f32.mxu1 %vm17790_vm1, %v17789_v0  ;;  %v2288_v9 = vld [vmem:[%s17910_s25 + $0xa5] sm:$0xff] }
 0x1e1   : > { %v15696_v28 = vpop.f32.mrf.mxu0  ;;  %v15821_v32 = vpop.f32.mrf.mxu1  ;;  %v2801_v14 = vld [vmem:[%s17910_s25 + $0x86] sm:$0xff] }
 0x1e3   : > { %v1549_v38 = vpop.f32.mrf.mxu0  ;;  %v2046_v41 = vpop.f32.mrf.mxu1  ;;  %15981 = vmatmul.mubr.msk.f32.gmra.mxu0 %vm385_vm2, %v2286_v25  ;;  %16106 = vmatmul.mubr.msk.f32.gmra.mxu1 %vm385_vm2, %v2799_v26 }
 0x1e4   : > { %v1721_v21 = vadd.f32 %v1549_v38, %v18457_v29  ;;  %v18882_v43 = vadd.f32 %v2046_v41, %v1717_v51  ;;  %15983 = vmatprep.mubr.msk.f32.mxu0 %vm17790_vm1, %v17789_v0  ;;  %16108 = vmatprep.mubr.msk.f32.mxu1 %vm17790_vm1, %v17789_v0  ;;  %v2289_v38 = vld [vmem:[%s17910_s25 + $0xad] sm:$0xff] }
 0x1e5   : > { %v15699_v57 = vpop.f32.mrf.mxu0  ;;  %v15824_v5 = vpop.f32.mrf.mxu1  ;;  %v2802_v41 = vld [vmem:[%s17910_s25 + $0x8e] sm:$0xff] }
 0x1e7   : > { %v1554_v54 = vpop.f32.mrf.mxu0  ;;  %v2051_v7 = vpop.f32.mrf.mxu1  ;;  %15984 = vmatmul.mubr.msk.f32.gmra.mxu0 %vm385_vm2, %v2287_v44  ;;  %16109 = vmatmul.mubr.msk.f32.gmra.mxu1 %vm385_vm2, %v2800_v53 }
 0x1e8   : > { %v1722_v29 = vadd.f32 %v1554_v54, %v18467_v37  ;;  %v18893_v51 = vadd.f32 %v2051_v7, %v1718_v59  ;;  %15986 = vmatprep.mubr.msk.f32.mxu0 %vm17790_vm1, %v17789_v0  ;;  %16111 = vmatprep.mubr.msk.f32.mxu1 %vm17790_vm1, %v17789_v0  ;;  %v2290_v54 = vld [vmem:[%s17910_s25 + $0xb5] sm:$0xff] }
 0x1e9   : > { %v15702_v25 = vpop.f32.mrf.mxu0  ;;  %v15827_v26 = vpop.f32.mrf.mxu1  ;;  %v2803_v7 = vld [vmem:[%s17910_s25 + $0x96] sm:$0xff] }
 0x1eb   : > { %v1559_v28 = vpop.f32.mrf.mxu0  ;;  %v2056_v32 = vpop.f32.mrf.mxu1  ;;  %15987 = vmatmul.mubr.msk.f32.gmra.mxu0 %vm385_vm2, %v2288_v9  ;;  %16112 = vmatmul.mubr.msk.f32.gmra.mxu1 %vm385_vm2, %v2801_v14 }
 0x1ec   : > { %v1723_v37 = vadd.f32 %v1559_v28, %v18477_v46  ;;  %v18904_v59 = vadd.f32 %v2056_v32, %v1719_v4  ;;  %15989 = vmatprep.mubr.msk.f32.mxu0 %vm17790_vm1, %v17789_v0  ;;  %16114 = vmatprep.mubr.msk.f32.mxu1 %vm17790_vm1, %v17789_v0  ;;  %v2291_v28 = vld [vmem:[%s17910_s25 + $0xbd] sm:$0xff] }
 0x1ed   : > { %v15705_v44 = vpop.f32.mrf.mxu0  ;;  %v15830_v53 = vpop.f32.mrf.mxu1  ;;  %v2804_v32 = vld [vmem:[%s17910_s25 + $0x9e] sm:$0xff] }
 0x1ef   : > { %v1564_v57 = vpop.f32.mrf.mxu0  ;;  %v2061_v5 = vpop.f32.mrf.mxu1  ;;  %15990 = vmatmul.mubr.msk.f32.gmra.mxu0 %vm385_vm2, %v2289_v38  ;;  %16115 = vmatmul.mubr.msk.f32.gmra.mxu1 %vm385_vm2, %v2802_v41 }
 0x1f0   : > { %v1724_v46 = vadd.f32 %v1564_v57, %v18487_v56  ;;  %v18915_v4 = vadd.f32 %v2061_v5, %v1720_v12  ;;  %15992 = vmatprep.mubr.msk.f32.mxu0 %vm17790_vm1, %v17789_v0  ;;  %16117 = vmatprep.mubr.msk.f32.mxu1 %vm17790_vm1, %v17789_v0  ;;  %v2292_v57 = vld [vmem:[%s17910_s25 + $0xc5] sm:$0xff] }
 0x1f1   : > { %v15708_v9 = vpop.f32.mrf.mxu0  ;;  %v15833_v14 = vpop.f32.mrf.mxu1  ;;  %v2805_v5 = vld [vmem:[%s17910_s25 + $0xa6] sm:$0xff] }
 0x1f3   : > { %v1569_v25 = vpop.f32.mrf.mxu0  ;;  %v2066_v26 = vpop.f32.mrf.mxu1  ;;  %15993 = vmatmul.mubr.msk.f32.gmra.mxu0 %vm385_vm2, %v2290_v54  ;;  %16118 = vmatmul.mubr.msk.f32.gmra.mxu1 %vm385_vm2, %v2803_v7 }
 0x1f4   : > { %v1725_v56 = vadd.f32 %v1569_v25, %v18497_v2  ;;  %v18926_v12 = vadd.f32 %v2066_v26, %v1721_v21  ;;  %15995 = vmatprep.mubr.msk.f32.mxu0 %vm17790_vm1, %v17789_v0  ;;  %16120 = vmatprep.mubr.msk.f32.mxu1 %vm17790_vm1, %v17789_v0  ;;  %v2293_v25 = vld [vmem:[%s17910_s25 + $0xcd] sm:$0xff] }
 0x1f5   : > { %v15711_v38 = vpop.f32.mrf.mxu0  ;;  %v15836_v41 = vpop.f32.mrf.mxu1  ;;  %v2806_v26 = vld [vmem:[%s17910_s25 + $0xae] sm:$0xff] }
 0x1f7   : > { %v1574_v44 = vpop.f32.mrf.mxu0  ;;  %v2071_v53 = vpop.f32.mrf.mxu1  ;;  %15996 = vmatmul.mubr.msk.f32.gmra.mxu0 %vm385_vm2, %v2291_v28  ;;  %16121 = vmatmul.mubr.msk.f32.gmra.mxu1 %vm385_vm2, %v2804_v32 }
 0x1f8   : > { %v1726_v2 = vadd.f32 %v1574_v44, %v18507_v11  ;;  %v18937_v21 = vadd.f32 %v2071_v53, %v1722_v29  ;;  %15998 = vmatprep.mubr.msk.f32.mxu0 %vm17790_vm1, %v17789_v0  ;;  %16123 = vmatprep.mubr.msk.f32.mxu1 %vm17790_vm1, %v17789_v0  ;;  %v2294_v44 = vld [vmem:[%s17910_s25 + $0xd5] sm:$0xff] }
 0x1f9   : > { %v15714_v54 = vpop.f32.mrf.mxu0  ;;  %v15839_v7 = vpop.f32.mrf.mxu1  ;;  %v2807_v53 = vld [vmem:[%s17910_s25 + $0xb6] sm:$0xff] }
 0x1fb   : > { %v1579_v9 = vpop.f32.mrf.mxu0  ;;  %v2076_v14 = vpop.f32.mrf.mxu1  ;;  %15999 = vmatmul.mubr.msk.f32.gmra.mxu0 %vm385_vm2, %v2292_v57  ;;  %16124 = vmatmul.mubr.msk.f32.gmra.mxu1 %vm385_vm2, %v2805_v5 }
 0x1fc   : > { %v1727_v11 = vadd.f32 %v1579_v9, %v18517_v22  ;;  %v18948_v29 = vadd.f32 %v2076_v14, %v1723_v37  ;;  %16001 = vmatprep.mubr.msk.f32.mxu0 %vm17790_vm1, %v17789_v0  ;;  %16126 = vmatprep.mubr.msk.f32.mxu1 %vm17790_vm1, %v17789_v0  ;;  %v2295_v9 = vld [vmem:[%s17910_s25 + $0xdd] sm:$0xff] }
 0x1fd   : > { %v15717_v28 = vpop.f32.mrf.mxu0  ;;  %v15842_v32 = vpop.f32.mrf.mxu1  ;;  %v2808_v14 = vld [vmem:[%s17910_s25 + $0xbe] sm:$0xff] }
 0x1ff   : > { %v1584_v38 = vpop.f32.mrf.mxu0  ;;  %v2081_v41 = vpop.f32.mrf.mxu1  ;;  %16002 = vmatmul.mubr.msk.f32.gmra.mxu0 %vm385_vm2, %v2293_v25  ;;  %16127 = vmatmul.mubr.msk.f32.gmra.mxu1 %vm385_vm2, %v2806_v26 }
 0x200   : > { %v1728_v22 = vadd.f32 %v1584_v38, %v18527_v31  ;;  %v18959_v37 = vadd.f32 %v2081_v41, %v1724_v46  ;;  %16004 = vmatprep.mubr.msk.f32.mxu0 %vm17790_vm1, %v17789_v0  ;;  %16129 = vmatprep.mubr.msk.f32.mxu1 %vm17790_vm1, %v17789_v0  ;;  %v2296_v38 = vld [vmem:[%s17910_s25 + $0xe5] sm:$0xff] }
 0x201   : > { %v15720_v57 = vpop.f32.mrf.mxu0  ;;  %v15845_v5 = vpop.f32.mrf.mxu1  ;;  %v2809_v41 = vld [vmem:[%s17910_s25 + $0xc6] sm:$0xff] }
 0x203   : > { %v1589_v54 = vpop.f32.mrf.mxu0  ;;  %v2086_v7 = vpop.f32.mrf.mxu1  ;;  %16005 = vmatmul.mubr.msk.f32.gmra.mxu0 %vm385_vm2, %v2294_v44  ;;  %16130 = vmatmul.mubr.msk.f32.gmra.mxu1 %vm385_vm2, %v2807_v53 }
 0x204   : > { %v1729_v31 = vadd.f32 %v1589_v54, %v18537_v40  ;;  %v18970_v46 = vadd.f32 %v2086_v7, %v1725_v56  ;;  %16007 = vmatprep.mubr.msk.f32.mxu0 %vm17790_vm1, %v17789_v0  ;;  %16132 = vmatprep.mubr.msk.f32.mxu1 %vm17790_vm1, %v17789_v0  ;;  %v2297_v54 = vld [vmem:[%s17910_s25 + $0xed] sm:$0xff] }
 0x205   : > { %v15723_v25 = vpop.f32.mrf.mxu0  ;;  %v15848_v26 = vpop.f32.mrf.mxu1  ;;  %v2810_v7 = vld [vmem:[%s17910_s25 + $0xce] sm:$0xff] }
 0x207   : > { %v1594_v28 = vpop.f32.mrf.mxu0  ;;  %v2091_v32 = vpop.f32.mrf.mxu1  ;;  %16008 = vmatmul.mubr.msk.f32.gmra.mxu0 %vm385_vm2, %v2295_v9  ;;  %16133 = vmatmul.mubr.msk.f32.gmra.mxu1 %vm385_vm2, %v2808_v14 }
 0x208   : > { %v1730_v40 = vadd.f32 %v1594_v28, %v18547_v52  ;;  %v18981_v56 = vadd.f32 %v2091_v32, %v1726_v2  ;;  %16010 = vmatprep.mubr.msk.f32.mxu0 %vm17790_vm1, %v17789_v0  ;;  %16135 = vmatprep.mubr.msk.f32.mxu1 %vm17790_vm1, %v17789_v0  ;;  %v2298_v28 = vld [vmem:[%s17910_s25 + $0xf5] sm:$0xff] }
 0x209   : > { %v15726_v44 = vpop.f32.mrf.mxu0  ;;  %v15851_v53 = vpop.f32.mrf.mxu1  ;;  %v2811_v32 = vld [vmem:[%s17910_s25 + $0xd6] sm:$0xff] }
 0x20b   : > { %v1599_v57 = vpop.f32.mrf.mxu0  ;;  %v2096_v5 = vpop.f32.mrf.mxu1  ;;  %16011 = vmatmul.mubr.msk.f32.gmra.mxu0 %vm385_vm2, %v2296_v38  ;;  %16136 = vmatmul.mubr.msk.f32.gmra.mxu1 %vm385_vm2, %v2809_v41 }
 0x20c   : > { %v1731_v52 = vadd.f32 %v1599_v57, %v18557_v63  ;;  %v18992_v2 = vadd.f32 %v2096_v5, %v1727_v11  ;;  %16013 = vmatprep.mubr.msk.f32.mxu0 %vm17790_vm1, %v17789_v0  ;;  %16138 = vmatprep.mubr.msk.f32.mxu1 %vm17790_vm1, %v17789_v0  ;;  %v2299_v57 = vld [vmem:[%s17910_s25 + $0xfd] sm:$0xff] }
 0x20d   : > { %v15729_v9 = vpop.f32.mrf.mxu0  ;;  %v15854_v14 = vpop.f32.mrf.mxu1  ;;  %v2812_v5 = vld [vmem:[%s17910_s25 + $0xde] sm:$0xff] }
 0x20f   : > { %v1604_v25 = vpop.f32.mrf.mxu0  ;;  %v2101_v26 = vpop.f32.mrf.mxu1  ;;  %16014 = vmatmul.mubr.msk.f32.gmra.mxu0 %vm385_vm2, %v2297_v54  ;;  %16139 = vmatmul.mubr.msk.f32.gmra.mxu1 %vm385_vm2, %v2810_v7 }
 0x210   : > { %v1732_v63 = vadd.f32 %v1604_v25, %v18567_v10  ;;  %v19003_v11 = vadd.f32 %v2101_v26, %v1728_v22  ;;  %16016 = vmatprep.mubr.msk.f32.mxu0 %vm17790_vm1, %v17789_v0  ;;  %16141 = vmatprep.mubr.msk.f32.mxu1 %vm17790_vm1, %v17789_v0  ;;  %v2300_v25 = vld [vmem:[%s17910_s25 + $0x105] sm:$0xff] }
 0x211   : > { %v15732_v38 = vpop.f32.mrf.mxu0  ;;  %v15857_v41 = vpop.f32.mrf.mxu1  ;;  %v2813_v26 = vld [vmem:[%s17910_s25 + $0xe6] sm:$0xff] }
 0x213   : > { %v1609_v44 = vpop.f32.mrf.mxu0  ;;  %v2106_v53 = vpop.f32.mrf.mxu1  ;;  %16017 = vmatmul.mubr.msk.f32.gmra.mxu0 %vm385_vm2, %v2298_v28  ;;  %16142 = vmatmul.mubr.msk.f32.gmra.mxu1 %vm385_vm2, %v2811_v32 }
 0x214   : > { %v1733_v10 = vadd.f32 %v1609_v44, %v18577_v23  ;;  %v19014_v22 = vadd.f32 %v2106_v53, %v1729_v31  ;;  %16019 = vmatprep.mubr.msk.f32.mxu0 %vm17790_vm1, %v17789_v0  ;;  %16144 = vmatprep.mubr.msk.f32.mxu1 %vm17790_vm1, %v17789_v0  ;;  %v2301_v44 = vld [vmem:[%s17910_s25 + $0x10d] sm:$0xff] }
 0x215   : > { %v15735_v54 = vpop.f32.mrf.mxu0  ;;  %v15860_v7 = vpop.f32.mrf.mxu1  ;;  %v2814_v53 = vld [vmem:[%s17910_s25 + $0xee] sm:$0xff] }
 0x217   : > { %v1614_v9 = vpop.f32.mrf.mxu0  ;;  %v2111_v14 = vpop.f32.mrf.mxu1  ;;  %16020 = vmatmul.mubr.msk.f32.gmra.mxu0 %vm385_vm2, %v2299_v57  ;;  %16145 = vmatmul.mubr.msk.f32.gmra.mxu1 %vm385_vm2, %v2812_v5 }
 0x218   : > { %v1734_v23 = vadd.f32 %v1614_v9, %v18587_v33  ;;  %v19025_v31 = vadd.f32 %v2111_v14, %v1730_v40  ;;  %16022 = vmatprep.mubr.msk.f32.mxu0 %vm17790_vm1, %v17789_v0  ;;  %16147 = vmatprep.mubr.msk.f32.mxu1 %vm17790_vm1, %v17789_v0  ;;  %v2302_v9 = vld [vmem:[%s17910_s25 + $0x115] sm:$0xff] }
 0x219   : > { %v15738_v28 = vpop.f32.mrf.mxu0  ;;  %v15863_v32 = vpop.f32.mrf.mxu1  ;;  %v2815_v14 = vld [vmem:[%s17910_s25 + $0xf6] sm:$0xff] }
 0x21b   : > { %v1619_v38 = vpop.f32.mrf.mxu0  ;;  %v2116_v41 = vpop.f32.mrf.mxu1  ;;  %16023 = vmatmul.mubr.msk.f32.gmra.mxu0 %vm385_vm2, %v2300_v25  ;;  %16148 = vmatmul.mubr.msk.f32.gmra.mxu1 %vm385_vm2, %v2813_v26 }
 0x21c   : > { %v1735_v33 = vadd.f32 %v1619_v38, %v18597_v45  ;;  %v19036_v40 = vadd.f32 %v2116_v41, %v1731_v52  ;;  %16025 = vmatprep.mubr.msk.f32.mxu0 %vm17790_vm1, %v17789_v0  ;;  %16150 = vmatprep.mubr.msk.f32.mxu1 %vm17790_vm1, %v17789_v0  ;;  %v2303_v38 = vld [vmem:[%s17910_s25 + $0x11d] sm:$0xff] }
 0x21d   : > { %v15741_v57 = vpop.f32.mrf.mxu0  ;;  %v15866_v5 = vpop.f32.mrf.mxu1  ;;  %v2816_v41 = vld [vmem:[%s17910_s25 + $0xfe] sm:$0xff] }
 0x21f   : > { %v1624_v54 = vpop.f32.mrf.mxu0  ;;  %v2121_v7 = vpop.f32.mrf.mxu1  ;;  %16026 = vmatmul.mubr.msk.f32.gmra.mxu0 %vm385_vm2, %v2301_v44  ;;  %16151 = vmatmul.mubr.msk.f32.gmra.mxu1 %vm385_vm2, %v2814_v53 }
 0x220   : > { %v1736_v45 = vadd.f32 %v1624_v54, %v18607_v58  ;;  %v19047_v52 = vadd.f32 %v2121_v7, %v1732_v63  ;;  %16028 = vmatprep.mubr.msk.f32.mxu0 %vm17790_vm1, %v17789_v0  ;;  %16153 = vmatprep.mubr.msk.f32.mxu1 %vm17790_vm1, %v17789_v0  ;;  %v2304_v54 = vld [vmem:[%s17910_s25 + $0x125] sm:$0xff] }
 0x221   : > { %v15744_v25 = vpop.f32.mrf.mxu0  ;;  %v15869_v26 = vpop.f32.mrf.mxu1  ;;  %v2817_v7 = vld [vmem:[%s17910_s25 + $0x106] sm:$0xff] }
 0x223   : > { %v1629_v28 = vpop.f32.mrf.mxu0  ;;  %v2126_v32 = vpop.f32.mrf.mxu1  ;;  %16029 = vmatmul.mubr.msk.f32.gmra.mxu0 %vm385_vm2, %v2302_v9  ;;  %16154 = vmatmul.mubr.msk.f32.gmra.mxu1 %vm385_vm2, %v2815_v14 }
 0x224   : > { %v1737_v58 = vadd.f32 %v1629_v28, %v18617_v8  ;;  %v19058_v63 = vadd.f32 %v2126_v32, %v1733_v10  ;;  %16031 = vmatprep.mubr.msk.f32.mxu0 %vm17790_vm1, %v17789_v0  ;;  %16156 = vmatprep.mubr.msk.f32.mxu1 %vm17790_vm1, %v17789_v0  ;;  %v2305_v28 = vld [vmem:[%s17910_s25 + $0x12d] sm:$0xff] }
 0x225   : > { %v15747_v44 = vpop.f32.mrf.mxu0  ;;  %v15872_v53 = vpop.f32.mrf.mxu1  ;;  %v2818_v32 = vld [vmem:[%s17910_s25 + $0x10e] sm:$0xff] }
 0x227   : > { %v1634_v57 = vpop.f32.mrf.mxu0  ;;  %v2131_v5 = vpop.f32.mrf.mxu1  ;;  %16032 = vmatmul.mubr.msk.f32.gmra.mxu0 %vm385_vm2, %v2303_v38  ;;  %16157 = vmatmul.mubr.msk.f32.gmra.mxu1 %vm385_vm2, %v2816_v41 }
 0x228   : > { %v1738_v8 = vadd.f32 %v1634_v57, %v18627_v19  ;;  %v19069_v10 = vadd.f32 %v2131_v5, %v1734_v23  ;;  %16034 = vmatprep.mubr.msk.f32.mxu0 %vm17790_vm1, %v17789_v0  ;;  %16159 = vmatprep.mubr.msk.f32.mxu1 %vm17790_vm1, %v17789_v0  ;;  %v2306_v57 = vld [vmem:[%s17910_s25 + $0x135] sm:$0xff] }
 0x229   : > { %v15750_v9 = vpop.f32.mrf.mxu0  ;;  %v15875_v14 = vpop.f32.mrf.mxu1  ;;  %v2819_v5 = vld [vmem:[%s17910_s25 + $0x116] sm:$0xff] }
 0x22b   : > { %v1639_v25 = vpop.f32.mrf.mxu0  ;;  %v2136_v26 = vpop.f32.mrf.mxu1  ;;  %16035 = vmatmul.mubr.msk.f32.gmra.mxu0 %vm385_vm2, %v2304_v54  ;;  %16160 = vmatmul.mubr.msk.f32.gmra.mxu1 %vm385_vm2, %v2817_v7 }
 0x22c   : > { %v1739_v19 = vadd.f32 %v1639_v25, %v18637_v34  ;;  %v19080_v23 = vadd.f32 %v2136_v26, %v1735_v33  ;;  %16037 = vmatprep.mubr.msk.f32.mxu0 %vm17790_vm1, %v17789_v0  ;;  %16162 = vmatprep.mubr.msk.f32.mxu1 %vm17790_vm1, %v17789_v0  ;;  %v2307_v25 = vld [vmem:[%s17910_s25 + $0x13d] sm:$0xff] }
 0x22d   : > { %v15753_v38 = vpop.f32.mrf.mxu0  ;;  %v15878_v41 = vpop.f32.mrf.mxu1  ;;  %v2820_v26 = vld [vmem:[%s17910_s25 + $0x11e] sm:$0xff] }
 0x22f   : > { %v1644_v44 = vpop.f32.mrf.mxu0  ;;  %v2141_v53 = vpop.f32.mrf.mxu1  ;;  %16038 = vmatmul.mubr.msk.f32.gmra.mxu0 %vm385_vm2, %v2305_v28  ;;  %16163 = vmatmul.mubr.msk.f32.gmra.mxu1 %vm385_vm2, %v2818_v32 }
 0x230   : > { %v1740_v34 = vadd.f32 %v1644_v44, %v18647_v49  ;;  %v19091_v33 = vadd.f32 %v2141_v53, %v1736_v45  ;;  %16040 = vmatprep.mubr.msk.f32.mxu0 %vm17790_vm1, %v17789_v0  ;;  %16165 = vmatprep.mubr.msk.f32.mxu1 %vm17790_vm1, %v17789_v0  ;;  %v2308_v44 = vld [vmem:[%s17910_s25 + $0x145] sm:$0xff] }
 0x231   : > { %v15756_v54 = vpop.f32.mrf.mxu0  ;;  %v15881_v7 = vpop.f32.mrf.mxu1  ;;  %v2821_v53 = vld [vmem:[%s17910_s25 + $0x126] sm:$0xff] }
 0x233   : > { %v1649_v9 = vpop.f32.mrf.mxu0  ;;  %v2146_v14 = vpop.f32.mrf.mxu1  ;;  %16041 = vmatmul.mubr.msk.f32.gmra.mxu0 %vm385_vm2, %v2306_v57  ;;  %16166 = vmatmul.mubr.msk.f32.gmra.mxu1 %vm385_vm2, %v2819_v5 }
 0x234   : > { %v1741_v49 = vadd.f32 %v1649_v9, %v18657_v1  ;;  %v19102_v45 = vadd.f32 %v2146_v14, %v1737_v58  ;;  %16043 = vmatprep.mubr.msk.f32.mxu0 %vm17790_vm1, %v17789_v0  ;;  %16168 = vmatprep.mubr.msk.f32.mxu1 %vm17790_vm1, %v17789_v0  ;;  %v2309_v9 = vld [vmem:[%s17910_s25 + $0x14d] sm:$0xff] }
 0x235   : > { %v15759_v28 = vpop.f32.mrf.mxu0  ;;  %v15884_v32 = vpop.f32.mrf.mxu1  ;;  %v2822_v14 = vld [vmem:[%s17910_s25 + $0x12e] sm:$0xff] }
 0x237   : > { %v1654_v38 = vpop.f32.mrf.mxu0  ;;  %v2151_v41 = vpop.f32.mrf.mxu1  ;;  %16044 = vmatmul.mubr.msk.f32.gmra.mxu0 %vm385_vm2, %v2307_v25  ;;  %16169 = vmatmul.mubr.msk.f32.gmra.mxu1 %vm385_vm2, %v2820_v26 }
 0x238   : > { %v1742_v1 = vadd.f32 %v1654_v38, %v18667_v16  ;;  %v19113_v58 = vadd.f32 %v2151_v41, %v1738_v8  ;;  %16046 = vmatprep.mubr.msk.f32.mxu0 %vm17790_vm1, %v17789_v0  ;;  %16171 = vmatprep.mubr.msk.f32.mxu1 %vm17790_vm1, %v17789_v0  ;;  %v2310_v38 = vld [vmem:[%s17910_s25 + $0x155] sm:$0xff] }
 0x239   : > { %v15762_v57 = vpop.f32.mrf.mxu0  ;;  %v15887_v5 = vpop.f32.mrf.mxu1  ;;  %v2823_v41 = vld [vmem:[%s17910_s25 + $0x136] sm:$0xff] }
 0x23b   : > { %v1659_v54 = vpop.f32.mrf.mxu0  ;;  %v2156_v7 = vpop.f32.mrf.mxu1  ;;  %16047 = vmatmul.mubr.msk.f32.gmra.mxu0 %vm385_vm2, %v2308_v44  ;;  %16172 = vmatmul.mubr.msk.f32.gmra.mxu1 %vm385_vm2, %v2821_v53 }
 0x23c   : > { %v1743_v16 = vadd.f32 %v1659_v54, %v18677_v30  ;;  %v19124_v8 = vadd.f32 %v2156_v7, %v1739_v19  ;;  %16049 = vmatprep.mubr.msk.f32.mxu0 %vm17790_vm1, %v17789_v0  ;;  %16174 = vmatprep.mubr.msk.f32.mxu1 %vm17790_vm1, %v17789_v0  ;;  %v2311_v54 = vld [vmem:[%s17910_s25 + $0x15d] sm:$0xff] }
 0x23d   : > { %v15765_v25 = vpop.f32.mrf.mxu0  ;;  %v15890_v26 = vpop.f32.mrf.mxu1  ;;  %v2824_v7 = vld [vmem:[%s17910_s25 + $0x13e] sm:$0xff] }
 0x23f   : > { %v1664_v28 = vpop.f32.mrf.mxu0  ;;  %v2161_v32 = vpop.f32.mrf.mxu1  ;;  %16050 = vmatmul.mubr.msk.f32.gmra.mxu0 %vm385_vm2, %v2309_v9  ;;  %16175 = vmatmul.mubr.msk.f32.gmra.mxu1 %vm385_vm2, %v2822_v14 }
 0x240   : > { %v1744_v30 = vadd.f32 %v1664_v28, %v18687_v47  ;;  %v19135_v19 = vadd.f32 %v2161_v32, %v1740_v34  ;;  %16052 = vmatprep.mubr.msk.f32.mxu0 %vm17790_vm1, %v17789_v0  ;;  %16177 = vmatprep.mubr.msk.f32.mxu1 %vm17790_vm1, %v17789_v0  ;;  %v2312_v28 = vld [vmem:[%s17910_s25 + $0x165] sm:$0xff] }
 0x241   : > { %v15768_v44 = vpop.f32.mrf.mxu0  ;;  %v15893_v53 = vpop.f32.mrf.mxu1  ;;  %v2825_v32 = vld [vmem:[%s17910_s25 + $0x146] sm:$0xff] }
 0x243   : > { %v1669_v57 = vpop.f32.mrf.mxu0  ;;  %v2166_v5 = vpop.f32.mrf.mxu1  ;;  %16053 = vmatmul.mubr.msk.f32.gmra.mxu0 %vm385_vm2, %v2310_v38  ;;  %16178 = vmatmul.mubr.msk.f32.gmra.mxu1 %vm385_vm2, %v2823_v41 }
 0x244   : > { %v1745_v47 = vadd.f32 %v1669_v57, %v18697_v3  ;;  %v19146_v34 = vadd.f32 %v2166_v5, %v1741_v49  ;;  %16055 = vmatprep.mubr.msk.f32.mxu0 %vm17790_vm1, %v17789_v0  ;;  %16180 = vmatprep.mubr.msk.f32.mxu1 %vm17790_vm1, %v17789_v0  ;;  %v2313_v57 = vld [vmem:[%s17910_s25 + $0x16d] sm:$0xff] }
 0x245   : > { %v15771_v9 = vpop.f32.mrf.mxu0  ;;  %v15896_v14 = vpop.f32.mrf.mxu1  ;;  %v2826_v5 = vld [vmem:[%s17910_s25 + $0x14e] sm:$0xff] }
 0x247   : > { %v1674_v25 = vpop.f32.mrf.mxu0  ;;  %v2171_v26 = vpop.f32.mrf.mxu1  ;;  %16056 = vmatmul.mubr.msk.f32.gmra.mxu0 %vm385_vm2, %v2311_v54  ;;  %16181 = vmatmul.mubr.msk.f32.gmra.mxu1 %vm385_vm2, %v2824_v7 }
 0x248   : > { %v1746_v3 = vadd.f32 %v1674_v25, %v18707_v24  ;;  %v19157_v49 = vadd.f32 %v2171_v26, %v1742_v1  ;;  %16058 = vmatprep.mubr.msk.f32.mxu0 %vm17790_vm1, %v17789_v0  ;;  %16183 = vmatprep.mubr.msk.f32.mxu1 %vm17790_vm1, %v17789_v0  ;;  %v2314_v25 = vld [vmem:[%s17910_s25 + $0x175] sm:$0xff] }
 0x249   : > { %v15774_v38 = vpop.f32.mrf.mxu0  ;;  %v15899_v41 = vpop.f32.mrf.mxu1  ;;  %v2827_v26 = vld [vmem:[%s17910_s25 + $0x156] sm:$0xff] }
 0x24b   : > { %v1679_v44 = vpop.f32.mrf.mxu0  ;;  %v2176_v53 = vpop.f32.mrf.mxu1  ;;  %16059 = vmatmul.mubr.msk.f32.gmra.mxu0 %vm385_vm2, %v2312_v28  ;;  %16184 = vmatmul.mubr.msk.f32.gmra.mxu1 %vm385_vm2, %v2825_v32 }
 0x24c   : > { %v1747_v24 = vadd.f32 %v1679_v44, %v18718_v39  ;;  %v19168_v1 = vadd.f32 %v2176_v53, %v1743_v16  ;;  %16061 = vmatprep.mubr.msk.f32.mxu0 %vm17790_vm1, %v17789_v0  ;;  %16186 = vmatprep.mubr.msk.f32.mxu1 %vm17790_vm1, %v17789_v0  ;;  %v2828_v44 = vld [vmem:[%s17910_s25 + $0x15e] sm:$0xff]  ;;  %v3304_v53 = vld [vmem:[%s17910_s25 + $0x28] sm:$0xff] }
 0x24d   : > { %v15777_v54 = vpop.f32.mrf.mxu0  ;;  %v15902_v7 = vpop.f32.mrf.mxu1 }
 0x24e   : > { %v4384_v54 = vld [vmem:[#allocation3 + $0x40] sm:$0xff] }
 0x24f   : > { %v1684_v9 = vpop.f32.mrf.mxu0  ;;  %v2181_v14 = vpop.f32.mrf.mxu1  ;;  %16062 = vmatmul.mubr.msk.f32.gmra.mxu0 %vm385_vm2, %v2313_v57  ;;  %16187 = vmatmul.mubr.msk.f32.gmra.mxu1 %vm385_vm2, %v2826_v5 }
 0x250   : > { %v1748_v39 = vadd.f32 %v1684_v9, %v18728_v61  ;;  %v19179_v16 = vadd.f32 %v2181_v14, %v1744_v30  ;;  %16064 = vmatprep.mubr.msk.f32.mxu0 %vm17790_vm1, %v17789_v0  ;;  %16189 = vmatprep.mubr.msk.f32.mxu1 %vm17790_vm1, %v17789_v0  ;;  %v2829_v14 = vld [vmem:[%s17910_s25 + $0x166] sm:$0xff] }
 0x251   : > { %v15780_v28 = vpop.f32.mrf.mxu0  ;;  %v15905_v32 = vpop.f32.mrf.mxu1 }
 0x252   : > { %v1228_v32 = vadd.f32 %v18758_v60, %v18304_v42 }
 0x253   : > { %v1689_v38 = vpop.f32.mrf.mxu0  ;;  %v2186_v41 = vpop.f32.mrf.mxu1  ;;  %16065 = vmatmul.mubr.msk.f32.gmra.mxu0 %vm385_vm2, %v2314_v25  ;;  %16190 = vmatmul.mubr.msk.f32.gmra.mxu1 %vm385_vm2, %v2827_v26  ;;  %v3305_v25 = vld [vmem:[%s17910_s25 + $0x30] sm:$0xff] }
 0x254   : > { %v1749_v61 = vadd.f32 %v1689_v38, %v18738_v18  ;;  %v19190_v30 = vadd.f32 %v2186_v41, %v1745_v47  ;;  %16192 = vmatprep.mubr.msk.f32.mxu1 %vm17790_vm1, %v17789_v0  ;;  %16206 = vmatprep.mubr.msk.f32.mxu0 %vm17790_vm1, %v17789_v0 }
 0x255   : > { %v15783_v57 = vpop.f32.mrf.mxu0  ;;  %v15908_v5 = vpop.f32.mrf.mxu1 }
 0x256   : > { %v1233_v57 = vadd.f32 %v18769_v15, %v18314_v48 }
 0x257   : > { %v1694_v7 = vpop.f32.mrf.mxu0  ;;  %v2191_v9 = vpop.f32.mrf.mxu1  ;;  %16193 = vmatmul.mubr.msk.f32.gmra.mxu1 %vm385_vm2, %v2828_v44  ;;  %16207 = vmatmul.mubr.msk.f32.vlgmr.msra.gmra.mxu0 %vm385_vm2, %v3304_v53  ;;  %v2830_v44 = vld [vmem:[%s17910_s25 + $0x16e] sm:$0xff]  ;;  %v3306_v53 = vld [vmem:[%s17910_s25 + $0x38] sm:$0xff] }
 0x258   : > { %v1750_v18 = vadd.f32 %v1694_v7, %v18749_v36  ;;  %v19201_v47 = vadd.f32 %v2191_v9, %v1746_v3  ;;  %16479 = vmatpush3.msra.mxu0 %v4384_v54  ;;  %16195 = vmatprep.mubr.msk.f32.mxu1 %vm17790_vm1, %v17789_v0  ;;  %v2831_v9 = vld [vmem:[%s17910_s25 + $0x176] sm:$0xff] }
 0x259   : > { %v15786_v26 = vpop.f32.mrf.mxu0  ;;  %v15911_v28 = vpop.f32.mrf.mxu1  ;;  %16209 = vmatprep.mubr.msk.f32.mxu0 %vm17790_vm1, %v17789_v0 }
 0x25b   : > { %v1699_v38 = vpop.f32.mrf.mxu0  ;;  %v2196_v36 = vpop.f32.mrf.mxu1  ;;  %16196 = vmatmul.mubr.msk.f32.gmra.mxu1 %vm385_vm2, %v2829_v14  ;;  %16210 = vmatmul.mubr.msk.f32.gmra.mxu0 %vm385_vm2, %v3305_v25  ;;  %v3307_v14 = vld [vmem:[%s17910_s25 + $0x40] sm:$0xff] }
 0x25c   : > { %v1751_v3 = vadd.f32 %v1699_v38, %v1228_v32  ;;  %v19213_v41 = vadd.f32 %v2196_v36, %v1747_v24  ;;  %16198 = vmatprep.mubr.msk.f32.mxu1 %vm17790_vm1, %v17789_v0  ;;  %16212 = vmatprep.mubr.msk.f32.mxu0 %vm17790_vm1, %v17789_v0  ;;  %v3308_v32 = vld [vmem:[%s17910_s25 + $0x48] sm:$0xff] }
 0x25d   : > { %v15789_v42 = vpop.f32.mrf.mxu0  ;;  %v15914_v60 = vpop.f32.mrf.mxu1  ;;  %v3821_v38 = vld [vmem:[%s17910_s25 + $0x29] sm:$0xff] }
 0x25e   : > { %v3309_v60 = vld [vmem:[%s17910_s25 + $0x50] sm:$0xff] }
 0x25f   : > { %v1704_v5 = vpop.f32.mrf.mxu0  ;;  %v2201_v54 = vpop.f32.mrf.mxu1  ;;  %16199 = vmatmul.mubr.msk.f32.gmra.mxu1 %vm385_vm2, %v2830_v44  ;;  %16213 = vmatmul.mubr.msk.f32.gmra.mxu0 %vm385_vm2, %v3306_v53 }
 0x260   : > { %v1752_v24 = vadd.f32 %v1704_v5, %v1233_v57  ;;  %v19225_v7 = vadd.f32 %v2201_v54, %v1748_v39  ;;  %16201 = vmatprep.mubr.msk.f32.mxu1 %vm17790_vm1, %v17789_v0  ;;  %16215 = vmatprep.mubr.msk.f32.mxu0 %vm17790_vm1, %v17789_v0  ;;  %v3822_v57 = vld [vmem:[%s17910_s25 + $0x31] sm:$0xff] }
 0x261   : > { %v15792_v48 = vpop.f32.mrf.mxu0  ;;  %v15917_v15 = vpop.f32.mrf.mxu1 }
 0x262   : > { %v3310_v48 = vld [vmem:[%s17910_s25 + $0x58] sm:$0xff] }
 0x263   : > { %v2206_v25 = vpop.f32.mrf.mxu1  ;;  %v2518_v26 = vpop.f32.mrf.mxu0  ;;  %16202 = vmatmul.mubr.msk.f32.gmra.mxu1 %vm385_vm2, %v2831_v9  ;;  %16216 = vmatmul.mubr.msk.f32.gmra.mxu0 %vm385_vm2, %v3307_v14  ;;  %v3823_v15 = vld [vmem:[%s17910_s25 + $0x39] sm:$0xff] }
 0x264   : > { %v19235_v28 = vadd.f32 %v2206_v25, %v1749_v61  ;;  %v2742_v39 = vadd.f32 %v2518_v26, %v18783_v13  ;;  %16218 = vmatprep.mubr.msk.f32.mxu0 %vm17790_vm1, %v17789_v0  ;;  %16343 = vmatprep.mubr.msk.f32.mxu1 %vm17790_vm1, %v17789_v0 }
 0x265   : > { %v15920_v36 = vpop.f32.mrf.mxu1  ;;  %v15934_v44 = vpop.f32.mrf.mxu0 }
 0x266   : > { %v3311_v36 = vld [vmem:[%s17910_s25 + $0x60] sm:$0xff] }
 0x267   : > { %v2211_v53 = vpop.f32.mrf.mxu1  ;;  %v2523_v42 = vpop.f32.mrf.mxu0  ;;  %16219 = vmatmul.mubr.msk.f32.gmra.mxu0 %vm385_vm2, %v3308_v32  ;;  %16344 = vmatmul.mubr.msk.f32.vlgmr.msra.gmra.mxu1 %vm385_vm2, %v3821_v38  ;;  %v3824_v44 = vld [vmem:[%s17910_s25 + $0x41] sm:$0xff] }
 0x268   : > { %v19246_v61 = vadd.f32 %v2211_v53, %v1750_v18  ;;  %v2743_v13 = vadd.f32 %v2523_v42, %v18794_v17  ;;  %16221 = vmatprep.mubr.msk.f32.mxu0 %vm17790_vm1, %v17789_v0  ;;  %16346 = vmatprep.mubr.msk.f32.mxu1 %vm17790_vm1, %v17789_v0 }
 0x269   : > { %v15923_v5 = vpop.f32.mrf.mxu1  ;;  %v15937_v54 = vpop.f32.mrf.mxu0 }
 0x26a   : > { %v3312_v5 = vld [vmem:[%s17910_s25 + $0x68] sm:$0xff] }
 0x26b   : > { %v2216_v9 = vpop.f32.mrf.mxu1  ;;  %v2528_v14 = vpop.f32.mrf.mxu0  ;;  %16222 = vmatmul.mubr.msk.f32.gmra.mxu0 %vm385_vm2, %v3309_v60  ;;  %16347 = vmatmul.mubr.msk.f32.gmra.mxu1 %vm385_vm2, %v3822_v57  ;;  %v3825_v54 = vld [vmem:[%s17910_s25 + $0x49] sm:$0xff] }
 0x26c   : > { %v19257_v18 = vadd.f32 %v2216_v9, %v1751_v3  ;;  %v2744_v17 = vadd.f32 %v2528_v14, %v18805_v55  ;;  %16224 = vmatprep.mubr.msk.f32.mxu0 %vm17790_vm1, %v17789_v0  ;;  %16349 = vmatprep.mubr.msk.f32.mxu1 %vm17790_vm1, %v17789_v0 }
 0x26d   : > { %v15926_v25 = vpop.f32.mrf.mxu1  ;;  %v15940_v26 = vpop.f32.mrf.mxu0 }
 0x26e   : > { %v3313_v25 = vld [vmem:[%s17910_s25 + $0x70] sm:$0xff] }
 0x26f   : > { %v2221_v32 = vpop.f32.mrf.mxu1  ;;  %v2533_v38 = vpop.f32.mrf.mxu0  ;;  %16225 = vmatmul.mubr.msk.f32.gmra.mxu0 %vm385_vm2, %v3310_v48  ;;  %16350 = vmatmul.mubr.msk.f32.gmra.mxu1 %vm385_vm2, %v3823_v15  ;;  %v3826_v26 = vld [vmem:[%s17910_s25 + $0x51] sm:$0xff] }
 0x270   : > { %v19268_v3 = vadd.f32 %v2221_v32, %v1752_v24  ;;  %v2745_v55 = vadd.f32 %v2533_v38, %v18816_v62  ;;  %16227 = vmatprep.mubr.msk.f32.mxu0 %vm17790_vm1, %v17789_v0  ;;  %16352 = vmatprep.mubr.msk.f32.mxu1 %vm17790_vm1, %v17789_v0 }
 0x271   : > { %v15929_v53 = vpop.f32.mrf.mxu1  ;;  %v15943_v42 = vpop.f32.mrf.mxu0 }
 0x272   : > { %v3314_v53 = vld [vmem:[%s17910_s25 + $0x78] sm:$0xff] }
 0x273   : > { %v2538_v60 = vpop.f32.mrf.mxu0  ;;  %v3035_v57 = vpop.f32.mrf.mxu1  ;;  %16228 = vmatmul.mubr.msk.f32.gmra.mxu0 %vm385_vm2, %v3311_v36  ;;  %16353 = vmatmul.mubr.msk.f32.gmra.mxu1 %vm385_vm2, %v3824_v44  ;;  %v3827_v42 = vld [vmem:[%s17910_s25 + $0x59] sm:$0xff] }
 0x274   : > { %v2746_v24 = vadd.f32 %v2538_v60, %v18827_v6  ;;  %v19280_v62 = vadd.f32 %v3035_v57, %v2742_v39  ;;  %16230 = vmatprep.mubr.msk.f32.mxu0 %vm17790_vm1, %v17789_v0  ;;  %16355 = vmatprep.mubr.msk.f32.mxu1 %vm17790_vm1, %v17789_v0 }
 0x275   : > { %v15946_v9 = vpop.f32.mrf.mxu0  ;;  %v16071_v14 = vpop.f32.mrf.mxu1 }
 0x276   : > { %v3315_v9 = vld [vmem:[%s17910_s25 + $0x80] sm:$0xff] }
 0x277   : > { %v2543_v48 = vpop.f32.mrf.mxu0  ;;  %v3040_v15 = vpop.f32.mrf.mxu1  ;;  %16231 = vmatmul.mubr.msk.f32.gmra.mxu0 %vm385_vm2, %v3312_v5  ;;  %16356 = vmatmul.mubr.msk.f32.gmra.mxu1 %vm385_vm2, %v3825_v54  ;;  %v3828_v14 = vld [vmem:[%s17910_s25 + $0x61] sm:$0xff] }
 0x278   : > { %v2747_v6 = vadd.f32 %v2543_v48, %v18838_v50  ;;  %v19291_v39 = vadd.f32 %v3040_v15, %v2743_v13  ;;  %16233 = vmatprep.mubr.msk.f32.mxu0 %vm17790_vm1, %v17789_v0  ;;  %16358 = vmatprep.mubr.msk.f32.mxu1 %vm17790_vm1, %v17789_v0 }
 0x279   : > { %v15949_v32 = vpop.f32.mrf.mxu0  ;;  %v16074_v38 = vpop.f32.mrf.mxu1 }
 0x27a   : > { %v3316_v32 = vld [vmem:[%s17910_s25 + $0x88] sm:$0xff] }
 0x27b   : > { %v2548_v36 = vpop.f32.mrf.mxu0  ;;  %v3045_v44 = vpop.f32.mrf.mxu1  ;;  %16234 = vmatmul.mubr.msk.f32.gmra.mxu0 %vm385_vm2, %v3313_v25  ;;  %16359 = vmatmul.mubr.msk.f32.gmra.mxu1 %vm385_vm2, %v3826_v26  ;;  %v3829_v38 = vld [vmem:[%s17910_s25 + $0x69] sm:$0xff] }
 0x27c   : > { %v2748_v50 = vadd.f32 %v2548_v36, %v18849_v20  ;;  %v19302_v13 = vadd.f32 %v3045_v44, %v2744_v17  ;;  %16236 = vmatprep.mubr.msk.f32.mxu0 %vm17790_vm1, %v17789_v0  ;;  %16361 = vmatprep.mubr.msk.f32.mxu1 %vm17790_vm1, %v17789_v0 }
 0x27d   : > { %v15952_v60 = vpop.f32.mrf.mxu0  ;;  %v16077_v57 = vpop.f32.mrf.mxu1 }
 0x27f   : > { %v2553_v5 = vpop.f32.mrf.mxu0  ;;  %v3050_v54 = vpop.f32.mrf.mxu1  ;;  %16237 = vmatmul.mubr.msk.f32.gmra.mxu0 %vm385_vm2, %v3314_v53  ;;  %16362 = vmatmul.mubr.msk.f32.gmra.mxu1 %vm385_vm2, %v3827_v42  ;;  %v17791_v53 = vmov 0  }
 0x280   : > { %v19313_v20 = vadd.f32 %v2553_v5, %v18860_v27  ;;  %v19315_v17 = vadd.f32 %v3050_v54, %v2745_v55  ;;  %16239 = vmatprep.mubr.msk.f32.mxu0 %vm17790_vm1, %v17789_v0  ;;  %16364 = vmatprep.mubr.msk.f32.mxu1 %vm17790_vm1, %v17789_v0  ;;  %v3317_v54 = vld [vmem:[%s17910_s25 + $0x90] sm:$0xff] }
 0x281   : > { %v15955_v48 = vpop.f32.mrf.mxu0  ;;  %v16080_v15 = vpop.f32.mrf.mxu1  ;;  %17688 = vset.pattern.permute.xlu1 %v17791_v53  ;;  %17687 = vset.pattern.permute.xlu0 %v17791_v53 }
 0x282   : > { %v4957_v15 = vld [vmem:[%s23466_s5 + $0x28] sm:$0xff] }
 0x283   : > { %v2558_v25 = vpop.f32.mrf.mxu0  ;;  %v3055_v26 = vpop.f32.mrf.mxu1  ;;  %16240 = vmatmul.mubr.msk.f32.gmra.mxu0 %vm385_vm2, %v3315_v9  ;;  %16365 = vmatmul.mubr.msk.f32.gmra.mxu1 %vm385_vm2, %v3828_v14  ;;  %v3830_v9 = vld [vmem:[%s17910_s25 + $0x71] sm:$0xff] }
 0x284   : > { %v19326_v27 = vadd.f32 %v2558_v25, %v18871_v35  ;;  %v19328_v55 = vadd.f32 %v3055_v26, %v2746_v24  ;;  %16242 = vmatprep.mubr.msk.f32.mxu0 %vm17790_vm1, %v17789_v0  ;;  %16367 = vmatprep.mubr.msk.f32.mxu1 %vm17790_vm1, %v17789_v0  ;;  %v4956_v35 = vld [vmem:[%s23466_s5 + $0x20] sm:$0xff]  ;;  %v4954_v24 = vld [vmem:[%s23466_s5 + $0x10] sm:$0xff] }
 0x285   : > { %v15958_v36 = vpop.f32.mrf.mxu0  ;;  %v16083_v44 = vpop.f32.mrf.mxu1  ;;  %5019 = vperm.xlu1 %17688, %v4956_v35   ;;  %5009 = vperm.xlu0 %17687, %v4954_v24   ;;  %v4959_v35 = vld [vmem:[%s23466_s5 + $0x38] sm:$0xff] }
 0x286   : > { %v3831_v36 = vld [vmem:[%s17910_s25 + $0x79] sm:$0xff] }
 0x287   : > { %v2563_v42 = vpop.f32.mrf.mxu0  ;;  %v3060_v60 = vpop.f32.mrf.mxu1  ;;  %16243 = vmatmul.mubr.msk.f32.gmra.mxu0 %vm385_vm2, %v3316_v32  ;;  %16368 = vmatmul.mubr.msk.f32.gmra.mxu1 %vm385_vm2, %v3829_v38  ;;  %v3318_v38 = vld [vmem:[%s17910_s25 + $0x98] sm:$0xff] }
 0x288   : > { %v19345_v57 = vadd.f32 %v2563_v42, %v18882_v43  ;;  %v19347_v5 = vadd.f32 %v3060_v60, %v2747_v6  ;;  %16245 = vmatprep.mubr.msk.f32.mxu0 %vm17790_vm1, %v17789_v0  ;;  %16370 = vmatprep.mubr.msk.f32.mxu1 %vm17790_vm1, %v17789_v0  ;;  %v4955_v43 = vld [vmem:[%s23466_s5 + $0x18] sm:$0xff] }
 0x289   : > { %v15961_v14 = vpop.f32.mrf.mxu0  ;;  %v16086_v48 = vpop.f32.mrf.mxu1  ;;  %5024 = vperm.xlu1 %17688, %v4957_v15   ;;  %5014 = vperm.xlu0 %17687, %v4955_v43  }
 0x28b   : > { %v2568_v6 = vpop.f32.mrf.mxu0  ;;  %v3065_v25 = vpop.f32.mrf.mxu1  ;;  %16246 = vmatmul.mubr.msk.f32.gmra.mxu0 %vm385_vm2, %v3317_v54  ;;  %16371 = vmatmul.mubr.msk.f32.gmra.mxu1 %vm385_vm2, %v3830_v9  ;;  %v3319_v54 = vld [vmem:[%s17910_s25 + $0xa0] sm:$0xff] }
 0x28c   : > { %v19364_v26 = vadd.f32 %v2568_v6, %v18893_v51  ;;  %v19366_v32 = vadd.f32 %v3065_v25, %v2748_v50  ;;  %16248 = vmatprep.mubr.msk.f32.mxu0 %vm17790_vm1, %v17789_v0  ;;  %16373 = vmatprep.mubr.msk.f32.mxu1 %vm17790_vm1, %v17789_v0  ;;  %v4958_v51 = vld [vmem:[%s23466_s5 + $0x30] sm:$0xff]  ;;  %v3832_v9 = vld [vmem:[%s17910_s25 + $0x81] sm:$0xff] }
 0x28d   : > { %v15964_v44 = vpop.f32.mrf.mxu0  ;;  %v16089_v53 = vpop.f32.mrf.mxu1  ;;  %5034 = vperm.xlu1 %17688, %v4959_v35   ;;  %5029 = vperm.xlu0 %17687, %v4958_v51  }
 0x28f   : > { %v2573_v50 = vpop.f32.mrf.mxu0  ;;  %v3070_v24 = vpop.f32.mrf.mxu1  ;;  %16249 = vmatmul.mubr.msk.f32.gmra.mxu0 %vm385_vm2, %v3318_v38  ;;  %16374 = vmatmul.mubr.msk.f32.gmra.mxu1 %vm385_vm2, %v3831_v36  ;;  %v3320_v38 = vld [vmem:[%s17910_s25 + $0xa8] sm:$0xff] }
 0x290   : > { %v19383_v42 = vadd.f32 %v2573_v50, %v18904_v59  ;;  %v19386_v60 = vadd.f32 %v3070_v24, %v19313_v20  ;;  %16251 = vmatprep.mubr.msk.f32.mxu0 %vm17790_vm1, %v17789_v0  ;;  %16376 = vmatprep.mubr.msk.f32.mxu1 %vm17790_vm1, %v17789_v0  ;;  %v4961_v59 = vld [vmem:[%s23466_s5 + $0x48] sm:$0xff]  ;;  %v4960_v20 = vld [vmem:[%s23466_s5 + $0x40] sm:$0xff] }
 0x291   : > { %v15967_v14 = vpop.f32.mrf.mxu0  ;;  %v16092_v48 = vpop.f32.mrf.mxu1  ;;  %5044 = vperm.xlu1 %17688, %v4961_v59   ;;  %5039 = vperm.xlu0 %17687, %v4960_v20   ;;  %v3833_v36 = vld [vmem:[%s17910_s25 + $0x89] sm:$0xff] }
 0x293   : > { %v2578_v15 = vpop.f32.mrf.mxu0  ;;  %v3075_v43 = vpop.f32.mrf.mxu1  ;;  %16252 = vmatmul.mubr.msk.f32.gmra.mxu0 %vm385_vm2, %v3319_v54  ;;  %16377 = vmatmul.mubr.msk.f32.gmra.mxu1 %vm385_vm2, %v3832_v9  ;;  %v3321_v54 = vld [vmem:[%s17910_s25 + $0xb0] sm:$0xff] }
 0x294   : > { %v19403_v6 = vadd.f32 %v2578_v15, %v18915_v4  ;;  %v19406_v25 = vadd.f32 %v3075_v43, %v19326_v27  ;;  %16254 = vmatprep.mubr.msk.f32.mxu0 %vm17790_vm1, %v17789_v0  ;;  %16379 = vmatprep.mubr.msk.f32.mxu1 %vm17790_vm1, %v17789_v0  ;;  %v4963_v4 = vld [vmem:[%s23466_s5 + $0x58] sm:$0xff]  ;;  %v4962_v27 = vld [vmem:[%s23466_s5 + $0x50] sm:$0xff] }
 0x295   : > { %v15970_v44 = vpop.f32.mrf.mxu0  ;;  %v16095_v53 = vpop.f32.mrf.mxu1  ;;  %5054 = vperm.xlu1 %17688, %v4963_v4   ;;  %5049 = vperm.xlu0 %17687, %v4962_v27   ;;  %v3834_v9 = vld [vmem:[%s17910_s25 + $0x91] sm:$0xff] }
 0x297   : > { %v2583_v35 = vpop.f32.mrf.mxu0  ;;  %v3080_v51 = vpop.f32.mrf.mxu1  ;;  %16255 = vmatmul.mubr.msk.f32.gmra.mxu0 %vm385_vm2, %v3320_v38  ;;  %16380 = vmatmul.mubr.msk.f32.gmra.mxu1 %vm385_vm2, %v3833_v36  ;;  %v3322_v38 = vld [vmem:[%s17910_s25 + $0xb8] sm:$0xff] }
 0x298   : > { %v19423_v50 = vadd.f32 %v2583_v35, %v18926_v12  ;;  %v19426_v24 = vadd.f32 %v3080_v51, %v19345_v57  ;;  %16257 = vmatprep.mubr.msk.f32.mxu0 %vm17790_vm1, %v17789_v0  ;;  %16382 = vmatprep.mubr.msk.f32.mxu1 %vm17790_vm1, %v17789_v0  ;;  %v4965_v12 = vld [vmem:[%s23466_s5 + $0x68] sm:$0xff]  ;;  %v4964_v57 = vld [vmem:[%s23466_s5 + $0x60] sm:$0xff] }
 0x299   : > { %v15973_v14 = vpop.f32.mrf.mxu0  ;;  %v16098_v48 = vpop.f32.mrf.mxu1  ;;  %5064 = vperm.xlu1 %17688, %v4965_v12   ;;  %5059 = vperm.xlu0 %17687, %v4964_v57   ;;  %v3835_v36 = vld [vmem:[%s17910_s25 + $0x99] sm:$0xff] }
 0x29b   : > { %v2588_v59 = vpop.f32.mrf.mxu0  ;;  %v3085_v20 = vpop.f32.mrf.mxu1  ;;  %16258 = vmatmul.mubr.msk.f32.gmra.mxu0 %vm385_vm2, %v3321_v54  ;;  %16383 = vmatmul.mubr.msk.f32.gmra.mxu1 %vm385_vm2, %v3834_v9  ;;  %v3323_v54 = vld [vmem:[%s17910_s25 + $0xc0] sm:$0xff] }
 0x29c   : > { %v19443_v15 = vadd.f32 %v2588_v59, %v18937_v21  ;;  %v19446_v43 = vadd.f32 %v3085_v20, %v19364_v26  ;;  %16260 = vmatprep.mubr.msk.f32.mxu0 %vm17790_vm1, %v17789_v0  ;;  %16385 = vmatprep.mubr.msk.f32.mxu1 %vm17790_vm1, %v17789_v0  ;;  %v4967_v21 = vld [vmem:[%s23466_s5 + $0x78] sm:$0xff]  ;;  %v4966_v26 = vld [vmem:[%s23466_s5 + $0x70] sm:$0xff]  ;;  %v3836_v9 = vld [vmem:[%s17910_s25 + $0xa1] sm:$0xff] }
 0x29d   : > { %v15976_v44 = vpop.f32.mrf.mxu0  ;;  %v16101_v53 = vpop.f32.mrf.mxu1  ;;  %5074 = vperm.xlu1 %17688, %v4967_v21   ;;  %5069 = vperm.xlu0 %17687, %v4966_v26  }
 0x29f   : > { %v2593_v4 = vpop.f32.mrf.mxu0  ;;  %v3090_v27 = vpop.f32.mrf.mxu1  ;;  %16261 = vmatmul.mubr.msk.f32.gmra.mxu0 %vm385_vm2, %v3322_v38  ;;  %16386 = vmatmul.mubr.msk.f32.gmra.mxu1 %vm385_vm2, %v3835_v36  ;;  %v3324_v38 = vld [vmem:[%s17910_s25 + $0xc8] sm:$0xff] }
 0x2a0   : > { %v19463_v35 = vadd.f32 %v2593_v4, %v18948_v29  ;;  %v19466_v51 = vadd.f32 %v3090_v27, %v19383_v42  ;;  %16263 = vmatprep.mubr.msk.f32.mxu0 %vm17790_vm1, %v17789_v0  ;;  %16388 = vmatprep.mubr.msk.f32.mxu1 %vm17790_vm1, %v17789_v0  ;;  %v4969_v29 = vld [vmem:[%s23466_s5 + $0x88] sm:$0xff]  ;;  %v4968_v42 = vld [vmem:[%s23466_s5 + $0x80] sm:$0xff] }
 0x2a1   : > { %v15979_v14 = vpop.f32.mrf.mxu0  ;;  %v16104_v48 = vpop.f32.mrf.mxu1  ;;  %5084 = vperm.xlu1 %17688, %v4969_v29   ;;  %5079 = vperm.xlu0 %17687, %v4968_v42   ;;  %v3837_v36 = vld [vmem:[%s17910_s25 + $0xa9] sm:$0xff] }
 0x2a3   : > { %v2598_v12 = vpop.f32.mrf.mxu0  ;;  %v3095_v57 = vpop.f32.mrf.mxu1  ;;  %16264 = vmatmul.mubr.msk.f32.gmra.mxu0 %vm385_vm2, %v3323_v54  ;;  %16389 = vmatmul.mubr.msk.f32.gmra.mxu1 %vm385_vm2, %v3836_v9  ;;  %v3325_v54 = vld [vmem:[%s17910_s25 + $0xd0] sm:$0xff] }
 0x2a4   : > { %v19483_v59 = vadd.f32 %v2598_v12, %v18959_v37  ;;  %v19486_v20 = vadd.f32 %v3095_v57, %v19403_v6  ;;  %16266 = vmatprep.mubr.msk.f32.mxu0 %vm17790_vm1, %v17789_v0  ;;  %16391 = vmatprep.mubr.msk.f32.mxu1 %vm17790_vm1, %v17789_v0  ;;  %v4971_v37 = vld [vmem:[%s23466_s5 + $0x98] sm:$0xff]  ;;  %v4970_v6 = vld [vmem:[%s23466_s5 + $0x90] sm:$0xff] }
 0x2a5   : > { %v15982_v44 = vpop.f32.mrf.mxu0  ;;  %v16107_v53 = vpop.f32.mrf.mxu1  ;;  %5094 = vperm.xlu1 %17688, %v4971_v37   ;;  %5089 = vperm.xlu0 %17687, %v4970_v6   ;;  %v3838_v9 = vld [vmem:[%s17910_s25 + $0xb1] sm:$0xff] }
 0x2a7   : > { %v2603_v21 = vpop.f32.mrf.mxu0  ;;  %v3100_v26 = vpop.f32.mrf.mxu1  ;;  %16267 = vmatmul.mubr.msk.f32.gmra.mxu0 %vm385_vm2, %v3324_v38  ;;  %16392 = vmatmul.mubr.msk.f32.gmra.mxu1 %vm385_vm2, %v3837_v36  ;;  %v3326_v38 = vld [vmem:[%s17910_s25 + $0xd8] sm:$0xff] }
 0x2a8   : > { %v19503_v4 = vadd.f32 %v2603_v21, %v18970_v46  ;;  %v19506_v27 = vadd.f32 %v3100_v26, %v19423_v50  ;;  %16269 = vmatprep.mubr.msk.f32.mxu0 %vm17790_vm1, %v17789_v0  ;;  %16394 = vmatprep.mubr.msk.f32.mxu1 %vm17790_vm1, %v17789_v0  ;;  %v4973_v46 = vld [vmem:[%s23466_s5 + $0xa8] sm:$0xff]  ;;  %v4972_v50 = vld [vmem:[%s23466_s5 + $0xa0] sm:$0xff] }
 0x2a9   : > { %v15985_v14 = vpop.f32.mrf.mxu0  ;;  %v16110_v48 = vpop.f32.mrf.mxu1  ;;  %5104 = vperm.xlu1 %17688, %v4973_v46   ;;  %5099 = vperm.xlu0 %17687, %v4972_v50   ;;  %v3839_v36 = vld [vmem:[%s17910_s25 + $0xb9] sm:$0xff] }
 0x2ab   : > { %v2608_v29 = vpop.f32.mrf.mxu0  ;;  %v3105_v42 = vpop.f32.mrf.mxu1  ;;  %16270 = vmatmul.mubr.msk.f32.gmra.mxu0 %vm385_vm2, %v3325_v54  ;;  %16395 = vmatmul.mubr.msk.f32.gmra.mxu1 %vm385_vm2, %v3838_v9  ;;  %v3327_v54 = vld [vmem:[%s17910_s25 + $0xe0] sm:$0xff] }
 0x2ac   : > { %v19523_v12 = vadd.f32 %v2608_v29, %v18981_v56  ;;  %v19526_v57 = vadd.f32 %v3105_v42, %v19443_v15  ;;  %16272 = vmatprep.mubr.msk.f32.mxu0 %vm17790_vm1, %v17789_v0  ;;  %16397 = vmatprep.mubr.msk.f32.mxu1 %vm17790_vm1, %v17789_v0  ;;  %v4975_v56 = vld [vmem:[%s23466_s5 + $0xb8] sm:$0xff]  ;;  %v4974_v15 = vld [vmem:[%s23466_s5 + $0xb0] sm:$0xff]  ;;  %v3840_v9 = vld [vmem:[%s17910_s25 + $0xc1] sm:$0xff] }
 0x2ad   : > { %v15988_v44 = vpop.f32.mrf.mxu0  ;;  %v16113_v53 = vpop.f32.mrf.mxu1  ;;  %5114 = vperm.xlu1 %17688, %v4975_v56   ;;  %5109 = vperm.xlu0 %17687, %v4974_v15  }
 0x2af   : > { %v2613_v37 = vpop.f32.mrf.mxu0  ;;  %v3110_v6 = vpop.f32.mrf.mxu1  ;;  %16273 = vmatmul.mubr.msk.f32.gmra.mxu0 %vm385_vm2, %v3326_v38  ;;  %16398 = vmatmul.mubr.msk.f32.gmra.mxu1 %vm385_vm2, %v3839_v36  ;;  %v3328_v38 = vld [vmem:[%s17910_s25 + $0xe8] sm:$0xff] }
 0x2b0   : > { %v19543_v21 = vadd.f32 %v2613_v37, %v18992_v2  ;;  %v19546_v26 = vadd.f32 %v3110_v6, %v19463_v35  ;;  %16275 = vmatprep.mubr.msk.f32.mxu0 %vm17790_vm1, %v17789_v0  ;;  %16400 = vmatprep.mubr.msk.f32.mxu1 %vm17790_vm1, %v17789_v0  ;;  %v4977_v2 = vld [vmem:[%s23466_s5 + $0xc8] sm:$0xff]  ;;  %v4976_v35 = vld [vmem:[%s23466_s5 + $0xc0] sm:$0xff] }
 0x2b1   : > { %v15991_v14 = vpop.f32.mrf.mxu0  ;;  %v16116_v48 = vpop.f32.mrf.mxu1  ;;  %5124 = vperm.xlu1 %17688, %v4977_v2   ;;  %5119 = vperm.xlu0 %17687, %v4976_v35   ;;  %v3841_v36 = vld [vmem:[%s17910_s25 + $0xc9] sm:$0xff] }
 0x2b3   : > { %v2618_v46 = vpop.f32.mrf.mxu0  ;;  %v3115_v50 = vpop.f32.mrf.mxu1  ;;  %16276 = vmatmul.mubr.msk.f32.gmra.mxu0 %vm385_vm2, %v3327_v54  ;;  %16401 = vmatmul.mubr.msk.f32.gmra.mxu1 %vm385_vm2, %v3840_v9  ;;  %v3329_v54 = vld [vmem:[%s17910_s25 + $0xf0] sm:$0xff] }
 0x2b4   : > { %v19563_v29 = vadd.f32 %v2618_v46, %v19003_v11  ;;  %v19566_v42 = vadd.f32 %v3115_v50, %v19483_v59  ;;  %16278 = vmatprep.mubr.msk.f32.mxu0 %vm17790_vm1, %v17789_v0  ;;  %16403 = vmatprep.mubr.msk.f32.mxu1 %vm17790_vm1, %v17789_v0  ;;  %v4979_v11 = vld [vmem:[%s23466_s5 + $0xd8] sm:$0xff]  ;;  %v4978_v59 = vld [vmem:[%s23466_s5 + $0xd0] sm:$0xff] }
 0x2b5   : > { %v15994_v44 = vpop.f32.mrf.mxu0  ;;  %v16119_v53 = vpop.f32.mrf.mxu1  ;;  %5134 = vperm.xlu1 %17688, %v4979_v11   ;;  %5129 = vperm.xlu0 %17687, %v4978_v59   ;;  %v3842_v9 = vld [vmem:[%s17910_s25 + $0xd1] sm:$0xff] }
 0x2b7   : > { %v2623_v56 = vpop.f32.mrf.mxu0  ;;  %v3120_v15 = vpop.f32.mrf.mxu1  ;;  %16279 = vmatmul.mubr.msk.f32.gmra.mxu0 %vm385_vm2, %v3328_v38  ;;  %16404 = vmatmul.mubr.msk.f32.gmra.mxu1 %vm385_vm2, %v3841_v36  ;;  %v3330_v38 = vld [vmem:[%s17910_s25 + $0xf8] sm:$0xff] }
 0x2b8   : > { %v19583_v37 = vadd.f32 %v2623_v56, %v19014_v22  ;;  %v19586_v6 = vadd.f32 %v3120_v15, %v19503_v4  ;;  %16281 = vmatprep.mubr.msk.f32.mxu0 %vm17790_vm1, %v17789_v0  ;;  %16406 = vmatprep.mubr.msk.f32.mxu1 %vm17790_vm1, %v17789_v0  ;;  %v4981_v22 = vld [vmem:[%s23466_s5 + $0xe8] sm:$0xff]  ;;  %v4980_v4 = vld [vmem:[%s23466_s5 + $0xe0] sm:$0xff] }
 0x2b9   : > { %v15997_v14 = vpop.f32.mrf.mxu0  ;;  %v16122_v48 = vpop.f32.mrf.mxu1  ;;  %5144 = vperm.xlu1 %17688, %v4981_v22   ;;  %5139 = vperm.xlu0 %17687, %v4980_v4   ;;  %v3843_v36 = vld [vmem:[%s17910_s25 + $0xd9] sm:$0xff] }
 0x2bb   : > { %v2628_v2 = vpop.f32.mrf.mxu0  ;;  %v3125_v35 = vpop.f32.mrf.mxu1  ;;  %16282 = vmatmul.mubr.msk.f32.gmra.mxu0 %vm385_vm2, %v3329_v54  ;;  %16407 = vmatmul.mubr.msk.f32.gmra.mxu1 %vm385_vm2, %v3842_v9  ;;  %v3331_v54 = vld [vmem:[%s17910_s25 + $0x100] sm:$0xff] }
 0x2bc   : > { %v19603_v46 = vadd.f32 %v2628_v2, %v19025_v31  ;;  %v19606_v50 = vadd.f32 %v3125_v35, %v19523_v12  ;;  %16284 = vmatprep.mubr.msk.f32.mxu0 %vm17790_vm1, %v17789_v0  ;;  %16409 = vmatprep.mubr.msk.f32.mxu1 %vm17790_vm1, %v17789_v0  ;;  %v4983_v31 = vld [vmem:[%s23466_s5 + $0xf8] sm:$0xff]  ;;  %v4982_v12 = vld [vmem:[%s23466_s5 + $0xf0] sm:$0xff]  ;;  %v3844_v9 = vld [vmem:[%s17910_s25 + $0xe1] sm:$0xff] }
 0x2bd   : > { %v16000_v44 = vpop.f32.mrf.mxu0  ;;  %v16125_v53 = vpop.f32.mrf.mxu1  ;;  %5154 = vperm.xlu1 %17688, %v4983_v31   ;;  %5149 = vperm.xlu0 %17687, %v4982_v12  }
 0x2bf   : > { %v2633_v11 = vpop.f32.mrf.mxu0  ;;  %v3130_v59 = vpop.f32.mrf.mxu1  ;;  %16285 = vmatmul.mubr.msk.f32.gmra.mxu0 %vm385_vm2, %v3330_v38  ;;  %16410 = vmatmul.mubr.msk.f32.gmra.mxu1 %vm385_vm2, %v3843_v36  ;;  %v3332_v38 = vld [vmem:[%s17910_s25 + $0x108] sm:$0xff] }
 0x2c0   : > { %v19623_v56 = vadd.f32 %v2633_v11, %v19036_v40  ;;  %v19626_v15 = vadd.f32 %v3130_v59, %v19543_v21  ;;  %16287 = vmatprep.mubr.msk.f32.mxu0 %vm17790_vm1, %v17789_v0  ;;  %16412 = vmatprep.mubr.msk.f32.mxu1 %vm17790_vm1, %v17789_v0  ;;  %v4985_v40 = vld [vmem:[%s23466_s5 + $0x108] sm:$0xff]  ;;  %v4984_v21 = vld [vmem:[%s23466_s5 + $0x100] sm:$0xff] }
 0x2c1   : > { %v16003_v14 = vpop.f32.mrf.mxu0  ;;  %v16128_v48 = vpop.f32.mrf.mxu1  ;;  %5164 = vperm.xlu1 %17688, %v4985_v40   ;;  %5159 = vperm.xlu0 %17687, %v4984_v21   ;;  %v3845_v36 = vld [vmem:[%s17910_s25 + $0xe9] sm:$0xff] }
 0x2c3   : > { %v2638_v22 = vpop.f32.mrf.mxu0  ;;  %v3135_v4 = vpop.f32.mrf.mxu1  ;;  %16288 = vmatmul.mubr.msk.f32.gmra.mxu0 %vm385_vm2, %v3331_v54  ;;  %16413 = vmatmul.mubr.msk.f32.gmra.mxu1 %vm385_vm2, %v3844_v9  ;;  %v3333_v54 = vld [vmem:[%s17910_s25 + $0x110] sm:$0xff] }
 0x2c4   : > { %v19643_v2 = vadd.f32 %v2638_v22, %v19047_v52  ;;  %v19646_v35 = vadd.f32 %v3135_v4, %v19563_v29  ;;  %16290 = vmatprep.mubr.msk.f32.mxu0 %vm17790_vm1, %v17789_v0  ;;  %16415 = vmatprep.mubr.msk.f32.mxu1 %vm17790_vm1, %v17789_v0  ;;  %v4987_v52 = vld [vmem:[%s23466_s5 + $0x118] sm:$0xff]  ;;  %v4986_v29 = vld [vmem:[%s23466_s5 + $0x110] sm:$0xff] }
 0x2c5   : > { %v16006_v44 = vpop.f32.mrf.mxu0  ;;  %v16131_v53 = vpop.f32.mrf.mxu1  ;;  %5174 = vperm.xlu1 %17688, %v4987_v52   ;;  %5169 = vperm.xlu0 %17687, %v4986_v29   ;;  %v3846_v9 = vld [vmem:[%s17910_s25 + $0xf1] sm:$0xff] }
 0x2c7   : > { %v2643_v31 = vpop.f32.mrf.mxu0  ;;  %v3140_v12 = vpop.f32.mrf.mxu1  ;;  %16291 = vmatmul.mubr.msk.f32.gmra.mxu0 %vm385_vm2, %v3332_v38  ;;  %16416 = vmatmul.mubr.msk.f32.gmra.mxu1 %vm385_vm2, %v3845_v36  ;;  %v3334_v38 = vld [vmem:[%s17910_s25 + $0x118] sm:$0xff] }
 0x2c8   : > { %v19663_v11 = vadd.f32 %v2643_v31, %v19058_v63  ;;  %v19666_v59 = vadd.f32 %v3140_v12, %v19583_v37  ;;  %16293 = vmatprep.mubr.msk.f32.mxu0 %vm17790_vm1, %v17789_v0  ;;  %16418 = vmatprep.mubr.msk.f32.mxu1 %vm17790_vm1, %v17789_v0  ;;  %v4989_v63 = vld [vmem:[%s23466_s5 + $0x128] sm:$0xff]  ;;  %v4988_v37 = vld [vmem:[%s23466_s5 + $0x120] sm:$0xff] }
 0x2c9   : > { %v16009_v14 = vpop.f32.mrf.mxu0  ;;  %v16134_v48 = vpop.f32.mrf.mxu1  ;;  %5184 = vperm.xlu1 %17688, %v4989_v63   ;;  %5179 = vperm.xlu0 %17687, %v4988_v37   ;;  %v3847_v36 = vld [vmem:[%s17910_s25 + $0xf9] sm:$0xff]  ;;  %v4993_v63 = vld [vmem:[%s23466_s5 + $0x148] sm:$0xff] }
 0x2cb   : > { %v2648_v40 = vpop.f32.mrf.mxu0  ;;  %v3145_v21 = vpop.f32.mrf.mxu1  ;;  %16294 = vmatmul.mubr.msk.f32.gmra.mxu0 %vm385_vm2, %v3333_v54  ;;  %16419 = vmatmul.mubr.msk.f32.gmra.mxu1 %vm385_vm2, %v3846_v9  ;;  %v3335_v54 = vld [vmem:[%s17910_s25 + $0x120] sm:$0xff] }
 0x2cc   : > { %v19683_v22 = vadd.f32 %v2648_v40, %v19069_v10  ;;  %v19686_v4 = vadd.f32 %v3145_v21, %v19603_v46  ;;  %16296 = vmatprep.mubr.msk.f32.mxu0 %vm17790_vm1, %v17789_v0  ;;  %16421 = vmatprep.mubr.msk.f32.mxu1 %vm17790_vm1, %v17789_v0  ;;  %v4991_v10 = vld [vmem:[%s23466_s5 + $0x138] sm:$0xff]  ;;  %v4990_v46 = vld [vmem:[%s23466_s5 + $0x130] sm:$0xff]  ;;  %v3848_v9 = vld [vmem:[%s17910_s25 + $0x101] sm:$0xff] }
 0x2cd   : > { %v16012_v44 = vpop.f32.mrf.mxu0  ;;  %v16137_v53 = vpop.f32.mrf.mxu1  ;;  %5194 = vperm.xlu1 %17688, %v4991_v10   ;;  %5189 = vperm.xlu0 %17687, %v4990_v46   ;;  %v4994_v10 = vld [vmem:[%s23466_s5 + $0x150] sm:$0xff] }
 0x2cf   : > { %v2653_v52 = vpop.f32.mrf.mxu0  ;;  %v3150_v29 = vpop.f32.mrf.mxu1  ;;  %16297 = vmatmul.mubr.msk.f32.gmra.mxu0 %vm385_vm2, %v3334_v38  ;;  %16422 = vmatmul.mubr.msk.f32.gmra.mxu1 %vm385_vm2, %v3847_v36  ;;  %v3336_v38 = vld [vmem:[%s17910_s25 + $0x128] sm:$0xff] }
 0x2d0   : > { %v2769_v31 = vadd.f32 %v2653_v52, %v19080_v23  ;;  %v19704_v12 = vadd.f32 %v3150_v29, %v19623_v56  ;;  %16299 = vmatprep.mubr.msk.f32.mxu0 %vm17790_vm1, %v17789_v0  ;;  %16424 = vmatprep.mubr.msk.f32.mxu1 %vm17790_vm1, %v17789_v0  ;;  %v4992_v23 = vld [vmem:[%s23466_s5 + $0x140] sm:$0xff]  ;;  %v3849_v36 = vld [vmem:[%s17910_s25 + $0x109] sm:$0xff] }
 0x2d1   : > { %v16015_v14 = vpop.f32.mrf.mxu0  ;;  %v16140_v48 = vpop.f32.mrf.mxu1  ;;  %5204 = vperm.xlu1 %17688, %v4993_v63   ;;  %5199 = vperm.xlu0 %17687, %v4992_v23   ;;  %v4953_v63 = vld [vmem:[%s23466_s5 + $0x8] sm:$0xff] }
 0x2d3   : > { %v2658_v56 = vpop.f32.mrf.mxu0  ;;  %v3155_v37 = vpop.f32.mrf.mxu1  ;;  %16300 = vmatmul.mubr.msk.f32.gmra.mxu0 %vm385_vm2, %v3335_v54  ;;  %16425 = vmatmul.mubr.msk.f32.gmra.mxu1 %vm385_vm2, %v3848_v9  ;;  %v3337_v54 = vld [vmem:[%s17910_s25 + $0x130] sm:$0xff] }
 0x2d4   : > { %v2770_v40 = vadd.f32 %v2658_v56, %v19091_v33  ;;  %v19722_v21 = vadd.f32 %v3155_v37, %v19643_v2  ;;  %16302 = vmatprep.mubr.msk.f32.mxu0 %vm17790_vm1, %v17789_v0  ;;  %16427 = vmatprep.mubr.msk.f32.mxu1 %vm17790_vm1, %v17789_v0  ;;  %v4952_v33 = vld [vmem:[%s23466_s5] sm:$0xff]  ;;  %v3850_v9 = vld [vmem:[%s17910_s25 + $0x111] sm:$0xff] }
 0x2d5   : > { %v16018_v44 = vpop.f32.mrf.mxu0  ;;  %v16143_v53 = vpop.f32.mrf.mxu1  ;;  %5209 = vperm.xlu0 %17687, %v4994_v10   ;;  %4999 = vperm.xlu1 %17688, %v4952_v33   ;;  %v3338_v37 = vld [vmem:[%s17910_s25 + $0x138] sm:$0xff]  ;;  %v3339_v33 = vld [vmem:[%s17910_s25 + $0x140] sm:$0xff] }
 0x2d7   : > { %v2663_v2 = vpop.f32.mrf.mxu0  ;;  %v3160_v46 = vpop.f32.mrf.mxu1  ;;  %16303 = vmatmul.mubr.msk.f32.gmra.mxu0 %vm385_vm2, %v3336_v38  ;;  %16428 = vmatmul.mubr.msk.f32.gmra.mxu1 %vm385_vm2, %v3849_v36  ;;  %v3851_v38 = vld [vmem:[%s17910_s25 + $0x119] sm:$0xff] }
 0x2d8   : > { %v2771_v52 = vadd.f32 %v2663_v2, %v19102_v45  ;;  %v19740_v29 = vadd.f32 %v3160_v46, %v19663_v11  ;;  %16305 = vmatprep.mubr.msk.f32.mxu0 %vm17790_vm1, %v17789_v0  ;;  %16430 = vmatprep.mubr.msk.f32.mxu1 %vm17790_vm1, %v17789_v0  ;;  %v3852_v2 = vld [vmem:[%s17910_s25 + $0x121] sm:$0xff] }
 0x2d9   : > { %v16021_v14 = vpop.f32.mrf.mxu0  ;;  %v16146_v48 = vpop.f32.mrf.mxu1  ;;  %5004 = vperm.xlu0 %17687, %v4953_v63   ;;  %v3853_v63 = vld [vmem:[%s17910_s25 + $0x129] sm:$0xff] }
 0x2da   : > { %v3340_v48 = vld [vmem:[%s17910_s25 + $0x148] sm:$0xff] }
 0x2db   : > { %v2668_v45 = vpop.f32.mrf.mxu0  ;;  %v3165_v11 = vpop.f32.mrf.mxu1  ;;  %16306 = vmatmul.mubr.msk.f32.gmra.mxu0 %vm385_vm2, %v3337_v54  ;;  %16431 = vmatmul.mubr.msk.f32.gmra.mxu1 %vm385_vm2, %v3850_v9 }
 0x2dc   : > { %v2772_v23 = vadd.f32 %v2668_v45, %v19113_v58  ;;  %v19755_v56 = vadd.f32 %v3165_v11, %v19683_v22  ;;  %16308 = vmatprep.mubr.msk.f32.mxu0 %vm17790_vm1, %v17789_v0  ;;  %16433 = vmatprep.mubr.msk.f32.mxu1 %vm17790_vm1, %v17789_v0 }
 0x2dd   : > { %v16024_v36 = vpop.f32.mrf.mxu0  ;;  %v16149_v44 = vpop.f32.mrf.mxu1 }
 0x2de   : > { %v3341_v36 = vld [vmem:[%s17910_s25 + $0x150] sm:$0xff] }
 0x2df   : > { %v2673_v53 = vpop.f32.mrf.mxu0  ;;  %v3170_v10 = vpop.f32.mrf.mxu1  ;;  %16309 = vmatmul.mubr.msk.f32.gmra.mxu0 %vm385_vm2, %v3338_v37  ;;  %16434 = vmatmul.mubr.msk.f32.gmra.mxu1 %vm385_vm2, %v3851_v38  ;;  %v3854_v44 = vld [vmem:[%s17910_s25 + $0x131] sm:$0xff] }
 0x2e0   : > { %v2773_v58 = vadd.f32 %v2673_v53, %v19124_v8  ;;  %v19766_v22 = vadd.f32 %v3170_v10, %v2769_v31  ;;  %16311 = vmatprep.mubr.msk.f32.mxu0 %vm17790_vm1, %v17789_v0  ;;  %16436 = vmatprep.mubr.msk.f32.mxu1 %vm17790_vm1, %v17789_v0 }
 0x2e1   : > { %v16027_v46 = vpop.f32.mrf.mxu0  ;;  %v16152_v54 = vpop.f32.mrf.mxu1 }
 0x2e2   : > { %v3342_v46 = vld [vmem:[%s17910_s25 + $0x158] sm:$0xff] }
 0x2e3   : > { %v2678_v9 = vpop.f32.mrf.mxu0  ;;  %v3175_v14 = vpop.f32.mrf.mxu1  ;;  %16312 = vmatmul.mubr.msk.f32.gmra.mxu0 %vm385_vm2, %v3339_v33  ;;  %16437 = vmatmul.mubr.msk.f32.gmra.mxu1 %vm385_vm2, %v3852_v2  ;;  %v3855_v54 = vld [vmem:[%s17910_s25 + $0x139] sm:$0xff] }
 0x2e4   : > { %v2774_v8 = vadd.f32 %v2678_v9, %v19135_v19  ;;  %v19777_v31 = vadd.f32 %v3175_v14, %v2770_v40  ;;  %16314 = vmatprep.mubr.msk.f32.mxu0 %vm17790_vm1, %v17789_v0  ;;  %16439 = vmatprep.mubr.msk.f32.mxu1 %vm17790_vm1, %v17789_v0 }
 0x2e5   : > { %v16030_v45 = vpop.f32.mrf.mxu0  ;;  %v16155_v11 = vpop.f32.mrf.mxu1 }
 0x2e6   : > { %v3343_v45 = vld [vmem:[%s17910_s25 + $0x160] sm:$0xff] }
 0x2e7   : > { %v2683_v37 = vpop.f32.mrf.mxu0  ;;  %v3180_v38 = vpop.f32.mrf.mxu1  ;;  %16315 = vmatmul.mubr.msk.f32.gmra.mxu0 %vm385_vm2, %v3340_v48  ;;  %16440 = vmatmul.mubr.msk.f32.gmra.mxu1 %vm385_vm2, %v3853_v63  ;;  %v3856_v11 = vld [vmem:[%s17910_s25 + $0x141] sm:$0xff] }
 0x2e8   : > { %v2775_v19 = vadd.f32 %v2683_v37, %v19146_v34  ;;  %v19788_v40 = vadd.f32 %v3180_v38, %v2771_v52  ;;  %16317 = vmatprep.mubr.msk.f32.mxu0 %vm17790_vm1, %v17789_v0  ;;  %16442 = vmatprep.mubr.msk.f32.mxu1 %vm17790_vm1, %v17789_v0 }
 0x2e9   : > { %v16033_v53 = vpop.f32.mrf.mxu0  ;;  %v16158_v10 = vpop.f32.mrf.mxu1 }
 0x2ea   : > { %v3344_v53 = vld [vmem:[%s17910_s25 + $0x168] sm:$0xff] }
 0x2eb   : > { %v2688_v33 = vpop.f32.mrf.mxu0  ;;  %v3185_v2 = vpop.f32.mrf.mxu1  ;;  %16318 = vmatmul.mubr.msk.f32.gmra.mxu0 %vm385_vm2, %v3341_v36  ;;  %16443 = vmatmul.mubr.msk.f32.gmra.mxu1 %vm385_vm2, %v3854_v44  ;;  %v3857_v10 = vld [vmem:[%s17910_s25 + $0x149] sm:$0xff] }
 0x2ec   : > { %v2776_v34 = vadd.f32 %v2688_v33, %v19157_v49  ;;  %v19799_v52 = vadd.f32 %v3185_v2, %v2772_v23  ;;  %16320 = vmatprep.mubr.msk.f32.mxu0 %vm17790_vm1, %v17789_v0  ;;  %16445 = vmatprep.mubr.msk.f32.mxu1 %vm17790_vm1, %v17789_v0 }
 0x2ed   : > { %v16036_v9 = vpop.f32.mrf.mxu0  ;;  %v16161_v14 = vpop.f32.mrf.mxu1 }
 0x2ee   : > { %v3345_v9 = vld [vmem:[%s17910_s25 + $0x170] sm:$0xff] }
 0x2ef   : > { %v2693_v48 = vpop.f32.mrf.mxu0  ;;  %v3190_v63 = vpop.f32.mrf.mxu1  ;;  %16321 = vmatmul.mubr.msk.f32.gmra.mxu0 %vm385_vm2, %v3342_v46  ;;  %16446 = vmatmul.mubr.msk.f32.gmra.mxu1 %vm385_vm2, %v3855_v54  ;;  %v3858_v14 = vld [vmem:[%s17910_s25 + $0x151] sm:$0xff] }
 0x2f0   : > { %v2777_v49 = vadd.f32 %v2693_v48, %v19168_v1  ;;  %v19810_v23 = vadd.f32 %v3190_v63, %v2773_v58  ;;  %16323 = vmatprep.mubr.msk.f32.mxu0 %vm17790_vm1, %v17789_v0  ;;  %16448 = vmatprep.mubr.msk.f32.mxu1 %vm17790_vm1, %v17789_v0 }
 0x2f1   : > { %v16039_v37 = vpop.f32.mrf.mxu0  ;;  %v16164_v38 = vpop.f32.mrf.mxu1 }
 0x2f2   : > { %v3346_v37 = vld [vmem:[%s17910_s25 + $0x178] sm:$0xff] }
 0x2f3   : > { %v2698_v36 = vpop.f32.mrf.mxu0  ;;  %v3195_v44 = vpop.f32.mrf.mxu1  ;;  %16324 = vmatmul.mubr.msk.f32.gmra.mxu0 %vm385_vm2, %v3343_v45  ;;  %16449 = vmatmul.mubr.msk.f32.gmra.mxu1 %vm385_vm2, %v3856_v11  ;;  %v3859_v38 = vld [vmem:[%s17910_s25 + $0x159] sm:$0xff] }
 0x2f4   : > { %v2778_v1 = vadd.f32 %v2698_v36, %v19179_v16  ;;  %v19821_v58 = vadd.f32 %v3195_v44, %v2774_v8  ;;  %16326 = vmatprep.mubr.msk.f32.mxu0 %vm17790_vm1, %v17789_v0  ;;  %16451 = vmatprep.mubr.msk.f32.mxu1 %vm17790_vm1, %v17789_v0 }
 0x2f5   : > { %v16042_v33 = vpop.f32.mrf.mxu0  ;;  %v16167_v2 = vpop.f32.mrf.mxu1 }
 0x2f6   : > { %v3347_v33 = vld [vmem:[%s17910_s25 + $0x180] sm:$0xff] }
 0x2f7   : > { %v2703_v46 = vpop.f32.mrf.mxu0  ;;  %v3200_v54 = vpop.f32.mrf.mxu1  ;;  %16327 = vmatmul.mubr.msk.f32.gmra.mxu0 %vm385_vm2, %v3344_v53  ;;  %16452 = vmatmul.mubr.msk.f32.gmra.mxu1 %vm385_vm2, %v3857_v10  ;;  %v3860_v2 = vld [vmem:[%s17910_s25 + $0x161] sm:$0xff] }
 0x2f8   : > { %v2779_v16 = vadd.f32 %v2703_v46, %v19190_v30  ;;  %v19832_v8 = vadd.f32 %v3200_v54, %v2775_v19  ;;  %16329 = vmatprep.mubr.msk.f32.mxu0 %vm17790_vm1, %v17789_v0  ;;  %16454 = vmatprep.mubr.msk.f32.mxu1 %vm17790_vm1, %v17789_v0 }
 0x2f9   : > { %v16045_v48 = vpop.f32.mrf.mxu0  ;;  %v16170_v63 = vpop.f32.mrf.mxu1 }
 0x2fa   : > { %v3348_v48 = vld [vmem:[%s17910_s25 + $0x188] sm:$0xff] }
 0x2fb   : > { %v2708_v45 = vpop.f32.mrf.mxu0  ;;  %v3205_v11 = vpop.f32.mrf.mxu1  ;;  %16330 = vmatmul.mubr.msk.f32.gmra.mxu0 %vm385_vm2, %v3345_v9  ;;  %16455 = vmatmul.mubr.msk.f32.gmra.mxu1 %vm385_vm2, %v3858_v14  ;;  %v3861_v63 = vld [vmem:[%s17910_s25 + $0x169] sm:$0xff] }
 0x2fc   : > { %v2780_v30 = vadd.f32 %v2708_v45, %v19201_v47  ;;  %v19843_v19 = vadd.f32 %v3205_v11, %v2776_v34  ;;  %16332 = vmatprep.mubr.msk.f32.mxu0 %vm17790_vm1, %v17789_v0  ;;  %16457 = vmatprep.mubr.msk.f32.mxu1 %vm17790_vm1, %v17789_v0  ;;  %v13503_v45 = vld [vmem:[%s23464_s3 + $0x78] sm:$0xff] }
 0x2fd   : > { %v16048_v36 = vpop.f32.mrf.mxu0  ;;  %v16173_v44 = vpop.f32.mrf.mxu1  ;;  %16615 = vmatprep.subr.mxu1 %v13503_v45 }
 0x2fe   : > { %16616 = vmatpush3.msra.mxu1 %v13503_v45  ;;  %v3862_v44 = vld [vmem:[%s17910_s25 + $0x171] sm:$0xff] }
 0x2ff   : > { %v2713_v53 = vpop.f32.mrf.mxu0  ;;  %v3210_v10 = vpop.f32.mrf.mxu1  ;;  %16333 = vmatmul.mubr.msk.f32.gmra.mxu0 %vm385_vm2, %v3346_v37  ;;  %16458 = vmatmul.mubr.msk.f32.gmra.mxu1 %vm385_vm2, %v3859_v38 }
 0x300   : > { %v2781_v47 = vadd.f32 %v2713_v53, %v19213_v41  ;;  %v19854_v34 = vadd.f32 %v3210_v10, %v2777_v49  ;;  %16335 = vmatprep.mubr.msk.f32.mxu0 %vm17790_vm1, %v17789_v0  ;;  %16460 = vmatprep.mubr.msk.f32.mxu1 %vm17790_vm1, %v17789_v0  ;;  %v4338_v53 = vld [vmem:[%s17910_s25 + $0x2a] sm:$0xff] }
 0x301   : > { %v16051_v46 = vpop.f32.mrf.mxu0  ;;  %v16176_v54 = vpop.f32.mrf.mxu1 }
 0x302   : > { %v3863_v54 = vld [vmem:[%s17910_s25 + $0x179] sm:$0xff] }
 0x303   : > { %v2718_v9 = vpop.f32.mrf.mxu0  ;;  %v3215_v14 = vpop.f32.mrf.mxu1  ;;  %16336 = vmatmul.mubr.msk.f32.gmra.mxu0 %vm385_vm2, %v3347_v33  ;;  %16461 = vmatmul.mubr.msk.f32.gmra.mxu1 %vm385_vm2, %v3860_v2 }
 0x304   : > { %v2782_v41 = vadd.f32 %v2718_v9, %v19225_v7  ;;  %v19865_v49 = vadd.f32 %v3215_v14, %v2778_v1  ;;  %16338 = vmatprep.mubr.msk.f32.mxu0 %vm17790_vm1, %v17789_v0  ;;  %16463 = vmatprep.mubr.msk.f32.mxu1 %vm17790_vm1, %v17789_v0  ;;  %v4339_v9 = vld [vmem:[%s17910_s25 + $0x32] sm:$0xff] }
 0x305   : > { %v16054_v11 = vpop.f32.mrf.mxu0  ;;  %v16179_v37 = vpop.f32.mrf.mxu1 }
 0x306   : > { %v3864_v11 = vld [vmem:[%s17910_s25 + $0x181] sm:$0xff] }
 0x307   : > { %v2723_v7 = vpop.f32.mrf.mxu0  ;;  %v3220_v1 = vpop.f32.mrf.mxu1  ;;  %16339 = vmatmul.mubr.msk.f32.gmra.mxu0 %vm385_vm2, %v3348_v48  ;;  %16464 = vmatmul.mubr.msk.f32.gmra.mxu1 %vm385_vm2, %v3861_v63  ;;  %v4340_v37 = vld [vmem:[%s17910_s25 + $0x3a] sm:$0xff] }
 0x308   : > { %v2783_v38 = vadd.f32 %v2723_v7, %v19235_v28  ;;  %v19879_v36 = vadd.f32 %v3220_v1, %v2779_v16  ;;  %16466 = vmatprep.mubr.msk.f32.mxu1 %vm17790_vm1, %v17789_v0  ;;  %16480 = vmatprep.mubr.msk.f32.mxu0 %vm17790_vm1, %v17789_v0 }
 0x309   : > { %v16057_v10 = vpop.f32.mrf.mxu0  ;;  %v16182_v33 = vpop.f32.mrf.mxu1 }
 0x30a   : > { %v3865_v10 = vld [vmem:[%s17910_s25 + $0x189] sm:$0xff] }
 0x30b   : > { %v2728_v2 = vpop.f32.mrf.mxu0  ;;  %v3225_v46 = vpop.f32.mrf.mxu1  ;;  %16467 = vmatmul.mubr.msk.f32.gmra.mxu1 %vm385_vm2, %v3862_v44  ;;  %16481 = vmatmul.mubr.msk.f32.vlgmr.msra.gmra.mxu0 %vm385_vm2, %v4338_v53  ;;  %v4341_v33 = vld [vmem:[%s17910_s25 + $0x42] sm:$0xff] }
 0x30c   : > { %v2784_v28 = vadd.f32 %v2728_v2, %v19246_v61  ;;  %v19890_v16 = vadd.f32 %v3225_v46, %v2780_v30  ;;  %16469 = vmatprep.mubr.msk.f32.mxu1 %vm17790_vm1, %v17789_v0  ;;  %16483 = vmatprep.mubr.msk.f32.mxu0 %vm17790_vm1, %v17789_v0 }
 0x30d   : > { %v16060_v14 = vpop.f32.mrf.mxu0  ;;  %v16185_v48 = vpop.f32.mrf.mxu1 }
 0x30e   : > { %v4342_v14 = vld [vmem:[%s17910_s25 + $0x4a] sm:$0xff] }
 0x30f   : > { %v2733_v63 = vpop.f32.mrf.mxu0  ;;  %v3230_v45 = vpop.f32.mrf.mxu1  ;;  %16470 = vmatmul.mubr.msk.f32.gmra.mxu1 %vm385_vm2, %v3863_v54  ;;  %16484 = vmatmul.mubr.msk.f32.gmra.mxu0 %vm385_vm2, %v4339_v9 }
 0x310   : > { %v2785_v61 = vadd.f32 %v2733_v63, %v19257_v18  ;;  %v19901_v30 = vadd.f32 %v3230_v45, %v2781_v47  ;;  %16472 = vmatprep.mubr.msk.f32.mxu1 %vm17790_vm1, %v17789_v0  ;;  %16486 = vmatprep.mubr.msk.f32.mxu0 %vm17790_vm1, %v17789_v0 }
 0x311   : > { %v16063_v7 = vpop.f32.mrf.mxu0  ;;  %v16188_v1 = vpop.f32.mrf.mxu1 }
 0x313   : > { %v2738_v44 = vpop.f32.mrf.mxu0  ;;  %v3235_v53 = vpop.f32.mrf.mxu1  ;;  %16473 = vmatmul.mubr.msk.f32.gmra.mxu1 %vm385_vm2, %v3864_v11  ;;  %16487 = vmatmul.mubr.msk.f32.gmra.mxu0 %vm385_vm2, %v4340_v37 }
 0x314   : > { %v2786_v18 = vadd.f32 %v2738_v44, %v19268_v3  ;;  %v19912_v47 = vadd.f32 %v3235_v53, %v2782_v41  ;;  %16475 = vmatprep.mubr.msk.f32.mxu1 %vm17790_vm1, %v17789_v0  ;;  %16489 = vmatprep.mubr.msk.f32.mxu0 %vm17790_vm1, %v17789_v0 }
 0x315   : > { %v16066_v2 = vpop.f32.mrf.mxu0  ;;  %v16191_v46 = vpop.f32.mrf.mxu1 }
 0x317   : > { %v3240_v54 = vpop.f32.mrf.mxu1  ;;  %v3552_v9 = vpop.f32.mrf.mxu0  ;;  %16476 = vmatmul.mubr.msk.f32.gmra.mxu1 %vm385_vm2, %v3865_v10  ;;  %16490 = vmatmul.mubr.msk.f32.gmra.mxu0 %vm385_vm2, %v4341_v33 }
 0x318   : > { %v19922_v3 = vadd.f32 %v3240_v54, %v2783_v38  ;;  %v3776_v41 = vadd.f32 %v3552_v9, %v19280_v62  ;;  %16492 = vmatprep.mubr.msk.f32.mxu0 %vm17790_vm1, %v17789_v0  ;;  %v4343_v38 = vld [vmem:[%s17910_s25 + $0x52] sm:$0xff] }
 0x319   : > { %v16194_v48 = vpop.f32.mrf.mxu1  ;;  %v16208_v63 = vpop.f32.mrf.mxu0 }
 0x31b   : > { %v3245_v45 = vpop.f32.mrf.mxu1  ;;  %v3557_v11 = vpop.f32.mrf.mxu0  ;;  %16493 = vmatmul.mubr.msk.f32.gmra.mxu0 %vm385_vm2, %v4342_v14 }
 0x31c   : > { %v19929_v37 = vadd.f32 %v3245_v45, %v2784_v28  ;;  %v3777_v7 = vadd.f32 %v3557_v11, %v19291_v39  ;;  %16495 = vmatprep.mubr.msk.f32.mxu0 %vm17790_vm1, %v17789_v0  ;;  %v4344_v28 = vld [vmem:[%s17910_s25 + $0x5a] sm:$0xff] }
 0x31d   : > { %v16197_v62 = vpop.f32.mrf.mxu1  ;;  %v16211_v1 = vpop.f32.mrf.mxu0 }
 0x31f   : > { %v3250_v44 = vpop.f32.mrf.mxu1  ;;  %v3562_v53 = vpop.f32.mrf.mxu0  ;;  %16496 = vmatmul.mubr.msk.f32.gmra.mxu0 %vm385_vm2, %v4343_v38 }
 0x320   : > { %v19936_v10 = vadd.f32 %v3250_v44, %v2785_v61  ;;  %v3778_v33 = vadd.f32 %v3562_v53, %v19302_v13  ;;  %16498 = vmatprep.mubr.msk.f32.mxu0 %vm17790_vm1, %v17789_v0  ;;  %v4345_v61 = vld [vmem:[%s17910_s25 + $0x62] sm:$0xff] }
 0x321   : > { %v16200_v39 = vpop.f32.mrf.mxu1  ;;  %v16214_v2 = vpop.f32.mrf.mxu0 }
 0x323   : > { %v3255_v46 = vpop.f32.mrf.mxu1  ;;  %v3567_v54 = vpop.f32.mrf.mxu0  ;;  %16499 = vmatmul.mubr.msk.f32.gmra.mxu0 %vm385_vm2, %v4344_v28 }
 0x324   : > { %v19943_v9 = vadd.f32 %v3255_v46, %v2786_v18  ;;  %v3779_v14 = vadd.f32 %v3567_v54, %v19315_v17  ;;  %16501 = vmatprep.mubr.msk.f32.mxu0 %vm17790_vm1, %v17789_v0  ;;  %v4346_v18 = vld [vmem:[%s17910_s25 + $0x6a] sm:$0xff] }
 0x325   : > { %v16203_v13 = vpop.f32.mrf.mxu1  ;;  %v16217_v48 = vpop.f32.mrf.mxu0 }
 0x326   : > { %v4995_v13 = vld [vmem:[%s23466_s5 + $0x158] sm:$0xff] }
 0x327   : > { %v3572_v63 = vpop.f32.mrf.mxu0  ;;  %v4069_v45 = vpop.f32.mrf.mxu1  ;;  %16502 = vmatmul.mubr.msk.f32.gmra.mxu0 %vm385_vm2, %v4345_v61  ;;  %v4348_v61 = vld [vmem:[%s17910_s25 + $0x7a] sm:$0xff]  ;;  %5214 = vperm.xlu1 %17688, %v4995_v13  }
 0x328   : > { %v3780_v11 = vadd.f32 %v3572_v63, %v19328_v55  ;;  %v19951_v38 = vadd.f32 %v4069_v45, %v3776_v41  ;;  %16504 = vmatprep.mubr.msk.f32.mxu0 %vm17790_vm1, %v17789_v0  ;;  %v4347_v55 = vld [vmem:[%s17910_s25 + $0x72] sm:$0xff]  ;;  %v4996_v41 = vld [vmem:[%s23466_s5 + $0x160] sm:$0xff] }
 0x329   : > { %v16220_v17 = vpop.f32.mrf.mxu0  ;;  %v16345_v62 = vpop.f32.mrf.mxu1  ;;  %5219 = vperm.xlu0 %17687, %v4996_v41  }
 0x32a   : > { %v4349_v17 = vld [vmem:[%s17910_s25 + $0x82] sm:$0xff] }
 0x32b   : > { %v3577_v1 = vpop.f32.mrf.mxu0  ;;  %v4074_v44 = vpop.f32.mrf.mxu1  ;;  %16505 = vmatmul.mubr.msk.f32.gmra.mxu0 %vm385_vm2, %v4346_v18 }
 0x32c   : > { %v3781_v53 = vadd.f32 %v3577_v1, %v19347_v5  ;;  %v19958_v28 = vadd.f32 %v4074_v44, %v3777_v7  ;;  %16507 = vmatprep.mubr.msk.f32.mxu0 %vm17790_vm1, %v17789_v0 }
 0x32d   : > { %v16223_v39 = vpop.f32.mrf.mxu0  ;;  %v16348_v2 = vpop.f32.mrf.mxu1 }
 0x32f   : > { %v3582_v46 = vpop.f32.mrf.mxu0  ;;  %v4079_v54 = vpop.f32.mrf.mxu1  ;;  %16508 = vmatmul.mubr.msk.f32.gmra.mxu0 %vm385_vm2, %v4347_v55 }
 0x330   : > { %v3782_v5 = vadd.f32 %v3582_v46, %v19366_v32  ;;  %v19968_v7 = vadd.f32 %v4079_v54, %v3778_v33  ;;  %16510 = vmatprep.mubr.msk.f32.mxu0 %vm17790_vm1, %v17789_v0 }
 0x331   : > { %v16226_v48 = vpop.f32.mrf.mxu0  ;;  %v16351_v63 = vpop.f32.mrf.mxu1 }
 0x333   : > { %v3587_v45 = vpop.f32.mrf.mxu0  ;;  %v4084_v18 = vpop.f32.mrf.mxu1  ;;  %16511 = vmatmul.mubr.msk.f32.gmra.mxu0 %vm385_vm2, %v4348_v61 }
 0x334   : > { %v3783_v32 = vadd.f32 %v3587_v45, %v19386_v60  ;;  %v19978_v33 = vadd.f32 %v4084_v18, %v3779_v14  ;;  %16513 = vmatprep.mubr.msk.f32.mxu0 %vm17790_vm1, %v17789_v0  ;;  %v4350_v60 = vld [vmem:[%s17910_s25 + $0x8a] sm:$0xff] }
 0x335   : > { %v16229_v62 = vpop.f32.mrf.mxu0  ;;  %v16354_v1 = vpop.f32.mrf.mxu1 }
 0x337   : > { %v3592_v44 = vpop.f32.mrf.mxu0  ;;  %v4089_v55 = vpop.f32.mrf.mxu1  ;;  %16514 = vmatmul.mubr.msk.f32.gmra.mxu0 %vm385_vm2, %v4349_v17 }
 0x338   : > { %v3784_v41 = vadd.f32 %v3592_v44, %v19406_v25  ;;  %v19985_v39 = vadd.f32 %v4089_v55, %v3780_v11  ;;  %16516 = vmatprep.mubr.msk.f32.mxu0 %vm17790_vm1, %v17789_v0  ;;  %v4351_v25 = vld [vmem:[%s17910_s25 + $0x92] sm:$0xff] }
 0x339   : > { %v16232_v14 = vpop.f32.mrf.mxu0  ;;  %v16357_v2 = vpop.f32.mrf.mxu1 }
 0x33b   : > { %v3597_v46 = vpop.f32.mrf.mxu0  ;;  %v4094_v54 = vpop.f32.mrf.mxu1  ;;  %16517 = vmatmul.mubr.msk.f32.gmra.mxu0 %vm385_vm2, %v4350_v60 }
 0x33c   : > { %v3785_v61 = vadd.f32 %v3597_v46, %v19426_v24  ;;  %v19992_v13 = vadd.f32 %v4094_v54, %v3781_v53  ;;  %16519 = vmatprep.mubr.msk.f32.mxu0 %vm17790_vm1, %v17789_v0  ;;  %v4352_v24 = vld [vmem:[%s17910_s25 + $0x9a] sm:$0xff] }
 0x33d   : > { %v16235_v11 = vpop.f32.mrf.mxu0  ;;  %v16360_v48 = vpop.f32.mrf.mxu1 }
 0x33f   : > { %v3602_v63 = vpop.f32.mrf.mxu0  ;;  %v4099_v45 = vpop.f32.mrf.mxu1  ;;  %16520 = vmatmul.mubr.msk.f32.gmra.mxu0 %vm385_vm2, %v4351_v25 }
 0x340   : > { %v3786_v18 = vadd.f32 %v3602_v63, %v19446_v43  ;;  %v19999_v17 = vadd.f32 %v4099_v45, %v3782_v5  ;;  %16522 = vmatprep.mubr.msk.f32.mxu0 %vm17790_vm1, %v17789_v0  ;;  %v4353_v43 = vld [vmem:[%s17910_s25 + $0xa2] sm:$0xff] }
 0x341   : > { %v16238_v53 = vpop.f32.mrf.mxu0  ;;  %v16363_v62 = vpop.f32.mrf.mxu1 }
 0x343   : > { %v3607_v1 = vpop.f32.mrf.mxu0  ;;  %v4104_v44 = vpop.f32.mrf.mxu1  ;;  %16523 = vmatmul.mubr.msk.f32.gmra.mxu0 %vm385_vm2, %v4352_v24 }
 0x344   : > { %v3787_v55 = vadd.f32 %v3607_v1, %v19466_v51  ;;  %v20006_v60 = vadd.f32 %v4104_v44, %v3783_v32  ;;  %16525 = vmatprep.mubr.msk.f32.mxu0 %vm17790_vm1, %v17789_v0  ;;  %v4354_v51 = vld [vmem:[%s17910_s25 + $0xaa] sm:$0xff] }
 0x345   : > { %v16241_v5 = vpop.f32.mrf.mxu0  ;;  %v16366_v14 = vpop.f32.mrf.mxu1 }
 0x347   : > { %v3612_v2 = vpop.f32.mrf.mxu0  ;;  %v4109_v46 = vpop.f32.mrf.mxu1  ;;  %16526 = vmatmul.mubr.msk.f32.gmra.mxu0 %vm385_vm2, %v4353_v43 }
 0x348   : > { %v3788_v54 = vadd.f32 %v3612_v2, %v19486_v20  ;;  %v20013_v25 = vadd.f32 %v4109_v46, %v3784_v41  ;;  %16528 = vmatprep.mubr.msk.f32.mxu0 %vm17790_vm1, %v17789_v0  ;;  %v4355_v20 = vld [vmem:[%s17910_s25 + $0xb2] sm:$0xff] }
 0x349   : > { %v16244_v32 = vpop.f32.mrf.mxu0  ;;  %v16369_v11 = vpop.f32.mrf.mxu1 }
 0x34b   : > { %v3617_v48 = vpop.f32.mrf.mxu0  ;;  %v4114_v63 = vpop.f32.mrf.mxu1  ;;  %16529 = vmatmul.mubr.msk.f32.gmra.mxu0 %vm385_vm2, %v4354_v51 }
 0x34c   : > { %v3789_v45 = vadd.f32 %v3617_v48, %v19506_v27  ;;  %v20020_v24 = vadd.f32 %v4114_v63, %v3785_v61  ;;  %16531 = vmatprep.mubr.msk.f32.mxu0 %vm17790_vm1, %v17789_v0  ;;  %v4356_v27 = vld [vmem:[%s17910_s25 + $0xba] sm:$0xff]  ;;  %v20041_v48 = vpop.permute.xlu1 %5019 }
 0x34d   : > { %v16247_v41 = vpop.f32.mrf.mxu0  ;;  %v16372_v53 = vpop.f32.mrf.mxu1 }
 0x34f   : > { %v3622_v62 = vpop.f32.mrf.mxu0  ;;  %v4119_v1 = vpop.f32.mrf.mxu1  ;;  %16532 = vmatmul.mubr.msk.f32.gmra.mxu0 %vm385_vm2, %v4355_v20 }
 0x350   : > { %v3790_v44 = vadd.f32 %v3622_v62, %v19526_v57  ;;  %v20027_v43 = vadd.f32 %v4119_v1, %v3786_v18  ;;  %16534 = vmatprep.mubr.msk.f32.mxu0 %vm17790_vm1, %v17789_v0  ;;  %v4357_v57 = vld [vmem:[%s17910_s25 + $0xc2] sm:$0xff]  ;;  %v20039_v18 = vpop.permute.xlu0 %5009 }
 0x351   : > { %v16250_v61 = vpop.f32.mrf.mxu0  ;;  %v16375_v5 = vpop.f32.mrf.mxu1 }
 0x352   : > { %v13627_v5 = vld [vmem:[%s23464_s3 + $0xf8] sm:$0xff] }
 0x353   : > { %v3627_v14 = vpop.f32.mrf.mxu0  ;;  %v4124_v2 = vpop.f32.mrf.mxu1  ;;  %16535 = vmatmul.mubr.msk.f32.gmra.mxu0 %vm385_vm2, %v4356_v27  ;;  %16807 = vmatprep.subr.mxu0 %v13627_v5 }
 0x354   : > { %v3791_v46 = vadd.f32 %v3627_v14, %v19546_v26  ;;  %v20034_v51 = vadd.f32 %v4124_v2, %v3787_v55  ;;  %16537 = vmatprep.mubr.msk.f32.mxu0 %vm17790_vm1, %v17789_v0  ;;  %v4358_v55 = vld [vmem:[%s17910_s25 + $0xca] sm:$0xff]  ;;  %v20050_v1 = vpop.permute.xlu0 %5014  ;;  %v4359_v14 = vld [vmem:[%s17910_s25 + $0xd2] sm:$0xff]  ;;  %v20062_v2 = vpop.permute.xlu1 %5024  ;;  %16808 = vmatpush3.msra.mxu0 %v13627_v5 }
 0x355   : > { %v16253_v32 = vpop.f32.mrf.mxu0  ;;  %v16378_v11 = vpop.f32.mrf.mxu1 }
 0x356   : > { %v13626_v11 = vld [vmem:[%s23464_s3 + $0xf0] sm:$0xff] }
 0x357   : > { %v3632_v63 = vpop.f32.mrf.mxu0  ;;  %v4129_v20 = vpop.f32.mrf.mxu1  ;;  %16538 = vmatmul.mubr.msk.f32.gmra.mxu0 %vm385_vm2, %v4357_v57  ;;  %16809 = vmatprep.subr.mxu0 %v13626_v11 }
 0x358   : > { %v3792_v41 = vadd.f32 %v3632_v63, %v19566_v42  ;;  %v20045_v26 = vadd.f32 %v4129_v20, %v3788_v54  ;;  %16540 = vmatprep.mubr.msk.f32.mxu0 %vm17790_vm1, %v17789_v0  ;;  %16810 = vmatpush3.msra.mxu0 %v13626_v11 }
 0x359   : > { %v16256_v53 = vpop.f32.mrf.mxu0  ;;  %v16381_v62 = vpop.f32.mrf.mxu1 }
 0x35a   : > { %v20074_v53 = vpop.permute.xlu0 %5029 }
 0x35b   : > { %v3637_v27 = vpop.f32.mrf.mxu0  ;;  %v4134_v61 = vpop.f32.mrf.mxu1  ;;  %16541 = vmatmul.mubr.msk.f32.gmra.mxu0 %vm385_vm2, %v4358_v55  ;;  %v4360_v55 = vld [vmem:[%s17910_s25 + $0xda] sm:$0xff] }
 0x35c   : > { %v3793_v42 = vadd.f32 %v3637_v27, %v19586_v6  ;;  %v20057_v54 = vadd.f32 %v4134_v61, %v3789_v45  ;;  %16543 = vmatprep.mubr.msk.f32.mxu0 %vm17790_vm1, %v17789_v0  ;;  %v20076_v61 = vpop.permute.xlu1 %5034 }
 0x35d   : > { %v16259_v57 = vpop.f32.mrf.mxu0  ;;  %v16384_v32 = vpop.f32.mrf.mxu1 }
 0x35e   : > { %v13502_v32 = vld [vmem:[%s23464_s3 + $0x70] sm:$0xff] }
 0x35f   : > { %v3642_v63 = vpop.f32.mrf.mxu0  ;;  %v4139_v6 = vpop.f32.mrf.mxu1  ;;  %16544 = vmatmul.mubr.msk.f32.gmra.mxu0 %vm385_vm2, %v4359_v14  ;;  %16617 = vmatprep.subr.mxu1 %v13502_v32 }
 0x360   : > { %v3794_v45 = vadd.f32 %v3642_v63, %v19606_v50  ;;  %v20069_v20 = vadd.f32 %v4139_v6, %v3790_v44  ;;  %16546 = vmatprep.mubr.msk.f32.mxu0 %vm17790_vm1, %v17789_v0  ;;  %v4361_v44 = vld [vmem:[%s17910_s25 + $0xe2] sm:$0xff]  ;;  %v20088_v6 = vpop.permute.xlu0 %5039  ;;  %16618 = vmatpush3.msra.mxu1 %v13502_v32 }
 0x361   : > { %v16262_v62 = vpop.f32.mrf.mxu0  ;;  %v16387_v27 = vpop.f32.mrf.mxu1 }
 0x362   : > { %23482 = vst [vmem:[#allocation10_spill] sm:$0xff] %v20069_v20  ;;  %v4362_v27 = vld [vmem:[%s17910_s25 + $0xea] sm:$0xff] }
 0x363   : > { %v3647_v5 = vpop.f32.mrf.mxu0  ;;  %v4144_v57 = vpop.f32.mrf.mxu1  ;;  %16547 = vmatmul.mubr.msk.f32.gmra.mxu0 %vm385_vm2, %v4360_v55 }
 0x364   : > { %v3795_v14 = vadd.f32 %v3647_v5, %v19626_v15  ;;  %v20080_v50 = vadd.f32 %v4144_v57, %v3791_v46  ;;  %16549 = vmatprep.mubr.msk.f32.mxu0 %vm17790_vm1, %v17789_v0  ;;  %v20097_v5 = vpop.permute.xlu1 %5044 }
 0x365   : > { %v16265_v11 = vpop.f32.mrf.mxu0  ;;  %v16390_v63 = vpop.f32.mrf.mxu1 }
 0x366   : > { %23483 = vst [vmem:[#allocation11_spill] sm:$0xff] %v20080_v50 }
 0x367   : > { %v3652_v55 = vpop.f32.mrf.mxu0  ;;  %v4149_v15 = vpop.f32.mrf.mxu1  ;;  %16550 = vmatmul.mubr.msk.f32.gmra.mxu0 %vm385_vm2, %v4361_v44 }
 0x368   : > { %v3796_v46 = vadd.f32 %v3652_v55, %v19646_v35  ;;  %v20092_v62 = vadd.f32 %v4149_v15, %v3792_v41  ;;  %16552 = vmatprep.mubr.msk.f32.mxu0 %vm17790_vm1, %v17789_v0  ;;  %v4363_v35 = vld [vmem:[%s17910_s25 + $0xf2] sm:$0xff]  ;;  %v20106_v41 = vpop.permute.xlu0 %5049 }
 0x369   : > { %v16268_v57 = vpop.f32.mrf.mxu0  ;;  %v16393_v11 = vpop.f32.mrf.mxu1 }
 0x36a   : > { %23484 = vst [vmem:[#allocation12_spill] sm:$0xff] %v20092_v62  ;;  %v20108_v62 = vpop.permute.xlu1 %5054 }
 0x36b   : > { %v3657_v63 = vpop.f32.mrf.mxu0  ;;  %v4154_v50 = vpop.f32.mrf.mxu1  ;;  %16553 = vmatmul.mubr.msk.f32.gmra.mxu0 %vm385_vm2, %v4362_v27 }
 0x36c   : > { %v3797_v32 = vadd.f32 %v3657_v63, %v19666_v59  ;;  %v20101_v44 = vadd.f32 %v4154_v50, %v3793_v42  ;;  %16555 = vmatprep.mubr.msk.f32.mxu0 %vm17790_vm1, %v17789_v0  ;;  %v4364_v42 = vld [vmem:[%s17910_s25 + $0xfa] sm:$0xff] }
 0x36d   : > { %v16271_v55 = vpop.f32.mrf.mxu0  ;;  %v16396_v15 = vpop.f32.mrf.mxu1 }
 0x36e   : > { %23485 = vst [vmem:[#allocation13_spill] sm:$0xff] %v20101_v44  ;;  %v20117_v44 = vpop.permute.xlu0 %5059 }
 0x36f   : > { %v3662_v57 = vpop.f32.mrf.mxu0  ;;  %v4159_v11 = vpop.f32.mrf.mxu1  ;;  %16556 = vmatmul.mubr.msk.f32.gmra.mxu0 %vm385_vm2, %v4363_v35 }
 0x370   : > { %v3798_v27 = vadd.f32 %v3662_v57, %v19686_v4  ;;  %v20112_v59 = vadd.f32 %v4159_v11, %v3794_v45  ;;  %16558 = vmatprep.mubr.msk.f32.mxu0 %vm17790_vm1, %v17789_v0  ;;  %v4365_v4 = vld [vmem:[%s17910_s25 + $0x102] sm:$0xff]  ;;  %v20126_v45 = vpop.permute.xlu1 %5064 }
 0x371   : > { %v16274_v50 = vpop.f32.mrf.mxu0  ;;  %v16399_v63 = vpop.f32.mrf.mxu1 }
 0x372   : > { %23486 = vst [vmem:[#allocation14_spill] sm:$0xff] %v20112_v59 }
 0x373   : > { %v3667_v55 = vpop.f32.mrf.mxu0  ;;  %v4164_v15 = vpop.f32.mrf.mxu1  ;;  %16559 = vmatmul.mubr.msk.f32.gmra.mxu0 %vm385_vm2, %v4364_v42 }
 0x374   : > { %v3799_v20 = vadd.f32 %v3667_v55, %v19704_v12  ;;  %v20121_v35 = vadd.f32 %v4164_v15, %v3795_v14  ;;  %16561 = vmatprep.mubr.msk.f32.mxu0 %vm17790_vm1, %v17789_v0  ;;  %v4366_v12 = vld [vmem:[%s17910_s25 + $0x10a] sm:$0xff]  ;;  %v20135_v14 = vpop.permute.xlu0 %5069 }
 0x375   : > { %v16277_v57 = vpop.f32.mrf.mxu0  ;;  %v16402_v11 = vpop.f32.mrf.mxu1 }
 0x376   : > { %23487 = vst [vmem:[#allocation15_spill] sm:$0xff] %v20121_v35  ;;  %v20137_v35 = vpop.permute.xlu1 %5074 }
 0x377   : > { %v3672_v50 = vpop.f32.mrf.mxu0  ;;  %v4169_v63 = vpop.f32.mrf.mxu1  ;;  %16562 = vmatmul.mubr.msk.f32.gmra.mxu0 %vm385_vm2, %v4365_v4  ;;  %23489 = vst [vmem:[#allocation17_spill] sm:$0xff] %v20137_v35 }
 0x378   : > { %v3800_v59 = vadd.f32 %v3672_v50, %v19722_v21  ;;  %v20130_v42 = vadd.f32 %v4169_v63, %v3796_v46  ;;  %16564 = vmatprep.mubr.msk.f32.mxu0 %vm17790_vm1, %v17789_v0  ;;  %v4367_v46 = vld [vmem:[%s17910_s25 + $0x112] sm:$0xff] }
 0x379   : > { %v16280_v55 = vpop.f32.mrf.mxu0  ;;  %v16405_v15 = vpop.f32.mrf.mxu1 }
 0x37a   : > { %23488 = vst [vmem:[#allocation16_spill] sm:$0xff] %v20130_v42  ;;  %v20146_v42 = vpop.permute.xlu0 %5079 }
 0x37b   : > { %v3677_v57 = vpop.f32.mrf.mxu0  ;;  %v4174_v11 = vpop.f32.mrf.mxu1  ;;  %16565 = vmatmul.mubr.msk.f32.gmra.mxu0 %vm385_vm2, %v4366_v12 }
 0x37c   : > { %v3801_v4 = vadd.f32 %v3677_v57, %v19740_v29  ;;  %v20141_v21 = vadd.f32 %v4174_v11, %v3797_v32  ;;  %16567 = vmatprep.mubr.msk.f32.mxu0 %vm17790_vm1, %v17789_v0  ;;  %v4368_v29 = vld [vmem:[%s17910_s25 + $0x11a] sm:$0xff]  ;;  %v20155_v32 = vpop.permute.xlu1 %5084 }
 0x37d   : > { %v16283_v50 = vpop.f32.mrf.mxu0  ;;  %v16408_v63 = vpop.f32.mrf.mxu1 }
 0x37e   : > { %23490 = vst [vmem:[#allocation18_spill] sm:$0xff] %v20141_v21 }
 0x37f   : > { %v3682_v55 = vpop.f32.mrf.mxu0  ;;  %v4179_v15 = vpop.f32.mrf.mxu1  ;;  %16568 = vmatmul.mubr.msk.f32.gmra.mxu0 %vm385_vm2, %v4367_v46 }
 0x380   : > { %v3802_v35 = vadd.f32 %v3682_v55, %v19755_v56  ;;  %v20150_v12 = vadd.f32 %v4179_v15, %v3798_v27  ;;  %16570 = vmatprep.mubr.msk.f32.mxu0 %vm17790_vm1, %v17789_v0  ;;  %v4369_v56 = vld [vmem:[%s17910_s25 + $0x122] sm:$0xff]  ;;  %v20164_v27 = vpop.permute.xlu0 %5089 }
 0x381   : > { %v16286_v57 = vpop.f32.mrf.mxu0  ;;  %v16411_v11 = vpop.f32.mrf.mxu1 }
 0x382   : > { %23491 = vst [vmem:[#allocation19_spill] sm:$0xff] %v20150_v12  ;;  %v20166_v12 = vpop.permute.xlu1 %5094 }
 0x383   : > { %v3687_v50 = vpop.f32.mrf.mxu0  ;;  %v4184_v63 = vpop.f32.mrf.mxu1  ;;  %16571 = vmatmul.mubr.msk.f32.gmra.mxu0 %vm385_vm2, %v4368_v29  ;;  %23493 = vst [vmem:[#allocation21_spill] sm:$0xff] %v20166_v12 }
 0x384   : > { %v3803_v21 = vadd.f32 %v3687_v50, %v19766_v22  ;;  %v20159_v46 = vadd.f32 %v4184_v63, %v3799_v20  ;;  %16573 = vmatprep.mubr.msk.f32.mxu0 %vm17790_vm1, %v17789_v0  ;;  %v4370_v20 = vld [vmem:[%s17910_s25 + $0x12a] sm:$0xff] }
 0x385   : > { %v16289_v55 = vpop.f32.mrf.mxu0  ;;  %v16414_v15 = vpop.f32.mrf.mxu1 }
 0x386   : > { %23492 = vst [vmem:[#allocation20_spill] sm:$0xff] %v20159_v46  ;;  %v20175_v46 = vpop.permute.xlu0 %5099 }
 0x387   : > { %v3692_v57 = vpop.f32.mrf.mxu0  ;;  %v4189_v11 = vpop.f32.mrf.mxu1  ;;  %16574 = vmatmul.mubr.msk.f32.gmra.mxu0 %vm385_vm2, %v4369_v56 }
 0x388   : > { %v3804_v29 = vadd.f32 %v3692_v57, %v19777_v31  ;;  %v20170_v22 = vadd.f32 %v4189_v11, %v3800_v59  ;;  %16576 = vmatprep.mubr.msk.f32.mxu0 %vm17790_vm1, %v17789_v0  ;;  %v4371_v31 = vld [vmem:[%s17910_s25 + $0x132] sm:$0xff]  ;;  %v20184_v59 = vpop.permute.xlu1 %5104 }
 0x389   : > { %v16292_v50 = vpop.f32.mrf.mxu0  ;;  %v16417_v63 = vpop.f32.mrf.mxu1 }
 0x38a   : > { %23494 = vst [vmem:[#allocation22_spill] sm:$0xff] %v20170_v22 }
 0x38b   : > { %v3697_v55 = vpop.f32.mrf.mxu0  ;;  %v4194_v15 = vpop.f32.mrf.mxu1  ;;  %16577 = vmatmul.mubr.msk.f32.gmra.mxu0 %vm385_vm2, %v4370_v20 }
 0x38c   : > { %v3805_v12 = vadd.f32 %v3697_v55, %v19788_v40  ;;  %v20179_v56 = vadd.f32 %v4194_v15, %v3801_v4  ;;  %16579 = vmatprep.mubr.msk.f32.mxu0 %vm17790_vm1, %v17789_v0  ;;  %v4372_v40 = vld [vmem:[%s17910_s25 + $0x13a] sm:$0xff]  ;;  %v20193_v4 = vpop.permute.xlu0 %5109 }
 0x38d   : > { %v16295_v57 = vpop.f32.mrf.mxu0  ;;  %v16420_v11 = vpop.f32.mrf.mxu1 }
 0x38e   : > { %23495 = vst [vmem:[#allocation23_spill] sm:$0xff] %v20179_v56  ;;  %v20195_v56 = vpop.permute.xlu1 %5114 }
 0x38f   : > { %v3702_v50 = vpop.f32.mrf.mxu0  ;;  %v4199_v63 = vpop.f32.mrf.mxu1  ;;  %16580 = vmatmul.mubr.msk.f32.gmra.mxu0 %vm385_vm2, %v4371_v31  ;;  %23497 = vst [vmem:[#allocation25_spill] sm:$0xff] %v20195_v56 }
 0x390   : > { %v3806_v22 = vadd.f32 %v3702_v50, %v19799_v52  ;;  %v20188_v20 = vadd.f32 %v4199_v63, %v3802_v35  ;;  %16582 = vmatprep.mubr.msk.f32.mxu0 %vm17790_vm1, %v17789_v0  ;;  %v4373_v35 = vld [vmem:[%s17910_s25 + $0x142] sm:$0xff] }
 0x391   : > { %v16298_v55 = vpop.f32.mrf.mxu0  ;;  %v16423_v15 = vpop.f32.mrf.mxu1 }
 0x392   : > { %23496 = vst [vmem:[#allocation24_spill] sm:$0xff] %v20188_v20  ;;  %v20204_v20 = vpop.permute.xlu0 %5119 }
 0x393   : > { %v3707_v57 = vpop.f32.mrf.mxu0  ;;  %v4204_v11 = vpop.f32.mrf.mxu1  ;;  %16583 = vmatmul.mubr.msk.f32.gmra.mxu0 %vm385_vm2, %v4372_v40 }
 0x394   : > { %v3807_v31 = vadd.f32 %v3707_v57, %v19810_v23  ;;  %v20199_v52 = vadd.f32 %v4204_v11, %v3803_v21  ;;  %16585 = vmatprep.mubr.msk.f32.mxu0 %vm17790_vm1, %v17789_v0  ;;  %v4374_v23 = vld [vmem:[%s17910_s25 + $0x14a] sm:$0xff]  ;;  %v20213_v21 = vpop.permute.xlu1 %5124 }
 0x395   : > { %v16301_v50 = vpop.f32.mrf.mxu0  ;;  %v16426_v63 = vpop.f32.mrf.mxu1 }
 0x396   : > { %23498 = vst [vmem:[#allocation26_spill] sm:$0xff] %v20199_v52 }
 0x397   : > { %v3712_v55 = vpop.f32.mrf.mxu0  ;;  %v4209_v15 = vpop.f32.mrf.mxu1  ;;  %16586 = vmatmul.mubr.msk.f32.gmra.mxu0 %vm385_vm2, %v4373_v35 }
 0x398   : > { %v3808_v56 = vadd.f32 %v3712_v55, %v19821_v58  ;;  %v20208_v40 = vadd.f32 %v4209_v15, %v3804_v29  ;;  %16588 = vmatprep.mubr.msk.f32.mxu0 %vm17790_vm1, %v17789_v0  ;;  %v4375_v58 = vld [vmem:[%s17910_s25 + $0x152] sm:$0xff]  ;;  %v20222_v29 = vpop.permute.xlu0 %5129 }
 0x399   : > { %v16304_v57 = vpop.f32.mrf.mxu0  ;;  %v16429_v11 = vpop.f32.mrf.mxu1 }
 0x39a   : > { %23499 = vst [vmem:[#allocation27_spill] sm:$0xff] %v20208_v40  ;;  %v20224_v40 = vpop.permute.xlu1 %5134 }
 0x39b   : > { %v3717_v50 = vpop.f32.mrf.mxu0  ;;  %v4214_v63 = vpop.f32.mrf.mxu1  ;;  %16589 = vmatmul.mubr.msk.f32.gmra.mxu0 %vm385_vm2, %v4374_v23  ;;  %23501 = vst [vmem:[#allocation29_spill] sm:$0xff] %v20224_v40 }
 0x39c   : > { %v3809_v52 = vadd.f32 %v3717_v50, %v19832_v8  ;;  %v20217_v35 = vadd.f32 %v4214_v63, %v3805_v12  ;;  %16591 = vmatprep.mubr.msk.f32.mxu0 %vm17790_vm1, %v17789_v0  ;;  %v4376_v12 = vld [vmem:[%s17910_s25 + $0x15a] sm:$0xff] }
 0x39d   : > { %v16307_v55 = vpop.f32.mrf.mxu0  ;;  %v16432_v15 = vpop.f32.mrf.mxu1 }
 0x39e   : > { %23500 = vst [vmem:[#allocation28_spill] sm:$0xff] %v20217_v35  ;;  %v20233_v35 = vpop.permute.xlu0 %5139 }
 0x39f   : > { %v3722_v57 = vpop.f32.mrf.mxu0  ;;  %v4219_v11 = vpop.f32.mrf.mxu1  ;;  %16592 = vmatmul.mubr.msk.f32.gmra.mxu0 %vm385_vm2, %v4375_v58 }
 0x3a0   : > { %v3810_v23 = vadd.f32 %v3722_v57, %v19843_v19  ;;  %v20228_v8 = vadd.f32 %v4219_v11, %v3806_v22  ;;  %16594 = vmatprep.mubr.msk.f32.mxu0 %vm17790_vm1, %v17789_v0  ;;  %v4377_v19 = vld [vmem:[%s17910_s25 + $0x162] sm:$0xff]  ;;  %v20242_v22 = vpop.permute.xlu1 %5144 }
 0x3a1   : > { %v16310_v50 = vpop.f32.mrf.mxu0  ;;  %v16435_v63 = vpop.f32.mrf.mxu1 }
 0x3a2   : > { %23502 = vst [vmem:[#allocation30_spill] sm:$0xff] %v20228_v8 }
 0x3a3   : > { %v3727_v55 = vpop.f32.mrf.mxu0  ;;  %v4224_v15 = vpop.f32.mrf.mxu1  ;;  %16595 = vmatmul.mubr.msk.f32.gmra.mxu0 %vm385_vm2, %v4376_v12 }
 0x3a4   : > { %v3811_v40 = vadd.f32 %v3727_v55, %v19854_v34  ;;  %v20237_v58 = vadd.f32 %v4224_v15, %v3807_v31  ;;  %16597 = vmatprep.mubr.msk.f32.mxu0 %vm17790_vm1, %v17789_v0  ;;  %v4378_v34 = vld [vmem:[%s17910_s25 + $0x16a] sm:$0xff]  ;;  %v20251_v31 = vpop.permute.xlu0 %5149 }
 0x3a5   : > { %v16313_v57 = vpop.f32.mrf.mxu0  ;;  %v16438_v11 = vpop.f32.mrf.mxu1 }
 0x3a6   : > { %23503 = vst [vmem:[#allocation31_spill] sm:$0xff] %v20237_v58  ;;  %v20253_v58 = vpop.permute.xlu1 %5154 }
 0x3a7   : > { %v3732_v50 = vpop.f32.mrf.mxu0  ;;  %v4229_v63 = vpop.f32.mrf.mxu1  ;;  %16598 = vmatmul.mubr.msk.f32.gmra.mxu0 %vm385_vm2, %v4377_v19  ;;  %23505 = vst [vmem:[#allocation33_spill] sm:$0xff] %v20253_v58 }
 0x3a8   : > { %v3812_v8 = vadd.f32 %v3732_v50, %v19865_v49  ;;  %v20246_v12 = vadd.f32 %v4229_v63, %v3808_v56  ;;  %16600 = vmatprep.mubr.msk.f32.mxu0 %vm17790_vm1, %v17789_v0  ;;  %v4379_v56 = vld [vmem:[%s17910_s25 + $0x172] sm:$0xff] }
 0x3a9   : > { %v16316_v55 = vpop.f32.mrf.mxu0  ;;  %v16441_v15 = vpop.f32.mrf.mxu1 }
 0x3aa   : > { %23504 = vst [vmem:[#allocation32_spill] sm:$0xff] %v20246_v12  ;;  %v20262_v12 = vpop.permute.xlu0 %5159 }
 0x3ab   : > { %v3737_v57 = vpop.f32.mrf.mxu0  ;;  %v4234_v11 = vpop.f32.mrf.mxu1  ;;  %16601 = vmatmul.mubr.msk.f32.gmra.mxu0 %vm385_vm2, %v4378_v34  ;;  %23506 = vst [vmem:[#allocation34_spill] sm:$0xff] %v20262_v12 }
 0x3ac   : > { %v3813_v19 = vadd.f32 %v3737_v57, %v19879_v36  ;;  %v20257_v49 = vadd.f32 %v4234_v11, %v3809_v52  ;;  %16603 = vmatprep.mubr.msk.f32.mxu0 %vm17790_vm1, %v17789_v0  ;;  %v4380_v36 = vld [vmem:[%s17910_s25 + $0x17a] sm:$0xff]  ;;  %v20271_v52 = vpop.permute.xlu1 %5164 }
 0x3ad   : > { %v16319_v50 = vpop.f32.mrf.mxu0  ;;  %v16444_v63 = vpop.f32.mrf.mxu1  ;;  %23508 = vst [vmem:[#allocation36_spill] sm:$0xff] %v20271_v52 }
 0x3af   : > { %v3742_v55 = vpop.f32.mrf.mxu0  ;;  %v4239_v15 = vpop.f32.mrf.mxu1  ;;  %16604 = vmatmul.mubr.msk.f32.gmra.mxu0 %vm385_vm2, %v4379_v56 }
 0x3b0   : > { %v3814_v58 = vadd.f32 %v3742_v55, %v19890_v16  ;;  %v20266_v34 = vadd.f32 %v4239_v15, %v3810_v23  ;;  %16606 = vmatprep.mubr.msk.f32.mxu0 %vm17790_vm1, %v17789_v0  ;;  %v4381_v16 = vld [vmem:[%s17910_s25 + $0x182] sm:$0xff]  ;;  %v20280_v23 = vpop.permute.xlu0 %5169  ;;  %v20282_v52 = vpop.permute.xlu1 %5174 }
 0x3b1   : > { %v16322_v57 = vpop.f32.mrf.mxu0  ;;  %v16447_v11 = vpop.f32.mrf.mxu1  ;;  %23510 = vst [vmem:[#allocation38_spill] sm:$0xff] %v20280_v23  ;;  %23511 = vst [vmem:[#allocation39_spill] sm:$0xff] %v20282_v52 }
 0x3b2   : > { %23507 = vst [vmem:[#allocation35_spill] sm:$0xff] %v20266_v34 }
 0x3b3   : > { %v3747_v50 = vpop.f32.mrf.mxu0  ;;  %v4244_v63 = vpop.f32.mrf.mxu1  ;;  %16607 = vmatmul.mubr.msk.f32.gmra.mxu0 %vm385_vm2, %v4380_v36 }
 0x3b4   : > { %v3815_v12 = vadd.f32 %v3747_v50, %v19901_v30  ;;  %v20275_v56 = vadd.f32 %v4244_v63, %v3811_v40  ;;  %16609 = vmatprep.mubr.msk.f32.mxu0 %vm17790_vm1, %v17789_v0  ;;  %v4382_v30 = vld [vmem:[%s17910_s25 + $0x18a] sm:$0xff]  ;;  %v20291_v63 = vpop.permute.xlu0 %5179  ;;  %s17642_s25 = smul.u32 1280, %s24121_s24 }
 0x3b5   : > { %v16325_v55 = vpop.f32.mrf.mxu0  ;;  %v16450_v15 = vpop.f32.mrf.mxu1  ;;  %23513 = vst [vmem:[#allocation41_spill] sm:$0xff] %v20291_v63 }
 0x3b6   : > { %23509 = vst [vmem:[#allocation37_spill] sm:$0xff] %v20275_v56  ;;  %v20322_v56 = vld [vmem:[#allocation5] ss:$0 sm:$0xff]  ;;  %s21605_s17 = scalar_lea.vmem %s23467_s6, %s17642_s25 }
 0x3b7   : > { %v3752_v57 = vpop.f32.mrf.mxu0  ;;  %v4249_v11 = vpop.f32.mrf.mxu1  ;;  %16610 = vmatmul.mubr.msk.f32.gmra.mxu0 %vm385_vm2, %v4381_v16 }
 0x3b8   : > { %v3816_v36 = vadd.f32 %v3752_v57, %v19912_v47  ;;  %v20286_v34 = vadd.f32 %v4249_v11, %v3812_v8  ;;  %16612 = vmatprep.mubr.msk.f32.mxu0 %vm17790_vm1, %v17789_v0  ;;  %v20297_v16 = vpop.permute.xlu1 %5184 }
 0x3b9   : > { %v16328_v40 = vpop.f32.mrf.mxu0  ;;  %v16453_v50 = vpop.f32.mrf.mxu1  ;;  %23515 = vst [vmem:[#allocation43_spill] sm:$0xff] %v20297_v16 }
 0x3ba   : > { %23512 = vst [vmem:[#allocation40_spill] sm:$0xff] %v20286_v34  ;;  %v20302_v50 = vpop.permute.xlu0 %5189 }
 0x3bb   : > { %v3757_v55 = vpop.f32.mrf.mxu0  ;;  %v4254_v15 = vpop.f32.mrf.mxu1  ;;  %16613 = vmatmul.mubr.msk.f32.gmra.mxu0 %vm385_vm2, %v4382_v30  ;;  %23517 = vst [vmem:[#allocation45_spill] sm:$0xff] %v20302_v50  ;;  %v20307_v30 = vld [vmem:[%s23464_s3 + $0x58] sm:$0xff] }
 0x3bc   : > { %v3817_v52 = vadd.f32 %v3757_v55, %v19922_v3  ;;  %v20295_v23 = vadd.f32 %v4254_v15, %v3813_v19  ;;  %16679 = vmatprep.subr.mxu1 %v20307_v30  ;;  %v20310_v55 = vpop.permute.xlu1 %5194 }
 0x3bd   : > { %v16331_v47 = vpop.f32.mrf.mxu0  ;;  %v16456_v8 = vpop.f32.mrf.mxu1  ;;  %23518 = vst [vmem:[#allocation46_spill] sm:$0xff] %v20310_v55 }
 0x3be   : > { %23514 = vst [vmem:[#allocation42_spill] sm:$0xff] %v20295_v23 }
 0x3bf   : > { %v3762_v57 = vpop.f32.mrf.mxu0  ;;  %v4259_v11 = vpop.f32.mrf.mxu1 }
 0x3c0   : > { %v3818_v0 = vadd.f32 %v3762_v57, %v19929_v37  ;;  %v20300_v40 = vadd.f32 %v4259_v11, %v3814_v58  ;;  %v20315_v11 = vpop.permute.xlu0 %5199 }
 0x3c1   : > { %v16334_v3 = vpop.f32.mrf.mxu0  ;;  %v16459_v19 = vpop.f32.mrf.mxu1  ;;  %23519 = vst [vmem:[#allocation47_spill] sm:$0xff] %v20315_v11 }
 0x3c2   : > { %23516 = vst [vmem:[#allocation44_spill] sm:$0xff] %v20300_v40  ;;  %v20320_v19 = vpop.permute.xlu1 %5204 }
 0x3c3   : > { %v3767_v15 = vpop.f32.mrf.mxu0  ;;  %v4264_v47 = vpop.f32.mrf.mxu1  ;;  %23520 = vst [vmem:[#allocation48_spill] sm:$0xff] %v20320_v19 }
 0x3c4   : > { %v3819_v8 = vadd.f32 %v3767_v15, %v19936_v10  ;;  %v20313_v37 = vadd.f32 %v4264_v47, %v3815_v12  ;;  %v20327_v15 = vpop.permute.xlu0 %5209 }
 0x3c5   : > { %v16337_v58 = vpop.f32.mrf.mxu0  ;;  %v16462_v57 = vpop.f32.mrf.mxu1  ;;  %23521 = vst [vmem:[#allocation49_spill] sm:$0xff] %v20327_v15 }
 0x3c7   : > { %v3772_v50 = vpop.f32.mrf.mxu0  ;;  %v4269_v16 = vpop.f32.mrf.mxu1 }
 0x3c8   : > { %v3820_v40 = vadd.f32 %v3772_v50, %v19943_v9  ;;  %v20318_v3 = vadd.f32 %v4269_v16, %v3816_v36  ;;  %v5000_v36 = vpop.permute.xlu1 %4999 }
 0x3c9   : > { %v16340_v63 = vpop.f32.mrf.mxu0  ;;  %v16465_v55 = vpop.f32.mrf.mxu1 }
 0x3cb   : > { %v4274_v23 = vpop.f32.mrf.mxu1  ;;  %v4586_v34 = vpop.f32.mrf.mxu0 }
 0x3cc   : > { %v20324_v10 = vadd.f32 %v4274_v23, %v3817_v52  ;;  %v4810_v12 = vadd.f32 %v4586_v34, %v19951_v38  ;;  %v5005_v38 = vpop.permute.xlu0 %5004 }
 0x3cd   : > { %v16468_v47 = vpop.f32.mrf.mxu1  ;;  %v16482_v58 = vpop.f32.mrf.mxu0 }
 0x3ce   : > { %v4862_v9 = vadd.f32 %v20322_v56, %v4810_v12 }
 0x3cf   : > { %v4279_v16 = vpop.f32.mrf.mxu1  ;;  %v4591_v50 = vpop.f32.mrf.mxu0 }
 0x3d0   : > { %v20330_v57 = vadd.f32 %v4279_v16, %v3818_v0  ;;  %v4811_v63 = vadd.f32 %v4591_v50, %v19958_v28  ;;  %v4907_v55 = vmax.f32 %v4862_v9, 0.0 }
 0x3d1   : > { %v16471_v19 = vpop.f32.mrf.mxu1  ;;  %v16485_v11 = vpop.f32.mrf.mxu0 }
 0x3d2   : > { %v4863_v52 = vadd.f32 %v20322_v56, %v4811_v63  ;;  %v5222_v23 = vmul.f32 %v5000_v36, %v4907_v55 }
 0x3d3   : > { %v4284_v34 = vpop.f32.mrf.mxu1  ;;  %v4596_v15 = vpop.f32.mrf.mxu0 }
 0x3d4   : > { %5268 = vst.msk [vmem:[#allocation2] sm:$0xff] %vm5267_vm0, %v5222_v23  ;;  %v20335_v47 = vadd.f32 %v4284_v34, %v3819_v8  ;;  %v4812_v12 = vadd.f32 %v4596_v15, %v19968_v7  ;;  %v4908_v58 = vmax.f32 %v4863_v52, 0.0 }
 0x3d5   : > { %v16474_v0 = vpop.f32.mrf.mxu1  ;;  %v16488_v16 = vpop.f32.mrf.mxu0 }
 0x3d6   : > { %v4864_v28 = vadd.f32 %v20322_v56, %v4812_v12  ;;  %v5223_v9 = vmul.f32 %v5005_v38, %v4908_v58 }
 0x3d7   : > { %v4289_v19 = vpop.f32.mrf.mxu1  ;;  %v4601_v11 = vpop.f32.mrf.mxu0 }
 0x3d8   : > { %v4909_v50 = vmax.f32 %v4864_v28, 0.0  ;;  %5269 = vst.msk [vmem:[#allocation2 + $0x8] sm:$0xff] %vm5267_vm0, %v5223_v9  ;;  %v20340_v36 = vadd.f32 %v4289_v19, %v3820_v40  ;;  %v4813_v63 = vadd.f32 %v4601_v11, %v19978_v33 }
 0x3d9   : > { %v16491_v55 = vpop.f32.mrf.mxu0  ;;  %v16477_v8 = vpop.f32.mrf.mxu1 }
 0x3da   : > { %v5224_v23 = vmul.f32 %v20039_v18, %v4909_v50  ;;  %v4865_v7 = vadd.f32 %v20322_v56, %v4813_v63 }
 0x3db   : > { %v4606_v15 = vpop.f32.mrf.mxu0  ;;  %v6641_v52 = vld [vmem:[#allocation2] sm:$0xff] }
 0x3dc   : > { %5270 = vst.msk [vmem:[#allocation2 + $0x10] sm:$0xff] %vm5267_vm0, %v5224_v23  ;;  %v4910_v38 = vmax.f32 %v4865_v7, 0.0  ;;  %v4814_v34 = vadd.f32 %v4606_v15, %v19985_v39  ;;  %16811 = vmatprep.mubr.msk.f32.mxu0 %vm5267_vm0, %v6641_v52 }
 0x3dd   : > { %v16494_v12 = vpop.f32.mrf.mxu0 }
 0x3de   : > { %v5225_v40 = vmul.f32 %v20050_v1, %v4910_v38  ;;  %v4866_v33 = vadd.f32 %v20322_v56, %v4814_v34 }
 0x3df   : > { %v4611_v58 = vpop.f32.mrf.mxu0  ;;  %v6642_v0 = vld [vmem:[#allocation2 + $0x8] sm:$0xff] }
 0x3e0   : > { %5271 = vst.msk [vmem:[#allocation2 + $0x18] sm:$0xff] %vm5267_vm0, %v5225_v40  ;;  %v4911_v18 = vmax.f32 %v4866_v33, 0.0  ;;  %v4815_v16 = vadd.f32 %v4611_v58, %v19992_v13  ;;  %16812 = vmatmul.mubr.msk.f32.vlgmr.msra.gmra.mxu0 %vm5267_vm0, %v6642_v0  ;;  %v13500_v40 = vld [vmem:[%s23464_s3 + $0x50] sm:$0xff] }
 0x3e1   : > { %v16497_v28 = vpop.f32.mrf.mxu0 }
 0x3e2   : > { %v5226_v9 = vmul.f32 %v20041_v48, %v4911_v18  ;;  %v4867_v39 = vadd.f32 %v20322_v56, %v4815_v16 }
 0x3e3   : > { %v4616_v19 = vpop.f32.mrf.mxu0  ;;  %v6643_v11 = vld [vmem:[#allocation2 + $0x10] sm:$0xff] }
 0x3e4   : > { %5272 = vst.msk [vmem:[#allocation2 + $0x20] sm:$0xff] %vm5267_vm0, %v5226_v9  ;;  %v4912_v1 = vmax.f32 %v4867_v39, 0.0  ;;  %v4816_v50 = vadd.f32 %v4616_v19, %v19999_v17  ;;  %16814 = vmatprep.mubr.msk.f32.mxu0 %vm5267_vm0, %v6643_v11 }
 0x3e5   : > { %v16500_v63 = vpop.f32.mrf.mxu0 }
 0x3e6   : > { %v5227_v55 = vmul.f32 %v20062_v2, %v4912_v1  ;;  %v4868_v13 = vadd.f32 %v20322_v56, %v4816_v50 }
 0x3e7   : > { %v4621_v8 = vpop.f32.mrf.mxu0  ;;  %v5360_v23 = vld [vmem:[#allocation2 + $0x14] sm:$0xff] }
 0x3e8   : > { %v6644_v7 = vld [vmem:[#allocation2 + $0x18] sm:$0xff]  ;;  %5273 = vst.msk [vmem:[#allocation2 + $0x28] sm:$0xff] %vm5267_vm0, %v5227_v55  ;;  %v4913_v48 = vmax.f32 %v4868_v13, 0.0  ;;  %v4817_v15 = vadd.f32 %v4621_v8, %v20006_v60  ;;  %16619 = vmatprep.mubr.msk.f32.mxu1 %vm5267_vm0, %v5360_v23 }
 0x3e9   : > { %16815 = vmatmul.mubr.msk.f32.gmra.mxu0 %vm5267_vm0, %v6644_v7  ;;  %v16503_v17 = vpop.f32.mrf.mxu0  ;;  %v13670_v7 = vld [vmem:[%s23464_s3 + $0x68] sm:$0xff] }
 0x3ea   : > { %v5228_v52 = vmul.f32 %v20074_v53, %v4913_v48  ;;  %v4869_v38 = vadd.f32 %v20322_v56, %v4817_v15  ;;  %16935 = vmatprep.subr.mxu0 %v13670_v7 }
 0x3eb   : > { %v4626_v2 = vpop.f32.mrf.mxu0  ;;  %v5361_v34 = vld [vmem:[#allocation2 + $0x1c] sm:$0xff]  ;;  %16936 = vmatpush3.msra.mxu0 %v13670_v7 }
 0x3ec   : > { %v6645_v12 = vld [vmem:[#allocation2 + $0x20] sm:$0xff]  ;;  %5274 = vst.msk [vmem:[#allocation2 + $0x30] sm:$0xff] %vm5267_vm0, %v5228_v52  ;;  %v4914_v33 = vmax.f32 %v4869_v38, 0.0  ;;  %v4818_v60 = vadd.f32 %v4626_v2, %v20013_v25  ;;  %16620 = vmatmul.mubr.msk.f32.vlgmr.msra.gmra.mxu1 %vm5267_vm0, %v5361_v34 }
 0x3ed   : > { %16817 = vmatprep.mubr.msk.f32.mxu0 %vm5267_vm0, %v6645_v12  ;;  %v16506_v58 = vpop.f32.mrf.mxu0  ;;  %16680 = vmatpush3.msra.mxu1 %v20307_v30 }
 0x3ee   : > { %v5229_v53 = vmul.f32 %v20076_v61, %v4914_v33  ;;  %v4870_v0 = vadd.f32 %v20322_v56, %v4818_v60  ;;  %16681 = vmatprep.subr.mxu1 %v13500_v40 }
 0x3ef   : > { %v4631_v18 = vpop.f32.mrf.mxu0  ;;  %v5362_v16 = vld [vmem:[#allocation2 + $0x24] sm:$0xff]  ;;  %16682 = vmatpush3.msra.mxu1 %v13500_v40 }
 0x3f0   : > { %v6646_v28 = vld [vmem:[#allocation2 + $0x28] sm:$0xff]  ;;  %5275 = vst.msk [vmem:[#allocation2 + $0x38] sm:$0xff] %vm5267_vm0, %v5229_v53  ;;  %v4915_v9 = vmax.f32 %v4870_v0, 0.0  ;;  %v4819_v25 = vadd.f32 %v4631_v18, %v20020_v24  ;;  %16622 = vmatprep.mubr.msk.f32.mxu1 %vm5267_vm0, %v5362_v16 }
 0x3f1   : > { %16818 = vmatmul.mubr.msk.f32.gmra.mxu0 %vm5267_vm0, %v6646_v28  ;;  %v16509_v39 = vpop.f32.mrf.mxu0 }
 0x3f2   : > { %v5230_v30 = vmul.f32 %v20088_v6, %v4915_v9  ;;  %v4871_v61 = vadd.f32 %v20322_v56, %v4819_v25 }
 0x3f3   : > { %v4636_v19 = vpop.f32.mrf.mxu0  ;;  %v5363_v11 = vld [vmem:[#allocation2 + $0x2c] sm:$0xff] }
 0x3f4   : > { %v6647_v1 = vld [vmem:[#allocation2 + $0x30] sm:$0xff]  ;;  %5276 = vst.msk [vmem:[#allocation2 + $0x40] sm:$0xff] %vm5267_vm0, %v5230_v30  ;;  %v4916_v50 = vmax.f32 %v4871_v61, 0.0  ;;  %v4820_v63 = vadd.f32 %v4636_v19, %v20027_v43  ;;  %16623 = vmatmul.mubr.msk.f32.gmra.mxu1 %vm5267_vm0, %v5363_v11 }
 0x3f5   : > { %16820 = vmatprep.mubr.msk.f32.mxu0 %vm5267_vm0, %v6647_v1  ;;  %v16512_v24 = vpop.f32.mrf.mxu0  ;;  %v23522_v30 = vld [vmem:[#allocation10_spill] sm:$0xff] }
 0x3f6   : > { %v5231_v55 = vmul.f32 %v20097_v5, %v4916_v50  ;;  %v4872_v13 = vadd.f32 %v20322_v56, %v4820_v63  ;;  %v13669_v5 = vld [vmem:[%s23464_s3 + $0x60] sm:$0xff]  ;;  %v23523_v24 = vld [vmem:[#allocation11_spill] sm:$0xff] }
 0x3f7   : > { %v4641_v6 = vpop.f32.mrf.mxu0  ;;  %v5364_v8 = vld [vmem:[#allocation2 + $0x34] sm:$0xff]  ;;  %16937 = vmatprep.subr.mxu0 %v13669_v5 }
 0x3f8   : > { %v6648_v23 = vld [vmem:[#allocation2 + $0x38] sm:$0xff]  ;;  %5277 = vst.msk [vmem:[#allocation2 + $0x48] sm:$0xff] %vm5267_vm0, %v5231_v55  ;;  %v4917_v48 = vmax.f32 %v4872_v13, 0.0  ;;  %v4821_v43 = vadd.f32 %v4641_v6, %v20034_v51  ;;  %16625 = vmatprep.mubr.msk.f32.mxu1 %vm5267_vm0, %v5364_v8  ;;  %16938 = vmatpush3.msra.mxu0 %v13669_v5 }
 0x3f9   : > { %16821 = vmatmul.mubr.msk.f32.gmra.mxu0 %vm5267_vm0, %v6648_v23  ;;  %v16515_v15 = vpop.f32.mrf.mxu0  ;;  %v20425_v13 = vld [vmem:[%s23464_s3 + $0xd8] sm:$0xff] }
 0x3fa   : > { %v5232_v17 = vmul.f32 %v20106_v41, %v4917_v48  ;;  %v4873_v52 = vadd.f32 %v20322_v56, %v4821_v43  ;;  %16743 = vmatprep.subr.mxu1 %v20425_v13  ;;  %v23524_v15 = vld [vmem:[#allocation12_spill] sm:$0xff] }
 0x3fb   : > { %v4646_v38 = vpop.f32.mrf.mxu0  ;;  %v5365_v2 = vld [vmem:[#allocation2 + $0x3c] sm:$0xff] }
 0x3fc   : > { %v6649_v34 = vld [vmem:[#allocation2 + $0x40] sm:$0xff]  ;;  %5278 = vst.msk [vmem:[#allocation2 + $0x50] sm:$0xff] %vm5267_vm0, %v5232_v17  ;;  %v4918_v51 = vmax.f32 %v4873_v52, 0.0  ;;  %v4822_v12 = vadd.f32 %v4646_v38, %v20045_v26  ;;  %16626 = vmatmul.mubr.msk.f32.gmra.mxu1 %vm5267_vm0, %v5365_v2 }
 0x3fd   : > { %16823 = vmatprep.mubr.msk.f32.mxu0 %vm5267_vm0, %v6649_v34  ;;  %v16518_v40 = vpop.f32.mrf.mxu0  ;;  %v23525_v52 = vld [vmem:[#allocation17_spill] sm:$0xff] }
 0x3fe   : > { %v5233_v41 = vmul.f32 %v20108_v62, %v4918_v51  ;;  %v4874_v33 = vadd.f32 %v20322_v56, %v4822_v12  ;;  %v23526_v40 = vld [vmem:[#allocation13_spill] sm:$0xff] }
 0x3ff   : > { %v4651_v60 = vpop.f32.mrf.mxu0  ;;  %v5366_v58 = vld [vmem:[#allocation2 + $0x44] sm:$0xff] }
 0x400   : > { %v6650_v53 = vld [vmem:[#allocation2 + $0x48] sm:$0xff]  ;;  %5279 = vst.msk [vmem:[#allocation2 + $0x58] sm:$0xff] %vm5267_vm0, %v5233_v41  ;;  %v4919_v0 = vmax.f32 %v4874_v33, 0.0  ;;  %v4823_v18 = vadd.f32 %v4651_v60, %v20057_v54  ;;  %16628 = vmatprep.mubr.msk.f32.mxu1 %vm5267_vm0, %v5366_v58 }
 0x401   : > { %16824 = vmatmul.mubr.msk.f32.gmra.mxu0 %vm5267_vm0, %v6650_v53  ;;  %v16521_v26 = vpop.f32.mrf.mxu0 }
 0x402   : > { %v5234_v16 = vmul.f32 %v20117_v44, %v4919_v0  ;;  %v4875_v28 = vadd.f32 %v20322_v56, %v4823_v18 }
 0x403   : > { %v4656_v62 = vpop.f32.mrf.mxu0  ;;  %v5367_v9 = vld [vmem:[#allocation2 + $0x4c] sm:$0xff] }
 0x404   : > { %v6651_v25 = vld [vmem:[#allocation2 + $0x50] sm:$0xff]  ;;  %5280 = vst.msk [vmem:[#allocation2 + $0x60] sm:$0xff] %vm5267_vm0, %v5234_v16  ;;  %v4920_v39 = vmax.f32 %v4875_v28, 0.0  ;;  %v4824_v61 = vadd.f32 %v4656_v62, %v23522_v30  ;;  %16629 = vmatmul.mubr.msk.f32.gmra.mxu1 %vm5267_vm0, %v5367_v9 }
 0x405   : > { %16826 = vmatprep.mubr.msk.f32.mxu0 %vm5267_vm0, %v6651_v25  ;;  %v16524_v54 = vpop.f32.mrf.mxu0  ;;  %v23527_v16 = vld [vmem:[#allocation14_spill] sm:$0xff] }
 0x406   : > { %v5235_v19 = vmul.f32 %v20126_v45, %v4920_v39  ;;  %v4876_v11 = vadd.f32 %v20322_v56, %v4824_v61  ;;  %v23528_v54 = vld [vmem:[#allocation15_spill] sm:$0xff] }
 0x407   : > { %v4661_v44 = vpop.f32.mrf.mxu0  ;;  %v5368_v1 = vld [vmem:[#allocation2 + $0x54] sm:$0xff] }
 0x408   : > { %v6652_v50 = vld [vmem:[#allocation2 + $0x58] sm:$0xff]  ;;  %5281 = vst.msk [vmem:[#allocation2 + $0x68] sm:$0xff] %vm5267_vm0, %v5235_v19  ;;  %v4921_v63 = vmax.f32 %v4876_v11, 0.0  ;;  %v4825_v55 = vadd.f32 %v4661_v44, %v23523_v24  ;;  %16631 = vmatprep.mubr.msk.f32.mxu1 %vm5267_vm0, %v5368_v1 }
 0x409   : > { %16827 = vmatmul.mubr.msk.f32.gmra.mxu0 %vm5267_vm0, %v6652_v50  ;;  %v16527_v45 = vpop.f32.mrf.mxu0 }
 0x40a   : > { %v5236_v6 = vmul.f32 %v20135_v14, %v4921_v63  ;;  %v4877_v8 = vadd.f32 %v20322_v56, %v4825_v55  ;;  %v23529_v55 = vld [vmem:[#allocation16_spill] sm:$0xff] }
 0x40b   : > { %v4666_v23 = vpop.f32.mrf.mxu0  ;;  %v5369_v7 = vld [vmem:[#allocation2 + $0x5c] sm:$0xff] }
 0x40c   : > { %v6653_v48 = vld [vmem:[#allocation2 + $0x60] sm:$0xff]  ;;  %5282 = vst.msk [vmem:[#allocation2 + $0x70] sm:$0xff] %vm5267_vm0, %v5236_v6  ;;  %v4922_v43 = vmax.f32 %v4877_v8, 0.0  ;;  %v4826_v5 = vadd.f32 %v4666_v23, %v23524_v15  ;;  %16632 = vmatmul.mubr.msk.f32.gmra.mxu1 %vm5267_vm0, %v5369_v7 }
 0x40d   : > { %16829 = vmatprep.mubr.msk.f32.mxu0 %vm5267_vm0, %v6653_v48  ;;  %v16530_v17 = vpop.f32.mrf.mxu0  ;;  %v23530_v8 = vld [vmem:[#allocation21_spill] sm:$0xff] }
 0x40e   : > { %v5237_v38 = vmul.f32 %v23525_v52, %v4922_v43  ;;  %v4878_v2 = vadd.f32 %v20322_v56, %v4826_v5  ;;  %v23531_v5 = vld [vmem:[#allocation18_spill] sm:$0xff] }
 0x40f   : > { %v4671_v14 = vpop.f32.mrf.mxu0  ;;  %v5370_v34 = vld [vmem:[#allocation2 + $0x64] sm:$0xff] }
 0x410   : > { %v6654_v51 = vld [vmem:[#allocation2 + $0x68] sm:$0xff]  ;;  %5283 = vst.msk [vmem:[#allocation2 + $0x78] sm:$0xff] %vm5267_vm0, %v5237_v38  ;;  %v4923_v12 = vmax.f32 %v4878_v2, 0.0  ;;  %v4827_v41 = vadd.f32 %v4671_v14, %v23526_v40  ;;  %16634 = vmatprep.mubr.msk.f32.mxu1 %vm5267_vm0, %v5370_v34  ;;  %v23532_v40 = vld [vmem:[#allocation19_spill] sm:$0xff] }
 0x411   : > { %16830 = vmatmul.mubr.msk.f32.gmra.mxu0 %vm5267_vm0, %v6654_v51  ;;  %v16533_v33 = vpop.f32.mrf.mxu0 }
 0x412   : > { %v5238_v60 = vmul.f32 %v20146_v42, %v4923_v12  ;;  %v4879_v58 = vadd.f32 %v20322_v56, %v4827_v41 }
 0x413   : > { %v4676_v53 = vpop.f32.mrf.mxu0  ;;  %v5371_v0 = vld [vmem:[#allocation2 + $0x6c] sm:$0xff] }
 0x414   : > { %v6655_v18 = vld [vmem:[#allocation2 + $0x70] sm:$0xff]  ;;  %5284 = vst.msk [vmem:[#allocation2 + $0x80] sm:$0xff] %vm5267_vm0, %v5238_v60  ;;  %v4924_v26 = vmax.f32 %v4879_v58, 0.0  ;;  %v4828_v28 = vadd.f32 %v4676_v53, %v23527_v16  ;;  %16635 = vmatmul.mubr.msk.f32.gmra.mxu1 %vm5267_vm0, %v5371_v0 }
 0x415   : > { %16832 = vmatprep.mubr.msk.f32.mxu0 %vm5267_vm0, %v6655_v18  ;;  %v16536_v62 = vpop.f32.mrf.mxu0 }
 0x416   : > { %v5239_v9 = vmul.f32 %v20155_v32, %v4924_v26  ;;  %v4880_v25 = vadd.f32 %v20322_v56, %v4828_v28  ;;  %v23533_v26 = vld [vmem:[#allocation20_spill] sm:$0xff] }
 0x417   : > { %v4681_v42 = vpop.f32.mrf.mxu0  ;;  %v5372_v39 = vld [vmem:[#allocation2 + $0x74] sm:$0xff] }
 0x418   : > { %v6656_v30 = vld [vmem:[#allocation2 + $0x78] sm:$0xff]  ;;  %5285 = vst.msk [vmem:[#allocation2 + $0x88] sm:$0xff] %vm5267_vm0, %v5239_v9  ;;  %v4925_v61 = vmax.f32 %v4880_v25, 0.0  ;;  %v4829_v19 = vadd.f32 %v4681_v42, %v23528_v54  ;;  %16637 = vmatprep.mubr.msk.f32.mxu1 %vm5267_vm0, %v5372_v39 }
 0x419   : > { %16833 = vmatmul.mubr.msk.f32.gmra.mxu0 %vm5267_vm0, %v6656_v30  ;;  %v16539_v11 = vpop.f32.mrf.mxu0  ;;  %v23534_v30 = vld [vmem:[#allocation22_spill] sm:$0xff] }
 0x41a   : > { %v5240_v44 = vmul.f32 %v20164_v27, %v4925_v61  ;;  %v4881_v1 = vadd.f32 %v20322_v56, %v4829_v19  ;;  %v23535_v19 = vld [vmem:[#allocation25_spill] sm:$0xff] }
 0x41b   : > { %v4686_v32 = vpop.f32.mrf.mxu0  ;;  %v5373_v50 = vld [vmem:[#allocation2 + $0x7c] sm:$0xff] }
 0x41c   : > { %v6657_v63 = vld [vmem:[#allocation2 + $0x80] sm:$0xff]  ;;  %5286 = vst.msk [vmem:[#allocation2 + $0x90] sm:$0xff] %vm5267_vm0, %v5240_v44  ;;  %v4926_v24 = vmax.f32 %v4881_v1, 0.0  ;;  %v4830_v45 = vadd.f32 %v4686_v32, %v23529_v55  ;;  %16638 = vmatmul.mubr.msk.f32.gmra.mxu1 %vm5267_vm0, %v5373_v50 }
 0x41d   : > { %16835 = vmatprep.mubr.msk.f32.mxu0 %vm5267_vm0, %v6657_v63  ;;  %v16542_v6 = vpop.f32.mrf.mxu0  ;;  %v23536_v63 = vld [vmem:[#allocation23_spill] sm:$0xff] }
 0x41e   : > { %v5241_v23 = vmul.f32 %v23530_v8, %v4926_v24  ;;  %v4882_v7 = vadd.f32 %v20322_v56, %v4830_v45 }
 0x41f   : > { %v4691_v27 = vpop.f32.mrf.mxu0  ;;  %v5374_v48 = vld [vmem:[#allocation2 + $0x84] sm:$0xff] }
 0x420   : > { %v6658_v43 = vld [vmem:[#allocation2 + $0x88] sm:$0xff]  ;;  %5287 = vst.msk [vmem:[#allocation2 + $0x98] sm:$0xff] %vm5267_vm0, %v5241_v23  ;;  %v4927_v15 = vmax.f32 %v4882_v7, 0.0  ;;  %v4831_v17 = vadd.f32 %v4691_v27, %v23531_v5  ;;  %16640 = vmatprep.mubr.msk.f32.mxu1 %vm5267_vm0, %v5374_v48  ;;  %v23537_v48 = vld [vmem:[#allocation24_spill] sm:$0xff] }
 0x421   : > { %16836 = vmatmul.mubr.msk.f32.gmra.mxu0 %vm5267_vm0, %v6658_v43  ;;  %v16545_v52 = vpop.f32.mrf.mxu0 }
 0x422   : > { %v5242_v38 = vmul.f32 %v20175_v46, %v4927_v15  ;;  %v4883_v2 = vadd.f32 %v20322_v56, %v4831_v17 }
 0x423   : > { %v4696_v14 = vpop.f32.mrf.mxu0  ;;  %v5375_v34 = vld [vmem:[#allocation2 + $0x8c] sm:$0xff] }
 0x424   : > { %v6659_v51 = vld [vmem:[#allocation2 + $0x90] sm:$0xff]  ;;  %5288 = vst.msk [vmem:[#allocation2 + $0xa0] sm:$0xff] %vm5267_vm0, %v5242_v38  ;;  %v4928_v12 = vmax.f32 %v4883_v2, 0.0  ;;  %v4832_v41 = vadd.f32 %v4696_v14, %v23532_v40  ;;  %16641 = vmatmul.mubr.msk.f32.gmra.mxu1 %vm5267_vm0, %v5375_v34 }
 0x425   : > { %16838 = vmatprep.mubr.msk.f32.mxu0 %vm5267_vm0, %v6659_v51  ;;  %v16548_v33 = vpop.f32.mrf.mxu0  ;;  %v23538_v14 = vld [vmem:[#allocation26_spill] sm:$0xff] }
 0x426   : > { %v5243_v60 = vmul.f32 %v20184_v59, %v4928_v12  ;;  %v4884_v58 = vadd.f32 %v20322_v56, %v4832_v41 }
 0x427   : > { %v4701_v46 = vpop.f32.mrf.mxu0  ;;  %v5376_v53 = vld [vmem:[#allocation2 + $0x94] sm:$0xff] }
 0x428   : > { %v6660_v0 = vld [vmem:[#allocation2 + $0x98] sm:$0xff]  ;;  %5289 = vst.msk [vmem:[#allocation2 + $0xa8] sm:$0xff] %vm5267_vm0, %v5243_v60  ;;  %v4929_v18 = vmax.f32 %v4884_v58, 0.0  ;;  %v4833_v16 = vadd.f32 %v4701_v46, %v23533_v26  ;;  %16643 = vmatprep.mubr.msk.f32.mxu1 %vm5267_vm0, %v5376_v53 }
 0x429   : > { %16839 = vmatmul.mubr.msk.f32.gmra.mxu0 %vm5267_vm0, %v6660_v0  ;;  %v16551_v28 = vpop.f32.mrf.mxu0  ;;  %v23539_v58 = vld [vmem:[#allocation27_spill] sm:$0xff]  ;;  %v23540_v0 = vld [vmem:[#allocation29_spill] sm:$0xff] }
 0x42a   : > { %v5244_v62 = vmul.f32 %v20193_v4, %v4929_v18  ;;  %v4885_v9 = vadd.f32 %v20322_v56, %v4833_v16 }
 0x42b   : > { %v4706_v59 = vpop.f32.mrf.mxu0  ;;  %v5377_v25 = vld [vmem:[#allocation2 + $0x9c] sm:$0xff] }
 0x42c   : > { %v6661_v42 = vld [vmem:[#allocation2 + $0xa0] sm:$0xff]  ;;  %5290 = vst.msk [vmem:[#allocation2 + $0xb0] sm:$0xff] %vm5267_vm0, %v5244_v62  ;;  %v4930_v39 = vmax.f32 %v4885_v9, 0.0  ;;  %v4834_v61 = vadd.f32 %v4706_v59, %v23534_v30  ;;  %16644 = vmatmul.mubr.msk.f32.gmra.mxu1 %vm5267_vm0, %v5377_v25 }
 0x42d   : > { %16841 = vmatprep.mubr.msk.f32.mxu0 %vm5267_vm0, %v6661_v42  ;;  %v16554_v54 = vpop.f32.mrf.mxu0  ;;  %v23541_v9 = vld [vmem:[#allocation28_spill] sm:$0xff] }
 0x42e   : > { %v5245_v11 = vmul.f32 %v23535_v19, %v4930_v39  ;;  %v4886_v44 = vadd.f32 %v20322_v56, %v4834_v61 }
 0x42f   : > { %v4711_v4 = vpop.f32.mrf.mxu0  ;;  %v5378_v1 = vld [vmem:[#allocation2 + $0xa4] sm:$0xff] }
 0x430   : > { %v6662_v32 = vld [vmem:[#allocation2 + $0xa8] sm:$0xff]  ;;  %5291 = vst.msk [vmem:[#allocation2 + $0xb8] sm:$0xff] %vm5267_vm0, %v5245_v11  ;;  %v4931_v50 = vmax.f32 %v4886_v44, 0.0  ;;  %v4835_v24 = vadd.f32 %v4711_v4, %v23536_v63  ;;  %16646 = vmatprep.mubr.msk.f32.mxu1 %vm5267_vm0, %v5378_v1 }
 0x431   : > { %16842 = vmatmul.mubr.msk.f32.gmra.mxu0 %vm5267_vm0, %v6662_v32  ;;  %v16557_v55 = vpop.f32.mrf.mxu0  ;;  %v23542_v11 = vld [vmem:[#allocation30_spill] sm:$0xff] }
 0x432   : > { %v5246_v45 = vmul.f32 %v20204_v20, %v4931_v50  ;;  %v4887_v6 = vadd.f32 %v20322_v56, %v4835_v24  ;;  %v23543_v55 = vld [vmem:[#allocation31_spill] sm:$0xff] }
 0x433   : > { %v4716_v8 = vpop.f32.mrf.mxu0  ;;  %v5379_v23 = vld [vmem:[#allocation2 + $0xac] sm:$0xff] }
 0x434   : > { %v6663_v7 = vld [vmem:[#allocation2 + $0xb0] sm:$0xff]  ;;  %5292 = vst.msk [vmem:[#allocation2 + $0xc0] sm:$0xff] %vm5267_vm0, %v5246_v45  ;;  %v4932_v27 = vmax.f32 %v4887_v6, 0.0  ;;  %v4836_v43 = vadd.f32 %v4716_v8, %v23537_v48  ;;  %16647 = vmatmul.mubr.msk.f32.gmra.mxu1 %vm5267_vm0, %v5379_v23  ;;  %v20527_v6 = vld [vmem:[%s23464_s3 + $0xc8] sm:$0xff] }
 0x435   : > { %16844 = vmatprep.mubr.msk.f32.mxu0 %vm5267_vm0, %v6663_v7  ;;  %v16560_v15 = vpop.f32.mrf.mxu0  ;;  %17063 = vmatprep.subr.mxu0 %v20527_v6 }
 0x436   : > { %v5247_v5 = vmul.f32 %v20213_v21, %v4932_v27  ;;  %v4888_v17 = vadd.f32 %v20322_v56, %v4836_v43  ;;  %v23544_v15 = vld [vmem:[#allocation32_spill] sm:$0xff] }
 0x437   : > { %v4721_v20 = vpop.f32.mrf.mxu0  ;;  %v5380_v52 = vld [vmem:[#allocation2 + $0xb4] sm:$0xff] }
 0x438   : > { %v6664_v38 = vld [vmem:[#allocation2 + $0xb8] sm:$0xff]  ;;  %5293 = vst.msk [vmem:[#allocation2 + $0xc8] sm:$0xff] %vm5267_vm0, %v5247_v5  ;;  %v4933_v2 = vmax.f32 %v4888_v17, 0.0  ;;  %v4837_v34 = vadd.f32 %v4721_v20, %v23538_v14  ;;  %16649 = vmatprep.mubr.msk.f32.mxu1 %vm5267_vm0, %v5380_v52  ;;  %v23545_v20 = vld [vmem:[#allocation33_spill] sm:$0xff] }
 0x439   : > { %16845 = vmatmul.mubr.msk.f32.gmra.mxu0 %vm5267_vm0, %v6664_v38  ;;  %v16563_v51 = vpop.f32.mrf.mxu0 }
 0x43a   : > { %v5248_v12 = vmul.f32 %v20222_v29, %v4933_v2  ;;  %v4889_v40 = vadd.f32 %v20322_v56, %v4837_v34 }
 0x43b   : > { %v4726_v21 = vpop.f32.mrf.mxu0  ;;  %v5381_v41 = vld [vmem:[#allocation2 + $0xbc] sm:$0xff] }
 0x43c   : > { %v6665_v33 = vld [vmem:[#allocation2 + $0xc0] sm:$0xff]  ;;  %5294 = vst.msk [vmem:[#allocation2 + $0xd0] sm:$0xff] %vm5267_vm0, %v5248_v12  ;;  %v4934_v60 = vmax.f32 %v4889_v40, 0.0  ;;  %v4838_v46 = vadd.f32 %v4726_v21, %v23539_v58  ;;  %16650 = vmatmul.mubr.msk.f32.gmra.mxu1 %vm5267_vm0, %v5381_v41  ;;  %v23546_v40 = vld [vmem:[#allocation34_spill] sm:$0xff] }
 0x43d   : > { %16847 = vmatprep.mubr.msk.f32.mxu0 %vm5267_vm0, %v6665_v33  ;;  %v16566_v53 = vpop.f32.mrf.mxu0 }
 0x43e   : > { %v5249_v18 = vmul.f32 %v23540_v0, %v4934_v60  ;;  %v4890_v26 = vadd.f32 %v20322_v56, %v4838_v46  ;;  %v23547_v53 = vld [vmem:[#allocation35_spill] sm:$0xff] }
 0x43f   : > { %v4731_v29 = vpop.f32.mrf.mxu0  ;;  %v5382_v16 = vld [vmem:[#allocation2 + $0xc4] sm:$0xff] }
 0x440   : > { %v6666_v28 = vld [vmem:[#allocation2 + $0xc8] sm:$0xff]  ;;  %5295 = vst.msk [vmem:[#allocation2 + $0xd8] sm:$0xff] %vm5267_vm0, %v5249_v18  ;;  %v4935_v62 = vmax.f32 %v4890_v26, 0.0  ;;  %v4839_v59 = vadd.f32 %v4731_v29, %v23541_v9  ;;  %16652 = vmatprep.mubr.msk.f32.mxu1 %vm5267_vm0, %v5382_v16  ;;  %v23548_v18 = vld [vmem:[#allocation36_spill] sm:$0xff] }
 0x441   : > { %16848 = vmatmul.mubr.msk.f32.gmra.mxu0 %vm5267_vm0, %v6666_v28  ;;  %v16569_v25 = vpop.f32.mrf.mxu0 }
 0x442   : > { %v5250_v42 = vmul.f32 %v20233_v35, %v4935_v62  ;;  %v4891_v39 = vadd.f32 %v20322_v56, %v4839_v59  ;;  %v23549_v59 = vld [vmem:[#allocation37_spill] sm:$0xff] }
 0x443   : > { %v4736_v30 = vpop.f32.mrf.mxu0  ;;  %v5383_v61 = vld [vmem:[#allocation2 + $0xcc] sm:$0xff] }
 0x444   : > { %v6667_v54 = vld [vmem:[#allocation2 + $0xd0] sm:$0xff]  ;;  %5296 = vst.msk [vmem:[#allocation2 + $0xe0] sm:$0xff] %vm5267_vm0, %v5250_v42  ;;  %v4936_v19 = vmax.f32 %v4891_v39, 0.0  ;;  %v4840_v44 = vadd.f32 %v4736_v30, %v23542_v11  ;;  %16653 = vmatmul.mubr.msk.f32.gmra.mxu1 %vm5267_vm0, %v5383_v61 }
 0x445   : > { %16850 = vmatprep.mubr.msk.f32.mxu0 %vm5267_vm0, %v6667_v54  ;;  %v16572_v4 = vpop.f32.mrf.mxu0  ;;  %v23550_v39 = vld [vmem:[#allocation38_spill] sm:$0xff] }
 0x446   : > { %v5251_v1 = vmul.f32 %v20242_v22, %v4936_v19  ;;  %v4892_v32 = vadd.f32 %v20322_v56, %v4840_v44  ;;  %v23551_v4 = vld [vmem:[#allocation40_spill] sm:$0xff] }
 0x447   : > { %v4741_v35 = vpop.f32.mrf.mxu0  ;;  %v5384_v50 = vld [vmem:[#allocation2 + $0xd4] sm:$0xff] }
 0x448   : > { %v6668_v63 = vld [vmem:[#allocation2 + $0xd8] sm:$0xff]  ;;  %5297 = vst.msk [vmem:[#allocation2 + $0xe8] sm:$0xff] %vm5267_vm0, %v5251_v1  ;;  %v4937_v24 = vmax.f32 %v4892_v32, 0.0  ;;  %v4841_v45 = vadd.f32 %v4741_v35, %v23543_v55  ;;  %16655 = vmatprep.mubr.msk.f32.mxu1 %vm5267_vm0, %v5384_v50 }
 0x449   : > { %16851 = vmatmul.mubr.msk.f32.gmra.mxu0 %vm5267_vm0, %v6668_v63  ;;  %v16575_v22 = vpop.f32.mrf.mxu0  ;;  %v23552_v35 = vld [vmem:[#allocation39_spill] sm:$0xff] }
 0x44a   : > { %v5252_v8 = vmul.f32 %v20251_v31, %v4937_v24  ;;  %v4893_v23 = vadd.f32 %v20322_v56, %v4841_v45 }
 0x44b   : > { %v4746_v7 = vpop.f32.mrf.mxu0  ;;  %v5385_v27 = vld [vmem:[#allocation2 + $0xdc] sm:$0xff] }
 0x44c   : > { %v6669_v48 = vld [vmem:[#allocation2 + $0xe0] sm:$0xff]  ;;  %5298 = vst.msk [vmem:[#allocation2 + $0xf0] sm:$0xff] %vm5267_vm0, %v5252_v8  ;;  %v4938_v43 = vmax.f32 %v4893_v23, 0.0  ;;  %v4842_v5 = vadd.f32 %v4746_v7, %v23544_v15  ;;  %16656 = vmatmul.mubr.msk.f32.gmra.mxu1 %vm5267_vm0, %v5385_v27  ;;  %v23553_v8 = vld [vmem:[#allocation42_spill] sm:$0xff] }
 0x44d   : > { %16853 = vmatprep.mubr.msk.f32.mxu0 %vm5267_vm0, %v6669_v48  ;;  %v16578_v17 = vpop.f32.mrf.mxu0  ;;  %v23554_v27 = vld [vmem:[#allocation41_spill] sm:$0xff] }
 0x44e   : > { %v5253_v52 = vmul.f32 %v23545_v20, %v4938_v43  ;;  %v4894_v38 = vadd.f32 %v20322_v56, %v4842_v5 }
 0x44f   : > { %v4751_v31 = vpop.f32.mrf.mxu0  ;;  %v5386_v2 = vld [vmem:[#allocation2 + $0xe4] sm:$0xff] }
 0x450   : > { %v6670_v14 = vld [vmem:[#allocation2 + $0xe8] sm:$0xff]  ;;  %5299 = vst.msk [vmem:[#allocation2 + $0xf8] sm:$0xff] %vm5267_vm0, %v5253_v52  ;;  %v4939_v34 = vmax.f32 %v4894_v38, 0.0  ;;  %v4843_v51 = vadd.f32 %v4751_v31, %v20257_v49  ;;  %16658 = vmatprep.mubr.msk.f32.mxu1 %vm5267_vm0, %v5386_v2  ;;  %v23555_v52 = vld [vmem:[#allocation44_spill] sm:$0xff]  ;;  %v23556_v2 = vld [vmem:[#allocation43_spill] sm:$0xff] }
 0x451   : > { %16854 = vmatmul.mubr.msk.f32.gmra.mxu0 %vm5267_vm0, %v6670_v14  ;;  %v16581_v12 = vpop.f32.mrf.mxu0 }
 0x452   : > { %v5254_v21 = vmul.f32 %v23546_v40, %v4939_v34  ;;  %v4895_v41 = vadd.f32 %v20322_v56, %v4843_v51 }
 0x453   : > { %v4756_v33 = vpop.f32.mrf.mxu0  ;;  %v5387_v60 = vld [vmem:[#allocation2 + $0xec] sm:$0xff] }
 0x454   : > { %v6671_v58 = vld [vmem:[#allocation2 + $0xf0] sm:$0xff]  ;;  %5300 = vst.msk [vmem:[#allocation2 + $0x100] sm:$0xff] %vm5267_vm0, %v5254_v21  ;;  %v4940_v46 = vmax.f32 %v4895_v41, 0.0  ;;  %v4844_v0 = vadd.f32 %v4756_v33, %v23547_v53  ;;  %16659 = vmatmul.mubr.msk.f32.gmra.mxu1 %vm5267_vm0, %v5387_v60  ;;  %v23557_v60 = vld [vmem:[#allocation45_spill] sm:$0xff] }
 0x455   : > { %16856 = vmatprep.mubr.msk.f32.mxu0 %vm5267_vm0, %v6671_v58  ;;  %v16584_v49 = vpop.f32.mrf.mxu0 }
 0x456   : > { %v5255_v26 = vmul.f32 %v23548_v18, %v4940_v46  ;;  %v4896_v29 = vadd.f32 %v20322_v56, %v4844_v0 }
 0x457   : > { %v4761_v16 = vpop.f32.mrf.mxu0  ;;  %v5388_v28 = vld [vmem:[#allocation2 + $0xf4] sm:$0xff] }
 0x458   : > { %v6672_v62 = vld [vmem:[#allocation2 + $0xf8] sm:$0xff]  ;;  %5301 = vst.msk [vmem:[#allocation2 + $0x108] sm:$0xff] %vm5267_vm0, %v5255_v26  ;;  %v4941_v9 = vmax.f32 %v4896_v29, 0.0  ;;  %v4845_v25 = vadd.f32 %v4761_v16, %v23549_v59  ;;  %16661 = vmatprep.mubr.msk.f32.mxu1 %vm5267_vm0, %v5388_v28  ;;  %v23558_v29 = vld [vmem:[#allocation46_spill] sm:$0xff] }
 0x459   : > { %16857 = vmatmul.mubr.msk.f32.gmra.mxu0 %vm5267_vm0, %v6672_v62  ;;  %v16587_v42 = vpop.f32.mrf.mxu0 }
 0x45a   : > { %v5256_v30 = vmul.f32 %v23550_v39, %v4941_v9  ;;  %v4897_v61 = vadd.f32 %v20322_v56, %v4845_v25  ;;  %v23559_v39 = vld [vmem:[#allocation47_spill] sm:$0xff] }
 0x45b   : > { %v4766_v54 = vpop.f32.mrf.mxu0  ;;  %v5389_v19 = vld [vmem:[#allocation2 + $0xfc] sm:$0xff] }
 0x45c   : > { %v6673_v11 = vld [vmem:[#allocation2 + $0x100] sm:$0xff]  ;;  %5302 = vst.msk [vmem:[#allocation2 + $0x110] sm:$0xff] %vm5267_vm0, %v5256_v30  ;;  %v4942_v44 = vmax.f32 %v4897_v61, 0.0  ;;  %v4846_v1 = vadd.f32 %v4766_v54, %v23551_v4  ;;  %16662 = vmatmul.mubr.msk.f32.gmra.mxu1 %vm5267_vm0, %v5389_v19 }
 0x45d   : > { %16859 = vmatprep.mubr.msk.f32.mxu0 %vm5267_vm0, %v6673_v11  ;;  %v16590_v32 = vpop.f32.mrf.mxu0 }
 0x45e   : > { %v5257_v50 = vmul.f32 %v23552_v35, %v4942_v44  ;;  %v4898_v63 = vadd.f32 %v20322_v56, %v4846_v1  ;;  %v23560_v1 = vld [vmem:[#allocation48_spill] sm:$0xff] }
 0x45f   : > { %v4771_v24 = vpop.f32.mrf.mxu0  ;;  %v5390_v55 = vld [vmem:[#allocation2 + $0x104] sm:$0xff] }
 0x460   : > { %v6674_v45 = vld [vmem:[#allocation2 + $0x108] sm:$0xff]  ;;  %5303 = vst.msk [vmem:[#allocation2 + $0x118] sm:$0xff] %vm5267_vm0, %v5257_v50  ;;  %v4943_v22 = vmax.f32 %v4898_v63, 0.0  ;;  %v4847_v23 = vadd.f32 %v4771_v24, %v23553_v8  ;;  %16664 = vmatprep.mubr.msk.f32.mxu1 %vm5267_vm0, %v5390_v55 }
 0x461   : > { %16860 = vmatmul.mubr.msk.f32.gmra.mxu0 %vm5267_vm0, %v6674_v45  ;;  %v16593_v7 = vpop.f32.mrf.mxu0  ;;  %v23561_v8 = vld [vmem:[#allocation49_spill] sm:$0xff] }
 0x462   : > { %v5258_v48 = vmul.f32 %v23554_v27, %v4943_v22  ;;  %v4899_v43 = vadd.f32 %v20322_v56, %v4847_v23 }
 0x463   : > { %v4776_v15 = vpop.f32.mrf.mxu0  ;;  %v5391_v5 = vld [vmem:[#allocation2 + $0x10c] sm:$0xff] }
 0x464   : > { %v6675_v17 = vld [vmem:[#allocation2 + $0x110] sm:$0xff]  ;;  %5304 = vst.msk [vmem:[#allocation2 + $0x120] sm:$0xff] %vm5267_vm0, %v5258_v48  ;;  %v4944_v20 = vmax.f32 %v4899_v43, 0.0  ;;  %v4848_v38 = vadd.f32 %v4776_v15, %v23555_v52  ;;  %16665 = vmatmul.mubr.msk.f32.gmra.mxu1 %vm5267_vm0, %v5391_v5  ;;  %v20608_v43 = vld [vmem:[#allocation2 + $0x1d] sm:$0xff] }
 0x465   : > { %16862 = vmatprep.mubr.msk.f32.mxu0 %vm5267_vm0, %v6675_v17  ;;  %v16596_v31 = vpop.f32.mrf.mxu0  ;;  %v20618_v17 = vld [vmem:[#allocation2 + $0x25] sm:$0xff] }
 0x466   : > { %v5259_v14 = vmul.f32 %v23556_v2, %v4944_v20  ;;  %v4900_v34 = vadd.f32 %v20322_v56, %v4848_v38  ;;  %v5215_v20 = vpop.permute.xlu1 %5214 }
 0x467   : > { %v4781_v51 = vpop.f32.mrf.mxu0  ;;  %v5392_v12 = vld [vmem:[#allocation2 + $0x114] sm:$0xff] }
 0x468   : > { %v6676_v40 = vld [vmem:[#allocation2 + $0x118] sm:$0xff]  ;;  %5305 = vst.msk [vmem:[#allocation2 + $0x128] sm:$0xff] %vm5267_vm0, %v5259_v14  ;;  %v4945_v21 = vmax.f32 %v4900_v34, 0.0  ;;  %v4849_v41 = vadd.f32 %v4781_v51, %v20313_v37  ;;  %16667 = vmatprep.mubr.msk.f32.mxu1 %vm5267_vm0, %v5392_v12  ;;  %v5220_v51 = vpop.permute.xlu0 %5219 }
 0x469   : > { %16863 = vmatmul.mubr.msk.f32.gmra.mxu0 %vm5267_vm0, %v6676_v40  ;;  %v16599_v33 = vpop.f32.mrf.mxu0  ;;  %v20630_v34 = vld [vmem:[#allocation2 + $0x35] sm:$0xff]  ;;  %v20634_v12 = vld [vmem:[#allocation2 + $0x3d] sm:$0xff]  ;;  %v20640_v40 = vld [vmem:[#allocation2 + $0x45] sm:$0xff] }
 0x46a   : > { %v5260_v58 = vmul.f32 %v23557_v60, %v4945_v21  ;;  %v4901_v46 = vadd.f32 %v20322_v56, %v4849_v41  ;;  %v20646_v21 = vld [vmem:[#allocation2 + $0x4d] sm:$0xff]  ;;  %v20658_v33 = vld [vmem:[#allocation2 + $0x55] sm:$0xff]  ;;  %v20662_v60 = vld [vmem:[#allocation2 + $0x5d] sm:$0xff] }
 0x46b   : > { %v4786_v53 = vpop.f32.mrf.mxu0  ;;  %v5393_v0 = vld [vmem:[#allocation2 + $0x11c] sm:$0xff]  ;;  %v13584_v41 = vld [vmem:[%s23464_s3 + $0xd0] sm:$0xff] }
 0x46c   : > { %v6677_v49 = vld [vmem:[#allocation2 + $0x120] sm:$0xff]  ;;  %5306 = vst.msk [vmem:[#allocation2 + $0x130] sm:$0xff] %vm5267_vm0, %v5260_v58  ;;  %v4946_v18 = vmax.f32 %v4901_v46, 0.0  ;;  %v4850_v26 = vadd.f32 %v4786_v53, %v20318_v3  ;;  %16668 = vmatmul.mubr.msk.f32.gmra.mxu1 %vm5267_vm0, %v5393_v0  ;;  %v20667_v58 = vld [vmem:[%s23464_s3 + $0x48] sm:$0xff]  ;;  %v20686_v53 = vld [vmem:[#allocation2 + $0x75] sm:$0xff] }
 0x46d   : > { %16865 = vmatprep.mubr.msk.f32.mxu0 %vm5267_vm0, %v6677_v49  ;;  %v16602_v37 = vpop.f32.mrf.mxu0  ;;  %v20680_v46 = vld [vmem:[#allocation2 + $0x6d] sm:$0xff]  ;;  %v20692_v0 = vld [vmem:[#allocation2 + $0x7d] sm:$0xff]  ;;  %v20698_v49 = vld [vmem:[#allocation2 + $0x85] sm:$0xff] }
 0x46e   : > { %v5261_v16 = vmul.f32 %v23558_v29, %v4946_v18  ;;  %v4902_v28 = vadd.f32 %v20322_v56, %v4850_v26  ;;  %v20704_v18 = vld [vmem:[#allocation2 + $0x8d] sm:$0xff]  ;;  %v20710_v26 = vld [vmem:[#allocation2 + $0x95] sm:$0xff]  ;;  %v20722_v29 = vld [vmem:[#allocation2 + $0x9d] sm:$0xff] }
 0x46f   : > { %v4791_v62 = vpop.f32.mrf.mxu0  ;;  %v5394_v9 = vld [vmem:[#allocation2 + $0x124] sm:$0xff]  ;;  %v20715_v37 = vld [vmem:[%s23464_s3 + $0x98] sm:$0xff] }
 0x470   : > { %v6678_v59 = vld [vmem:[#allocation2 + $0x128] sm:$0xff]  ;;  %5307 = vst.msk [vmem:[#allocation2 + $0x138] sm:$0xff] %vm5267_vm0, %v5261_v16  ;;  %v4947_v25 = vmax.f32 %v4902_v28, 0.0  ;;  %v4851_v42 = vadd.f32 %v4791_v62, %v20324_v10  ;;  %16670 = vmatprep.mubr.msk.f32.mxu1 %vm5267_vm0, %v5394_v9  ;;  %v20740_v62 = vld [vmem:[#allocation2 + $0xb5] sm:$0xff]  ;;  %v20746_v9 = vld [vmem:[#allocation2 + $0xbd] sm:$0xff] }
 0x471   : > { %16866 = vmatmul.mubr.msk.f32.gmra.mxu0 %vm5267_vm0, %v6678_v59  ;;  %v16605_v3 = vpop.f32.mrf.mxu0  ;;  %v20728_v16 = vld [vmem:[#allocation2 + $0xa5] sm:$0xff]  ;;  %v20734_v28 = vld [vmem:[#allocation2 + $0xad] sm:$0xff] }
 0x472   : > { %v5262_v30 = vmul.f32 %v23559_v39, %v4947_v25  ;;  %v4903_v61 = vadd.f32 %v20322_v56, %v4851_v42  ;;  %v20752_v59 = vld [vmem:[#allocation2 + $0xc5] sm:$0xff]  ;;  %v20758_v25 = vld [vmem:[#allocation2 + $0xcd] sm:$0xff]  ;;  %v20764_v42 = vld [vmem:[#allocation2 + $0xd5] sm:$0xff] }
 0x473   : > { %v4796_v54 = vpop.f32.mrf.mxu0  ;;  %v5395_v19 = vld [vmem:[#allocation2 + $0x12c] sm:$0xff]  ;;  %v20770_v3 = vld [vmem:[#allocation2 + $0xdd] sm:$0xff] }
 0x474   : > { %v6679_v11 = vld [vmem:[#allocation2 + $0x130] sm:$0xff]  ;;  %5308 = vst.msk [vmem:[#allocation2 + $0x140] sm:$0xff] %vm5267_vm0, %v5262_v30  ;;  %v4948_v44 = vmax.f32 %v4903_v61, 0.0  ;;  %v4852_v4 = vadd.f32 %v4796_v54, %v20330_v57  ;;  %16671 = vmatmul.mubr.msk.f32.gmra.mxu1 %vm5267_vm0, %v5395_v19  ;;  %v20776_v39 = vld [vmem:[#allocation2 + $0xe5] sm:$0xff]  ;;  %v20794_v54 = vld [vmem:[#allocation2 + $0xfd] sm:$0xff] }
 0x475   : > { %16868 = vmatprep.mubr.msk.f32.mxu0 %vm5267_vm0, %v6679_v11  ;;  %v16608_v10 = vpop.f32.mrf.mxu0  ;;  %v20602_v57 = vld [vmem:[#allocation2 + $0x15] sm:$0xff]  ;;  %v20782_v30 = vld [vmem:[#allocation2 + $0xed] sm:$0xff]  ;;  %v20800_v19 = vld [vmem:[#allocation2 + $0x105] sm:$0xff] }
 0x476   : > { %v5263_v32 = vmul.f32 %v23560_v1, %v4948_v44  ;;  %v4904_v35 = vadd.f32 %v20322_v56, %v4852_v4  ;;  %v20788_v61 = vld [vmem:[#allocation2 + $0xf5] sm:$0xff]  ;;  %v20806_v11 = vld [vmem:[#allocation2 + $0x10d] sm:$0xff]  ;;  %v20818_v4 = vld [vmem:[#allocation2 + $0x11d] sm:$0xff] }
 0x477   : > { %v4801_v50 = vpop.f32.mrf.mxu0  ;;  %v5396_v63 = vld [vmem:[#allocation2 + $0x134] sm:$0xff]  ;;  %v20824_v10 = vld [vmem:[#allocation2 + $0x125] sm:$0xff] }
 0x478   : > { %v6680_v24 = vld [vmem:[#allocation2 + $0x138] sm:$0xff]  ;;  %5309 = vst.msk [vmem:[#allocation2 + $0x148] sm:$0xff] %vm5267_vm0, %v5263_v32  ;;  %v4949_v55 = vmax.f32 %v4904_v35, 0.0  ;;  %v4853_v45 = vadd.f32 %v4801_v50, %v20335_v47  ;;  %16673 = vmatprep.mubr.msk.f32.mxu1 %vm5267_vm0, %v5396_v63  ;;  %v13795_v47 = vld [vmem:[%s23464_s3 + $0xc0] sm:$0xff]  ;;  %v20830_v1 = vld [vmem:[#allocation2 + $0x12d] sm:$0xff] }
 0x479   : > { %16869 = vmatmul.mubr.msk.f32.gmra.mxu0 %vm5267_vm0, %v6680_v24  ;;  %v16611_v22 = vpop.f32.mrf.mxu0  ;;  %v20812_v44 = vld [vmem:[#allocation2 + $0x115] sm:$0xff] }
 0x47a   : > { %16939 = vmatprep.mubr.msk.f32.mxu0 %vm5267_vm0, %v20602_v57  ;;  %v5264_v23 = vmul.f32 %v23561_v8, %v4949_v55  ;;  %v4905_v7 = vadd.f32 %v20322_v56, %v4853_v45  ;;  %v20836_v32 = vld [vmem:[#allocation2 + $0x135] sm:$0xff]  ;;  %v8560_v55 = vld [vmem:[#allocation2 + $0x2] sm:$0xff]  ;;  %v8561_v22 = vld [vmem:[#allocation2 + $0xa] sm:$0xff] }
 0x47b   : > { %v4806_v27 = vpop.f32.mrf.mxu0  ;;  %v5397_v48 = vld [vmem:[#allocation2 + $0x13c] sm:$0xff] }
 0x47c   : > { %5310 = vst.msk [vmem:[#allocation2 + $0x150] sm:$0xff] %vm5267_vm0, %v5264_v23  ;;  %v4950_v15 = vmax.f32 %v4905_v7, 0.0  ;;  %v4854_v5 = vadd.f32 %v4806_v27, %v20340_v36  ;;  %16674 = vmatmul.mubr.msk.f32.gmra.mxu1 %vm5267_vm0, %v5397_v48  ;;  %v20624_v36 = vld [vmem:[#allocation2 + $0x2d] sm:$0xff]  ;;  %v20842_v35 = vld [vmem:[#allocation2 + $0x13d] sm:$0xff] }
 0x47d   : > { %16940 = vmatmul.mubr.msk.f32.vlgmr.msra.gmra.mxu0 %vm5267_vm0, %v20608_v43  ;;  %v16614_v52 = vpop.f32.mrf.mxu0  ;;  %v8562_v23 = vld [vmem:[#allocation2 + $0x12] sm:$0xff]  ;;  %v8563_v27 = vld [vmem:[#allocation2 + $0x1a] sm:$0xff] }
 0x47e   : > { %16942 = vmatprep.mubr.msk.f32.mxu0 %vm5267_vm0, %v20618_v17  ;;  %17064 = vmatpush3.msra.mxu0 %v20527_v6  ;;  %v5265_v38 = vmul.f32 %v5215_v20, %v4950_v15  ;;  %v4906_v31 = vadd.f32 %v20322_v56, %v4854_v5  ;;  %v13878_v7 = vld [vmem:[%s23464_s3 + $0x90] sm:$0xff]  ;;  %v20894_v52 = vld [vmem:[#allocation2 + $0x1] sm:$0xff] }
 0x47f   : > { %17065 = vmatprep.subr.mxu0 %v13795_v47  ;;  %v5398_v2 = vld [vmem:[#allocation2 + $0x144] sm:$0xff] }
 0x480   : > { %17066 = vmatpush3.msra.mxu0 %v13795_v47  ;;  %5311 = vst.msk [vmem:[#allocation2 + $0x158] sm:$0xff] %vm5267_vm0, %v5265_v38  ;;  %v4951_v14 = vmax.f32 %v4906_v31, 0.0  ;;  %16676 = vmatprep.mubr.msk.f32.mxu1 %vm5267_vm0, %v5398_v2  ;;  %v20848_v50 = vld [vmem:[#allocation2 + $0x145] sm:$0xff]  ;;  %v8566_v38 = vld [vmem:[#allocation2 + $0x32] sm:$0xff] }
 0x481   : > { %16943 = vmatmul.mubr.msk.f32.gmra.mxu0 %vm5267_vm0, %v20624_v36  ;;  %17191 = vmatprep.subr.mxu0 %v20715_v37  ;;  %v8564_v47 = vld [vmem:[#allocation2 + $0x22] sm:$0xff]  ;;  %v8565_v20 = vld [vmem:[#allocation2 + $0x2a] sm:$0xff] }
 0x482   : > { %16945 = vmatprep.mubr.msk.f32.mxu0 %vm5267_vm0, %v20630_v34  ;;  %v5266_v56 = vmul.f32 %v5220_v51, %v4951_v14  ;;  %v20903_v14 = vld [vmem:[#allocation2 + $0x9] sm:$0xff]  ;;  %v8567_v51 = vld [vmem:[#allocation2 + $0x3a] sm:$0xff] }
 0x483   : > { %v5399_v6 = vld [vmem:[#allocation2 + $0x14c] sm:$0xff] }
 0x484   : > { %5312 = vst.msk [vmem:[#allocation2 + $0x160] sm:$0xff] %vm5267_vm0, %v5266_v56  ;;  %16677 = vmatmul.mubr.msk.f32.gmra.mxu1 %vm5267_vm0, %v5399_v6  ;;  %v20856_v24 = vld [vmem:[#allocation2 + $0x14d] sm:$0xff]  ;;  %v13671_v56 = vld [vmem:[%s23464_s3 + $0x40] sm:$0xff] }
 0x485   : > { %16946 = vmatmul.mubr.msk.f32.gmra.mxu0 %vm5267_vm0, %v20634_v12  ;;  %16683 = vmatprep.mubr.msk.f32.mxu1 %vm5267_vm0, %v20602_v57 }
 0x486   : > { %16948 = vmatprep.mubr.msk.f32.mxu0 %vm5267_vm0, %v20640_v40 }
 0x488   : > { %16684 = vmatmul.mubr.msk.f32.vlgmr.msra.gmra.mxu1 %vm5267_vm0, %v20608_v43 }
 0x489   : > { %16949 = vmatmul.mubr.msk.f32.gmra.mxu0 %vm5267_vm0, %v20646_v21  ;;  %16686 = vmatprep.mubr.msk.f32.mxu1 %vm5267_vm0, %v20618_v17 }
 0x48a   : > { %16744 = vmatpush3.msra.mxu1 %v20425_v13  ;;  %16951 = vmatprep.mubr.msk.f32.mxu0 %vm5267_vm0, %v20658_v33  ;;  %v20673_v13 = vld [vmem:[#allocation2 + $0x65] sm:$0xff] }
 0x48b   : > { %16745 = vmatprep.subr.mxu1 %v13584_v41 }
 0x48c   : > { %16746 = vmatpush3.msra.mxu1 %v13584_v41 }
 0x48d   : > { %16687 = vmatmul.mubr.msk.f32.gmra.mxu1 %vm5267_vm0, %v20624_v36  ;;  %16952 = vmatmul.mubr.msk.f32.gmra.mxu0 %vm5267_vm0, %v20662_v60 }
 0x48e   : > { %16689 = vmatprep.mubr.msk.f32.mxu1 %vm5267_vm0, %v20630_v34  ;;  %16954 = vmatprep.mubr.msk.f32.mxu0 %vm5267_vm0, %v20673_v13 }
 0x48f   : > { %16871 = vmatprep.subr.mxu1 %v20667_v58 }
 0x491   : > { %16690 = vmatmul.mubr.msk.f32.gmra.mxu1 %vm5267_vm0, %v20634_v12  ;;  %16955 = vmatmul.mubr.msk.f32.gmra.mxu0 %vm5267_vm0, %v20680_v46 }
 0x492   : > { %16692 = vmatprep.mubr.msk.f32.mxu1 %vm5267_vm0, %v20640_v40  ;;  %16957 = vmatprep.mubr.msk.f32.mxu0 %vm5267_vm0, %v20686_v53 }
 0x495   : > { %16693 = vmatmul.mubr.msk.f32.gmra.mxu1 %vm5267_vm0, %v20646_v21  ;;  %16958 = vmatmul.mubr.msk.f32.gmra.mxu0 %vm5267_vm0, %v20692_v0 }
 0x496   : > { %16695 = vmatprep.mubr.msk.f32.mxu1 %vm5267_vm0, %v20658_v33  ;;  %16960 = vmatprep.mubr.msk.f32.mxu0 %vm5267_vm0, %v20698_v49 }
 0x499   : > { %16696 = vmatmul.mubr.msk.f32.gmra.mxu1 %vm5267_vm0, %v20662_v60  ;;  %16961 = vmatmul.mubr.msk.f32.gmra.mxu0 %vm5267_vm0, %v20704_v18 }
 0x49a   : > { %16698 = vmatprep.mubr.msk.f32.mxu1 %vm5267_vm0, %v20673_v13  ;;  %16963 = vmatprep.mubr.msk.f32.mxu0 %vm5267_vm0, %v20710_v26 }
 0x49d   : > { %16699 = vmatmul.mubr.msk.f32.gmra.mxu1 %vm5267_vm0, %v20680_v46  ;;  %16964 = vmatmul.mubr.msk.f32.gmra.mxu0 %vm5267_vm0, %v20722_v29 }
 0x49e   : > { %16701 = vmatprep.mubr.msk.f32.mxu1 %vm5267_vm0, %v20686_v53  ;;  %16966 = vmatprep.mubr.msk.f32.mxu0 %vm5267_vm0, %v20728_v16 }
 0x4a0   : > { %v20854_v63 = vpop.f32.mrf.mxu0 }
 0x4a1   : > { %16702 = vmatmul.mubr.msk.f32.gmra.mxu1 %vm5267_vm0, %v20692_v0  ;;  %16967 = vmatmul.mubr.msk.f32.gmra.mxu0 %vm5267_vm0, %v20734_v28  ;;  %23562 = vst [vmem:[#allocation10_spill] sm:$0xff] %v20854_v63  ;;  %v8579_v63 = vld [vmem:[#allocation2 + $0x9a] sm:$0xff] }
 0x4a2   : > { %16704 = vmatprep.mubr.msk.f32.mxu1 %vm5267_vm0, %v20698_v49  ;;  %16969 = vmatprep.mubr.msk.f32.mxu0 %vm5267_vm0, %v20740_v62  ;;  %v20865_v45 = vpop.f32.mrf.mxu0 }
 0x4a3   : > { %23563 = vst [vmem:[#allocation11_spill] sm:$0xff] %v20865_v45  ;;  %v8578_v45 = vld [vmem:[#allocation2 + $0x92] sm:$0xff] }
 0x4a5   : > { %16705 = vmatmul.mubr.msk.f32.gmra.mxu1 %vm5267_vm0, %v20704_v18  ;;  %16970 = vmatmul.mubr.msk.f32.gmra.mxu0 %vm5267_vm0, %v20746_v9 }
 0x4a6   : > { %16707 = vmatprep.mubr.msk.f32.mxu1 %vm5267_vm0, %v20710_v26  ;;  %16972 = vmatprep.mubr.msk.f32.mxu0 %vm5267_vm0, %v20752_v59 }
 0x4a9   : > { %16708 = vmatmul.mubr.msk.f32.gmra.mxu1 %vm5267_vm0, %v20722_v29  ;;  %16973 = vmatmul.mubr.msk.f32.gmra.mxu0 %vm5267_vm0, %v20758_v25  ;;  %v20867_v8 = vpop.f32.mrf.mxu0 }
 0x4aa   : > { %16710 = vmatprep.mubr.msk.f32.mxu1 %vm5267_vm0, %v20728_v16  ;;  %16975 = vmatprep.mubr.msk.f32.mxu0 %vm5267_vm0, %v20764_v42  ;;  %23564 = vst [vmem:[#allocation12_spill] sm:$0xff] %v20867_v8  ;;  %v8574_v8 = vld [vmem:[#allocation2 + $0x72] sm:$0xff] }
 0x4ab   : > { %v20879_v48 = vpop.f32.mrf.mxu0 }
 0x4ac   : > { %23565 = vst [vmem:[#allocation17_spill] sm:$0xff] %v20879_v48  ;;  %v20887_v15 = vpop.f32.mrf.mxu1 }
 0x4ad   : > { %16711 = vmatmul.mubr.msk.f32.gmra.mxu1 %vm5267_vm0, %v20734_v28  ;;  %16976 = vmatmul.mubr.msk.f32.gmra.mxu0 %vm5267_vm0, %v20770_v3  ;;  %23566 = vst [vmem:[#allocation13_spill] sm:$0xff] %v20887_v15  ;;  %v8580_v15 = vld [vmem:[#allocation2 + $0xa2] sm:$0xff] }
 0x4ae   : > { %16713 = vmatprep.mubr.msk.f32.mxu1 %vm5267_vm0, %v20740_v62  ;;  %16978 = vmatprep.mubr.msk.f32.mxu0 %vm5267_vm0, %v20776_v39  ;;  %v20899_v31 = vpop.f32.mrf.mxu1 }
 0x4af   : > { %23568 = vst [vmem:[#allocation15_spill] sm:$0xff] %v20899_v31 }
 0x4b1   : > { %16714 = vmatmul.mubr.msk.f32.gmra.mxu1 %vm5267_vm0, %v20746_v9  ;;  %16979 = vmatmul.mubr.msk.f32.gmra.mxu0 %vm5267_vm0, %v20782_v30  ;;  %v20889_v5 = vpop.f32.mrf.mxu0 }
 0x4b2   : > { %16716 = vmatprep.mubr.msk.f32.mxu1 %vm5267_vm0, %v20752_v59  ;;  %16981 = vmatprep.mubr.msk.f32.mxu0 %vm5267_vm0, %v20788_v61  ;;  %23567 = vst [vmem:[#allocation14_spill] sm:$0xff] %v20889_v5 }
 0x4b3   : > { %v20901_v2 = vpop.f32.mrf.mxu0 }
 0x4b4   : > { %23569 = vst [vmem:[#allocation16_spill] sm:$0xff] %v20901_v2  ;;  %v20908_v6 = vpop.f32.mrf.mxu1  ;;  %v8573_v2 = vld [vmem:[#allocation2 + $0x6a] sm:$0xff] }
 0x4b5   : > { %16717 = vmatmul.mubr.msk.f32.gmra.mxu1 %vm5267_vm0, %v20758_v25  ;;  %16982 = vmatmul.mubr.msk.f32.gmra.mxu0 %vm5267_vm0, %v20794_v54  ;;  %23570 = vst [vmem:[#allocation21_spill] sm:$0xff] %v20908_v6 }
 0x4b6   : > { %16719 = vmatprep.mubr.msk.f32.mxu1 %vm5267_vm0, %v20764_v42  ;;  %16984 = vmatprep.mubr.msk.f32.mxu0 %vm5267_vm0, %v20800_v19 }
 0x4b9   : > { %16720 = vmatmul.mubr.msk.f32.gmra.mxu1 %vm5267_vm0, %v20770_v3  ;;  %16985 = vmatmul.mubr.msk.f32.gmra.mxu0 %vm5267_vm0, %v20806_v11  ;;  %v20910_v41 = vpop.f32.mrf.mxu0 }
 0x4ba   : > { %16722 = vmatprep.mubr.msk.f32.mxu1 %vm5267_vm0, %v20776_v39  ;;  %16987 = vmatprep.mubr.msk.f32.mxu0 %vm5267_vm0, %v20812_v44  ;;  %23571 = vst [vmem:[#allocation18_spill] sm:$0xff] %v20910_v41  ;;  %v20959_v41 = vld [vmem:[#allocation2 + $0x39] sm:$0xff] }
 0x4bd   : > { %16723 = vmatmul.mubr.msk.f32.gmra.mxu1 %vm5267_vm0, %v20782_v30  ;;  %16988 = vmatmul.mubr.msk.f32.gmra.mxu0 %vm5267_vm0, %v20818_v4 }
 0x4be   : > { %16725 = vmatprep.mubr.msk.f32.mxu1 %vm5267_vm0, %v20788_v61  ;;  %16990 = vmatprep.mubr.msk.f32.mxu0 %vm5267_vm0, %v20824_v10 }
 0x4c1   : > { %16726 = vmatmul.mubr.msk.f32.gmra.mxu1 %vm5267_vm0, %v20794_v54  ;;  %16991 = vmatmul.mubr.msk.f32.gmra.mxu0 %vm5267_vm0, %v20830_v1 }
 0x4c2   : > { %16728 = vmatprep.mubr.msk.f32.mxu1 %vm5267_vm0, %v20800_v19  ;;  %16993 = vmatprep.mubr.msk.f32.mxu0 %vm5267_vm0, %v20836_v32 }
 0x4c5   : > { %16729 = vmatmul.mubr.msk.f32.gmra.mxu1 %vm5267_vm0, %v20806_v11  ;;  %16994 = vmatmul.mubr.msk.f32.gmra.mxu0 %vm5267_vm0, %v20842_v35 }
 0x4c6   : > { %16731 = vmatprep.mubr.msk.f32.mxu1 %vm5267_vm0, %v20812_v44  ;;  %16996 = vmatprep.mubr.msk.f32.mxu0 %vm5267_vm0, %v20848_v50 }
 0x4c9   : > { %16732 = vmatmul.mubr.msk.f32.gmra.mxu1 %vm5267_vm0, %v20818_v4  ;;  %16997 = vmatmul.mubr.msk.f32.gmra.mxu0 %vm5267_vm0, %v20856_v24 }
 0x4ca   : > { %16734 = vmatprep.mubr.msk.f32.mxu1 %vm5267_vm0, %v20824_v10  ;;  %17067 = vmatprep.mubr.msk.f32.mxu0 %vm5267_vm0, %v8560_v55  ;;  %v8568_v55 = vld [vmem:[#allocation2 + $0x42] sm:$0xff] }
 0x4cd   : > { %16735 = vmatmul.mubr.msk.f32.gmra.mxu1 %vm5267_vm0, %v20830_v1  ;;  %17068 = vmatmul.mubr.msk.f32.vlgmr.msra.gmra.mxu0 %vm5267_vm0, %v8561_v22  ;;  %v20921_v22 = vld [vmem:[#allocation2 + $0x19] sm:$0xff] }
 0x4ce   : > { %16737 = vmatprep.mubr.msk.f32.mxu1 %vm5267_vm0, %v20836_v32  ;;  %17070 = vmatprep.mubr.msk.f32.mxu0 %vm5267_vm0, %v8562_v23  ;;  %v8569_v23 = vld [vmem:[#allocation2 + $0x4a] sm:$0xff] }
 0x4cf   : > { %17192 = vmatpush3.msra.mxu0 %v20715_v37  ;;  %v20915_v37 = vld [vmem:[#allocation2 + $0x11] sm:$0xff] }
 0x4d0   : > { %17193 = vmatprep.subr.mxu0 %v13878_v7 }
 0x4d1   : > { %16738 = vmatmul.mubr.msk.f32.gmra.mxu1 %vm5267_vm0, %v20842_v35  ;;  %17071 = vmatmul.mubr.msk.f32.gmra.mxu0 %vm5267_vm0, %v8563_v27  ;;  %v20928_v27 = vpop.f32.mrf.mxu1 }
 0x4d2   : > { %16740 = vmatprep.mubr.msk.f32.mxu1 %vm5267_vm0, %v20848_v50  ;;  %17073 = vmatprep.mubr.msk.f32.mxu0 %vm5267_vm0, %v8564_v47  ;;  %23572 = vst [vmem:[#allocation19_spill] sm:$0xff] %v20928_v27  ;;  %v20930_v47 = vpop.f32.mrf.mxu0  ;;  %v21011_v27 = vld [vmem:[#allocation2 + $0x69] sm:$0xff] }
 0x4d3   : > { %17194 = vmatpush3.msra.mxu0 %v13878_v7  ;;  %v20926_v7 = vld [vmem:[%s23464_s3 + $0xe8] sm:$0xff]  ;;  %23573 = vst [vmem:[#allocation20_spill] sm:$0xff] %v20930_v47  ;;  %23587 = vst [vmem:[#allocation35_spill] sm:$0xff] %v21011_v27 }
 0x4d4   : > { %v8572_v47 = vld [vmem:[#allocation2 + $0x62] sm:$0xff] }
 0x4d5   : > { %16741 = vmatmul.mubr.msk.f32.gmra.mxu1 %vm5267_vm0, %v20856_v24  ;;  %17074 = vmatmul.mubr.msk.f32.gmra.mxu0 %vm5267_vm0, %v8565_v20  ;;  %v8570_v20 = vld [vmem:[#allocation2 + $0x52] sm:$0xff] }
 0x4d6   : > { %16747 = vmatprep.mubr.msk.f32.mxu1 %vm5267_vm0, %v20894_v52  ;;  %17076 = vmatprep.mubr.msk.f32.mxu0 %vm5267_vm0, %v8566_v38  ;;  %v20940_v38 = vpop.f32.mrf.mxu1 }
 0x4d7   : > { %23574 = vst [vmem:[#allocation22_spill] sm:$0xff] %v20940_v38  ;;  %v8577_v38 = vld [vmem:[#allocation2 + $0x8a] sm:$0xff] }
 0x4d9   : > { %16748 = vmatmul.mubr.msk.f32.vlgmr.msra.gmra.mxu1 %vm5267_vm0, %v20903_v14  ;;  %17077 = vmatmul.mubr.msk.f32.gmra.mxu0 %vm5267_vm0, %v8567_v51  ;;  %v20942_v51 = vpop.f32.mrf.mxu0 }
 0x4da   : > { %16750 = vmatprep.mubr.msk.f32.mxu1 %vm5267_vm0, %v20915_v37  ;;  %16872 = vmatpush3.msra.mxu1 %v20667_v58  ;;  %v20935_v58 = vld [vmem:[#allocation2 + $0x21] sm:$0xff]  ;;  %23575 = vst [vmem:[#allocation25_spill] sm:$0xff] %v20942_v51 }
 0x4db   : > { %17079 = vmatprep.mubr.msk.f32.mxu0 %vm5267_vm0, %v8568_v55  ;;  %16873 = vmatprep.subr.mxu1 %v13671_v56  ;;  %v8571_v55 = vld [vmem:[#allocation2 + $0x5a] sm:$0xff]  ;;  %v20957_v51 = vpop.f32.mrf.mxu0 }
 0x4dc   : > { %16874 = vmatpush3.msra.mxu1 %v13671_v56  ;;  %v20945_v56 = vld [vmem:[#allocation2 + $0x29] sm:$0xff]  ;;  %23577 = vst [vmem:[#allocation24_spill] sm:$0xff] %v20957_v51  ;;  %v8575_v51 = vld [vmem:[#allocation2 + $0x7a] sm:$0xff] }
 0x4dd   : > { %16751 = vmatmul.mubr.msk.f32.gmra.mxu1 %vm5267_vm0, %v20921_v22  ;;  %17080 = vmatmul.mubr.msk.f32.gmra.mxu0 %vm5267_vm0, %v8569_v23  ;;  %v20950_v23 = vld [vmem:[#allocation2 + $0x31] sm:$0xff]  ;;  %v20963_v48 = vpop.f32.mrf.mxu0 }
 0x4de   : > { %16753 = vmatprep.mubr.msk.f32.mxu1 %vm5267_vm0, %v20935_v58  ;;  %17082 = vmatprep.mubr.msk.f32.mxu0 %vm5267_vm0, %v8570_v20  ;;  %v20955_v20 = vpop.f32.mrf.mxu1  ;;  %23579 = vst [vmem:[#allocation27_spill] sm:$0xff] %v20963_v48  ;;  %v8576_v48 = vld [vmem:[#allocation2 + $0x82] sm:$0xff] }
 0x4df   : > { %16999 = vmatprep.subr.mxu1 %v20926_v7  ;;  %23576 = vst [vmem:[#allocation23_spill] sm:$0xff] %v20955_v20 }
 0x4e0   : > { %v20961_v5 = vpop.f32.mrf.mxu1 }
 0x4e1   : > { %16754 = vmatmul.mubr.msk.f32.gmra.mxu1 %vm5267_vm0, %v20945_v56  ;;  %17083 = vmatmul.mubr.msk.f32.gmra.mxu0 %vm5267_vm0, %v8571_v55  ;;  %23578 = vst [vmem:[#allocation26_spill] sm:$0xff] %v20961_v5  ;;  %v20968_v55 = vld [vmem:[#allocation2 + $0x41] sm:$0xff]  ;;  %v20977_v5 = vpop.f32.mrf.mxu0 }
 0x4e2   : > { %16756 = vmatprep.mubr.msk.f32.mxu1 %vm5267_vm0, %v20950_v23  ;;  %17085 = vmatprep.mubr.msk.f32.mxu0 %vm5267_vm0, %v8572_v47  ;;  %v20973_v47 = vld [vmem:[#allocation2 + $0x49] sm:$0xff]  ;;  %v20975_v20 = vpop.f32.mrf.mxu1  ;;  %23581 = vst [vmem:[#allocation28_spill] sm:$0xff] %v20977_v5 }
 0x4e3   : > { %23580 = vst [vmem:[#allocation29_spill] sm:$0xff] %v20975_v20  ;;  %v20994_v5 = vpop.f32.mrf.mxu0 }
 0x4e4   : > { %v20992_v20 = vpop.f32.mrf.mxu1  ;;  %23583 = vst [vmem:[#allocation31_spill] sm:$0xff] %v20994_v5 }
 0x4e5   : > { %16757 = vmatmul.mubr.msk.f32.gmra.mxu1 %vm5267_vm0, %v20959_v41  ;;  %17086 = vmatmul.mubr.msk.f32.gmra.mxu0 %vm5267_vm0, %v8573_v2  ;;  %v20982_v2 = vld [vmem:[#allocation2 + $0x51] sm:$0xff]  ;;  %23582 = vst [vmem:[#allocation30_spill] sm:$0xff] %v20992_v20  ;;  %v21009_v5 = vpop.f32.mrf.mxu0 }
 0x4e6   : > { %16759 = vmatprep.mubr.msk.f32.mxu1 %vm5267_vm0, %v20968_v55  ;;  %17088 = vmatprep.mubr.msk.f32.mxu0 %vm5267_vm0, %v8574_v8  ;;  %v20990_v8 = vld [vmem:[%s23464_s3 + $0x38] sm:$0xff]  ;;  %v21007_v20 = vpop.f32.mrf.mxu1  ;;  %23586 = vst [vmem:[#allocation34_spill] sm:$0xff] %v21009_v5  ;;  %v8581_v5 = vld [vmem:[#allocation2 + $0xaa] sm:$0xff] }
 0x4e7   : > { %17319 = vmatprep.subr.mxu0 %v20990_v8  ;;  %23585 = vst [vmem:[#allocation33_spill] sm:$0xff] %v21007_v20  ;;  %v21015_v31 = vpop.f32.mrf.mxu0 }
 0x4e8   : > { %v21013_v6 = vpop.f32.mrf.mxu1  ;;  %23589 = vst [vmem:[#allocation37_spill] sm:$0xff] %v21015_v31  ;;  %v8582_v31 = vld [vmem:[#allocation2 + $0xb2] sm:$0xff] }
 0x4e9   : > { %16760 = vmatmul.mubr.msk.f32.gmra.mxu1 %vm5267_vm0, %v20973_v47  ;;  %17089 = vmatmul.mubr.msk.f32.gmra.mxu0 %vm5267_vm0, %v8575_v51  ;;  %v20997_v51 = vld [vmem:[#allocation2 + $0x59] sm:$0xff]  ;;  %23588 = vst [vmem:[#allocation36_spill] sm:$0xff] %v21013_v6  ;;  %v21029_v6 = vpop.f32.mrf.mxu0 }
 0x4ea   : > { %16762 = vmatprep.mubr.msk.f32.mxu1 %vm5267_vm0, %v20982_v2  ;;  %17091 = vmatprep.mubr.msk.f32.mxu0 %vm5267_vm0, %v8576_v48  ;;  %v21002_v48 = vld [vmem:[#allocation2 + $0x61] sm:$0xff]  ;;  %v21027_v20 = vpop.f32.mrf.mxu1  ;;  %23593 = vst [vmem:[#allocation42_spill] sm:$0xff] %v21029_v6  ;;  %v6191_v6 = vld [vmem:[#allocation2 + $0x91] sm:$0xff] }
 0x4eb   : > { %23584 = vst [vmem:[#allocation32_spill] sm:$0xff] %v21002_v48  ;;  %23592 = vst [vmem:[#allocation39_spill] sm:$0xff] %v21027_v20  ;;  %v6190_v20 = vld [vmem:[#allocation2 + $0x89] sm:$0xff] }
 0x4ed   : > { %16763 = vmatmul.mubr.msk.f32.gmra.mxu1 %vm5267_vm0, %v20997_v51  ;;  %17092 = vmatmul.mubr.msk.f32.gmra.mxu0 %vm5267_vm0, %v8577_v38  ;;  %v21020_v38 = vld [vmem:[#allocation2 + $0x71] sm:$0xff] }
 0x4ee   : > { %16765 = vmatprep.mubr.msk.f32.mxu1 %vm5267_vm0, %v21002_v48  ;;  %17094 = vmatprep.mubr.msk.f32.mxu0 %vm5267_vm0, %v8578_v45  ;;  %23590 = vst [vmem:[#allocation38_spill] sm:$0xff] %v21020_v38  ;;  %v21025_v45 = vld [vmem:[#allocation2 + $0x79] sm:$0xff] }
 0x4ef   : > { %23591 = vst [vmem:[#allocation40_spill] sm:$0xff] %v21025_v45 }
 0x4f1   : > { %16766 = vmatmul.mubr.msk.f32.gmra.mxu1 %vm5267_vm0, %v21011_v27  ;;  %17095 = vmatmul.mubr.msk.f32.gmra.mxu0 %vm5267_vm0, %v8579_v63  ;;  %v21034_v63 = vld [vmem:[#allocation2 + $0x81] sm:$0xff] }
 0x4f2   : > { %16768 = vmatprep.mubr.msk.f32.mxu1 %vm5267_vm0, %v21020_v38  ;;  %17097 = vmatprep.mubr.msk.f32.mxu0 %vm5267_vm0, %v8580_v15  ;;  %23594 = vst [vmem:[#allocation41_spill] sm:$0xff] %v21034_v63  ;;  %v21039_v15 = vpop.f32.mrf.mxu1  ;;  %v21041_v38 = vpop.f32.mrf.mxu0  ;;  %v8583_v27 = vld [vmem:[#allocation2 + $0xba] sm:$0xff] }
 0x4f3   : > { %23595 = vst [vmem:[#allocation44_spill] sm:$0xff] %v21039_v15  ;;  %23596 = vst [vmem:[#allocation43_spill] sm:$0xff] %v21041_v38  ;;  %v8585_v15 = vld [vmem:[#allocation2 + $0xca] sm:$0xff] }
 0x4f5   : > { %16769 = vmatmul.mubr.msk.f32.gmra.mxu1 %vm5267_vm0, %v21025_v45  ;;  %17098 = vmatmul.mubr.msk.f32.gmra.mxu0 %vm5267_vm0, %v8581_v5  ;;  %v8584_v5 = vld [vmem:[#allocation2 + $0xc2] sm:$0xff]  ;;  %v21047_v45 = vpop.f32.mrf.mxu1 }
 0x4f6   : > { %16771 = vmatprep.mubr.msk.f32.mxu1 %vm5267_vm0, %v21034_v63  ;;  %17100 = vmatprep.mubr.msk.f32.mxu0 %vm5267_vm0, %v8582_v31  ;;  %23597 = vst [vmem:[#allocation45_spill] sm:$0xff] %v21047_v45  ;;  %v21049_v63 = vpop.f32.mrf.mxu0  ;;  %v6192_v31 = vld [vmem:[#allocation2 + $0x99] sm:$0xff] }
 0x4f7   : > { %23598 = vst [vmem:[#allocation46_spill] sm:$0xff] %v21049_v63  ;;  %v21051_v48 = vpop.f32.mrf.mxu1 }
 0x4f8   : > { %23599 = vst [vmem:[#allocation47_spill] sm:$0xff] %v21051_v48  ;;  %v21053_v38 = vpop.f32.mrf.mxu0  ;;  %v8589_v48 = vld [vmem:[#allocation2 + $0xea] sm:$0xff] }
 0x4f9   : > { %16772 = vmatmul.mubr.msk.f32.gmra.mxu1 %vm5267_vm0, %v6190_v20  ;;  %17101 = vmatmul.mubr.msk.f32.gmra.mxu0 %vm5267_vm0, %v8583_v27  ;;  %23600 = vst [vmem:[#allocation48_spill] sm:$0xff] %v21053_v38  ;;  %v6193_v27 = vld [vmem:[#allocation2 + $0xa1] sm:$0xff]  ;;  %v8586_v20 = vld [vmem:[#allocation2 + $0xd2] sm:$0xff]  ;;  %v21059_v45 = vpop.f32.mrf.mxu1 }
 0x4fa   : > { %16774 = vmatprep.mubr.msk.f32.mxu1 %vm5267_vm0, %v6191_v6  ;;  %17103 = vmatprep.mubr.msk.f32.mxu0 %vm5267_vm0, %v8584_v5  ;;  %v6194_v6 = vld [vmem:[#allocation2 + $0xa9] sm:$0xff]  ;;  %v8587_v5 = vld [vmem:[#allocation2 + $0xda] sm:$0xff]  ;;  %23601 = vst [vmem:[#allocation49_spill] sm:$0xff] %v21059_v45  ;;  %v21061_v63 = vpop.f32.mrf.mxu0  ;;  %v6195_v38 = vld [vmem:[#allocation2 + $0xb1] sm:$0xff] }
 0x4fb   : > { %23602 = vst [vmem:[#allocation50_spill] sm:$0xff] %v21061_v63  ;;  %v6197_v63 = vld [vmem:[#allocation2 + $0xc1] sm:$0xff] }
 0x4fd   : > { %16775 = vmatmul.mubr.msk.f32.gmra.mxu1 %vm5267_vm0, %v6192_v31  ;;  %17104 = vmatmul.mubr.msk.f32.gmra.mxu0 %vm5267_vm0, %v8585_v15  ;;  %v8588_v31 = vld [vmem:[#allocation2 + $0xe2] sm:$0xff]  ;;  %v21067_v15 = vpop.f32.mrf.mxu1 }
 0x4fe   : > { %16777 = vmatprep.mubr.msk.f32.mxu1 %vm5267_vm0, %v6193_v27  ;;  %17106 = vmatprep.mubr.msk.f32.mxu0 %vm5267_vm0, %v8586_v20  ;;  %23603 = vst [vmem:[#allocation51_spill] sm:$0xff] %v21067_v15  ;;  %v21069_v27 = vpop.f32.mrf.mxu0  ;;  %v6196_v20 = vld [vmem:[#allocation2 + $0xb9] sm:$0xff] }
 0x4ff   : > { %23604 = vst [vmem:[#allocation52_spill] sm:$0xff] %v21069_v27  ;;  %v8591_v15 = vld [vmem:[#allocation2 + $0xfa] sm:$0xff] }
 0x501   : > { %16778 = vmatmul.mubr.msk.f32.gmra.mxu1 %vm5267_vm0, %v6194_v6  ;;  %17107 = vmatmul.mubr.msk.f32.gmra.mxu0 %vm5267_vm0, %v8587_v5  ;;  %v8590_v6 = vld [vmem:[#allocation2 + $0xf2] sm:$0xff]  ;;  %v21075_v5 = vpop.f32.mrf.mxu1 }
 0x502   : > { %16780 = vmatprep.mubr.msk.f32.mxu1 %vm5267_vm0, %v6195_v38  ;;  %17109 = vmatprep.mubr.msk.f32.mxu0 %vm5267_vm0, %v8588_v31  ;;  %23605 = vst [vmem:[#allocation53_spill] sm:$0xff] %v21075_v5  ;;  %v21077_v38 = vpop.f32.mrf.mxu0  ;;  %v6198_v31 = vld [vmem:[#allocation2 + $0xc9] sm:$0xff] }
 0x503   : > { %23606 = vst [vmem:[#allocation54_spill] sm:$0xff] %v21077_v38  ;;  %v21079_v45 = vpop.f32.mrf.mxu1 }
 0x504   : > { %23607 = vst [vmem:[#allocation55_spill] sm:$0xff] %v21079_v45  ;;  %v21081_v27 = vpop.f32.mrf.mxu0  ;;  %v8595_v45 = vld [vmem:[#allocation2 + $0x11a] sm:$0xff] }
 0x505   : > { %16781 = vmatmul.mubr.msk.f32.gmra.mxu1 %vm5267_vm0, %v6196_v20  ;;  %17110 = vmatmul.mubr.msk.f32.gmra.mxu0 %vm5267_vm0, %v8589_v48  ;;  %23608 = vst [vmem:[#allocation56_spill] sm:$0xff] %v21081_v27  ;;  %v6199_v48 = vld [vmem:[#allocation2 + $0xd1] sm:$0xff]  ;;  %v8592_v20 = vld [vmem:[#allocation2 + $0x102] sm:$0xff]  ;;  %v21087_v5 = vpop.f32.mrf.mxu1 }
 0x506   : > { %16783 = vmatprep.mubr.msk.f32.mxu1 %vm5267_vm0, %v6197_v63  ;;  %17112 = vmatprep.mubr.msk.f32.mxu0 %vm5267_vm0, %v8590_v6  ;;  %v6200_v63 = vld [vmem:[#allocation2 + $0xd9] sm:$0xff]  ;;  %v8593_v6 = vld [vmem:[#allocation2 + $0x10a] sm:$0xff]  ;;  %23609 = vst [vmem:[#allocation57_spill] sm:$0xff] %v21087_v5  ;;  %v21089_v38 = vpop.f32.mrf.mxu0  ;;  %v6201_v27 = vld [vmem:[#allocation2 + $0xe1] sm:$0xff] }
 0x507   : > { %23610 = vst [vmem:[#allocation58_spill] sm:$0xff] %v21089_v38  ;;  %v6203_v38 = vld [vmem:[#allocation2 + $0xf1] sm:$0xff] }
 0x509   : > { %16784 = vmatmul.mubr.msk.f32.gmra.mxu1 %vm5267_vm0, %v6198_v31  ;;  %17113 = vmatmul.mubr.msk.f32.gmra.mxu0 %vm5267_vm0, %v8591_v15  ;;  %v8594_v31 = vld [vmem:[#allocation2 + $0x112] sm:$0xff]  ;;  %v21095_v15 = vpop.f32.mrf.mxu1 }
 0x50a   : > { %16786 = vmatprep.mubr.msk.f32.mxu1 %vm5267_vm0, %v6199_v48  ;;  %17115 = vmatprep.mubr.msk.f32.mxu0 %vm5267_vm0, %v8592_v20  ;;  %23611 = vst [vmem:[#allocation59_spill] sm:$0xff] %v21095_v15  ;;  %v21097_v48 = vpop.f32.mrf.mxu0  ;;  %v6202_v20 = vld [vmem:[#allocation2 + $0xe9] sm:$0xff] }
 0x50b   : > { %23612 = vst [vmem:[#allocation60_spill] sm:$0xff] %v21097_v48  ;;  %v8597_v15 = vld [vmem:[#allocation2 + $0x12a] sm:$0xff] }
 0x50d   : > { %16787 = vmatmul.mubr.msk.f32.gmra.mxu1 %vm5267_vm0, %v6200_v63  ;;  %17116 = vmatmul.mubr.msk.f32.gmra.mxu0 %vm5267_vm0, %v8593_v6  ;;  %v8596_v63 = vld [vmem:[#allocation2 + $0x122] sm:$0xff]  ;;  %v21103_v6 = vpop.f32.mrf.mxu1 }
 0x50e   : > { %16789 = vmatprep.mubr.msk.f32.mxu1 %vm5267_vm0, %v6201_v27  ;;  %17118 = vmatprep.mubr.msk.f32.mxu0 %vm5267_vm0, %v8594_v31  ;;  %23613 = vst [vmem:[#allocation61_spill] sm:$0xff] %v21103_v6  ;;  %v21105_v27 = vpop.f32.mrf.mxu0  ;;  %v6204_v31 = vld [vmem:[#allocation2 + $0xf9] sm:$0xff] }
 0x50f   : > { %23614 = vst [vmem:[#allocation62_spill] sm:$0xff] %v21105_v27  ;;  %v21107_v5 = vpop.f32.mrf.mxu1 }
 0x510   : > { %v21109_v48 = vpop.f32.mrf.mxu0 }
 0x511   : > { %16790 = vmatmul.mubr.msk.f32.gmra.mxu1 %vm5267_vm0, %v6202_v20  ;;  %17119 = vmatmul.mubr.msk.f32.gmra.mxu0 %vm5267_vm0, %v8595_v45  ;;  %23615 = vst [vmem:[#allocation63_spill] sm:$0xff] %v21109_v48  ;;  %v6205_v45 = vld [vmem:[#allocation2 + $0x101] sm:$0xff]  ;;  %v8598_v20 = vld [vmem:[#allocation2 + $0x132] sm:$0xff]  ;;  %v21115_v6 = vpop.f32.mrf.mxu1 }
 0x512   : > { %16792 = vmatprep.mubr.msk.f32.mxu1 %vm5267_vm0, %v6203_v38  ;;  %17121 = vmatprep.mubr.msk.f32.mxu0 %vm5267_vm0, %v8596_v63  ;;  %v6206_v38 = vld [vmem:[#allocation2 + $0x109] sm:$0xff]  ;;  %v8599_v63 = vld [vmem:[#allocation2 + $0x13a] sm:$0xff]  ;;  %v21117_v27 = vpop.f32.mrf.mxu0  ;;  %v6207_v48 = vld [vmem:[#allocation2 + $0x111] sm:$0xff] }
 0x515   : > { %16793 = vmatmul.mubr.msk.f32.gmra.mxu1 %vm5267_vm0, %v6204_v31  ;;  %17122 = vmatmul.mubr.msk.f32.gmra.mxu0 %vm5267_vm0, %v8597_v15  ;;  %v21124_v15 = vpop.f32.mrf.mxu1  ;;  %v21126_v31 = vpop.f32.mrf.mxu0 }
 0x516   : > { %16795 = vmatprep.mubr.msk.f32.mxu1 %vm5267_vm0, %v6205_v45  ;;  %17124 = vmatprep.mubr.msk.f32.mxu0 %vm5267_vm0, %v8598_v20  ;;  %v6208_v45 = vld [vmem:[#allocation2 + $0x119] sm:$0xff]  ;;  %v6209_v20 = vld [vmem:[#allocation2 + $0x121] sm:$0xff] }
 0x519   : > { %16796 = vmatmul.mubr.msk.f32.gmra.mxu1 %vm5267_vm0, %v6206_v38  ;;  %17125 = vmatmul.mubr.msk.f32.gmra.mxu0 %vm5267_vm0, %v8599_v63  ;;  %v14004_v38 = vld [vmem:[%s23464_s3 + $0x30] sm:$0xff] }
 0x51a   : > { %16798 = vmatprep.mubr.msk.f32.mxu1 %vm5267_vm0, %v6207_v48  ;;  %17195 = vmatprep.mubr.msk.f32.mxu0 %vm5267_vm0, %v20602_v57  ;;  %v21137_v57 = vpop.f32.mrf.mxu1  ;;  %v21139_v48 = vpop.f32.mrf.mxu0  ;;  %v6210_v63 = vld [vmem:[#allocation2 + $0x129] sm:$0xff] }
 0x51b   : > { %23616 = vst [vmem:[#allocation64_spill] sm:$0xff] %v21139_v48 }
 0x51d   : > { %16799 = vmatmul.mubr.msk.f32.gmra.mxu1 %vm5267_vm0, %v6208_v45  ;;  %17196 = vmatmul.mubr.msk.f32.vlgmr.msra.gmra.mxu0 %vm5267_vm0, %v20608_v43  ;;  %v21142_v45 = vpop.f32.mrf.mxu1  ;;  %v21144_v43 = vpop.f32.mrf.mxu0 }
 0x51e   : > { %16801 = vmatprep.mubr.msk.f32.mxu1 %vm5267_vm0, %v6209_v20  ;;  %17198 = vmatprep.mubr.msk.f32.mxu0 %vm5267_vm0, %v20618_v17  ;;  %23617 = vst [vmem:[#allocation65_spill] sm:$0xff] %v21144_v43  ;;  %v6211_v20 = vld [vmem:[#allocation2 + $0x131] sm:$0xff]  ;;  %v6212_v17 = vld [vmem:[#allocation2 + $0x139] sm:$0xff] }
 0x51f   : > { %17320 = vmatpush3.msra.mxu0 %v20990_v8  ;;  %v21152_v8 = vpop.f32.mrf.mxu1  ;;  %v21154_v48 = vpop.f32.mrf.mxu0  ;;  %v10505_v43 = vld [vmem:[#allocation2 + $0xf0] sm:$0xff] }
 0x520   : > { %17321 = vmatprep.subr.mxu0 %v14004_v38  ;;  %23618 = vst [vmem:[#allocation66_spill] sm:$0xff] %v21154_v48 }
 0x521   : > { %16802 = vmatmul.mubr.msk.f32.gmra.mxu1 %vm5267_vm0, %v6210_v63  ;;  %17199 = vmatmul.mubr.msk.f32.gmra.mxu0 %vm5267_vm0, %v20624_v36  ;;  %v7279_v63 = vld [vmem:[#allocation2 + $0x16] sm:$0xff]  ;;  %v21162_v36 = vpop.f32.mrf.mxu1 }
 0x522   : > { %16804 = vmatprep.mubr.msk.f32.mxu1 %vm5267_vm0, %v6211_v20  ;;  %17201 = vmatprep.mubr.msk.f32.mxu0 %vm5267_vm0, %v20630_v34  ;;  %v21164_v34 = vpop.f32.mrf.mxu0  ;;  %v13753_v20 = vld [vmem:[%s23464_s3 + $0xe0] sm:$0xff] }
 0x523   : > { %17322 = vmatpush3.msra.mxu0 %v14004_v38  ;;  %23619 = vst [vmem:[#allocation67_spill] sm:$0xff] %v21164_v34  ;;  %v7280_v38 = vld [vmem:[#allocation2 + $0x1e] sm:$0xff]  ;;  %v23681_v34 = vld [vmem:[#allocation35_spill] sm:$0xff] }
 0x525   : > { %16805 = vmatmul.mubr.msk.f32.gmra.mxu1 %vm5267_vm0, %v6212_v17  ;;  %17202 = vmatmul.mubr.msk.f32.gmra.mxu0 %vm5267_vm0, %v20634_v12  ;;  %v7281_v12 = vld [vmem:[#allocation2 + $0x26] sm:$0xff]  ;;  %v21176_v17 = vpop.f32.mrf.mxu0 }
 0x526   : > { %16875 = vmatprep.mubr.msk.f32.mxu1 %vm5267_vm0, %v7279_v63  ;;  %17204 = vmatprep.mubr.msk.f32.mxu0 %vm5267_vm0, %v20640_v40  ;;  %v21174_v40 = vpop.f32.mrf.mxu1  ;;  %23620 = vst [vmem:[#allocation68_spill] sm:$0xff] %v21176_v17  ;;  %v7282_v63 = vld [vmem:[#allocation2 + $0x2e] sm:$0xff] }
 0x529   : > { %16876 = vmatmul.mubr.msk.f32.vlgmr.msra.gmra.mxu1 %vm5267_vm0, %v7280_v38  ;;  %17205 = vmatmul.mubr.msk.f32.gmra.mxu0 %vm5267_vm0, %v20646_v21  ;;  %v21183_v38 = vld [vmem:[%s23464_s3 + $0xb8] sm:$0xff]  ;;  %v21185_v21 = vpop.f32.mrf.mxu1 }
 0x52a   : > { %16878 = vmatprep.mubr.msk.f32.mxu1 %vm5267_vm0, %v7281_v12  ;;  %17000 = vmatpush3.msra.mxu1 %v20926_v7  ;;  %v21187_v12 = vpop.f32.mrf.mxu0  ;;  %v7283_v7 = vld [vmem:[#allocation2 + $0x36] sm:$0xff] }
 0x52b   : > { %17207 = vmatprep.mubr.msk.f32.mxu0 %vm5267_vm0, %v20658_v33  ;;  %17001 = vmatprep.subr.mxu1 %v13753_v20  ;;  %23621 = vst [vmem:[#allocation69_spill] sm:$0xff] %v21187_v12  ;;  %v7284_v33 = vld [vmem:[#allocation2 + $0x3e] sm:$0xff]  ;;  %v10485_v12 = vld [vmem:[#allocation2 + $0x50] sm:$0xff] }
 0x52c   : > { %17002 = vmatpush3.msra.mxu1 %v13753_v20  ;;  %v21196_v20 = vpop.f32.mrf.mxu1  ;;  %v21198_v17 = vpop.f32.mrf.mxu0 }
 0x52d   : > { %16879 = vmatmul.mubr.msk.f32.gmra.mxu1 %vm5267_vm0, %v7282_v63  ;;  %17208 = vmatmul.mubr.msk.f32.gmra.mxu0 %vm5267_vm0, %v20662_v60  ;;  %23622 = vst [vmem:[#allocation70_spill] sm:$0xff] %v21198_v17  ;;  %v7285_v63 = vld [vmem:[#allocation2 + $0x46] sm:$0xff] }
 0x52e   : > { %16881 = vmatprep.mubr.msk.f32.mxu1 %vm5267_vm0, %v7283_v7  ;;  %17210 = vmatprep.mubr.msk.f32.mxu0 %vm5267_vm0, %v20673_v13  ;;  %v21206_v60 = vpop.f32.mrf.mxu1  ;;  %v7286_v7 = vld [vmem:[#allocation2 + $0x4e] sm:$0xff] }
 0x52f   : > { %17127 = vmatprep.subr.mxu1 %v21183_v38 }
 0x531   : > { %16882 = vmatmul.mubr.msk.f32.gmra.mxu1 %vm5267_vm0, %v7284_v33  ;;  %17211 = vmatmul.mubr.msk.f32.gmra.mxu0 %vm5267_vm0, %v20680_v46  ;;  %v21208_v13 = vpop.f32.mrf.mxu0  ;;  %v7287_v33 = vld [vmem:[#allocation2 + $0x56] sm:$0xff]  ;;  %v21216_v46 = vpop.f32.mrf.mxu1 }
 0x532   : > { %16884 = vmatprep.mubr.msk.f32.mxu1 %vm5267_vm0, %v7285_v63  ;;  %17213 = vmatprep.mubr.msk.f32.mxu0 %vm5267_vm0, %v20686_v53  ;;  %23623 = vst [vmem:[#allocation71_spill] sm:$0xff] %v21208_v13  ;;  %23624 = vst [vmem:[#allocation72_spill] sm:$0xff] %v21216_v46  ;;  %v7288_v53 = vld [vmem:[#allocation2 + $0x5e] sm:$0xff] }
 0x533   : > { %v21218_v63 = vpop.f32.mrf.mxu0  ;;  %v8111_v46 = vld [vmem:[#allocation2 + $0x99] sm:$0xff] }
 0x534   : > { %23625 = vst [vmem:[#allocation73_spill] sm:$0xff] %v21218_v63  ;;  %v21220_v17 = vpop.f32.mrf.mxu1 }
 0x535   : > { %16885 = vmatmul.mubr.msk.f32.gmra.mxu1 %vm5267_vm0, %v7286_v7  ;;  %17214 = vmatmul.mubr.msk.f32.gmra.mxu0 %vm5267_vm0, %v20692_v0  ;;  %23626 = vst [vmem:[#allocation74_spill] sm:$0xff] %v21220_v17  ;;  %v7289_v0 = vld [vmem:[#allocation2 + $0x66] sm:$0xff] }
 0x536   : > { %16887 = vmatprep.mubr.msk.f32.mxu1 %vm5267_vm0, %v7287_v33  ;;  %17216 = vmatprep.mubr.msk.f32.mxu0 %vm5267_vm0, %v20698_v49  ;;  %v21233_v49 = vld [vmem:[%s23464_s3 + $0xa8] sm:$0xff] }
 0x537   : > { %17447 = vmatprep.subr.mxu0 %v21233_v49  ;;  %v7290_v33 = vld [vmem:[#allocation2 + $0x6e] sm:$0xff] }
 0x539   : > { %v21222_v13 = vpop.f32.mrf.mxu0  ;;  %16888 = vmatmul.mubr.msk.f32.gmra.mxu1 %vm5267_vm0, %v7288_v53  ;;  %17217 = vmatmul.mubr.msk.f32.gmra.mxu0 %vm5267_vm0, %v20704_v18  ;;  %v21238_v53 = vpop.f32.mrf.mxu1 }
 0x53a   : > { %23627 = vst [vmem:[#allocation75_spill] sm:$0xff] %v21222_v13  ;;  %16890 = vmatprep.mubr.msk.f32.mxu1 %vm5267_vm0, %v7289_v0  ;;  %17219 = vmatprep.mubr.msk.f32.mxu0 %vm5267_vm0, %v20710_v26  ;;  %23629 = vst [vmem:[#allocation77_spill] sm:$0xff] %v21238_v53  ;;  %v7291_v26 = vld [vmem:[#allocation2 + $0x76] sm:$0xff]  ;;  %v7292_v13 = vld [vmem:[#allocation2 + $0x7e] sm:$0xff] }
 0x53b   : > { %v21235_v7 = vpop.f32.mrf.mxu0 }
 0x53c   : > { %23628 = vst [vmem:[#allocation76_spill] sm:$0xff] %v21235_v7  ;;  %v21248_v0 = vpop.f32.mrf.mxu1 }
 0x53d   : > { %16891 = vmatmul.mubr.msk.f32.gmra.mxu1 %vm5267_vm0, %v7290_v33  ;;  %v21241_v18 = vpop.f32.mrf.mxu0  ;;  %17220 = vmatmul.mubr.msk.f32.gmra.mxu0 %vm5267_vm0, %v20722_v29  ;;  %23631 = vst [vmem:[#allocation79_spill] sm:$0xff] %v21248_v0  ;;  %v7293_v33 = vld [vmem:[#allocation2 + $0x86] sm:$0xff] }
 0x53e   : > { %23630 = vst [vmem:[#allocation78_spill] sm:$0xff] %v21241_v18  ;;  %16893 = vmatprep.mubr.msk.f32.mxu1 %vm5267_vm0, %v7291_v26  ;;  %17222 = vmatprep.mubr.msk.f32.mxu0 %vm5267_vm0, %v20728_v16  ;;  %v21260_v29 = vpop.f32.mrf.mxu1  ;;  %v7294_v26 = vld [vmem:[#allocation2 + $0x8e] sm:$0xff] }
 0x53f   : > { %v21250_v7 = vpop.f32.mrf.mxu0  ;;  %23634 = vst [vmem:[#allocation82_spill] sm:$0xff] %v21260_v29  ;;  %v10481_v18 = vld [vmem:[#allocation2 + $0x30] sm:$0xff]  ;;  %v10484_v29 = vld [vmem:[#allocation2 + $0x48] sm:$0xff] }
 0x540   : > { %23632 = vst [vmem:[#allocation80_spill] sm:$0xff] %v21250_v7 }
 0x541   : > { %16894 = vmatmul.mubr.msk.f32.gmra.mxu1 %vm5267_vm0, %v7292_v13  ;;  %v21253_v63 = vpop.f32.mrf.mxu0  ;;  %17223 = vmatmul.mubr.msk.f32.gmra.mxu0 %vm5267_vm0, %v20734_v28  ;;  %v7295_v28 = vld [vmem:[#allocation2 + $0x96] sm:$0xff] }
 0x542   : > { %23633 = vst [vmem:[#allocation81_spill] sm:$0xff] %v21253_v63  ;;  %16896 = vmatprep.mubr.msk.f32.mxu1 %vm5267_vm0, %v7293_v33  ;;  %17225 = vmatprep.mubr.msk.f32.mxu0 %vm5267_vm0, %v20740_v62 }
 0x543   : > { %v21262_v16 = vpop.f32.mrf.mxu0 }
 0x544   : > { %23635 = vst [vmem:[#allocation83_spill] sm:$0xff] %v21262_v16  ;;  %v21264_v7 = vpop.f32.mrf.mxu1  ;;  %v7296_v16 = vld [vmem:[#allocation2 + $0x9e] sm:$0xff] }
 0x545   : > { %23636 = vst [vmem:[#allocation84_spill] sm:$0xff] %v21264_v7  ;;  %16897 = vmatmul.mubr.msk.f32.gmra.mxu1 %vm5267_vm0, %v7294_v26  ;;  %v21267_v13 = vpop.f32.mrf.mxu0  ;;  %17226 = vmatmul.mubr.msk.f32.gmra.mxu0 %vm5267_vm0, %v20746_v9  ;;  %v7297_v9 = vld [vmem:[#allocation2 + $0xa6] sm:$0xff] }
 0x546   : > { %23637 = vst [vmem:[#allocation85_spill] sm:$0xff] %v21267_v13  ;;  %16899 = vmatprep.mubr.msk.f32.mxu1 %vm5267_vm0, %v7295_v28  ;;  %17228 = vmatprep.mubr.msk.f32.mxu0 %vm5267_vm0, %v20752_v59  ;;  %v21274_v62 = vpop.f32.mrf.mxu1 }
 0x547   : > { %23638 = vst [vmem:[#allocation86_spill] sm:$0xff] %v21274_v62  ;;  %v21276_v33 = vpop.f32.mrf.mxu0 }
 0x548   : > { %23639 = vst [vmem:[#allocation87_spill] sm:$0xff] %v21276_v33  ;;  %v21278_v63 = vpop.f32.mrf.mxu1  ;;  %v7298_v33 = vld [vmem:[#allocation2 + $0xae] sm:$0xff] }
 0x549   : > { %16900 = vmatmul.mubr.msk.f32.gmra.mxu1 %vm5267_vm0, %v7296_v16  ;;  %v21281_v26 = vpop.f32.mrf.mxu0  ;;  %17229 = vmatmul.mubr.msk.f32.gmra.mxu0 %vm5267_vm0, %v20758_v25  ;;  %v7299_v25 = vld [vmem:[#allocation2 + $0xb6] sm:$0xff] }
 0x54a   : > { %23640 = vst [vmem:[#allocation88_spill] sm:$0xff] %v21281_v26  ;;  %16902 = vmatprep.mubr.msk.f32.mxu1 %vm5267_vm0, %v7297_v9  ;;  %17231 = vmatprep.mubr.msk.f32.mxu0 %vm5267_vm0, %v20764_v42  ;;  %v21288_v59 = vpop.f32.mrf.mxu1 }
 0x54b   : > { %v21290_v28 = vpop.f32.mrf.mxu0 }
 0x54c   : > { %23641 = vst [vmem:[#allocation89_spill] sm:$0xff] %v21290_v28  ;;  %v7300_v28 = vld [vmem:[#allocation2 + $0xbe] sm:$0xff] }
 0x54d   : > { %v21292_v13 = vpop.f32.mrf.mxu1  ;;  %16903 = vmatmul.mubr.msk.f32.gmra.mxu1 %vm5267_vm0, %v7298_v33  ;;  %v21295_v16 = vpop.f32.mrf.mxu0  ;;  %17232 = vmatmul.mubr.msk.f32.gmra.mxu0 %vm5267_vm0, %v20770_v3  ;;  %v7301_v3 = vld [vmem:[#allocation2 + $0xc6] sm:$0xff] }
 0x54e   : > { %23642 = vst [vmem:[#allocation90_spill] sm:$0xff] %v21295_v16  ;;  %16905 = vmatprep.mubr.msk.f32.mxu1 %vm5267_vm0, %v7299_v25  ;;  %17234 = vmatprep.mubr.msk.f32.mxu0 %vm5267_vm0, %v20776_v39 }
 0x54f   : > { %v21302_v42 = vpop.f32.mrf.mxu1  ;;  %v21304_v9 = vpop.f32.mrf.mxu0 }
 0x550   : > { %23643 = vst [vmem:[#allocation91_spill] sm:$0xff] %v21304_v9  ;;  %v7302_v9 = vld [vmem:[#allocation2 + $0xce] sm:$0xff] }
 0x551   : > { %v21306_v26 = vpop.f32.mrf.mxu1  ;;  %16906 = vmatmul.mubr.msk.f32.gmra.mxu1 %vm5267_vm0, %v7300_v28  ;;  %v21309_v33 = vpop.f32.mrf.mxu0  ;;  %17235 = vmatmul.mubr.msk.f32.gmra.mxu0 %vm5267_vm0, %v20782_v30  ;;  %v7303_v30 = vld [vmem:[#allocation2 + $0xd6] sm:$0xff] }
 0x552   : > { %23644 = vst [vmem:[#allocation92_spill] sm:$0xff] %v21309_v33  ;;  %16908 = vmatprep.mubr.msk.f32.mxu1 %vm5267_vm0, %v7301_v3  ;;  %17237 = vmatprep.mubr.msk.f32.mxu0 %vm5267_vm0, %v20788_v61 }
 0x553   : > { %v21316_v39 = vpop.f32.mrf.mxu1  ;;  %v21318_v25 = vpop.f32.mrf.mxu0 }
 0x554   : > { %23645 = vst [vmem:[#allocation93_spill] sm:$0xff] %v21318_v25  ;;  %v7304_v25 = vld [vmem:[#allocation2 + $0xde] sm:$0xff] }
 0x555   : > { %v21320_v16 = vpop.f32.mrf.mxu1  ;;  %16909 = vmatmul.mubr.msk.f32.gmra.mxu1 %vm5267_vm0, %v7302_v9  ;;  %v21323_v28 = vpop.f32.mrf.mxu0  ;;  %17238 = vmatmul.mubr.msk.f32.gmra.mxu0 %vm5267_vm0, %v20794_v54  ;;  %v7305_v54 = vld [vmem:[#allocation2 + $0xe6] sm:$0xff] }
 0x556   : > { %23646 = vst [vmem:[#allocation94_spill] sm:$0xff] %v21323_v28  ;;  %16911 = vmatprep.mubr.msk.f32.mxu1 %vm5267_vm0, %v7303_v30  ;;  %17240 = vmatprep.mubr.msk.f32.mxu0 %vm5267_vm0, %v20800_v19 }
 0x557   : > { %v21330_v61 = vpop.f32.mrf.mxu1  ;;  %v21332_v3 = vpop.f32.mrf.mxu0 }
 0x558   : > { %23647 = vst [vmem:[#allocation95_spill] sm:$0xff] %v21332_v3  ;;  %v7306_v3 = vld [vmem:[#allocation2 + $0xee] sm:$0xff] }
 0x559   : > { %v21334_v33 = vpop.f32.mrf.mxu1  ;;  %16912 = vmatmul.mubr.msk.f32.gmra.mxu1 %vm5267_vm0, %v7304_v25  ;;  %v21337_v9 = vpop.f32.mrf.mxu0  ;;  %17241 = vmatmul.mubr.msk.f32.gmra.mxu0 %vm5267_vm0, %v20806_v11  ;;  %v7307_v11 = vld [vmem:[#allocation2 + $0xf6] sm:$0xff] }
 0x55a   : > { %23648 = vst [vmem:[#allocation96_spill] sm:$0xff] %v21337_v9  ;;  %16914 = vmatprep.mubr.msk.f32.mxu1 %vm5267_vm0, %v7305_v54  ;;  %17243 = vmatprep.mubr.msk.f32.mxu0 %vm5267_vm0, %v20812_v44 }
 0x55b   : > { %v21344_v19 = vpop.f32.mrf.mxu1  ;;  %v21346_v30 = vpop.f32.mrf.mxu0 }
 0x55c   : > { %23649 = vst [vmem:[#allocation97_spill] sm:$0xff] %v21346_v30  ;;  %v7308_v30 = vld [vmem:[#allocation2 + $0xfe] sm:$0xff] }
 0x55d   : > { %v21348_v28 = vpop.f32.mrf.mxu1  ;;  %16915 = vmatmul.mubr.msk.f32.gmra.mxu1 %vm5267_vm0, %v7306_v3  ;;  %v21351_v25 = vpop.f32.mrf.mxu0  ;;  %17244 = vmatmul.mubr.msk.f32.gmra.mxu0 %vm5267_vm0, %v20818_v4  ;;  %v7309_v4 = vld [vmem:[#allocation2 + $0x106] sm:$0xff] }
 0x55e   : > { %23650 = vst [vmem:[#allocation98_spill] sm:$0xff] %v21351_v25  ;;  %16917 = vmatprep.mubr.msk.f32.mxu1 %vm5267_vm0, %v7307_v11  ;;  %17246 = vmatprep.mubr.msk.f32.mxu0 %vm5267_vm0, %v20824_v10 }
 0x55f   : > { %v21358_v44 = vpop.f32.mrf.mxu1  ;;  %v21360_v54 = vpop.f32.mrf.mxu0 }
 0x560   : > { %23651 = vst [vmem:[#allocation99_spill] sm:$0xff] %v21360_v54  ;;  %v7310_v54 = vld [vmem:[#allocation2 + $0x10e] sm:$0xff] }
 0x561   : > { %v21362_v9 = vpop.f32.mrf.mxu1  ;;  %16918 = vmatmul.mubr.msk.f32.gmra.mxu1 %vm5267_vm0, %v7308_v30  ;;  %v21365_v3 = vpop.f32.mrf.mxu0  ;;  %17247 = vmatmul.mubr.msk.f32.gmra.mxu0 %vm5267_vm0, %v20830_v1  ;;  %v7311_v1 = vld [vmem:[#allocation2 + $0x116] sm:$0xff] }
 0x562   : > { %23652 = vst [vmem:[#allocation100_spill] sm:$0xff] %v21365_v3  ;;  %16920 = vmatprep.mubr.msk.f32.mxu1 %vm5267_vm0, %v7309_v4  ;;  %17249 = vmatprep.mubr.msk.f32.mxu0 %vm5267_vm0, %v20836_v32 }
 0x563   : > { %v21372_v10 = vpop.f32.mrf.mxu1  ;;  %v21374_v11 = vpop.f32.mrf.mxu0 }
 0x564   : > { %23653 = vst [vmem:[#allocation101_spill] sm:$0xff] %v21374_v11  ;;  %v7312_v11 = vld [vmem:[#allocation2 + $0x11e] sm:$0xff] }
 0x565   : > { %v21376_v25 = vpop.f32.mrf.mxu1  ;;  %16921 = vmatmul.mubr.msk.f32.gmra.mxu1 %vm5267_vm0, %v7310_v54  ;;  %v21379_v30 = vpop.f32.mrf.mxu0  ;;  %17250 = vmatmul.mubr.msk.f32.gmra.mxu0 %vm5267_vm0, %v20842_v35  ;;  %v7313_v35 = vld [vmem:[#allocation2 + $0x126] sm:$0xff] }
 0x566   : > { %23654 = vst [vmem:[#allocation102_spill] sm:$0xff] %v21379_v30  ;;  %16923 = vmatprep.mubr.msk.f32.mxu1 %vm5267_vm0, %v7311_v1  ;;  %17252 = vmatprep.mubr.msk.f32.mxu0 %vm5267_vm0, %v20848_v50  ;;  %v10480_v30 = vld [vmem:[#allocation2 + $0x28] sm:$0xff] }
 0x567   : > { %v21386_v32 = vpop.f32.mrf.mxu1  ;;  %v21388_v4 = vpop.f32.mrf.mxu0 }
 0x568   : > { %23655 = vst [vmem:[#allocation103_spill] sm:$0xff] %v21388_v4  ;;  %v7314_v4 = vld [vmem:[#allocation2 + $0x12e] sm:$0xff] }
 0x569   : > { %v21390_v3 = vpop.f32.mrf.mxu1  ;;  %16924 = vmatmul.mubr.msk.f32.gmra.mxu1 %vm5267_vm0, %v7312_v11  ;;  %v21393_v54 = vpop.f32.mrf.mxu0  ;;  %17253 = vmatmul.mubr.msk.f32.gmra.mxu0 %vm5267_vm0, %v20856_v24  ;;  %v7315_v24 = vld [vmem:[#allocation2 + $0x136] sm:$0xff] }
 0x56a   : > { %23656 = vst [vmem:[#allocation104_spill] sm:$0xff] %v21393_v54  ;;  %16926 = vmatprep.mubr.msk.f32.mxu1 %vm5267_vm0, %v7313_v35  ;;  %17323 = vmatprep.mubr.msk.f32.mxu0 %vm5267_vm0, %v10480_v30  ;;  %v10482_v54 = vld [vmem:[#allocation2 + $0x38] sm:$0xff]  ;;  %v14087_v30 = vld [vmem:[%s23464_s3 + $0xa0] sm:$0xff] }
 0x56b   : > { %v21399_v50 = vpop.f32.mrf.mxu1  ;;  %v21401_v1 = vpop.f32.mrf.mxu0 }
 0x56c   : > { %23657 = vst [vmem:[#allocation105_spill] sm:$0xff] %v21401_v1 }
 0x56d   : > { %v21403_v62 = vpop.f32.mrf.mxu1  ;;  %16927 = vmatmul.mubr.msk.f32.gmra.mxu1 %vm5267_vm0, %v7314_v4  ;;  %v21406_v11 = vpop.f32.mrf.mxu0  ;;  %17324 = vmatmul.mubr.msk.f32.vlgmr.msra.gmra.mxu0 %vm5267_vm0, %v10481_v18  ;;  %v7316_v4 = vld [vmem:[#allocation2 + $0x13e] sm:$0xff] }
 0x56e   : > { %23658 = vst [vmem:[#allocation106_spill] sm:$0xff] %v21406_v11  ;;  %16929 = vmatprep.mubr.msk.f32.mxu1 %vm5267_vm0, %v7315_v24  ;;  %17326 = vmatprep.mubr.msk.f32.mxu0 %vm5267_vm0, %v10482_v54  ;;  %v10483_v11 = vld [vmem:[#allocation2 + $0x40] sm:$0xff] }
 0x56f   : > { %v21414_v35 = vpop.f32.mrf.mxu1  ;;  %v21416_v1 = vpop.f32.mrf.mxu0  ;;  %17448 = vmatpush3.msra.mxu0 %v21233_v49  ;;  %v7317_v24 = vld [vmem:[#allocation2 + $0x146] sm:$0xff] }
 0x570   : > { %23659 = vst [vmem:[#allocation107_spill] sm:$0xff] %v21416_v1  ;;  %17449 = vmatprep.subr.mxu0 %v14087_v30  ;;  %v7318_v1 = vld [vmem:[#allocation2 + $0x14e] sm:$0xff] }
 0x571   : > { %v21419_v18 = vpop.f32.mrf.mxu1  ;;  %16930 = vmatmul.mubr.msk.f32.gmra.mxu1 %vm5267_vm0, %v7316_v4  ;;  %v21422_v7 = vpop.f32.mrf.mxu0  ;;  %17327 = vmatmul.mubr.msk.f32.gmra.mxu0 %vm5267_vm0, %v10483_v11  ;;  %v10486_v11 = vld [vmem:[#allocation2 + $0x58] sm:$0xff] }
 0x572   : > { %23660 = vst [vmem:[#allocation108_spill] sm:$0xff] %v21422_v7  ;;  %16932 = vmatprep.mubr.msk.f32.mxu1 %vm5267_vm0, %v7317_v24  ;;  %17329 = vmatprep.mubr.msk.f32.mxu0 %vm5267_vm0, %v10484_v29 }
 0x573   : > { %v21427_v54 = vpop.f32.mrf.mxu1  ;;  %v21429_v49 = vpop.f32.mrf.mxu0  ;;  %17450 = vmatpush3.msra.mxu0 %v14087_v30  ;;  %v10487_v30 = vld [vmem:[#allocation2 + $0x60] sm:$0xff] }
 0x574   : > { %23661 = vst [vmem:[#allocation109_spill] sm:$0xff] %v21429_v49  ;;  %v13880_v49 = vld [vmem:[%s23464_s3 + $0xb0] sm:$0xff] }
 0x575   : > { %v21431_v0 = vpop.f32.mrf.mxu1  ;;  %16933 = vmatmul.mubr.msk.f32.gmra.mxu1 %vm5267_vm0, %v7318_v1  ;;  %v21434_v4 = vpop.f32.mrf.mxu0  ;;  %17330 = vmatmul.mubr.msk.f32.gmra.mxu0 %vm5267_vm0, %v10485_v12 }
 0x576   : > { %23662 = vst [vmem:[#allocation110_spill] sm:$0xff] %v21434_v4  ;;  %17003 = vmatprep.mubr.msk.f32.mxu1 %vm5267_vm0, %v20894_v52  ;;  %17332 = vmatprep.mubr.msk.f32.mxu0 %vm5267_vm0, %v10486_v11  ;;  %v10488_v52 = vld [vmem:[#allocation2 + $0x68] sm:$0xff] }
 0x577   : > { %v21440_v29 = vpop.f32.mrf.mxu1  ;;  %v21442_v24 = vpop.f32.mrf.mxu0 }
 0x578   : > { %23663 = vst [vmem:[#allocation111_spill] sm:$0xff] %v21442_v24  ;;  %v10489_v24 = vld [vmem:[#allocation2 + $0x70] sm:$0xff] }
 0x579   : > { %v21447_v1 = vpop.f32.mrf.mxu1  ;;  %v21449_v4 = vpop.f32.mrf.mxu0  ;;  %17004 = vmatmul.mubr.msk.f32.vlgmr.msra.gmra.mxu1 %vm5267_vm0, %v20903_v14  ;;  %17333 = vmatmul.mubr.msk.f32.gmra.mxu0 %vm5267_vm0, %v10487_v30  ;;  %v21465_v14 = vld [vmem:[%s23464_s3 + $0x18] sm:$0xff] }
 0x57a   : > { %23664 = vst [vmem:[#allocation112_spill] sm:$0xff] %v21449_v4  ;;  %17006 = vmatprep.mubr.msk.f32.mxu1 %vm5267_vm0, %v20915_v37  ;;  %17128 = vmatpush3.msra.mxu1 %v21183_v38  ;;  %v10490_v38 = vld [vmem:[#allocation2 + $0x78] sm:$0xff] }
 0x57b   : > { %17335 = vmatprep.mubr.msk.f32.mxu0 %vm5267_vm0, %v10488_v52  ;;  %v21458_v12 = vpop.f32.mrf.mxu1  ;;  %v21460_v11 = vpop.f32.mrf.mxu0  ;;  %17129 = vmatprep.subr.mxu1 %v13880_v49 }
 0x57c   : > { %23665 = vst [vmem:[#allocation113_spill] sm:$0xff] %v21460_v11  ;;  %17130 = vmatpush3.msra.mxu1 %v13880_v49  ;;  %v10491_v11 = vld [vmem:[#allocation2 + $0x80] sm:$0xff] }
 0x57d   : > { %v21467_v30 = vpop.f32.mrf.mxu1  ;;  %v21469_v37 = vpop.f32.mrf.mxu0  ;;  %17007 = vmatmul.mubr.msk.f32.gmra.mxu1 %vm5267_vm0, %v20921_v22  ;;  %17336 = vmatmul.mubr.msk.f32.gmra.mxu0 %vm5267_vm0, %v10489_v24  ;;  %v10492_v22 = vld [vmem:[#allocation2 + $0x88] sm:$0xff] }
 0x57e   : > { %23666 = vst [vmem:[#allocation114_spill] sm:$0xff] %v21469_v37  ;;  %17009 = vmatprep.mubr.msk.f32.mxu1 %vm5267_vm0, %v20935_v58  ;;  %17338 = vmatprep.mubr.msk.f32.mxu0 %vm5267_vm0, %v10490_v38  ;;  %v10493_v38 = vld [vmem:[#allocation2 + $0x90] sm:$0xff] }
 0x57f   : > { %v21477_v49 = vpop.f32.mrf.mxu1  ;;  %v21479_v52 = vpop.f32.mrf.mxu0  ;;  %17255 = vmatprep.subr.mxu1 %v21465_v14 }
 0x580   : > { %23667 = vst [vmem:[#allocation115_spill] sm:$0xff] %v21479_v52 }
 0x581   : > { %v21482_v4 = vpop.f32.mrf.mxu1  ;;  %v21484_v37 = vpop.f32.mrf.mxu0  ;;  %17010 = vmatmul.mubr.msk.f32.gmra.mxu1 %vm5267_vm0, %v20945_v56  ;;  %17339 = vmatmul.mubr.msk.f32.gmra.mxu0 %vm5267_vm0, %v10491_v11  ;;  %v10494_v56 = vld [vmem:[#allocation2 + $0x98] sm:$0xff] }
 0x582   : > { %23668 = vst [vmem:[#allocation116_spill] sm:$0xff] %v21484_v37  ;;  %17012 = vmatprep.mubr.msk.f32.mxu1 %vm5267_vm0, %v20950_v23  ;;  %17341 = vmatprep.mubr.msk.f32.mxu0 %vm5267_vm0, %v10492_v22  ;;  %v10495_v22 = vld [vmem:[#allocation2 + $0xa0] sm:$0xff] }
 0x583   : > { %v21492_v58 = vpop.f32.mrf.mxu1  ;;  %v21494_v24 = vpop.f32.mrf.mxu0 }
 0x584   : > { %23669 = vst [vmem:[#allocation117_spill] sm:$0xff] %v21494_v24 }
 0x585   : > { %v21496_v52 = vpop.f32.mrf.mxu1  ;;  %v21498_v7 = vpop.f32.mrf.mxu0  ;;  %17013 = vmatmul.mubr.msk.f32.gmra.mxu1 %vm5267_vm0, %v20959_v41  ;;  %17342 = vmatmul.mubr.msk.f32.gmra.mxu0 %vm5267_vm0, %v10493_v38  ;;  %v10496_v41 = vld [vmem:[#allocation2 + $0xa8] sm:$0xff] }
 0x586   : > { %23670 = vst [vmem:[#allocation118_spill] sm:$0xff] %v21498_v7  ;;  %17015 = vmatprep.mubr.msk.f32.mxu1 %vm5267_vm0, %v20968_v55  ;;  %17344 = vmatprep.mubr.msk.f32.mxu0 %vm5267_vm0, %v10494_v56  ;;  %v21523_v55 = vld [vmem:[%s23464_s3 + $0x8] sm:$0xff]  ;;  %v10499_v7 = vld [vmem:[#allocation2 + $0xc0] sm:$0xff] }
 0x587   : > { %v21506_v23 = vpop.f32.mrf.mxu1  ;;  %v21508_v11 = vpop.f32.mrf.mxu0  ;;  %17575 = vmatprep.subr.mxu0 %v21523_v55 }
 0x588   : > { %23671 = vst [vmem:[#allocation119_spill] sm:$0xff] %v21508_v11 }
 0x589   : > { %v21510_v24 = vpop.f32.mrf.mxu1  ;;  %v21512_v37 = vpop.f32.mrf.mxu0  ;;  %17016 = vmatmul.mubr.msk.f32.gmra.mxu1 %vm5267_vm0, %v20973_v47  ;;  %17345 = vmatmul.mubr.msk.f32.gmra.mxu0 %vm5267_vm0, %v10495_v22  ;;  %v10497_v47 = vld [vmem:[#allocation2 + $0xb0] sm:$0xff]  ;;  %v10498_v22 = vld [vmem:[#allocation2 + $0xb8] sm:$0xff] }
 0x58a   : > { %23672 = vst [vmem:[#allocation120_spill] sm:$0xff] %v21512_v37  ;;  %17018 = vmatprep.mubr.msk.f32.mxu1 %vm5267_vm0, %v20982_v2  ;;  %17347 = vmatprep.mubr.msk.f32.mxu0 %vm5267_vm0, %v10496_v41  ;;  %v23677_v41 = vld [vmem:[#allocation32_spill] sm:$0xff] }
 0x58b   : > { %v21525_v38 = vpop.f32.mrf.mxu1  ;;  %v21527_v56 = vpop.f32.mrf.mxu0 }
 0x58c   : > { %23673 = vst [vmem:[#allocation121_spill] sm:$0xff] %v21525_v38  ;;  %23674 = vst [vmem:[#allocation122_spill] sm:$0xff] %v21527_v56 }
 0x58d   : > { %v21530_v37 = vpop.f32.mrf.mxu1  ;;  %17019 = vmatmul.mubr.msk.f32.gmra.mxu1 %vm5267_vm0, %v20997_v51  ;;  %v21534_v2 = vpop.f32.mrf.mxu0  ;;  %17348 = vmatmul.mubr.msk.f32.gmra.mxu0 %vm5267_vm0, %v10497_v47  ;;  %v10500_v47 = vld [vmem:[#allocation2 + $0xc8] sm:$0xff] }
 0x58e   : > { %23675 = vst [vmem:[#allocation123_spill] sm:$0xff] %v21530_v37  ;;  %23676 = vst [vmem:[#allocation124_spill] sm:$0xff] %v21534_v2  ;;  %17021 = vmatprep.mubr.msk.f32.mxu1 %vm5267_vm0, %v23677_v41  ;;  %17350 = vmatprep.mubr.msk.f32.mxu0 %vm5267_vm0, %v10498_v22  ;;  %v23683_v2 = vld [vmem:[#allocation38_spill] sm:$0xff] }
 0x58f   : > { %v21540_v11 = vpop.f32.mrf.mxu1  ;;  %v21542_v56 = vpop.f32.mrf.mxu0 }
 0x590   : > { %23678 = vst [vmem:[#allocation32_spill] sm:$0xff] %v21540_v11  ;;  %23679 = vst [vmem:[#allocation125_spill] sm:$0xff] %v21542_v56  ;;  %v10501_v56 = vld [vmem:[#allocation2 + $0xd0] sm:$0xff] }
 0x591   : > { %v21544_v53 = vpop.f32.mrf.mxu1  ;;  %17022 = vmatmul.mubr.msk.f32.gmra.mxu1 %vm5267_vm0, %v23681_v34  ;;  %v21548_v51 = vpop.f32.mrf.mxu0  ;;  %17351 = vmatmul.mubr.msk.f32.gmra.mxu0 %vm5267_vm0, %v10499_v7  ;;  %v10502_v7 = vld [vmem:[#allocation2 + $0xd8] sm:$0xff] }
 0x592   : > { %23680 = vst [vmem:[#allocation126_spill] sm:$0xff] %v21544_v53  ;;  %23682 = vst [vmem:[#allocation35_spill] sm:$0xff] %v21548_v51  ;;  %17024 = vmatprep.mubr.msk.f32.mxu1 %vm5267_vm0, %v23683_v2  ;;  %17353 = vmatprep.mubr.msk.f32.mxu0 %vm5267_vm0, %v10500_v47  ;;  %v23687_v53 = vld [vmem:[#allocation40_spill] sm:$0xff]  ;;  %v23689_v51 = vld [vmem:[#allocation41_spill] sm:$0xff] }
 0x593   : > { %v21554_v22 = vpop.f32.mrf.mxu1  ;;  %v21556_v41 = vpop.f32.mrf.mxu0 }
 0x594   : > { %23684 = vst [vmem:[#allocation38_spill] sm:$0xff] %v21554_v22  ;;  %23685 = vst [vmem:[#allocation127_spill] sm:$0xff] %v21556_v41  ;;  %v23692_v41 = vld [vmem:[#allocation13_spill] sm:$0xff] }
 0x595   : > { %v21558_v11 = vpop.f32.mrf.mxu1  ;;  %17025 = vmatmul.mubr.msk.f32.gmra.mxu1 %vm5267_vm0, %v23687_v53  ;;  %v21562_v34 = vpop.f32.mrf.mxu0  ;;  %17354 = vmatmul.mubr.msk.f32.gmra.mxu0 %vm5267_vm0, %v10501_v56  ;;  %v8109_v22 = vld [vmem:[#allocation2 + $0x89] sm:$0xff]  ;;  %v10503_v53 = vld [vmem:[#allocation2 + $0xe0] sm:$0xff] }
 0x596   : > { %23686 = vst [vmem:[#allocation128_spill] sm:$0xff] %v21558_v11  ;;  %23688 = vst [vmem:[#allocation40_spill] sm:$0xff] %v21562_v34  ;;  %17027 = vmatprep.mubr.msk.f32.mxu1 %vm5267_vm0, %v23689_v51  ;;  %17356 = vmatprep.mubr.msk.f32.mxu0 %vm5267_vm0, %v10502_v7  ;;  %v5980_v11 = vadd.f32 %v21278_v63, %v23692_v41  ;;  %v8110_v51 = vld [vmem:[#allocation2 + $0x91] sm:$0xff]  ;;  %v10504_v34 = vld [vmem:[#allocation2 + $0xe8] sm:$0xff] }
 0x597   : > { %v21568_v2 = vpop.f32.mrf.mxu1  ;;  %v21570_v47 = vpop.f32.mrf.mxu0  ;;  %v23694_v7 = vld [vmem:[#allocation15_spill] sm:$0xff]  ;;  %v21583_v63 = vld [vmem:[#allocation7] ss:$0 sm:$0xff] }
 0x598   : > { %23690 = vst [vmem:[#allocation41_spill] sm:$0xff] %v21568_v2  ;;  %23691 = vst [vmem:[#allocation129_spill] sm:$0xff] %v21570_v47  ;;  %v5975_v17 = vadd.f32 %v21288_v59, %v23694_v7  ;;  %v23698_v59 = vld [vmem:[#allocation19_spill] sm:$0xff] }
 0x599   : > { %v16749_v37 = vpop.f32.mrf.mxu1  ;;  %17028 = vmatmul.mubr.msk.f32.gmra.mxu1 %vm5267_vm0, %v8109_v22  ;;  %v21575_v56 = vpop.f32.mrf.mxu0  ;;  %17357 = vmatmul.mubr.msk.f32.gmra.mxu0 %vm5267_vm0, %v10503_v53  ;;  %v23696_v22 = vld [vmem:[#allocation21_spill] sm:$0xff]  ;;  %v23697_v53 = vld [vmem:[#allocation10_spill] sm:$0xff]  ;;  %v10506_v7 = vld [vmem:[#allocation2 + $0xf8] sm:$0xff] }
 0x59a   : > { %23693 = vst [vmem:[#allocation13_spill] sm:$0xff] %v21575_v56  ;;  %v6602_v2 = vadd.f32 %v16749_v37, %v5980_v11  ;;  %17030 = vmatprep.mubr.msk.f32.mxu1 %vm5267_vm0, %v8110_v51  ;;  %17359 = vmatprep.mubr.msk.f32.mxu0 %vm5267_vm0, %v10504_v34  ;;  %v5990_v56 = vadd.f32 %v21292_v13, %v23696_v22  ;;  %v8112_v51 = vld [vmem:[#allocation2 + $0xa1] sm:$0xff]  ;;  %v23699_v13 = vld [vmem:[#allocation11_spill] sm:$0xff] }
 0x59b   : > { %v6402_v41 = vpop.f32.mrf.mxu1  ;;  %v21585_v47 = vpop.f32.mrf.mxu0  ;;  %v5985_v37 = vadd.f32 %v21302_v42, %v23698_v59  ;;  %v8113_v59 = vld [vmem:[#allocation2 + $0xa9] sm:$0xff] }
 0x59c   : > { %23695 = vst [vmem:[#allocation15_spill] sm:$0xff] %v21585_v47  ;;  %v7070_v48 = vadd.f32 %v23697_v53, %v6602_v2  ;;  %v6601_v38 = vadd.f32 %v6402_v41, %v5975_v17  ;;  %v23700_v17 = vld [vmem:[#allocation22_spill] sm:$0xff] }
 0x59d   : > { %v16752_v11 = vpop.f32.mrf.mxu1  ;;  %17031 = vmatmul.mubr.msk.f32.gmra.mxu1 %vm5267_vm0, %v8111_v46  ;;  %v21593_v34 = vpop.f32.mrf.mxu0  ;;  %17360 = vmatmul.mubr.msk.f32.gmra.mxu0 %vm5267_vm0, %v10505_v43  ;;  %v6000_v42 = vadd.f32 %v21306_v26, %v23700_v17  ;;  %v8114_v17 = vld [vmem:[#allocation2 + $0xb1] sm:$0xff] }
 0x59e   : > { %v7117_v47 = vadd.f32 %v21583_v63, %v7070_v48  ;;  %v7069_v22 = vadd.f32 %v23699_v13, %v6601_v38  ;;  %v6604_v2 = vadd.f32 %v16752_v11, %v5990_v56  ;;  %17033 = vmatprep.mubr.msk.f32.mxu1 %vm5267_vm0, %v8112_v51  ;;  %17362 = vmatprep.mubr.msk.f32.mxu0 %vm5267_vm0, %v10506_v7  ;;  %v23701_v56 = vld [vmem:[#allocation12_spill] sm:$0xff]  ;;  %v23702_v51 = vld [vmem:[#allocation23_spill] sm:$0xff] }
 0x59f   : > { %v6412_v43 = vpop.f32.mrf.mxu1  ;;  %v21607_v46 = vpop.f32.mrf.mxu0  ;;  %v10507_v11 = vld [vmem:[#allocation2 + $0x100] sm:$0xff]  ;;  %v5995_v26 = vadd.f32 %v21316_v39, %v23702_v51  ;;  %v23705_v39 = vld [vmem:[#allocation26_spill] sm:$0xff] }
 0x5a0   : > { %v7157_v48 = vmax.f32 %v7117_v47, 0.0  ;;  %v7116_v38 = vadd.f32 %v21583_v63, %v7069_v22  ;;  %v7072_v41 = vadd.f32 %v23701_v56, %v6604_v2  ;;  %v6603_v53 = vadd.f32 %v6412_v43, %v5985_v37  ;;  %v10508_v47 = vld [vmem:[#allocation2 + $0x108] sm:$0xff] }
 0x5a1   : > { %v16755_v7 = vpop.f32.mrf.mxu1  ;;  %17034 = vmatmul.mubr.msk.f32.gmra.mxu1 %vm5267_vm0, %v8113_v59  ;;  %v21614_v13 = vpop.f32.mrf.mxu0  ;;  %17363 = vmatmul.mubr.msk.f32.gmra.mxu0 %vm5267_vm0, %v10507_v11  ;;  %v23704_v2 = vld [vmem:[#allocation17_spill] sm:$0xff]  ;;  %v6010_v59 = vadd.f32 %v21320_v16, %v23705_v39 }
 0x5a2   : > { %23703 = vst [vmem:[#allocation21_spill] sm:$0xff] %v21614_v13  ;;  %7197 = vst.msk [vmem:[%s21605_s17 + $0x8] sm:$0xff] %vm385_vm2, %v7157_v48  ;;  %v7156_v22 = vmax.f32 %v7116_v38, 0.0  ;;  %v7119_v37 = vadd.f32 %v21583_v63, %v7072_v41  ;;  %v7071_v43 = vadd.f32 %v23704_v2, %v6603_v53  ;;  %v6606_v56 = vadd.f32 %v16755_v7, %v6000_v42  ;;  %v23706_v41 = vld [vmem:[#allocation14_spill] sm:$0xff]  ;;  %v8115_v42 = vld [vmem:[#allocation2 + $0xb9] sm:$0xff] }
 0x5a3   : > { %17036 = vmatprep.mubr.msk.f32.mxu1 %vm5267_vm0, %v8114_v17  ;;  %17365 = vmatprep.mubr.msk.f32.mxu0 %vm5267_vm0, %v10508_v47  ;;  %v6422_v51 = vpop.f32.mrf.mxu1  ;;  %v21625_v11 = vpop.f32.mrf.mxu0  ;;  %v10509_v7 = vld [vmem:[#allocation2 + $0x110] sm:$0xff]  ;;  %v23707_v17 = vld [vmem:[#allocation29_spill] sm:$0xff] }
 0x5a4   : > { %7196 = vst.msk [vmem:[%s21605_s17] sm:$0xff] %vm385_vm2, %v7156_v22  ;;  %v7159_v48 = vmax.f32 %v7119_v37, 0.0  ;;  %v7118_v38 = vadd.f32 %v21583_v63, %v7071_v43  ;;  %v7074_v13 = vadd.f32 %v23706_v41, %v6606_v56  ;;  %v6605_v53 = vadd.f32 %v6422_v51, %v5995_v26  ;;  %v8116_v22 = vld [vmem:[#allocation2 + $0xc1] sm:$0xff]  ;;  %v10510_v37 = vld [vmem:[#allocation2 + $0x118] sm:$0xff] }
 0x5a5   : > { %v6005_v47 = vadd.f32 %v21330_v61, %v23707_v17  ;;  %v16758_v2 = vpop.f32.mrf.mxu1  ;;  %17037 = vmatmul.mubr.msk.f32.gmra.mxu1 %vm5267_vm0, %v8115_v42  ;;  %v21634_v16 = vpop.f32.mrf.mxu0  ;;  %17366 = vmatmul.mubr.msk.f32.gmra.mxu0 %vm5267_vm0, %v10509_v7  ;;  %v23708_v56 = vld [vmem:[#allocation16_spill] sm:$0xff]  ;;  %v23709_v61 = vld [vmem:[#allocation30_spill] sm:$0xff] }
 0x5a6   : > { %7199 = vst.msk [vmem:[%s21605_s17 + $0x18] sm:$0xff] %vm385_vm2, %v7159_v48  ;;  %v7158_v43 = vmax.f32 %v7118_v38, 0.0  ;;  %v7121_v26 = vadd.f32 %v21583_v63, %v7074_v13  ;;  %v7073_v39 = vadd.f32 %v23708_v56, %v6605_v53  ;;  %v6608_v51 = vadd.f32 %v16758_v2, %v6010_v59  ;;  %17039 = vmatprep.mubr.msk.f32.mxu1 %vm5267_vm0, %v8116_v22  ;;  %v23710_v13 = vld [vmem:[#allocation18_spill] sm:$0xff]  ;;  %v10511_v2 = vld [vmem:[#allocation2 + $0x120] sm:$0xff] }
 0x5a7   : > { %17368 = vmatprep.mubr.msk.f32.mxu0 %vm5267_vm0, %v10510_v37  ;;  %v6020_v41 = vadd.f32 %v21334_v33, %v23709_v61  ;;  %v6432_v42 = vpop.f32.mrf.mxu1  ;;  %v21645_v7 = vpop.f32.mrf.mxu0  ;;  %v8117_v59 = vld [vmem:[#allocation2 + $0xc9] sm:$0xff] }
 0x5a8   : > { %7198 = vst.msk [vmem:[%s21605_s17 + $0x10] sm:$0xff] %vm385_vm2, %v7158_v43  ;;  %v7161_v48 = vmax.f32 %v7121_v26, 0.0  ;;  %v7120_v38 = vadd.f32 %v21583_v63, %v7073_v39  ;;  %v7076_v17 = vadd.f32 %v23710_v13, %v6608_v51  ;;  %v6607_v53 = vadd.f32 %v6432_v42, %v6005_v47  ;;  %v23711_v22 = vld [vmem:[#allocation33_spill] sm:$0xff]  ;;  %v8118_v43 = vld [vmem:[#allocation2 + $0xd1] sm:$0xff]  ;;  %v23712_v51 = vld [vmem:[#allocation20_spill] sm:$0xff] }
 0x5a9   : > { %v6015_v37 = vadd.f32 %v21344_v19, %v23711_v22  ;;  %v16761_v56 = vpop.f32.mrf.mxu1  ;;  %17040 = vmatmul.mubr.msk.f32.gmra.mxu1 %vm5267_vm0, %v8117_v59  ;;  %v21654_v33 = vpop.f32.mrf.mxu0  ;;  %17369 = vmatmul.mubr.msk.f32.gmra.mxu0 %vm5267_vm0, %v10511_v2  ;;  %v10512_v26 = vld [vmem:[#allocation2 + $0x128] sm:$0xff]  ;;  %v23713_v19 = vld [vmem:[#allocation36_spill] sm:$0xff] }
 0x5aa   : > { %7201 = vst.msk [vmem:[%s21605_s17 + $0x28] sm:$0xff] %vm385_vm2, %v7161_v48  ;;  %v7160_v39 = vmax.f32 %v7120_v38, 0.0  ;;  %v7123_v47 = vadd.f32 %v21583_v63, %v7076_v17  ;;  %v7075_v61 = vadd.f32 %v23712_v51, %v6607_v53  ;;  %v6610_v42 = vadd.f32 %v16761_v56, %v6020_v41  ;;  %17042 = vmatprep.mubr.msk.f32.mxu1 %vm5267_vm0, %v8118_v43  ;;  %v23714_v17 = vld [vmem:[#allocation25_spill] sm:$0xff]  ;;  %v8119_v41 = vld [vmem:[#allocation2 + $0xd9] sm:$0xff]  ;;  %v10513_v56 = vld [vmem:[#allocation2 + $0x130] sm:$0xff] }
 0x5ab   : > { %17371 = vmatprep.mubr.msk.f32.mxu0 %vm5267_vm0, %v10512_v26  ;;  %v6030_v13 = vadd.f32 %v21348_v28, %v23713_v19  ;;  %v6442_v59 = vpop.f32.mrf.mxu1  ;;  %v21665_v2 = vpop.f32.mrf.mxu0  ;;  %v23715_v43 = vld [vmem:[#allocation39_spill] sm:$0xff] }
 0x5ac   : > { %7200 = vst.msk [vmem:[%s21605_s17 + $0x20] sm:$0xff] %vm385_vm2, %v7160_v39  ;;  %v7163_v48 = vmax.f32 %v7123_v47, 0.0  ;;  %v7122_v38 = vadd.f32 %v21583_v63, %v7075_v61  ;;  %v7078_v22 = vadd.f32 %v23714_v17, %v6610_v42  ;;  %v6609_v53 = vadd.f32 %v6442_v59, %v6015_v37  ;;  %v8120_v39 = vld [vmem:[#allocation2 + $0xe1] sm:$0xff]  ;;  %v10514_v47 = vld [vmem:[#allocation2 + $0x138] sm:$0xff] }
 0x5ad   : > { %v6025_v26 = vadd.f32 %v21358_v44, %v23715_v43  ;;  %v16764_v51 = vpop.f32.mrf.mxu1  ;;  %17043 = vmatmul.mubr.msk.f32.gmra.mxu1 %vm5267_vm0, %v8119_v41  ;;  %v21674_v28 = vpop.f32.mrf.mxu0  ;;  %17372 = vmatmul.mubr.msk.f32.gmra.mxu0 %vm5267_vm0, %v10513_v56  ;;  %v23716_v42 = vld [vmem:[#allocation24_spill] sm:$0xff] }
 0x5ae   : > { %7203 = vst.msk [vmem:[%s21605_s17 + $0x38] sm:$0xff] %vm385_vm2, %v7163_v48  ;;  %v7162_v61 = vmax.f32 %v7122_v38, 0.0  ;;  %v7125_v37 = vadd.f32 %v21583_v63, %v7078_v22  ;;  %v7077_v19 = vadd.f32 %v23716_v42, %v6609_v53  ;;  %v6612_v59 = vadd.f32 %v16764_v51, %v6030_v13  ;;  %17045 = vmatprep.mubr.msk.f32.mxu1 %vm5267_vm0, %v8120_v39  ;;  %v23717_v44 = vld [vmem:[#allocation44_spill] sm:$0xff]  ;;  %v23718_v22 = vld [vmem:[#allocation27_spill] sm:$0xff]  ;;  %v8121_v13 = vld [vmem:[#allocation2 + $0xe9] sm:$0xff] }
 0x5af   : > { %17374 = vmatprep.mubr.msk.f32.mxu0 %vm5267_vm0, %v10514_v47  ;;  %v6040_v17 = vadd.f32 %v21362_v9, %v23717_v44  ;;  %v6452_v41 = vpop.f32.mrf.mxu1  ;;  %v21685_v56 = vpop.f32.mrf.mxu0  ;;  %v10515_v51 = vld [vmem:[#allocation2 + $0x140] sm:$0xff] }
 0x5b0   : > { %7202 = vst.msk [vmem:[%s21605_s17 + $0x30] sm:$0xff] %vm385_vm2, %v7162_v61  ;;  %v7165_v48 = vmax.f32 %v7125_v37, 0.0  ;;  %v7124_v38 = vadd.f32 %v21583_v63, %v7077_v19  ;;  %v7080_v43 = vadd.f32 %v23718_v22, %v6612_v59  ;;  %v6611_v53 = vadd.f32 %v6452_v41, %v6025_v26  ;;  %v23719_v39 = vld [vmem:[#allocation45_spill] sm:$0xff]  ;;  %v8122_v61 = vld [vmem:[#allocation2 + $0xf1] sm:$0xff]  ;;  %v23720_v59 = vld [vmem:[#allocation28_spill] sm:$0xff] }
 0x5b1   : > { %v6035_v47 = vadd.f32 %v21372_v10, %v23719_v39  ;;  %v16767_v42 = vpop.f32.mrf.mxu1  ;;  %17046 = vmatmul.mubr.msk.f32.gmra.mxu1 %vm5267_vm0, %v8121_v13  ;;  %v21694_v9 = vpop.f32.mrf.mxu0  ;;  %17375 = vmatmul.mubr.msk.f32.gmra.mxu0 %vm5267_vm0, %v10515_v51  ;;  %v10516_v37 = vld [vmem:[#allocation2 + $0x148] sm:$0xff]  ;;  %v23721_v10 = vld [vmem:[#allocation47_spill] sm:$0xff] }
 0x5b2   : > { %7205 = vst.msk [vmem:[%s21605_s17 + $0x48] sm:$0xff] %vm385_vm2, %v7165_v48  ;;  %v7164_v19 = vmax.f32 %v7124_v38, 0.0  ;;  %v7127_v26 = vadd.f32 %v21583_v63, %v7080_v43  ;;  %v7079_v44 = vadd.f32 %v23720_v59, %v6611_v53  ;;  %v6614_v41 = vadd.f32 %v16767_v42, %v6040_v17  ;;  %17048 = vmatprep.mubr.msk.f32.mxu1 %vm5267_vm0, %v8122_v61  ;;  %v23722_v43 = vld [vmem:[#allocation31_spill] sm:$0xff]  ;;  %v23723_v61 = vld [vmem:[#allocation49_spill] sm:$0xff] }
 0x5b3   : > { %17377 = vmatprep.mubr.msk.f32.mxu0 %vm5267_vm0, %v10516_v37  ;;  %v6050_v22 = vadd.f32 %v21376_v25, %v23721_v10  ;;  %v6462_v13 = vpop.f32.mrf.mxu1  ;;  %v21705_v51 = vpop.f32.mrf.mxu0  ;;  %v8123_v17 = vld [vmem:[#allocation2 + $0xf9] sm:$0xff]  ;;  %v10517_v42 = vld [vmem:[#allocation2 + $0x150] sm:$0xff]  ;;  %v6045_v37 = vadd.f32 %v21386_v32, %v23723_v61 }
 0x5b4   : > { %7204 = vst.msk [vmem:[%s21605_s17 + $0x40] sm:$0xff] %vm385_vm2, %v7164_v19  ;;  %v7167_v48 = vmax.f32 %v7127_v26, 0.0  ;;  %v7126_v38 = vadd.f32 %v21583_v63, %v7079_v44  ;;  %v7082_v39 = vadd.f32 %v23722_v43, %v6614_v41  ;;  %v6613_v53 = vadd.f32 %v6462_v13, %v6035_v47  ;;  %v8124_v19 = vld [vmem:[#allocation2 + $0x101] sm:$0xff]  ;;  %v10518_v26 = vld [vmem:[#allocation2 + $0x158] sm:$0xff]  ;;  %v23724_v41 = vld [vmem:[#allocation34_spill] sm:$0xff] }
 0x5b5   : > { %v16770_v59 = vpop.f32.mrf.mxu1  ;;  %17049 = vmatmul.mubr.msk.f32.gmra.mxu1 %vm5267_vm0, %v8123_v17  ;;  %v21714_v25 = vpop.f32.mrf.mxu0  ;;  %17378 = vmatmul.mubr.msk.f32.gmra.mxu0 %vm5267_vm0, %v10517_v42  ;;  %v23725_v32 = vld [vmem:[#allocation51_spill] sm:$0xff] }
 0x5b6   : > { %7207 = vst.msk [vmem:[%s21605_s17 + $0x58] sm:$0xff] %vm385_vm2, %v7167_v48  ;;  %v7166_v44 = vmax.f32 %v7126_v38, 0.0  ;;  %v7129_v47 = vadd.f32 %v21583_v63, %v7082_v39  ;;  %v7081_v10 = vadd.f32 %v23724_v41, %v6613_v53  ;;  %v6616_v13 = vadd.f32 %v16770_v59, %v6050_v22  ;;  %17051 = vmatprep.mubr.msk.f32.mxu1 %vm5267_vm0, %v8124_v19  ;;  %v23726_v39 = vld [vmem:[#allocation37_spill] sm:$0xff] }
 0x5b7   : > { %17380 = vmatprep.mubr.msk.f32.mxu0 %vm5267_vm0, %v10518_v26  ;;  %v6060_v43 = vadd.f32 %v21390_v3, %v23725_v32  ;;  %v6472_v17 = vpop.f32.mrf.mxu1  ;;  %v21725_v42 = vpop.f32.mrf.mxu0  ;;  %v8125_v22 = vld [vmem:[#allocation2 + $0x109] sm:$0xff]  ;;  %v10519_v59 = vld [vmem:[#allocation2 + $0x160] sm:$0xff] }
 0x5b8   : > { %7206 = vst.msk [vmem:[%s21605_s17 + $0x50] sm:$0xff] %vm385_vm2, %v7166_v44  ;;  %v7169_v48 = vmax.f32 %v7129_v47, 0.0  ;;  %v7128_v38 = vadd.f32 %v21583_v63, %v7081_v10  ;;  %v7084_v61 = vadd.f32 %v23726_v39, %v6616_v13  ;;  %v6615_v53 = vadd.f32 %v6472_v17, %v6045_v37  ;;  %v23727_v19 = vld [vmem:[#allocation53_spill] sm:$0xff]  ;;  %v8126_v44 = vld [vmem:[#allocation2 + $0x111] sm:$0xff] }
 0x5b9   : > { %v6055_v26 = vadd.f32 %v21399_v50, %v23727_v19  ;;  %v16773_v41 = vpop.f32.mrf.mxu1  ;;  %17052 = vmatmul.mubr.msk.f32.gmra.mxu1 %vm5267_vm0, %v8125_v22  ;;  %v21734_v3 = vpop.f32.mrf.mxu0  ;;  %17381 = vmatmul.mubr.msk.f32.gmra.mxu0 %vm5267_vm0, %v10519_v59  ;;  %v11076_v47 = vld [vmem:[#allocation2 + $0x15] sm:$0xff]  ;;  %v23728_v13 = vld [vmem:[#allocation42_spill] sm:$0xff] }
 0x5ba   : > { %7209 = vst.msk [vmem:[%s21605_s17 + $0x68] sm:$0xff] %vm385_vm2, %v7169_v48  ;;  %v7168_v10 = vmax.f32 %v7128_v38, 0.0  ;;  %v7131_v37 = vadd.f32 %v21583_v63, %v7084_v61  ;;  %v7083_v32 = vadd.f32 %v23728_v13, %v6615_v53  ;;  %v6618_v17 = vadd.f32 %v16773_v41, %v6060_v43  ;;  %17054 = vmatprep.mubr.msk.f32.mxu1 %vm5267_vm0, %v8126_v44  ;;  %v23729_v50 = vld [vmem:[#allocation55_spill] sm:$0xff]  ;;  %v11077_v41 = vld [vmem:[#allocation2 + $0x1d] sm:$0xff] }
 0x5bb   : > { %17451 = vmatprep.mubr.msk.f32.mxu0 %vm5267_vm0, %v11076_v47  ;;  %v6070_v39 = vadd.f32 %v21403_v62, %v23729_v50  ;;  %v6482_v22 = vpop.f32.mrf.mxu1  ;;  %v21745_v19 = vpop.f32.mrf.mxu0  ;;  %v23730_v61 = vld [vmem:[#allocation43_spill] sm:$0xff]  ;;  %v23731_v44 = vld [vmem:[#allocation57_spill] sm:$0xff] }
 0x5bc   : > { %7208 = vst.msk [vmem:[%s21605_s17 + $0x60] sm:$0xff] %vm385_vm2, %v7168_v10  ;;  %v7171_v48 = vmax.f32 %v7131_v37, 0.0  ;;  %v7130_v38 = vadd.f32 %v21583_v63, %v7083_v32  ;;  %v7086_v59 = vadd.f32 %v23730_v61, %v6618_v17  ;;  %v6617_v53 = vadd.f32 %v6482_v22, %v6055_v26  ;;  %v8127_v43 = vld [vmem:[#allocation2 + $0x119] sm:$0xff]  ;;  %v8128_v10 = vld [vmem:[#allocation2 + $0x121] sm:$0xff] }
 0x5bd   : > { %v6065_v47 = vadd.f32 %v21414_v35, %v23731_v44  ;;  %v16776_v13 = vpop.f32.mrf.mxu1  ;;  %17055 = vmatmul.mubr.msk.f32.gmra.mxu1 %vm5267_vm0, %v8127_v43  ;;  %v21754_v62 = vpop.f32.mrf.mxu0  ;;  %17452 = vmatmul.mubr.msk.f32.vlgmr.msra.gmra.mxu0 %vm5267_vm0, %v11077_v41  ;;  %v11078_v37 = vld [vmem:[#allocation2 + $0x25] sm:$0xff]  ;;  %v23733_v61 = vld [vmem:[#allocation59_spill] sm:$0xff] }
 0x5be   : > { %v12440_v32 = vld [vmem:[%s23464_s3] sm:$0xff]  ;;  %7211 = vst.msk [vmem:[%s21605_s17 + $0x78] sm:$0xff] %vm385_vm2, %v7171_v48  ;;  %v7170_v26 = vmax.f32 %v7130_v38, 0.0  ;;  %v7133_v17 = vadd.f32 %v21583_v63, %v7086_v59  ;;  %v23732_v35 = vld [vmem:[#allocation46_spill] sm:$0xff]  ;;  %v6620_v22 = vadd.f32 %v16776_v13, %v6070_v39  ;;  %17057 = vmatprep.mubr.msk.f32.mxu1 %vm5267_vm0, %v8128_v10  ;;  %17454 = vmatprep.mubr.msk.f32.mxu0 %vm5267_vm0, %v11078_v37 }
 0x5bf   : > { %v7085_v50 = vadd.f32 %v23732_v35, %v6617_v53  ;;  %v6080_v43 = vadd.f32 %v21419_v18, %v23733_v61  ;;  %v6492_v41 = vpop.f32.mrf.mxu1  ;;  %v21768_v44 = vpop.f32.mrf.mxu0  ;;  %17576 = vmatpush3.msra.mxu0 %v21523_v55  ;;  %v23734_v59 = vld [vmem:[#allocation48_spill] sm:$0xff]  ;;  %v8129_v13 = vld [vmem:[#allocation2 + $0x129] sm:$0xff] }
 0x5c0   : > { %7210 = vst.msk [vmem:[%s21605_s17 + $0x70] sm:$0xff] %vm385_vm2, %v7170_v26  ;;  %v7173_v48 = vmax.f32 %v7133_v17, 0.0  ;;  %v7088_v39 = vadd.f32 %v23734_v59, %v6620_v22  ;;  %v6619_v53 = vadd.f32 %v6492_v41, %v6065_v47  ;;  %v11079_v10 = vld [vmem:[#allocation2 + $0x2d] sm:$0xff]  ;;  %17577 = vmatprep.subr.mxu0 %v12440_v32  ;;  %v23735_v37 = vld [vmem:[#allocation61_spill] sm:$0xff]  ;;  %v11080_v17 = vld [vmem:[#allocation2 + $0x35] sm:$0xff] }
 0x5c1   : > { %v7132_v38 = vadd.f32 %v21583_v63, %v7085_v50  ;;  %v6075_v18 = vadd.f32 %v21427_v54, %v23735_v37  ;;  %v16779_v35 = vpop.f32.mrf.mxu1  ;;  %17058 = vmatmul.mubr.msk.f32.gmra.mxu1 %vm5267_vm0, %v8129_v13  ;;  %v21778_v55 = vpop.f32.mrf.mxu0  ;;  %17455 = vmatmul.mubr.msk.f32.gmra.mxu0 %vm5267_vm0, %v11079_v10  ;;  %v8130_v26 = vld [vmem:[#allocation2 + $0x131] sm:$0xff]  ;;  %v6090_v54 = vadd.f32 %v21431_v0, %v21107_v5  ;;  %v8131_v10 = vld [vmem:[#allocation2 + $0x139] sm:$0xff] }
 0x5c2   : > { %23736 = vst [vmem:[#allocation10_spill] sm:$0xff] %v21778_v55  ;;  %7213 = vst.msk [vmem:[%s21605_s17 + $0x88] sm:$0xff] %vm385_vm2, %v7173_v48  ;;  %v7135_v47 = vadd.f32 %v21583_v63, %v7088_v39  ;;  %v23737_v22 = vld [vmem:[#allocation50_spill] sm:$0xff]  ;;  %v6622_v41 = vadd.f32 %v16779_v35, %v6080_v43  ;;  %17060 = vmatprep.mubr.msk.f32.mxu1 %vm5267_vm0, %v8130_v26  ;;  %17457 = vmatprep.mubr.msk.f32.mxu0 %vm5267_vm0, %v11080_v17  ;;  %v23739_v39 = vld [vmem:[#allocation52_spill] sm:$0xff] }
 0x5c3   : > { %v7172_v50 = vmax.f32 %v7132_v38, 0.0  ;;  %v7087_v61 = vadd.f32 %v23737_v22, %v6619_v53  ;;  %v6502_v59 = vpop.f32.mrf.mxu1  ;;  %v21789_v13 = vpop.f32.mrf.mxu0  ;;  %17578 = vmatpush3.msra.mxu0 %v12440_v32  ;;  %v11081_v37 = vld [vmem:[#allocation2 + $0x3d] sm:$0xff]  ;;  %v6085_v35 = vadd.f32 %v21440_v29, %v21115_v6  ;;  %v9199_v0 = vld [vmem:[#allocation2 + $0x14] sm:$0xff]  ;;  %v11082_v32 = vld [vmem:[#allocation2 + $0x45] sm:$0xff]  ;;  %v6100_v6 = vadd.f32 %v21447_v1, %v21124_v15 }
 0x5c4   : > { %23738 = vst [vmem:[#allocation19_spill] sm:$0xff] %v21789_v13  ;;  %v7175_v48 = vmax.f32 %v7135_v47, 0.0  ;;  %v7090_v53 = vadd.f32 %v23739_v39, %v6622_v41  ;;  %v6621_v43 = vadd.f32 %v6502_v59, %v6075_v18  ;;  %v6095_v15 = vadd.f32 %v21458_v12, %v21137_v57  ;;  %v11084_v57 = vld [vmem:[#allocation2 + $0x55] sm:$0xff]  ;;  %v10031_v13 = vld [vmem:[#allocation2 + $0xc1] sm:$0xff] }
 0x5c5   : > { %7212 = vst.msk [vmem:[%s21605_s17 + $0x80] sm:$0xff] %vm385_vm2, %v7172_v50  ;;  %v7134_v38 = vadd.f32 %v21583_v63, %v7087_v61  ;;  %v16782_v26 = vpop.f32.mrf.mxu1  ;;  %17061 = vmatmul.mubr.msk.f32.gmra.mxu1 %vm5267_vm0, %v8131_v10  ;;  %v21798_v5 = vpop.f32.mrf.mxu0  ;;  %17458 = vmatmul.mubr.msk.f32.gmra.mxu0 %vm5267_vm0, %v11081_v37  ;;  %v23741_v50 = vld [vmem:[#allocation54_spill] sm:$0xff]  ;;  %v9201_v37 = vld [vmem:[#allocation2 + $0x24] sm:$0xff]  ;;  %v6110_v12 = vadd.f32 %v21467_v30, %v21142_v45 }
 0x5c6   : > { %23740 = vst [vmem:[#allocation11_spill] sm:$0xff] %v21798_v5  ;;  %7215 = vst.msk [vmem:[%s21605_s17 + $0x98] sm:$0xff] %vm385_vm2, %v7175_v48  ;;  %v7137_v18 = vadd.f32 %v21583_v63, %v7090_v53  ;;  %v7089_v47 = vadd.f32 %v23741_v50, %v6621_v43  ;;  %v6624_v22 = vadd.f32 %v16782_v26, %v6090_v54  ;;  %17131 = vmatprep.mubr.msk.f32.mxu1 %vm5267_vm0, %v9199_v0  ;;  %v23743_v48 = vld [vmem:[#allocation56_spill] sm:$0xff]  ;;  %v11083_v53 = vld [vmem:[#allocation2 + $0x4d] sm:$0xff] }
 0x5c7   : > { %v7174_v17 = vmax.f32 %v7134_v38, 0.0  ;;  %17460 = vmatprep.mubr.msk.f32.mxu0 %vm5267_vm0, %v11082_v32  ;;  %v6512_v29 = vpop.f32.mrf.mxu1  ;;  %v21809_v61 = vpop.f32.mrf.mxu0  ;;  %v9200_v54 = vld [vmem:[#allocation2 + $0x1c] sm:$0xff]  ;;  %v13962_v43 = vld [vmem:[%s23464_s3 + $0x10] sm:$0xff]  ;;  %v21842_v45 = vld [vmem:[%s23464_s3 + $0x88] sm:$0xff]  ;;  %v6105_v30 = vadd.f32 %v21477_v49, %v21152_v8  ;;  %v6120_v8 = vadd.f32 %v21482_v4, %v21162_v36 }
 0x5c8   : > { %23742 = vst [vmem:[#allocation22_spill] sm:$0xff] %v21809_v61  ;;  %v7177_v41 = vmax.f32 %v7137_v18, 0.0  ;;  %v7136_v59 = vadd.f32 %v21583_v63, %v7089_v47  ;;  %v7092_v38 = vadd.f32 %v23743_v48, %v6624_v22  ;;  %v6623_v39 = vadd.f32 %v6512_v29, %v6085_v35  ;;  %v23745_v0 = vld [vmem:[#allocation58_spill] sm:$0xff]  ;;  %v23845_v5 = vld [vmem:[#allocation124_spill] sm:$0xff] }
 0x5c9   : > { %7214 = vst.msk [vmem:[%s21605_s17 + $0x90] sm:$0xff] %vm385_vm2, %v7174_v17  ;;  %v16785_v1 = vpop.f32.mrf.mxu1  ;;  %v21820_v10 = vpop.f32.mrf.mxu0  ;;  %17132 = vmatmul.mubr.msk.f32.vlgmr.msra.gmra.mxu1 %vm5267_vm0, %v9200_v54  ;;  %17461 = vmatmul.mubr.msk.f32.gmra.mxu0 %vm5267_vm0, %v11083_v53  ;;  %v11086_v54 = vld [vmem:[#allocation2 + $0x65] sm:$0xff]  ;;  %v10033_v55 = vld [vmem:[#allocation2 + $0xd1] sm:$0xff] }
 0x5ca   : > { %23744 = vst [vmem:[#allocation12_spill] sm:$0xff] %v21820_v10  ;;  %7217 = vst.msk [vmem:[%s21605_s17 + $0xa8] sm:$0xff] %vm385_vm2, %v7177_v41  ;;  %v7176_v35 = vmax.f32 %v7136_v59, 0.0  ;;  %v7139_v26 = vadd.f32 %v21583_v63, %v7092_v38  ;;  %v7091_v32 = vadd.f32 %v23745_v0, %v6623_v39  ;;  %v6626_v17 = vadd.f32 %v16785_v1, %v6100_v6  ;;  %v23747_v6 = vld [vmem:[#allocation60_spill] sm:$0xff]  ;;  %v9203_v39 = vld [vmem:[#allocation2 + $0x34] sm:$0xff] }
 0x5cb   : > { %17134 = vmatprep.mubr.msk.f32.mxu1 %vm5267_vm0, %v9201_v37  ;;  %17256 = vmatpush3.msra.mxu1 %v21465_v14  ;;  %v6522_v18 = vpop.f32.mrf.mxu1  ;;  %v21833_v50 = vpop.f32.mrf.mxu0  ;;  %v9202_v14 = vld [vmem:[#allocation2 + $0x2c] sm:$0xff]  ;;  %v11085_v59 = vld [vmem:[#allocation2 + $0x5d] sm:$0xff] }
 0x5cc   : > { %17463 = vmatprep.mubr.msk.f32.mxu0 %vm5267_vm0, %v11084_v57  ;;  %23746 = vst [vmem:[#allocation23_spill] sm:$0xff] %v21833_v50  ;;  %17257 = vmatprep.subr.mxu1 %v13962_v43  ;;  %7216 = vst.msk [vmem:[%s21605_s17 + $0xa0] sm:$0xff] %vm385_vm2, %v7176_v35  ;;  %v7179_v47 = vmax.f32 %v7139_v26, 0.0  ;;  %v7138_v22 = vadd.f32 %v21583_v63, %v7091_v32  ;;  %v7094_v29 = vadd.f32 %v23747_v6, %v6626_v17  ;;  %v23751_v32 = vld [vmem:[#allocation63_spill] sm:$0xff] }
 0x5cd   : > { %v6625_v41 = vadd.f32 %v6522_v18, %v6095_v15  ;;  %17258 = vmatpush3.msra.mxu1 %v13962_v43  ;;  %v16788_v48 = vpop.f32.mrf.mxu1  ;;  %v21846_v38 = vpop.f32.mrf.mxu0  ;;  %17464 = vmatmul.mubr.msk.f32.gmra.mxu0 %vm5267_vm0, %v11085_v59  ;;  %v23749_v15 = vld [vmem:[#allocation62_spill] sm:$0xff]  ;;  %v11088_v6 = vld [vmem:[#allocation2 + $0x75] sm:$0xff] }
 0x5ce   : > { %23748 = vst [vmem:[#allocation17_spill] sm:$0xff] %v21846_v38  ;;  %17135 = vmatmul.mubr.msk.f32.gmra.mxu1 %vm5267_vm0, %v9202_v14  ;;  %7219 = vst.msk [vmem:[%s21605_s17 + $0xb8] sm:$0xff] %vm385_vm2, %v7179_v47  ;;  %v7178_v53 = vmax.f32 %v7138_v22, 0.0  ;;  %v7141_v43 = vadd.f32 %v21583_v63, %v7094_v29  ;;  %v6628_v37 = vadd.f32 %v16788_v48, %v6110_v12  ;;  %17466 = vmatprep.mubr.msk.f32.mxu0 %vm5267_vm0, %v11086_v54  ;;  %v9204_v12 = vld [vmem:[#allocation2 + $0x3c] sm:$0xff]  ;;  %v11087_v18 = vld [vmem:[#allocation2 + $0x6d] sm:$0xff] }
 0x5cf   : > { %v7093_v1 = vadd.f32 %v23749_v15, %v6625_v41  ;;  %17137 = vmatprep.mubr.msk.f32.mxu1 %vm5267_vm0, %v9203_v39  ;;  %v6532_v49 = vpop.f32.mrf.mxu1  ;;  %v21858_v35 = vpop.f32.mrf.mxu0  ;;  %17383 = vmatprep.subr.mxu1 %v21842_v45  ;;  %v6115_v47 = vadd.f32 %v21492_v58, %v21174_v40  ;;  %v9205_v22 = vld [vmem:[#allocation2 + $0x44] sm:$0xff]  ;;  %v6130_v40 = vadd.f32 %v21496_v52, %v21185_v21  ;;  %v9207_v52 = vld [vmem:[#allocation2 + $0x54] sm:$0xff] }
 0x5d0   : > { %23750 = vst [vmem:[#allocation26_spill] sm:$0xff] %v21858_v35  ;;  %7218 = vst.msk [vmem:[%s21605_s17 + $0xb0] sm:$0xff] %vm385_vm2, %v7178_v53  ;;  %v7181_v26 = vmax.f32 %v7141_v43, 0.0  ;;  %v7096_v17 = vadd.f32 %v23751_v32, %v6628_v37  ;;  %v6627_v57 = vadd.f32 %v6532_v49, %v6105_v30  ;;  %v9206_v53 = vld [vmem:[#allocation2 + $0x4c] sm:$0xff]  ;;  %v11089_v43 = vld [vmem:[#allocation2 + $0x7d] sm:$0xff]  ;;  %v6125_v15 = vadd.f32 %v21506_v23, %v21196_v20 }
 0x5d1   : > { %v7140_v0 = vadd.f32 %v21583_v63, %v7093_v1  ;;  %v16791_v36 = vpop.f32.mrf.mxu1  ;;  %v21867_v4 = vpop.f32.mrf.mxu0  ;;  %17467 = vmatmul.mubr.msk.f32.gmra.mxu0 %vm5267_vm0, %v11087_v18  ;;  %v11090_v37 = vld [vmem:[#allocation2 + $0x85] sm:$0xff]  ;;  %v23755_v49 = vld [vmem:[#allocation64_spill] sm:$0xff]  ;;  %v6140_v20 = vadd.f32 %v21510_v24, %v21206_v60 }
 0x5d2   : > { %23752 = vst [vmem:[#allocation14_spill] sm:$0xff] %v21867_v4  ;;  %17138 = vmatmul.mubr.msk.f32.gmra.mxu1 %vm5267_vm0, %v9204_v12  ;;  %7221 = vst.msk [vmem:[%s21605_s17 + $0xc8] sm:$0xff] %vm385_vm2, %v7181_v26  ;;  %v7143_v41 = vadd.f32 %v21583_v63, %v7096_v17  ;;  %v7095_v14 = vadd.f32 %v21117_v27, %v6627_v57  ;;  %v6630_v59 = vadd.f32 %v16791_v36, %v6120_v8  ;;  %v23757_v12 = vld [vmem:[#allocation65_spill] sm:$0xff]  ;;  %v9208_v36 = vld [vmem:[#allocation2 + $0x5c] sm:$0xff] }
 0x5d3   : > { %v7180_v29 = vmax.f32 %v7140_v0, 0.0  ;;  %17140 = vmatprep.mubr.msk.f32.mxu1 %vm5267_vm0, %v9205_v22  ;;  %17469 = vmatprep.mubr.msk.f32.mxu0 %vm5267_vm0, %v11088_v6  ;;  %v6542_v58 = vpop.f32.mrf.mxu1  ;;  %v21879_v30 = vpop.f32.mrf.mxu0  ;;  %v11091_v22 = vld [vmem:[#allocation2 + $0x8d] sm:$0xff]  ;;  %v23758_v6 = vld [vmem:[#allocation72_spill] sm:$0xff]  ;;  %v9209_v24 = vld [vmem:[#allocation2 + $0x64] sm:$0xff] }
 0x5d4   : > { %23753 = vst [vmem:[#allocation29_spill] sm:$0xff] %v21879_v30  ;;  %v7183_v48 = vmax.f32 %v7143_v41, 0.0  ;;  %v7142_v39 = vadd.f32 %v21583_v63, %v7095_v14  ;;  %v7098_v54 = vadd.f32 %v21126_v31, %v6630_v59  ;;  %v6629_v27 = vadd.f32 %v6542_v58, %v6115_v47  ;;  %v11092_v59 = vld [vmem:[#allocation2 + $0x95] sm:$0xff] }
 0x5d5   : > { %7220 = vst.msk [vmem:[%s21605_s17 + $0xc0] sm:$0xff] %vm385_vm2, %v7180_v29  ;;  %v16794_v1 = vpop.f32.mrf.mxu1  ;;  %v21887_v21 = vpop.f32.mrf.mxu0  ;;  %17470 = vmatmul.mubr.msk.f32.gmra.mxu0 %vm5267_vm0, %v11089_v43  ;;  %v23759_v29 = vld [vmem:[#allocation121_spill] sm:$0xff]  ;;  %v12413_v4 = vld [vmem:[#allocation2 + $0x92] sm:$0xff] }
 0x5d6   : > { %23754 = vst [vmem:[#allocation16_spill] sm:$0xff] %v21887_v21  ;;  %17141 = vmatmul.mubr.msk.f32.gmra.mxu1 %vm5267_vm0, %v9206_v53  ;;  %7223 = vst.msk [vmem:[%s21605_s17 + $0xd8] sm:$0xff] %vm385_vm2, %v7183_v48  ;;  %v7182_v8 = vmax.f32 %v7142_v39, 0.0  ;;  %v7145_v31 = vadd.f32 %v21583_v63, %v7098_v54  ;;  %v7097_v26 = vadd.f32 %v23755_v49, %v6629_v27  ;;  %17472 = vmatprep.mubr.msk.f32.mxu0 %vm5267_vm0, %v11090_v37  ;;  %v23761_v48 = vld [vmem:[#allocation66_spill] sm:$0xff]  ;;  %v23763_v53 = vld [vmem:[#allocation123_spill] sm:$0xff] }
 0x5d7   : > { %v6632_v0 = vadd.f32 %v16794_v1, %v6130_v40  ;;  %17143 = vmatprep.mubr.msk.f32.mxu1 %vm5267_vm0, %v9207_v52  ;;  %v6552_v23 = vpop.f32.mrf.mxu1  ;;  %v21899_v32 = vpop.f32.mrf.mxu0  ;;  %v6135_v41 = vadd.f32 %v23759_v29, %v23758_v6  ;;  %v23762_v27 = vld [vmem:[#allocation74_spill] sm:$0xff]  ;;  %v23769_v6 = vld [vmem:[#allocation68_spill] sm:$0xff] }
 0x5d8   : > { %23756 = vst [vmem:[#allocation30_spill] sm:$0xff] %v21899_v32  ;;  %7222 = vst.msk [vmem:[%s21605_s17 + $0xd0] sm:$0xff] %vm385_vm2, %v7182_v8  ;;  %v7185_v17 = vmax.f32 %v7145_v31, 0.0  ;;  %v7144_v57 = vadd.f32 %v21583_v63, %v7097_v26  ;;  %v6631_v47 = vadd.f32 %v6552_v23, %v6125_v15  ;;  %v6150_v43 = vadd.f32 %v23763_v53, %v23762_v27  ;;  %v23765_v8 = vld [vmem:[#allocation67_spill] sm:$0xff]  ;;  %v9210_v26 = vld [vmem:[#allocation2 + $0x6c] sm:$0xff] }
 0x5d9   : > { %v7100_v18 = vadd.f32 %v23757_v12, %v6632_v0  ;;  %v16797_v14 = vpop.f32.mrf.mxu1  ;;  %v21907_v60 = vpop.f32.mrf.mxu0  ;;  %17473 = vmatmul.mubr.msk.f32.gmra.mxu0 %vm5267_vm0, %v11091_v22  ;;  %v11093_v0 = vld [vmem:[#allocation2 + $0x9d] sm:$0xff]  ;;  %v12409_v32 = vld [vmem:[#allocation2 + $0x72] sm:$0xff] }
 0x5da   : > { %23760 = vst [vmem:[#allocation18_spill] sm:$0xff] %v21907_v60  ;;  %17144 = vmatmul.mubr.msk.f32.gmra.mxu1 %vm5267_vm0, %v9208_v36  ;;  %7225 = vst.msk [vmem:[%s21605_s17 + $0xe8] sm:$0xff] %vm385_vm2, %v7185_v17  ;;  %v7184_v40 = vmax.f32 %v7144_v57, 0.0  ;;  %v7099_v39 = vadd.f32 %v23761_v48, %v6631_v47  ;;  %v6634_v54 = vadd.f32 %v16797_v14, %v6140_v20  ;;  %17475 = vmatprep.mubr.msk.f32.mxu0 %vm5267_vm0, %v11092_v59  ;;  %v23766_v20 = vld [vmem:[#allocation77_spill] sm:$0xff]  ;;  %v23767_v23 = vld [vmem:[#allocation32_spill] sm:$0xff] }
 0x5db   : > { %v7147_v58 = vadd.f32 %v21583_v63, %v7100_v18  ;;  %17146 = vmatprep.mubr.msk.f32.mxu1 %vm5267_vm0, %v9209_v24  ;;  %v6562_v15 = vpop.f32.mrf.mxu1  ;;  %v21919_v1 = vpop.f32.mrf.mxu0  ;;  %v6145_v17 = vadd.f32 %v23767_v23, %v23766_v20  ;;  %v9211_v18 = vld [vmem:[#allocation2 + $0x74] sm:$0xff]  ;;  %v11094_v47 = vld [vmem:[#allocation2 + $0xa5] sm:$0xff] }
 0x5dc   : > { %23764 = vst [vmem:[#allocation33_spill] sm:$0xff] %v21919_v1  ;;  %7224 = vst.msk [vmem:[%s21605_s17 + $0xe0] sm:$0xff] %vm385_vm2, %v7184_v40  ;;  %v7146_v37 = vadd.f32 %v21583_v63, %v7099_v39  ;;  %v7102_v31 = vadd.f32 %v23765_v8, %v6634_v54  ;;  %v6633_v49 = vadd.f32 %v6562_v15, %v6135_v41  ;;  %v23770_v14 = vld [vmem:[#allocation79_spill] sm:$0xff]  ;;  %v23771_v24 = vld [vmem:[#allocation126_spill] sm:$0xff] }
 0x5dd   : > { %v7187_v52 = vmax.f32 %v7147_v58, 0.0  ;;  %v16800_v57 = vpop.f32.mrf.mxu1  ;;  %v21928_v12 = vpop.f32.mrf.mxu0  ;;  %17476 = vmatmul.mubr.msk.f32.gmra.mxu0 %vm5267_vm0, %v11093_v0  ;;  %v6160_v59 = vadd.f32 %v23771_v24, %v23770_v14  ;;  %v23773_v54 = vld [vmem:[#allocation69_spill] sm:$0xff]  ;;  %v11095_v15 = vld [vmem:[#allocation2 + $0xad] sm:$0xff]  ;;  %v11096_v0 = vld [vmem:[#allocation2 + $0xb5] sm:$0xff] }
 0x5de   : > { %17147 = vmatmul.mubr.msk.f32.gmra.mxu1 %vm5267_vm0, %v9210_v26  ;;  %23768 = vst [vmem:[#allocation20_spill] sm:$0xff] %v21928_v12  ;;  %v7186_v36 = vmax.f32 %v7146_v37, 0.0  ;;  %v7149_v22 = vadd.f32 %v21583_v63, %v7102_v31  ;;  %v7101_v29 = vadd.f32 %v23769_v6, %v6633_v49  ;;  %v6636_v41 = vadd.f32 %v16800_v57, %v6150_v43  ;;  %v9212_v43 = vld [vmem:[#allocation2 + $0x7c] sm:$0xff]  ;;  %v23775_v37 = vld [vmem:[#allocation38_spill] sm:$0xff]  ;;  %v9213_v26 = vld [vmem:[#allocation2 + $0x84] sm:$0xff] }
 0x5df   : > { %7227 = vst.msk [vmem:[%s21605_s17 + $0xf8] sm:$0xff] %vm385_vm2, %v7187_v52  ;;  %17149 = vmatprep.mubr.msk.f32.mxu1 %vm5267_vm0, %v9211_v18  ;;  %17478 = vmatprep.mubr.msk.f32.mxu0 %vm5267_vm0, %v11094_v47  ;;  %v6572_v40 = vpop.f32.mrf.mxu1  ;;  %v21939_v58 = vpop.f32.mrf.mxu0  ;;  %v23774_v52 = vld [vmem:[#allocation82_spill] sm:$0xff]  ;;  %v23778_v47 = vld [vmem:[#allocation84_spill] sm:$0xff]  ;;  %v23781_v24 = vld [vmem:[#allocation71_spill] sm:$0xff] }
 0x5e0   : > { %23772 = vst [vmem:[#allocation36_spill] sm:$0xff] %v21939_v58  ;;  %7226 = vst.msk [vmem:[%s21605_s17 + $0xf0] sm:$0xff] %vm385_vm2, %v7186_v36  ;;  %v7189_v48 = vmax.f32 %v7149_v22, 0.0  ;;  %v7148_v39 = vadd.f32 %v21583_v63, %v7101_v29  ;;  %v7104_v27 = vadd.f32 %v23773_v54, %v6636_v41  ;;  %v6635_v53 = vadd.f32 %v6572_v40, %v6145_v17  ;;  %v23777_v17 = vld [vmem:[#allocation70_spill] sm:$0xff]  ;;  %v23779_v36 = vld [vmem:[#allocation128_spill] sm:$0xff] }
 0x5e1   : > { %v6155_v8 = vadd.f32 %v23775_v37, %v23774_v52  ;;  %v16803_v31 = vpop.f32.mrf.mxu1  ;;  %v21948_v49 = vpop.f32.mrf.mxu0  ;;  %17479 = vmatmul.mubr.msk.f32.gmra.mxu0 %vm5267_vm0, %v11095_v15  ;;  %v6170_v22 = vadd.f32 %v23779_v36, %v23778_v47  ;;  %v23782_v54 = vld [vmem:[#allocation86_spill] sm:$0xff]  ;;  %v9215_v52 = vld [vmem:[#allocation2 + $0x94] sm:$0xff]  ;;  %v12407_v12 = vld [vmem:[#allocation2 + $0x62] sm:$0xff] }
 0x5e2   : > { %17150 = vmatmul.mubr.msk.f32.gmra.mxu1 %vm5267_vm0, %v9212_v43  ;;  %23776 = vst [vmem:[#allocation25_spill] sm:$0xff] %v21948_v49  ;;  %7229 = vst.msk [vmem:[%s21605_s17 + $0x108] sm:$0xff] %vm385_vm2, %v7189_v48  ;;  %v7188_v20 = vmax.f32 %v7148_v39, 0.0  ;;  %v7151_v23 = vadd.f32 %v21583_v63, %v7104_v27  ;;  %v7103_v57 = vadd.f32 %v23777_v17, %v6635_v53  ;;  %17481 = vmatprep.mubr.msk.f32.mxu0 %vm5267_vm0, %v11096_v0  ;;  %v11097_v39 = vld [vmem:[#allocation2 + $0xbd] sm:$0xff]  ;;  %v11098_v37 = vld [vmem:[#allocation2 + $0xc5] sm:$0xff] }
 0x5e3   : > { %v6638_v18 = vadd.f32 %v16803_v31, %v6160_v59  ;;  %17152 = vmatprep.mubr.msk.f32.mxu1 %vm5267_vm0, %v9213_v26  ;;  %v6582_v6 = vpop.f32.mrf.mxu1  ;;  %v21959_v29 = vpop.f32.mrf.mxu0  ;;  %v9214_v59 = vld [vmem:[#allocation2 + $0x8c] sm:$0xff]  ;;  %v23783_v27 = vld [vmem:[#allocation41_spill] sm:$0xff]  ;;  %v23787_v47 = vld [vmem:[#allocation75_spill] sm:$0xff] }
 0x5e4   : > { %23780 = vst [vmem:[#allocation39_spill] sm:$0xff] %v21959_v29  ;;  %7228 = vst.msk [vmem:[%s21605_s17 + $0x100] sm:$0xff] %vm385_vm2, %v7188_v20  ;;  %v7191_v41 = vmax.f32 %v7151_v23, 0.0  ;;  %v7150_v14 = vadd.f32 %v21583_v63, %v7103_v57  ;;  %v6637_v48 = vadd.f32 %v6582_v6, %v6155_v8  ;;  %v6165_v53 = vadd.f32 %v23783_v27, %v23782_v54  ;;  %v23785_v26 = vld [vmem:[#allocation73_spill] sm:$0xff]  ;;  %v23789_v54 = vld [vmem:[#allocation76_spill] sm:$0xff] }
 0x5e5   : > { %v7106_v40 = vadd.f32 %v23781_v24, %v6638_v18  ;;  %v16806_v43 = vpop.f32.mrf.mxu1  ;;  %v21968_v15 = vpop.f32.mrf.mxu0  ;;  %17482 = vmatmul.mubr.msk.f32.gmra.mxu0 %vm5267_vm0, %v11097_v39  ;;  %v12405_v49 = vld [vmem:[#allocation2 + $0x52] sm:$0xff]  ;;  %v10015_v60 = vld [vmem:[#allocation2 + $0x41] sm:$0xff] }
 0x5e6   : > { %17153 = vmatmul.mubr.msk.f32.gmra.mxu1 %vm5267_vm0, %v9214_v59  ;;  %23784 = vst [vmem:[#allocation24_spill] sm:$0xff] %v21968_v15  ;;  %7231 = vst.msk [vmem:[%s21605_s17 + $0x118] sm:$0xff] %vm385_vm2, %v7191_v41  ;;  %v7190_v31 = vmax.f32 %v7150_v14, 0.0  ;;  %v7105_v0 = vadd.f32 %v23785_v26, %v6637_v48  ;;  %v6640_v20 = vadd.f32 %v16806_v43, %v6170_v22  ;;  %17484 = vmatprep.mubr.msk.f32.mxu0 %vm5267_vm0, %v11098_v37  ;;  %v9216_v41 = vld [vmem:[#allocation2 + $0x9c] sm:$0xff]  ;;  %v11099_v14 = vld [vmem:[#allocation2 + $0xcd] sm:$0xff] }
 0x5e7   : > { %v7153_v8 = vadd.f32 %v21583_v63, %v7106_v40  ;;  %17155 = vmatprep.mubr.msk.f32.mxu1 %vm5267_vm0, %v9215_v52  ;;  %v6592_v23 = vpop.f32.mrf.mxu1  ;;  %v21977_v17 = vpop.f32.mrf.mxu0  ;;  %v9217_v40 = vld [vmem:[#allocation2 + $0xa4] sm:$0xff]  ;;  %v11100_v48 = vld [vmem:[#allocation2 + $0xd5] sm:$0xff] }
 0x5e8   : > { %23786 = vst [vmem:[#allocation44_spill] sm:$0xff] %v21977_v17  ;;  %7230 = vst.msk [vmem:[%s21605_s17 + $0x110] sm:$0xff] %vm385_vm2, %v7190_v31  ;;  %v7152_v18 = vadd.f32 %v21583_v63, %v7105_v0  ;;  %v7108_v36 = vadd.f32 %v23787_v47, %v6640_v20  ;;  %v6639_v6 = vadd.f32 %v6592_v23, %v6165_v53  ;;  %v9218_v31 = vld [vmem:[#allocation2 + $0xac] sm:$0xff]  ;;  %v9219_v20 = vld [vmem:[#allocation2 + $0xb4] sm:$0xff] }
 0x5e9   : > { %v7193_v57 = vmax.f32 %v7153_v8, 0.0  ;;  %v21983_v22 = vpop.f32.mrf.mxu1  ;;  %v21986_v24 = vpop.f32.mrf.mxu0  ;;  %17485 = vmatmul.mubr.msk.f32.gmra.mxu0 %vm5267_vm0, %v11099_v14  ;;  %v11101_v8 = vld [vmem:[#allocation2 + $0xdd] sm:$0xff]  ;;  %v11102_v23 = vld [vmem:[#allocation2 + $0xe5] sm:$0xff] }
 0x5ea   : > { %17156 = vmatmul.mubr.msk.f32.gmra.mxu1 %vm5267_vm0, %v9216_v41  ;;  %23788 = vst [vmem:[#allocation27_spill] sm:$0xff] %v21986_v24  ;;  %v7192_v59 = vmax.f32 %v7152_v18, 0.0  ;;  %v7155_v39 = vadd.f32 %v21583_v63, %v7108_v36  ;;  %v7107_v27 = vadd.f32 %v23789_v54, %v6639_v6  ;;  %17487 = vmatprep.mubr.msk.f32.mxu0 %vm5267_vm0, %v11100_v48  ;;  %v9220_v47 = vld [vmem:[#allocation2 + $0xbc] sm:$0xff]  ;;  %v11103_v36 = vld [vmem:[#allocation2 + $0xed] sm:$0xff]  ;;  %v9221_v14 = vld [vmem:[#allocation2 + $0xc4] sm:$0xff] }
 0x5eb   : > { %7233 = vst.msk [vmem:[%s21605_s17 + $0x128] sm:$0xff] %vm385_vm2, %v7193_v57  ;;  %17158 = vmatprep.mubr.msk.f32.mxu1 %vm5267_vm0, %v9217_v40  ;;  %v21995_v53 = vpop.f32.mrf.mxu1  ;;  %v21997_v43 = vpop.f32.mrf.mxu0  ;;  %v11104_v40 = vld [vmem:[#allocation2 + $0xf5] sm:$0xff]  ;;  %v11105_v54 = vld [vmem:[#allocation2 + $0xfd] sm:$0xff] }
 0x5ec   : > { %23790 = vst [vmem:[#allocation45_spill] sm:$0xff] %v21997_v43  ;;  %7232 = vst.msk [vmem:[%s21605_s17 + $0x120] sm:$0xff] %vm385_vm2, %v7192_v59  ;;  %v7195_v52 = vmax.f32 %v7155_v39, 0.0  ;;  %v7154_v37 = vadd.f32 %v21583_v63, %v7107_v27  ;;  %v9222_v39 = vld [vmem:[#allocation2 + $0xcc] sm:$0xff]  ;;  %v12403_v15 = vld [vmem:[#allocation2 + $0x42] sm:$0xff] }
 0x5ed   : > { %v22002_v26 = vpop.f32.mrf.mxu1  ;;  %v22005_v0 = vpop.f32.mrf.mxu0  ;;  %17488 = vmatmul.mubr.msk.f32.gmra.mxu0 %vm5267_vm0, %v11101_v8  ;;  %v12401_v24 = vld [vmem:[#allocation2 + $0x32] sm:$0xff]  ;;  %v12411_v21 = vld [vmem:[#allocation2 + $0x82] sm:$0xff] }
 0x5ee   : > { %17159 = vmatmul.mubr.msk.f32.gmra.mxu1 %vm5267_vm0, %v9218_v31  ;;  %23791 = vst [vmem:[#allocation28_spill] sm:$0xff] %v22005_v0  ;;  %7235 = vst.msk [vmem:[%s21605_s17 + $0x138] sm:$0xff] %vm385_vm2, %v7195_v52  ;;  %v7194_v57 = vmax.f32 %v7154_v37, 0.0  ;;  %17490 = vmatprep.mubr.msk.f32.mxu0 %vm5267_vm0, %v11102_v23  ;;  %v9223_v37 = vld [vmem:[#allocation2 + $0xd4] sm:$0xff]  ;;  %v11106_v31 = vld [vmem:[#allocation2 + $0x105] sm:$0xff] }
 0x5ef   : > { %17161 = vmatprep.mubr.msk.f32.mxu1 %vm5267_vm0, %v9219_v20  ;;  %v22012_v63 = vpop.f32.mrf.mxu1  ;;  %v22014_v18 = vpop.f32.mrf.mxu0  ;;  %v9224_v23 = vld [vmem:[#allocation2 + $0xdc] sm:$0xff]  ;;  %v11115_v0 = vld [vmem:[#allocation2 + $0x14d] sm:$0xff] }
 0x5f0   : > { %23792 = vst [vmem:[#allocation47_spill] sm:$0xff] %v22014_v18  ;;  %7234 = vst.msk [vmem:[%s21605_s17 + $0x130] sm:$0xff] %vm385_vm2, %v7194_v57  ;;  %v11107_v57 = vld [vmem:[#allocation2 + $0x10d] sm:$0xff] }
 0x5f1   : > { %v22018_v6 = vpop.f32.mrf.mxu1  ;;  %v22021_v41 = vpop.f32.mrf.mxu0  ;;  %17491 = vmatmul.mubr.msk.f32.gmra.mxu0 %vm5267_vm0, %v11103_v36 }
 0x5f2   : > { %17162 = vmatmul.mubr.msk.f32.gmra.mxu1 %vm5267_vm0, %v9220_v47  ;;  %23793 = vst [vmem:[#allocation31_spill] sm:$0xff] %v22021_v41  ;;  %17493 = vmatprep.mubr.msk.f32.mxu0 %vm5267_vm0, %v11104_v40  ;;  %v11108_v40 = vld [vmem:[#allocation2 + $0x115] sm:$0xff]  ;;  %v11113_v41 = vld [vmem:[#allocation2 + $0x13d] sm:$0xff] }
 0x5f3   : > { %17164 = vmatprep.mubr.msk.f32.mxu1 %vm5267_vm0, %v9221_v14  ;;  %v22026_v48 = vpop.f32.mrf.mxu1  ;;  %v22028_v59 = vpop.f32.mrf.mxu0  ;;  %v9225_v14 = vld [vmem:[#allocation2 + $0xe4] sm:$0xff] }
 0x5f4   : > { %23794 = vst [vmem:[#allocation49_spill] sm:$0xff] %v22028_v59 }
 0x5f5   : > { %v22030_v27 = vpop.f32.mrf.mxu1  ;;  %v22033_v52 = vpop.f32.mrf.mxu0  ;;  %17494 = vmatmul.mubr.msk.f32.gmra.mxu0 %vm5267_vm0, %v11105_v54 }
 0x5f6   : > { %17165 = vmatmul.mubr.msk.f32.gmra.mxu1 %vm5267_vm0, %v9222_v39  ;;  %23795 = vst [vmem:[#allocation34_spill] sm:$0xff] %v22033_v52  ;;  %17496 = vmatprep.mubr.msk.f32.mxu0 %vm5267_vm0, %v11106_v31  ;;  %v11109_v31 = vld [vmem:[#allocation2 + $0x11d] sm:$0xff]  ;;  %v11111_v52 = vld [vmem:[#allocation2 + $0x12d] sm:$0xff] }
 0x5f7   : > { %17167 = vmatprep.mubr.msk.f32.mxu1 %vm5267_vm0, %v9223_v37  ;;  %v22038_v8 = vpop.f32.mrf.mxu1  ;;  %v22040_v20 = vpop.f32.mrf.mxu0  ;;  %v9226_v37 = vld [vmem:[#allocation2 + $0xec] sm:$0xff] }
 0x5f8   : > { %23796 = vst [vmem:[#allocation51_spill] sm:$0xff] %v22040_v20 }
 0x5f9   : > { %v22042_v47 = vpop.f32.mrf.mxu1  ;;  %v22045_v36 = vpop.f32.mrf.mxu0  ;;  %17497 = vmatmul.mubr.msk.f32.gmra.mxu0 %vm5267_vm0, %v11107_v57  ;;  %v9227_v57 = vld [vmem:[#allocation2 + $0xf4] sm:$0xff] }
 0x5fa   : > { %17168 = vmatmul.mubr.msk.f32.gmra.mxu1 %vm5267_vm0, %v9224_v23  ;;  %23797 = vst [vmem:[#allocation37_spill] sm:$0xff] %v22045_v36  ;;  %17499 = vmatprep.mubr.msk.f32.mxu0 %vm5267_vm0, %v11108_v40  ;;  %v11110_v36 = vld [vmem:[#allocation2 + $0x125] sm:$0xff] }
 0x5fb   : > { %17170 = vmatprep.mubr.msk.f32.mxu1 %vm5267_vm0, %v9225_v14  ;;  %v22050_v39 = vpop.f32.mrf.mxu1  ;;  %v22052_v54 = vpop.f32.mrf.mxu0 }
 0x5fc   : > { %23798 = vst [vmem:[#allocation53_spill] sm:$0xff] %v22052_v54  ;;  %v9228_v54 = vld [vmem:[#allocation2 + $0xfc] sm:$0xff] }
 0x5fd   : > { %v22054_v20 = vpop.f32.mrf.mxu1  ;;  %v22057_v23 = vpop.f32.mrf.mxu0  ;;  %17500 = vmatmul.mubr.msk.f32.gmra.mxu0 %vm5267_vm0, %v11109_v31  ;;  %v9229_v31 = vld [vmem:[#allocation2 + $0x104] sm:$0xff] }
 0x5fe   : > { %17171 = vmatmul.mubr.msk.f32.gmra.mxu1 %vm5267_vm0, %v9226_v37  ;;  %23799 = vst [vmem:[#allocation42_spill] sm:$0xff] %v22057_v23  ;;  %17502 = vmatprep.mubr.msk.f32.mxu0 %vm5267_vm0, %v11110_v36  ;;  %v11112_v23 = vld [vmem:[#allocation2 + $0x135] sm:$0xff] }
 0x5ff   : > { %17173 = vmatprep.mubr.msk.f32.mxu1 %vm5267_vm0, %v9227_v57  ;;  %v22062_v14 = vpop.f32.mrf.mxu1  ;;  %v22064_v40 = vpop.f32.mrf.mxu0 }
 0x600   : > { %23800 = vst [vmem:[#allocation55_spill] sm:$0xff] %v22064_v40  ;;  %v9230_v40 = vld [vmem:[#allocation2 + $0x10c] sm:$0xff] }
 0x601   : > { %v22066_v59 = vpop.f32.mrf.mxu1  ;;  %v22069_v37 = vpop.f32.mrf.mxu0  ;;  %17503 = vmatmul.mubr.msk.f32.gmra.mxu0 %vm5267_vm0, %v11111_v52  ;;  %v9231_v52 = vld [vmem:[#allocation2 + $0x114] sm:$0xff] }
 0x602   : > { %17174 = vmatmul.mubr.msk.f32.gmra.mxu1 %vm5267_vm0, %v9228_v54  ;;  %23801 = vst [vmem:[#allocation43_spill] sm:$0xff] %v22069_v37  ;;  %17505 = vmatprep.mubr.msk.f32.mxu0 %vm5267_vm0, %v11112_v23  ;;  %v11114_v37 = vld [vmem:[#allocation2 + $0x145] sm:$0xff] }
 0x603   : > { %17176 = vmatprep.mubr.msk.f32.mxu1 %vm5267_vm0, %v9229_v31  ;;  %v22074_v36 = vpop.f32.mrf.mxu1  ;;  %v22076_v57 = vpop.f32.mrf.mxu0 }
 0x604   : > { %23802 = vst [vmem:[#allocation57_spill] sm:$0xff] %v22076_v57  ;;  %v9232_v57 = vld [vmem:[#allocation2 + $0x11c] sm:$0xff] }
 0x605   : > { %v22078_v18 = vpop.f32.mrf.mxu1  ;;  %v22081_v54 = vpop.f32.mrf.mxu0  ;;  %17506 = vmatmul.mubr.msk.f32.gmra.mxu0 %vm5267_vm0, %v11113_v41  ;;  %v9233_v41 = vld [vmem:[#allocation2 + $0x124] sm:$0xff] }
 0x606   : > { %17177 = vmatmul.mubr.msk.f32.gmra.mxu1 %vm5267_vm0, %v9230_v40  ;;  %23803 = vst [vmem:[#allocation46_spill] sm:$0xff] %v22081_v54  ;;  %17508 = vmatprep.mubr.msk.f32.mxu0 %vm5267_vm0, %v11114_v37  ;;  %v12400_v54 = vld [vmem:[#allocation2 + $0x2a] sm:$0xff] }
 0x607   : > { %17179 = vmatprep.mubr.msk.f32.mxu1 %vm5267_vm0, %v9231_v52  ;;  %v22086_v23 = vpop.f32.mrf.mxu1  ;;  %v22088_v31 = vpop.f32.mrf.mxu0 }
 0x608   : > { %23804 = vst [vmem:[#allocation59_spill] sm:$0xff] %v22088_v31  ;;  %v9234_v31 = vld [vmem:[#allocation2 + $0x12c] sm:$0xff] }
 0x609   : > { %v22090_v43 = vpop.f32.mrf.mxu1  ;;  %v22093_v40 = vpop.f32.mrf.mxu0  ;;  %17509 = vmatmul.mubr.msk.f32.gmra.mxu0 %vm5267_vm0, %v11115_v0  ;;  %v9235_v0 = vld [vmem:[#allocation2 + $0x134] sm:$0xff] }
 0x60a   : > { %17180 = vmatmul.mubr.msk.f32.gmra.mxu1 %vm5267_vm0, %v9232_v57  ;;  %23805 = vst [vmem:[#allocation48_spill] sm:$0xff] %v22093_v40  ;;  %17579 = vmatprep.mubr.msk.f32.mxu0 %vm5267_vm0, %v12400_v54  ;;  %v12402_v40 = vld [vmem:[#allocation2 + $0x3a] sm:$0xff] }
 0x60b   : > { %17182 = vmatprep.mubr.msk.f32.mxu1 %vm5267_vm0, %v9233_v41  ;;  %v22098_v37 = vpop.f32.mrf.mxu1  ;;  %v22100_v52 = vpop.f32.mrf.mxu0 }
 0x60c   : > { %23806 = vst [vmem:[#allocation61_spill] sm:$0xff] %v22100_v52  ;;  %v9236_v52 = vld [vmem:[#allocation2 + $0x13c] sm:$0xff] }
 0x60d   : > { %v22102_v17 = vpop.f32.mrf.mxu1  ;;  %v22105_v57 = vpop.f32.mrf.mxu0  ;;  %17580 = vmatmul.mubr.msk.f32.vlgmr.msra.gmra.mxu0 %vm5267_vm0, %v12401_v24  ;;  %v9237_v24 = vld [vmem:[#allocation2 + $0x144] sm:$0xff] }
 0x60e   : > { %17183 = vmatmul.mubr.msk.f32.gmra.mxu1 %vm5267_vm0, %v9234_v31  ;;  %23807 = vst [vmem:[#allocation50_spill] sm:$0xff] %v22105_v57  ;;  %17582 = vmatprep.mubr.msk.f32.mxu0 %vm5267_vm0, %v12402_v40  ;;  %v12404_v57 = vld [vmem:[#allocation2 + $0x4a] sm:$0xff] }
 0x60f   : > { %17185 = vmatprep.mubr.msk.f32.mxu1 %vm5267_vm0, %v9235_v0  ;;  %v22110_v54 = vpop.f32.mrf.mxu1  ;;  %v22112_v41 = vpop.f32.mrf.mxu0 }
 0x610   : > { %23808 = vst [vmem:[#allocation52_spill] sm:$0xff] %v22112_v41  ;;  %v9238_v41 = vld [vmem:[#allocation2 + $0x14c] sm:$0xff] }
 0x611   : > { %v22114_v29 = vpop.f32.mrf.mxu1  ;;  %v22117_v31 = vpop.f32.mrf.mxu0  ;;  %17583 = vmatmul.mubr.msk.f32.gmra.mxu0 %vm5267_vm0, %v12403_v15  ;;  %v10012_v15 = vld [vmem:[#allocation2 + $0x29] sm:$0xff] }
 0x612   : > { %17186 = vmatmul.mubr.msk.f32.gmra.mxu1 %vm5267_vm0, %v9236_v52  ;;  %23809 = vst [vmem:[#allocation54_spill] sm:$0xff] %v22117_v31  ;;  %17585 = vmatprep.mubr.msk.f32.mxu0 %vm5267_vm0, %v12404_v57  ;;  %v12406_v31 = vld [vmem:[#allocation2 + $0x5a] sm:$0xff] }
 0x613   : > { %17188 = vmatprep.mubr.msk.f32.mxu1 %vm5267_vm0, %v9237_v24  ;;  %v22122_v40 = vpop.f32.mrf.mxu1  ;;  %v22124_v0 = vpop.f32.mrf.mxu0 }
 0x614   : > { %23810 = vst [vmem:[#allocation56_spill] sm:$0xff] %v22124_v0  ;;  %v10013_v0 = vld [vmem:[#allocation2 + $0x31] sm:$0xff] }
 0x615   : > { %v22126_v58 = vpop.f32.mrf.mxu1  ;;  %v22129_v52 = vpop.f32.mrf.mxu0  ;;  %17586 = vmatmul.mubr.msk.f32.gmra.mxu0 %vm5267_vm0, %v12405_v49  ;;  %v10014_v49 = vld [vmem:[#allocation2 + $0x39] sm:$0xff] }
 0x616   : > { %17189 = vmatmul.mubr.msk.f32.gmra.mxu1 %vm5267_vm0, %v9238_v41  ;;  %23811 = vst [vmem:[#allocation58_spill] sm:$0xff] %v22129_v52  ;;  %17588 = vmatprep.mubr.msk.f32.mxu0 %vm5267_vm0, %v12406_v31  ;;  %v14089_v41 = vld [vmem:[%s23464_s3 + $0x80] sm:$0xff]  ;;  %v12408_v31 = vld [vmem:[#allocation2 + $0x6a] sm:$0xff] }
 0x617   : > { %17259 = vmatprep.mubr.msk.f32.mxu1 %vm5267_vm0, %v10012_v15  ;;  %v22134_v57 = vpop.f32.mrf.mxu1  ;;  %v22136_v24 = vpop.f32.mrf.mxu0 }
 0x618   : > { %23812 = vst [vmem:[#allocation60_spill] sm:$0xff] %v22136_v24 }
 0x619   : > { %v22141_v1 = vpop.f32.mrf.mxu1  ;;  %v22143_v52 = vpop.f32.mrf.mxu0  ;;  %17589 = vmatmul.mubr.msk.f32.gmra.mxu0 %vm5267_vm0, %v12407_v12  ;;  %v22157_v12 = vld [vmem:[%s23464_s3 + $0x28] sm:$0xff] }
 0x61a   : > { %23813 = vst [vmem:[#allocation62_spill] sm:$0xff] %v22143_v52  ;;  %17260 = vmatmul.mubr.msk.f32.vlgmr.msra.gmra.mxu1 %vm5267_vm0, %v10013_v0  ;;  %17591 = vmatprep.mubr.msk.f32.mxu0 %vm5267_vm0, %v12408_v31  ;;  %v12410_v31 = vld [vmem:[#allocation2 + $0x7a] sm:$0xff]  ;;  %v10017_v52 = vld [vmem:[#allocation2 + $0x51] sm:$0xff] }
 0x61b   : > { %17262 = vmatprep.mubr.msk.f32.mxu1 %vm5267_vm0, %v10014_v49  ;;  %17384 = vmatpush3.msra.mxu1 %v21842_v45  ;;  %v22150_v15 = vpop.f32.mrf.mxu1  ;;  %v22152_v24 = vpop.f32.mrf.mxu0  ;;  %v10016_v45 = vld [vmem:[#allocation2 + $0x49] sm:$0xff] }
 0x61c   : > { %23814 = vst [vmem:[#allocation63_spill] sm:$0xff] %v22152_v24  ;;  %17385 = vmatprep.subr.mxu1 %v14089_v41 }
 0x61d   : > { %17386 = vmatpush3.msra.mxu1 %v14089_v41  ;;  %v22159_v0 = vpop.f32.mrf.mxu1  ;;  %v22161_v49 = vpop.f32.mrf.mxu0  ;;  %17592 = vmatmul.mubr.msk.f32.gmra.mxu0 %vm5267_vm0, %v12409_v32  ;;  %v10018_v32 = vld [vmem:[#allocation2 + $0x59] sm:$0xff] }
 0x61e   : > { %23815 = vst [vmem:[#allocation64_spill] sm:$0xff] %v22161_v49  ;;  %17263 = vmatmul.mubr.msk.f32.gmra.mxu1 %vm5267_vm0, %v10015_v60  ;;  %17594 = vmatprep.mubr.msk.f32.mxu0 %vm5267_vm0, %v12410_v31  ;;  %v12412_v60 = vld [vmem:[#allocation2 + $0x8a] sm:$0xff] }
 0x61f   : > { %17265 = vmatprep.mubr.msk.f32.mxu1 %vm5267_vm0, %v10016_v45  ;;  %v22167_v41 = vpop.f32.mrf.mxu1  ;;  %v22169_v24 = vpop.f32.mrf.mxu0  ;;  %17511 = vmatprep.subr.mxu1 %v22157_v12 }
 0x620   : > { %23816 = vst [vmem:[#allocation65_spill] sm:$0xff] %v22169_v24  ;;  %v10019_v24 = vld [vmem:[#allocation2 + $0x61] sm:$0xff] }
 0x621   : > { %v22172_v30 = vpop.f32.mrf.mxu1  ;;  %v22174_v49 = vpop.f32.mrf.mxu0  ;;  %17595 = vmatmul.mubr.msk.f32.gmra.mxu0 %vm5267_vm0, %v12411_v21  ;;  %v10020_v21 = vld [vmem:[#allocation2 + $0x69] sm:$0xff] }
 0x622   : > { %23817 = vst [vmem:[#allocation72_spill] sm:$0xff] %v22174_v49  ;;  %17266 = vmatmul.mubr.msk.f32.gmra.mxu1 %vm5267_vm0, %v10017_v52  ;;  %17597 = vmatprep.mubr.msk.f32.mxu0 %vm5267_vm0, %v12412_v60  ;;  %v12414_v52 = vld [vmem:[#allocation2 + $0x9a] sm:$0xff]  ;;  %v12415_v49 = vld [vmem:[#allocation2 + $0xa2] sm:$0xff] }
 0x623   : > { %17268 = vmatprep.mubr.msk.f32.mxu1 %vm5267_vm0, %v10018_v32  ;;  %v22180_v45 = vpop.f32.mrf.mxu1  ;;  %v22182_v31 = vpop.f32.mrf.mxu0 }
 0x624   : > { %23818 = vst [vmem:[#allocation121_spill] sm:$0xff] %v22180_v45  ;;  %23819 = vst [vmem:[#allocation66_spill] sm:$0xff] %v22182_v31  ;;  %v10021_v31 = vld [vmem:[#allocation2 + $0x71] sm:$0xff] }
 0x625   : > { %v22184_v35 = vpop.f32.mrf.mxu1  ;;  %v22186_v38 = vpop.f32.mrf.mxu0  ;;  %17598 = vmatmul.mubr.msk.f32.gmra.mxu0 %vm5267_vm0, %v12413_v4  ;;  %v10022_v4 = vld [vmem:[#allocation2 + $0x79] sm:$0xff] }
 0x626   : > { %23820 = vst [vmem:[#allocation74_spill] sm:$0xff] %v22184_v35  ;;  %23821 = vst [vmem:[#allocation123_spill] sm:$0xff] %v22186_v38  ;;  %17269 = vmatmul.mubr.msk.f32.gmra.mxu1 %vm5267_vm0, %v10019_v24  ;;  %17600 = vmatprep.mubr.msk.f32.mxu0 %vm5267_vm0, %v12414_v52  ;;  %v12416_v24 = vld [vmem:[#allocation2 + $0xaa] sm:$0xff]  ;;  %v12417_v38 = vld [vmem:[#allocation2 + $0xb2] sm:$0xff] }
 0x627   : > { %17271 = vmatprep.mubr.msk.f32.mxu1 %vm5267_vm0, %v10020_v21  ;;  %v22192_v32 = vpop.f32.mrf.mxu1  ;;  %v22194_v60 = vpop.f32.mrf.mxu0  ;;  %v12425_v45 = vld [vmem:[#allocation2 + $0xf2] sm:$0xff] }
 0x628   : > { %23822 = vst [vmem:[#allocation67_spill] sm:$0xff] %v22192_v32  ;;  %23823 = vst [vmem:[#allocation77_spill] sm:$0xff] %v22194_v60  ;;  %v10023_v60 = vld [vmem:[#allocation2 + $0x81] sm:$0xff] }
 0x629   : > { %v22196_v50 = vpop.f32.mrf.mxu1  ;;  %v22198_v10 = vpop.f32.mrf.mxu0  ;;  %17601 = vmatmul.mubr.msk.f32.gmra.mxu0 %vm5267_vm0, %v12415_v49  ;;  %v10024_v49 = vld [vmem:[#allocation2 + $0x89] sm:$0xff] }
 0x62a   : > { %23824 = vst [vmem:[#allocation32_spill] sm:$0xff] %v22196_v50  ;;  %23825 = vst [vmem:[#allocation68_spill] sm:$0xff] %v22198_v10  ;;  %17272 = vmatmul.mubr.msk.f32.gmra.mxu1 %vm5267_vm0, %v10021_v31  ;;  %17603 = vmatprep.mubr.msk.f32.mxu0 %vm5267_vm0, %v12416_v24  ;;  %v12418_v31 = vld [vmem:[#allocation2 + $0xba] sm:$0xff] }
 0x62b   : > { %17274 = vmatprep.mubr.msk.f32.mxu1 %vm5267_vm0, %v10022_v4  ;;  %v22204_v21 = vpop.f32.mrf.mxu1  ;;  %v22206_v52 = vpop.f32.mrf.mxu0 }
 0x62c   : > { %23826 = vst [vmem:[#allocation79_spill] sm:$0xff] %v22204_v21  ;;  %23827 = vst [vmem:[#allocation126_spill] sm:$0xff] %v22206_v52  ;;  %v10025_v52 = vld [vmem:[#allocation2 + $0x91] sm:$0xff]  ;;  %v12419_v21 = vld [vmem:[#allocation2 + $0xc2] sm:$0xff] }
 0x62d   : > { %v22208_v61 = vpop.f32.mrf.mxu1  ;;  %v22211_v10 = vpop.f32.mrf.mxu0  ;;  %17604 = vmatmul.mubr.msk.f32.gmra.mxu0 %vm5267_vm0, %v12417_v38  ;;  %v10026_v38 = vld [vmem:[#allocation2 + $0x99] sm:$0xff] }
 0x62e   : > { %23828 = vst [vmem:[#allocation69_spill] sm:$0xff] %v22208_v61  ;;  %17275 = vmatmul.mubr.msk.f32.gmra.mxu1 %vm5267_vm0, %v10023_v60  ;;  %23829 = vst [vmem:[#allocation82_spill] sm:$0xff] %v22211_v10  ;;  %17606 = vmatprep.mubr.msk.f32.mxu0 %vm5267_vm0, %v12418_v31  ;;  %v12420_v10 = vld [vmem:[#allocation2 + $0xca] sm:$0xff] }
 0x62f   : > { %17277 = vmatprep.mubr.msk.f32.mxu1 %vm5267_vm0, %v10024_v49  ;;  %v22216_v4 = vpop.f32.mrf.mxu1  ;;  %v22218_v24 = vpop.f32.mrf.mxu0 }
 0x630   : > { %23830 = vst [vmem:[#allocation38_spill] sm:$0xff] %v22216_v4  ;;  %23831 = vst [vmem:[#allocation70_spill] sm:$0xff] %v22218_v24  ;;  %v10027_v24 = vld [vmem:[#allocation2 + $0xa1] sm:$0xff]  ;;  %v12421_v4 = vld [vmem:[#allocation2 + $0xd2] sm:$0xff] }
 0x631   : > { %v22220_v50 = vpop.f32.mrf.mxu1  ;;  %v22223_v60 = vpop.f32.mrf.mxu0  ;;  %17607 = vmatmul.mubr.msk.f32.gmra.mxu0 %vm5267_vm0, %v12419_v21  ;;  %v10028_v21 = vld [vmem:[#allocation2 + $0xa9] sm:$0xff] }
 0x632   : > { %23832 = vst [vmem:[#allocation84_spill] sm:$0xff] %v22220_v50  ;;  %17278 = vmatmul.mubr.msk.f32.gmra.mxu1 %vm5267_vm0, %v10025_v52  ;;  %23833 = vst [vmem:[#allocation128_spill] sm:$0xff] %v22223_v60  ;;  %17609 = vmatprep.mubr.msk.f32.mxu0 %vm5267_vm0, %v12420_v10  ;;  %v12422_v60 = vld [vmem:[#allocation2 + $0xda] sm:$0xff]  ;;  %v12423_v50 = vld [vmem:[#allocation2 + $0xe2] sm:$0xff] }
 0x633   : > { %17280 = vmatprep.mubr.msk.f32.mxu1 %vm5267_vm0, %v10026_v38  ;;  %v22228_v49 = vpop.f32.mrf.mxu1  ;;  %v22230_v31 = vpop.f32.mrf.mxu0 }
 0x634   : > { %23834 = vst [vmem:[#allocation71_spill] sm:$0xff] %v22228_v49  ;;  %23835 = vst [vmem:[#allocation86_spill] sm:$0xff] %v22230_v31  ;;  %v23840_v31 = vld [vmem:[#allocation78_spill] sm:$0xff] }
 0x635   : > { %v22232_v61 = vpop.f32.mrf.mxu1  ;;  %v22235_v52 = vpop.f32.mrf.mxu0  ;;  %17610 = vmatmul.mubr.msk.f32.gmra.mxu0 %vm5267_vm0, %v12421_v4  ;;  %v7899_v49 = vadd.f32 %v23840_v31, %v21983_v22  ;;  %v10030_v4 = vld [vmem:[#allocation2 + $0xb9] sm:$0xff]  ;;  %v22254_v22 = vld [vmem:[#allocation7] ss:$0 sm:$0xff] }
 0x636   : > { %23836 = vst [vmem:[#allocation41_spill] sm:$0xff] %v22232_v61  ;;  %17281 = vmatmul.mubr.msk.f32.gmra.mxu1 %vm5267_vm0, %v10027_v24  ;;  %23837 = vst [vmem:[#allocation73_spill] sm:$0xff] %v22235_v52  ;;  %17612 = vmatprep.mubr.msk.f32.mxu0 %vm5267_vm0, %v12422_v60  ;;  %v10029_v61 = vld [vmem:[#allocation2 + $0xb1] sm:$0xff]  ;;  %v23842_v60 = vld [vmem:[#allocation80_spill] sm:$0xff] }
 0x637   : > { %17283 = vmatprep.mubr.msk.f32.mxu1 %vm5267_vm0, %v10028_v21  ;;  %v22240_v10 = vpop.f32.mrf.mxu1  ;;  %v22242_v38 = vpop.f32.mrf.mxu0  ;;  %v12424_v21 = vld [vmem:[#allocation2 + $0xea] sm:$0xff]  ;;  %v7894_v32 = vadd.f32 %v23842_v60, %v21995_v53  ;;  %v23846_v53 = vld [vmem:[#allocation83_spill] sm:$0xff] }
 0x638   : > { %23838 = vst [vmem:[#allocation75_spill] sm:$0xff] %v22240_v10  ;;  %23839 = vst [vmem:[#allocation76_spill] sm:$0xff] %v22242_v38  ;;  %v12426_v60 = vld [vmem:[#allocation2 + $0xfa] sm:$0xff] }
 0x639   : > { %v17005_v24 = vpop.f32.mrf.mxu1  ;;  %v22247_v52 = vpop.f32.mrf.mxu0  ;;  %17613 = vmatmul.mubr.msk.f32.gmra.mxu0 %vm5267_vm0, %v12423_v50 }
 0x63a   : > { %17284 = vmatmul.mubr.msk.f32.gmra.mxu1 %vm5267_vm0, %v10029_v61  ;;  %23841 = vst [vmem:[#allocation78_spill] sm:$0xff] %v22247_v52  ;;  %v8521_v10 = vadd.f32 %v17005_v24, %v7899_v49  ;;  %17615 = vmatprep.mubr.msk.f32.mxu0 %vm5267_vm0, %v12424_v21  ;;  %v23844_v61 = vld [vmem:[#allocation81_spill] sm:$0xff]  ;;  %v7904_v49 = vadd.f32 %v23846_v53, %v22012_v63  ;;  %v23850_v53 = vld [vmem:[#allocation35_spill] sm:$0xff] }
 0x63b   : > { %17286 = vmatprep.mubr.msk.f32.mxu1 %vm5267_vm0, %v10030_v4  ;;  %v8321_v31 = vpop.f32.mrf.mxu1  ;;  %v22256_v38 = vpop.f32.mrf.mxu0  ;;  %v7909_v52 = vadd.f32 %v23844_v61, %v22002_v26  ;;  %v10032_v21 = vld [vmem:[#allocation2 + $0xc9] sm:$0xff] }
 0x63c   : > { %23843 = vst [vmem:[#allocation80_spill] sm:$0xff] %v22256_v38  ;;  %v8989_v50 = vadd.f32 %v23845_v5, %v8521_v10  ;;  %v8520_v35 = vadd.f32 %v8321_v31, %v7894_v32  ;;  %v23848_v26 = vld [vmem:[#allocation125_spill] sm:$0xff] }
 0x63d   : > { %v17008_v24 = vpop.f32.mrf.mxu1  ;;  %v22264_v4 = vpop.f32.mrf.mxu0  ;;  %17616 = vmatmul.mubr.msk.f32.gmra.mxu0 %vm5267_vm0, %v12425_v45  ;;  %v23849_v63 = vld [vmem:[#allocation85_spill] sm:$0xff] }
 0x63e   : > { %17287 = vmatmul.mubr.msk.f32.gmra.mxu1 %vm5267_vm0, %v10031_v13  ;;  %23847 = vst [vmem:[#allocation81_spill] sm:$0xff] %v22264_v4  ;;  %v9036_v38 = vadd.f32 %v22254_v22, %v8989_v50  ;;  %v8988_v61 = vadd.f32 %v23848_v26, %v8520_v35  ;;  %v8523_v5 = vadd.f32 %v17008_v24, %v7909_v52  ;;  %v12427_v35 = vld [vmem:[#allocation2 + $0x102] sm:$0xff]  ;;  %v23851_v52 = vld [vmem:[#allocation87_spill] sm:$0xff] }
 0x63f   : > { %17289 = vmatprep.mubr.msk.f32.mxu1 %vm5267_vm0, %v10032_v21  ;;  %17618 = vmatprep.mubr.msk.f32.mxu0 %vm5267_vm0, %v12426_v60  ;;  %v7919_v32 = vadd.f32 %v23849_v63, %v22018_v6  ;;  %v8331_v13 = vpop.f32.mrf.mxu1  ;;  %v22273_v10 = vpop.f32.mrf.mxu0  ;;  %v7914_v24 = vadd.f32 %v23851_v52, %v22026_v48  ;;  %v10034_v60 = vld [vmem:[#allocation2 + $0xd9] sm:$0xff] }
 0x640   : > { %v9076_v31 = vmax.f32 %v9036_v38, 0.0  ;;  %v9035_v45 = vadd.f32 %v22254_v22, %v8988_v61  ;;  %v8991_v4 = vadd.f32 %v23850_v53, %v8523_v5  ;;  %v8522_v50 = vadd.f32 %v8331_v13, %v7904_v49  ;;  %v12428_v38 = vld [vmem:[#allocation2 + $0x10a] sm:$0xff]  ;;  %v23852_v61 = vld [vmem:[#allocation127_spill] sm:$0xff] }
 0x641   : > { %v17011_v21 = vpop.f32.mrf.mxu1  ;;  %v22280_v6 = vpop.f32.mrf.mxu0  ;;  %17619 = vmatmul.mubr.msk.f32.gmra.mxu0 %vm5267_vm0, %v12427_v35  ;;  %v12429_v52 = vld [vmem:[#allocation2 + $0x112] sm:$0xff] }
 0x642   : > { %17290 = vmatmul.mubr.msk.f32.gmra.mxu1 %vm5267_vm0, %v10033_v55  ;;  %13839 = vst.msk [vmem:[%s21605_s17 + $0x148] sm:$0xff] %vm385_vm2, %v9076_v31  ;;  %v9075_v26 = vmax.f32 %v9035_v45, 0.0  ;;  %v9038_v49 = vadd.f32 %v22254_v22, %v8991_v4  ;;  %v8990_v5 = vadd.f32 %v23852_v61, %v8522_v50  ;;  %v8525_v63 = vadd.f32 %v17011_v21, %v7919_v32  ;;  %v23853_v55 = vld [vmem:[#allocation88_spill] sm:$0xff]  ;;  %v23855_v21 = vld [vmem:[#allocation89_spill] sm:$0xff] }
 0x643   : > { %17292 = vmatprep.mubr.msk.f32.mxu1 %vm5267_vm0, %v10034_v60  ;;  %17621 = vmatprep.mubr.msk.f32.mxu0 %vm5267_vm0, %v12428_v38  ;;  %v7929_v48 = vadd.f32 %v23853_v55, %v22030_v27  ;;  %v8341_v13 = vpop.f32.mrf.mxu1  ;;  %v22291_v53 = vpop.f32.mrf.mxu0  ;;  %v23854_v4 = vld [vmem:[#allocation40_spill] sm:$0xff]  ;;  %v7924_v60 = vadd.f32 %v23855_v21, %v22038_v8  ;;  %v23857_v8 = vld [vmem:[#allocation90_spill] sm:$0xff] }
 0x644   : > { %13838 = vst.msk [vmem:[%s21605_s17 + $0x140] sm:$0xff] %vm385_vm2, %v9075_v26  ;;  %v9078_v31 = vmax.f32 %v9038_v49, 0.0  ;;  %v9037_v45 = vadd.f32 %v22254_v22, %v8990_v5  ;;  %v8993_v35 = vadd.f32 %v23854_v4, %v8525_v63  ;;  %v8524_v50 = vadd.f32 %v8341_v13, %v7914_v24  ;;  %v10035_v32 = vld [vmem:[#allocation2 + $0xe1] sm:$0xff]  ;;  %v10036_v26 = vld [vmem:[#allocation2 + $0xe9] sm:$0xff] }
 0x645   : > { %v17014_v38 = vpop.f32.mrf.mxu1  ;;  %v22300_v27 = vpop.f32.mrf.mxu0  ;;  %17622 = vmatmul.mubr.msk.f32.gmra.mxu0 %vm5267_vm0, %v12429_v52  ;;  %v12430_v49 = vld [vmem:[#allocation2 + $0x11a] sm:$0xff]  ;;  %v23856_v5 = vld [vmem:[#allocation129_spill] sm:$0xff]  ;;  %v7939_v13 = vadd.f32 %v23857_v8, %v22042_v47 }
 0x646   : > { %17293 = vmatmul.mubr.msk.f32.gmra.mxu1 %vm5267_vm0, %v10035_v32  ;;  %13841 = vst.msk [vmem:[%s21605_s17 + $0x158] sm:$0xff] %vm385_vm2, %v9078_v31  ;;  %v9077_v61 = vmax.f32 %v9037_v45, 0.0  ;;  %v9040_v24 = vadd.f32 %v22254_v22, %v8993_v35  ;;  %v8992_v63 = vadd.f32 %v23856_v5, %v8524_v50  ;;  %v8527_v55 = vadd.f32 %v17014_v38, %v7929_v48  ;;  %v23858_v35 = vld [vmem:[#allocation13_spill] sm:$0xff]  ;;  %v10037_v48 = vld [vmem:[#allocation2 + $0xf1] sm:$0xff] }
 0x647   : > { %17295 = vmatprep.mubr.msk.f32.mxu1 %vm5267_vm0, %v10036_v26  ;;  %17624 = vmatprep.mubr.msk.f32.mxu0 %vm5267_vm0, %v12430_v49  ;;  %v8351_v4 = vpop.f32.mrf.mxu1  ;;  %v22311_v32 = vpop.f32.mrf.mxu0  ;;  %v12431_v21 = vld [vmem:[#allocation2 + $0x122] sm:$0xff]  ;;  %v23859_v38 = vld [vmem:[#allocation91_spill] sm:$0xff] }
 0x648   : > { %13840 = vst.msk [vmem:[%s21605_s17 + $0x150] sm:$0xff] %vm385_vm2, %v9077_v61  ;;  %v9080_v31 = vmax.f32 %v9040_v24, 0.0  ;;  %v9039_v45 = vadd.f32 %v22254_v22, %v8992_v63  ;;  %v8995_v52 = vadd.f32 %v23858_v35, %v8527_v55  ;;  %v8526_v50 = vadd.f32 %v8351_v4, %v7924_v60  ;;  %v10038_v61 = vld [vmem:[#allocation2 + $0xf9] sm:$0xff]  ;;  %v12432_v24 = vld [vmem:[#allocation2 + $0x12a] sm:$0xff] }
 0x649   : > { %v7934_v26 = vadd.f32 %v23859_v38, %v22050_v39  ;;  %v17017_v49 = vpop.f32.mrf.mxu1  ;;  %v22320_v47 = vpop.f32.mrf.mxu0  ;;  %17625 = vmatmul.mubr.msk.f32.gmra.mxu0 %vm5267_vm0, %v12431_v21  ;;  %v23860_v63 = vld [vmem:[#allocation15_spill] sm:$0xff]  ;;  %v23861_v39 = vld [vmem:[#allocation92_spill] sm:$0xff]  ;;  %v23862_v38 = vld [vmem:[#allocation93_spill] sm:$0xff] }
 0x64a   : > { %17296 = vmatmul.mubr.msk.f32.gmra.mxu1 %vm5267_vm0, %v10037_v48  ;;  %13843 = vst.msk [vmem:[%s21605_s17 + $0x168] sm:$0xff] %vm385_vm2, %v9080_v31  ;;  %v9079_v5 = vmax.f32 %v9039_v45, 0.0  ;;  %v9042_v60 = vadd.f32 %v22254_v22, %v8995_v52  ;;  %v8994_v55 = vadd.f32 %v23860_v63, %v8526_v50  ;;  %v8529_v8 = vadd.f32 %v17017_v49, %v7939_v13  ;;  %v10039_v13 = vld [vmem:[#allocation2 + $0x101] sm:$0xff]  ;;  %v12433_v21 = vld [vmem:[#allocation2 + $0x132] sm:$0xff] }
 0x64b   : > { %17298 = vmatprep.mubr.msk.f32.mxu1 %vm5267_vm0, %v10038_v61  ;;  %17627 = vmatprep.mubr.msk.f32.mxu0 %vm5267_vm0, %v12432_v24  ;;  %v7949_v4 = vadd.f32 %v23861_v39, %v22054_v20  ;;  %v8361_v35 = vpop.f32.mrf.mxu1  ;;  %v22331_v48 = vpop.f32.mrf.mxu0  ;;  %v7944_v49 = vadd.f32 %v23862_v38, %v22062_v14  ;;  %v10040_v24 = vld [vmem:[#allocation2 + $0x109] sm:$0xff] }
 0x64c   : > { %13842 = vst.msk [vmem:[%s21605_s17 + $0x160] sm:$0xff] %vm385_vm2, %v9079_v5  ;;  %v9082_v31 = vmax.f32 %v9042_v60, 0.0  ;;  %v9041_v45 = vadd.f32 %v22254_v22, %v8994_v55  ;;  %v8997_v52 = vadd.f32 %v21593_v34, %v8529_v8  ;;  %v8528_v50 = vadd.f32 %v8361_v35, %v7934_v26  ;;  %v12434_v5 = vld [vmem:[#allocation2 + $0x13a] sm:$0xff]  ;;  %v23863_v14 = vld [vmem:[#allocation94_spill] sm:$0xff] }
 0x64d   : > { %v17020_v61 = vpop.f32.mrf.mxu1  ;;  %v22340_v20 = vpop.f32.mrf.mxu0  ;;  %17628 = vmatmul.mubr.msk.f32.gmra.mxu0 %vm5267_vm0, %v12433_v21  ;;  %v7959_v55 = vadd.f32 %v23863_v14, %v22066_v59 }
 0x64e   : > { %17299 = vmatmul.mubr.msk.f32.gmra.mxu1 %vm5267_vm0, %v10039_v13  ;;  %13845 = vst.msk [vmem:[%s21605_s17 + $0x178] sm:$0xff] %vm385_vm2, %v9082_v31  ;;  %v9081_v60 = vmax.f32 %v9041_v45, 0.0  ;;  %v9044_v34 = vadd.f32 %v22254_v22, %v8997_v52  ;;  %v8996_v26 = vadd.f32 %v21607_v46, %v8528_v50  ;;  %v8531_v63 = vadd.f32 %v17020_v61, %v7949_v4  ;;  %v23864_v45 = vld [vmem:[#allocation21_spill] sm:$0xff]  ;;  %v10041_v4 = vld [vmem:[#allocation2 + $0x111] sm:$0xff]  ;;  %v10042_v61 = vld [vmem:[#allocation2 + $0x119] sm:$0xff] }
 0x64f   : > { %17301 = vmatprep.mubr.msk.f32.mxu1 %vm5267_vm0, %v10040_v24  ;;  %17630 = vmatprep.mubr.msk.f32.mxu0 %vm5267_vm0, %v12434_v5  ;;  %v8371_v8 = vpop.f32.mrf.mxu1  ;;  %v22351_v39 = vpop.f32.mrf.mxu0  ;;  %v12435_v50 = vld [vmem:[#allocation2 + $0x142] sm:$0xff]  ;;  %v23865_v13 = vld [vmem:[#allocation95_spill] sm:$0xff]  ;;  %v12436_v24 = vld [vmem:[#allocation2 + $0x14a] sm:$0xff] }
 0x650   : > { %13844 = vst.msk [vmem:[%s21605_s17 + $0x170] sm:$0xff] %vm385_vm2, %v9081_v60  ;;  %v9084_v35 = vmax.f32 %v9044_v34, 0.0  ;;  %v9043_v31 = vadd.f32 %v22254_v22, %v8996_v26  ;;  %v8999_v52 = vadd.f32 %v23864_v45, %v8531_v63  ;;  %v8530_v46 = vadd.f32 %v8371_v8, %v7944_v49  ;;  %v12437_v45 = vld [vmem:[#allocation2 + $0x152] sm:$0xff] }
 0x651   : > { %v7954_v21 = vadd.f32 %v23865_v13, %v22074_v36  ;;  %v17023_v38 = vpop.f32.mrf.mxu1  ;;  %v22360_v59 = vpop.f32.mrf.mxu0  ;;  %17631 = vmatmul.mubr.msk.f32.gmra.mxu0 %vm5267_vm0, %v12435_v50  ;;  %v23866_v36 = vld [vmem:[#allocation96_spill] sm:$0xff]  ;;  %v10044_v50 = vld [vmem:[#allocation2 + $0x129] sm:$0xff] }
 0x652   : > { %17302 = vmatmul.mubr.msk.f32.gmra.mxu1 %vm5267_vm0, %v10041_v4  ;;  %13847 = vst.msk [vmem:[%s21605_s17 + $0x188] sm:$0xff] %vm385_vm2, %v9084_v35  ;;  %v9083_v5 = vmax.f32 %v9043_v31, 0.0  ;;  %v9046_v49 = vadd.f32 %v22254_v22, %v8999_v52  ;;  %v8998_v60 = vadd.f32 %v21625_v11, %v8530_v46  ;;  %v8533_v34 = vadd.f32 %v17023_v38, %v7959_v55  ;;  %v10043_v55 = vld [vmem:[#allocation2 + $0x121] sm:$0xff] }
 0x653   : > { %17304 = vmatprep.mubr.msk.f32.mxu1 %vm5267_vm0, %v10042_v61  ;;  %17633 = vmatprep.mubr.msk.f32.mxu0 %vm5267_vm0, %v12436_v24  ;;  %v7969_v26 = vadd.f32 %v23866_v36, %v22078_v18  ;;  %v8381_v63 = vpop.f32.mrf.mxu1  ;;  %v22371_v14 = vpop.f32.mrf.mxu0  ;;  %v23867_v52 = vld [vmem:[#allocation97_spill] sm:$0xff]  ;;  %v12438_v13 = vld [vmem:[#allocation2 + $0x15a] sm:$0xff] }
 0x654   : > { %13846 = vst.msk [vmem:[%s21605_s17 + $0x180] sm:$0xff] %vm385_vm2, %v9083_v5  ;;  %v9086_v8 = vmax.f32 %v9046_v49, 0.0  ;;  %v9045_v35 = vadd.f32 %v22254_v22, %v8998_v60  ;;  %v9001_v31 = vadd.f32 %v21634_v16, %v8533_v34  ;;  %v8532_v11 = vadd.f32 %v8381_v63, %v7954_v21  ;;  %v12439_v63 = vld [vmem:[#allocation2 + $0x162] sm:$0xff] }
 0x655   : > { %v7964_v46 = vadd.f32 %v23867_v52, %v22086_v23  ;;  %v17026_v4 = vpop.f32.mrf.mxu1  ;;  %v22380_v18 = vpop.f32.mrf.mxu0  ;;  %17634 = vmatmul.mubr.msk.f32.gmra.mxu0 %vm5267_vm0, %v12437_v45  ;;  %v23868_v23 = vld [vmem:[#allocation98_spill] sm:$0xff] }
 0x656   : > { %17305 = vmatmul.mubr.msk.f32.gmra.mxu1 %vm5267_vm0, %v10043_v55  ;;  %13849 = vst.msk [vmem:[%s21605_s17 + $0x198] sm:$0xff] %vm385_vm2, %v9086_v8  ;;  %v9085_v38 = vmax.f32 %v9045_v35, 0.0  ;;  %v9048_v16 = vadd.f32 %v22254_v22, %v9001_v31  ;;  %v9000_v21 = vadd.f32 %v21645_v7, %v8532_v11  ;;  %v8535_v61 = vadd.f32 %v17026_v4, %v7969_v26  ;;  %v10045_v26 = vld [vmem:[#allocation2 + $0x131] sm:$0xff]  ;;  %v10046_v11 = vld [vmem:[#allocation2 + $0x139] sm:$0xff] }
 0x657   : > { %17307 = vmatprep.mubr.msk.f32.mxu1 %vm5267_vm0, %v10044_v50  ;;  %17636 = vmatprep.mubr.msk.f32.mxu0 %vm5267_vm0, %v12438_v13  ;;  %v7979_v24 = vadd.f32 %v23868_v23, %v22090_v43  ;;  %v8391_v5 = vpop.f32.mrf.mxu1  ;;  %v22391_v49 = vpop.f32.mrf.mxu0  ;;  %v23869_v8 = vld [vmem:[#allocation99_spill] sm:$0xff] }
 0x658   : > { %13848 = vst.msk [vmem:[%s21605_s17 + $0x190] sm:$0xff] %vm385_vm2, %v9085_v38  ;;  %v9088_v60 = vmax.f32 %v9048_v16, 0.0  ;;  %v9047_v34 = vadd.f32 %v22254_v22, %v9000_v21  ;;  %v9003_v36 = vadd.f32 %v21654_v33, %v8535_v61  ;;  %v8534_v7 = vadd.f32 %v8391_v5, %v7964_v46  ;;  %v23871_v61 = vld [vmem:[#allocation101_spill] sm:$0xff] }
 0x659   : > { %v7974_v35 = vadd.f32 %v23869_v8, %v22098_v37  ;;  %v17029_v31 = vpop.f32.mrf.mxu1  ;;  %v22400_v43 = vpop.f32.mrf.mxu0  ;;  %17637 = vmatmul.mubr.msk.f32.gmra.mxu0 %vm5267_vm0, %v12439_v63  ;;  %v23870_v37 = vld [vmem:[#allocation100_spill] sm:$0xff]  ;;  %v7984_v23 = vadd.f32 %v23871_v61, %v22110_v54  ;;  %v10048_v5 = vld [vmem:[#allocation2 + $0x149] sm:$0xff] }
 0x65a   : > { %17308 = vmatmul.mubr.msk.f32.gmra.mxu1 %vm5267_vm0, %v10045_v26  ;;  %13851 = vst.msk [vmem:[%s21605_s17 + $0x1a8] sm:$0xff] %vm385_vm2, %v9088_v60  ;;  %v9087_v55 = vmax.f32 %v9047_v34, 0.0  ;;  %v9050_v33 = vadd.f32 %v22254_v22, %v9003_v36  ;;  %v9002_v45 = vadd.f32 %v21665_v2, %v8534_v7  ;;  %v8537_v52 = vadd.f32 %v17029_v31, %v7979_v24  ;;  %v10047_v2 = vld [vmem:[#allocation2 + $0x141] sm:$0xff]  ;;  %v23872_v7 = vld [vmem:[#allocation102_spill] sm:$0xff] }
 0x65b   : > { %17310 = vmatprep.mubr.msk.f32.mxu1 %vm5267_vm0, %v10046_v11  ;;  %v7989_v46 = vadd.f32 %v23870_v37, %v22102_v17  ;;  %v8401_v4 = vpop.f32.mrf.mxu1  ;;  %v22410_v50 = vpop.f32.mrf.mxu0  ;;  %v7999_v54 = vadd.f32 %v23872_v7, %v22114_v29 }
 0x65c   : > { %13850 = vst.msk [vmem:[%s21605_s17 + $0x1a0] sm:$0xff] %vm385_vm2, %v9087_v55  ;;  %v9090_v13 = vmax.f32 %v9050_v33, 0.0  ;;  %v9049_v38 = vadd.f32 %v22254_v22, %v9002_v45  ;;  %v9005_v16 = vadd.f32 %v21674_v28, %v8537_v52  ;;  %v8536_v21 = vadd.f32 %v8401_v4, %v7974_v35  ;;  %v23873_v55 = vld [vmem:[#allocation103_spill] sm:$0xff] }
 0x65d   : > { %v17032_v24 = vpop.f32.mrf.mxu1  ;;  %v22419_v17 = vpop.f32.mrf.mxu0  ;;  %v7994_v33 = vadd.f32 %v23873_v55, %v22122_v40  ;;  %v10050_v52 = vld [vmem:[#allocation2 + $0x159] sm:$0xff] }
 0x65e   : > { %17311 = vmatmul.mubr.msk.f32.gmra.mxu1 %vm5267_vm0, %v10047_v2  ;;  %13853 = vst.msk [vmem:[%s21605_s17 + $0x1b8] sm:$0xff] %vm385_vm2, %v9090_v13  ;;  %v9089_v60 = vmax.f32 %v9049_v38, 0.0  ;;  %v9052_v34 = vadd.f32 %v22254_v22, %v9005_v16  ;;  %v9004_v36 = vadd.f32 %v21685_v56, %v8536_v21  ;;  %v8539_v28 = vadd.f32 %v17032_v24, %v7989_v46  ;;  %v10049_v56 = vld [vmem:[#allocation2 + $0x151] sm:$0xff]  ;;  %v23875_v13 = vld [vmem:[#allocation104_spill] sm:$0xff]  ;;  %v23877_v24 = vld [vmem:[#allocation105_spill] sm:$0xff] }
 0x65f   : > { %17313 = vmatprep.mubr.msk.f32.mxu1 %vm5267_vm0, %v10048_v5  ;;  %v8411_v26 = vpop.f32.mrf.mxu1  ;;  %v22428_v63 = vpop.f32.mrf.mxu0  ;;  %v8009_v40 = vadd.f32 %v23875_v13, %v22126_v58  ;;  %v8004_v5 = vadd.f32 %v23877_v24, %v22134_v57  ;;  %v11120_v55 = vld [vmem:[#allocation2 + $0x1e] sm:$0xff] }
 0x660   : > { %13852 = vst.msk [vmem:[%s21605_s17 + $0x1b0] sm:$0xff] %vm385_vm2, %v9089_v60  ;;  %v9092_v8 = vmax.f32 %v9052_v34, 0.0  ;;  %v9051_v35 = vadd.f32 %v22254_v22, %v9004_v36  ;;  %v9007_v31 = vadd.f32 %v21694_v9, %v8539_v28  ;;  %v8538_v11 = vadd.f32 %v8411_v26, %v7984_v23  ;;  %v11119_v34 = vld [vmem:[#allocation2 + $0x16] sm:$0xff] }
 0x661   : > { %v17035_v45 = vpop.f32.mrf.mxu1  ;;  %v22437_v29 = vpop.f32.mrf.mxu0 }
 0x662   : > { %17314 = vmatmul.mubr.msk.f32.gmra.mxu1 %vm5267_vm0, %v10049_v56  ;;  %23874 = vst [vmem:[#allocation124_spill] sm:$0xff] %v22437_v29  ;;  %13855 = vst.msk [vmem:[%s21605_s17 + $0x1c8] sm:$0xff] %vm385_vm2, %v9092_v8  ;;  %v9091_v37 = vmax.f32 %v9051_v35, 0.0  ;;  %v9054_v46 = vadd.f32 %v22254_v22, %v9007_v31  ;;  %v9006_v4 = vadd.f32 %v21705_v51, %v8538_v11  ;;  %v10051_v51 = vld [vmem:[#allocation2 + $0x161] sm:$0xff] }
 0x663   : > { %v8541_v9 = vadd.f32 %v17035_v45, %v7999_v54  ;;  %17316 = vmatprep.mubr.msk.f32.mxu1 %vm5267_vm0, %v10050_v52  ;;  %v8421_v38 = vpop.f32.mrf.mxu1  ;;  %v22446_v16 = vpop.f32.mrf.mxu0  ;;  %v23879_v54 = vld [vmem:[#allocation106_spill] sm:$0xff] }
 0x664   : > { %23876 = vst [vmem:[#allocation83_spill] sm:$0xff] %v22446_v16  ;;  %13854 = vst.msk [vmem:[%s21605_s17 + $0x1c0] sm:$0xff] %vm385_vm2, %v9091_v37  ;;  %v9094_v21 = vmax.f32 %v9054_v46, 0.0  ;;  %v9053_v2 = vadd.f32 %v22254_v22, %v9006_v4  ;;  %v8540_v23 = vadd.f32 %v8421_v38, %v7994_v33  ;;  %v8019_v57 = vadd.f32 %v23879_v54, %v22141_v1  ;;  %v23881_v33 = vld [vmem:[#allocation107_spill] sm:$0xff]  ;;  %v11121_v37 = vld [vmem:[#allocation2 + $0x26] sm:$0xff] }
 0x665   : > { %v9009_v61 = vadd.f32 %v21714_v25, %v8541_v9  ;;  %v17038_v60 = vpop.f32.mrf.mxu1  ;;  %v22455_v58 = vpop.f32.mrf.mxu0  ;;  %v8014_v45 = vadd.f32 %v23881_v33, %v22150_v15  ;;  %v23883_v15 = vld [vmem:[#allocation108_spill] sm:$0xff]  ;;  %v11952_v16 = vld [vmem:[#allocation2 + $0xc9] sm:$0xff] }
 0x666   : > { %17317 = vmatmul.mubr.msk.f32.gmra.mxu1 %vm5267_vm0, %v10051_v51  ;;  %23878 = vst [vmem:[#allocation125_spill] sm:$0xff] %v22455_v58  ;;  %13857 = vst.msk [vmem:[%s21605_s17 + $0x1d8] sm:$0xff] %vm385_vm2, %v9094_v21  ;;  %v9093_v36 = vmax.f32 %v9053_v2, 0.0  ;;  %v9008_v7 = vadd.f32 %v21725_v42, %v8540_v23  ;;  %v8543_v25 = vadd.f32 %v17038_v60, %v8009_v40  ;;  %v14171_v42 = vld [vmem:[%s23464_s3 + $0x20] sm:$0xff]  ;;  %v11122_v23 = vld [vmem:[#allocation2 + $0x2e] sm:$0xff] }
 0x667   : > { %v9056_v28 = vadd.f32 %v22254_v22, %v9009_v61  ;;  %17387 = vmatprep.mubr.msk.f32.mxu1 %vm5267_vm0, %v11119_v34  ;;  %v8431_v26 = vpop.f32.mrf.mxu1  ;;  %v22464_v8 = vpop.f32.mrf.mxu0  ;;  %v8029_v13 = vadd.f32 %v23883_v15, %v22159_v0 }
 0x668   : > { %23880 = vst [vmem:[#allocation85_spill] sm:$0xff] %v22464_v8  ;;  %13856 = vst.msk [vmem:[%s21605_s17 + $0x1d0] sm:$0xff] %vm385_vm2, %v9093_v36  ;;  %v9055_v31 = vadd.f32 %v22254_v22, %v9008_v7  ;;  %v9011_v11 = vadd.f32 %v21734_v3, %v8543_v25  ;;  %v8542_v56 = vadd.f32 %v8431_v26, %v8004_v5  ;;  %v11123_v5 = vld [vmem:[#allocation2 + $0x36] sm:$0xff] }
 0x669   : > { %v9096_v35 = vmax.f32 %v9056_v28, 0.0  ;;  %v17041_v1 = vpop.f32.mrf.mxu1  ;;  %v22475_v52 = vpop.f32.mrf.mxu0  ;;  %v23887_v28 = vld [vmem:[#allocation110_spill] sm:$0xff] }
 0x66a   : > { %23882 = vst [vmem:[#allocation35_spill] sm:$0xff] %v22475_v52  ;;  %17388 = vmatmul.mubr.msk.f32.vlgmr.msra.gmra.mxu1 %vm5267_vm0, %v11120_v55  ;;  %v9095_v46 = vmax.f32 %v9055_v31, 0.0  ;;  %v9058_v3 = vadd.f32 %v22254_v22, %v9011_v11  ;;  %v9010_v4 = vadd.f32 %v21745_v19, %v8542_v56  ;;  %v8545_v9 = vadd.f32 %v17041_v1, %v8019_v57  ;;  %v23888_v57 = vld [vmem:[#allocation10_spill] sm:$0xff]  ;;  %v11124_v31 = vld [vmem:[#allocation2 + $0x3e] sm:$0xff]  ;;  %v23892_v1 = vld [vmem:[#allocation19_spill] sm:$0xff] }
 0x66b   : > { %13859 = vst.msk [vmem:[%s21605_s17 + $0x1e8] sm:$0xff] %vm385_vm2, %v9096_v35  ;;  %17390 = vmatprep.mubr.msk.f32.mxu1 %vm5267_vm0, %v11121_v37  ;;  %17512 = vmatpush3.msra.mxu1 %v22157_v12  ;;  %v8441_v40 = vpop.f32.mrf.mxu1  ;;  %v22486_v38 = vpop.f32.mrf.mxu0  ;;  %v23885_v12 = vld [vmem:[#allocation109_spill] sm:$0xff] }
 0x66c   : > { %23884 = vst [vmem:[#allocation87_spill] sm:$0xff] %v22486_v38  ;;  %17513 = vmatprep.subr.mxu1 %v14171_v42  ;;  %13858 = vst.msk [vmem:[%s21605_s17 + $0x1e0] sm:$0xff] %vm385_vm2, %v9095_v46  ;;  %v9098_v21 = vmax.f32 %v9058_v3, 0.0  ;;  %v9057_v2 = vadd.f32 %v22254_v22, %v9010_v4  ;;  %v9013_v19 = vadd.f32 %v21754_v62, %v8545_v9  ;;  %v23889_v11 = vld [vmem:[#allocation121_spill] sm:$0xff]  ;;  %v23893_v3 = vld [vmem:[#allocation74_spill] sm:$0xff] }
 0x66d   : > { %v8544_v61 = vadd.f32 %v8441_v40, %v8014_v45  ;;  %17514 = vmatpush3.msra.mxu1 %v14171_v42  ;;  %v8024_v51 = vadd.f32 %v23885_v12, %v22167_v41  ;;  %v17044_v0 = vpop.f32.mrf.mxu1  ;;  %v22494_v24 = vpop.f32.mrf.mxu0  ;;  %v8039_v41 = vadd.f32 %v23887_v28, %v22172_v30  ;;  %v11125_v30 = vld [vmem:[#allocation2 + $0x46] sm:$0xff]  ;;  %v23894_v4 = vld [vmem:[#allocation112_spill] sm:$0xff]  ;;  %v11945_v38 = vld [vmem:[#allocation2 + $0x91] sm:$0xff] }
 0x66e   : > { %23886 = vst [vmem:[#allocation127_spill] sm:$0xff] %v22494_v24  ;;  %17391 = vmatmul.mubr.msk.f32.gmra.mxu1 %vm5267_vm0, %v11122_v23  ;;  %13861 = vst.msk [vmem:[%s21605_s17 + $0x1f8] sm:$0xff] %vm385_vm2, %v9098_v21  ;;  %v9097_v60 = vmax.f32 %v9057_v2, 0.0  ;;  %v9060_v34 = vadd.f32 %v22254_v22, %v9013_v19  ;;  %v8547_v36 = vadd.f32 %v17044_v0, %v8029_v13  ;;  %v23895_v21 = vld [vmem:[#allocation11_spill] sm:$0xff]  ;;  %v23897_v12 = vld [vmem:[#allocation113_spill] sm:$0xff] }
 0x66f   : > { %v9012_v62 = vadd.f32 %v21768_v44, %v8544_v61  ;;  %17393 = vmatprep.mubr.msk.f32.mxu1 %vm5267_vm0, %v11123_v5  ;;  %v8451_v7 = vpop.f32.mrf.mxu1  ;;  %v23890_v44 = vld [vmem:[#allocation111_spill] sm:$0xff]  ;;  %v22510_v55 = vpop.f32.mrf.mxu0  ;;  %v8049_v9 = vadd.f32 %v23894_v4, %v23893_v3 }
 0x670   : > { %13860 = vst.msk [vmem:[%s21605_s17 + $0x1f0] sm:$0xff] %vm385_vm2, %v9097_v60  ;;  %v9100_v25 = vmax.f32 %v9060_v34, 0.0  ;;  %v9015_v26 = vadd.f32 %v23888_v57, %v8547_v36  ;;  %v8546_v35 = vadd.f32 %v8451_v7, %v8024_v51  ;;  %v8034_v56 = vadd.f32 %v23890_v44, %v23889_v11  ;;  %23891 = vst [vmem:[#allocation88_spill] sm:$0xff] %v22510_v55  ;;  %v11126_v61 = vld [vmem:[#allocation2 + $0x4e] sm:$0xff]  ;;  %v11127_v60 = vld [vmem:[#allocation2 + $0x56] sm:$0xff] }
 0x671   : > { %v9059_v54 = vadd.f32 %v22254_v22, %v9012_v62  ;;  %v17047_v42 = vpop.f32.mrf.mxu1  ;;  %v23896_v23 = vld [vmem:[#allocation67_spill] sm:$0xff]  ;;  %v22526_v0 = vpop.f32.mrf.mxu0  ;;  %v23899_v36 = vld [vmem:[#allocation22_spill] sm:$0xff]  ;;  %v23900_v7 = vld [vmem:[#allocation32_spill] sm:$0xff] }
 0x672   : > { %17394 = vmatmul.mubr.msk.f32.gmra.mxu1 %vm5267_vm0, %v11124_v31  ;;  %13863 = vst.msk [vmem:[%s21605_s17 + $0x208] sm:$0xff] %vm385_vm2, %v9100_v25  ;;  %v9062_v45 = vadd.f32 %v22254_v22, %v9015_v26  ;;  %v9014_v37 = vadd.f32 %v23892_v1, %v8546_v35  ;;  %v8549_v46 = vadd.f32 %v17047_v42, %v8039_v41  ;;  %23898 = vst [vmem:[#allocation40_spill] sm:$0xff] %v22526_v0  ;;  %v23901_v25 = vld [vmem:[#allocation114_spill] sm:$0xff]  ;;  %v23902_v31 = vld [vmem:[#allocation12_spill] sm:$0xff] }
 0x673   : > { %v9099_v33 = vmax.f32 %v9059_v54, 0.0  ;;  %17396 = vmatprep.mubr.msk.f32.mxu1 %vm5267_vm0, %v11125_v30  ;;  %v8461_v15 = vpop.f32.mrf.mxu1  ;;  %v8044_v51 = vadd.f32 %v23897_v12, %v23896_v23  ;;  %v8059_v54 = vadd.f32 %v23901_v25, %v23900_v7  ;;  %v23903_v42 = vld [vmem:[#allocation79_spill] sm:$0xff]  ;;  %v23909_v23 = vld [vmem:[#allocation17_spill] sm:$0xff] }
 0x674   : > { %v9102_v13 = vmax.f32 %v9062_v45, 0.0  ;;  %v9061_v40 = vadd.f32 %v22254_v22, %v9014_v37  ;;  %v9017_v2 = vadd.f32 %v23895_v21, %v8549_v46  ;;  %v8548_v19 = vadd.f32 %v8461_v15, %v8034_v56  ;;  %v11128_v56 = vld [vmem:[#allocation2 + $0x5e] sm:$0xff]  ;;  %v23904_v30 = vld [vmem:[#allocation115_spill] sm:$0xff]  ;;  %v22542_v45 = vpop.f32.mrf.mxu0  ;;  %v11129_v37 = vld [vmem:[#allocation2 + $0x66] sm:$0xff] }
 0x675   : > { %13862 = vst.msk [vmem:[%s21605_s17 + $0x200] sm:$0xff] %vm385_vm2, %v9099_v33  ;;  %v17050_v5 = vpop.f32.mrf.mxu1  ;;  %v8054_v33 = vadd.f32 %v23904_v30, %v23903_v42  ;;  %23905 = vst [vmem:[#allocation89_spill] sm:$0xff] %v22542_v45  ;;  %v23906_v4 = vld [vmem:[#allocation23_spill] sm:$0xff]  ;;  %v23916_v30 = vld [vmem:[#allocation14_spill] sm:$0xff] }
 0x676   : > { %17397 = vmatmul.mubr.msk.f32.gmra.mxu1 %vm5267_vm0, %v11126_v61  ;;  %13865 = vst.msk [vmem:[%s21605_s17 + $0x218] sm:$0xff] %vm385_vm2, %v9102_v13  ;;  %v9101_v34 = vmax.f32 %v9061_v40, 0.0  ;;  %v9064_v62 = vadd.f32 %v22254_v22, %v9017_v2  ;;  %v9016_v28 = vadd.f32 %v23899_v36, %v8548_v19  ;;  %v8551_v41 = vadd.f32 %v17050_v5, %v8049_v9  ;;  %v23907_v13 = vld [vmem:[#allocation69_spill] sm:$0xff]  ;;  %v23908_v40 = vld [vmem:[#allocation116_spill] sm:$0xff]  ;;  %v11130_v5 = vld [vmem:[#allocation2 + $0x6e] sm:$0xff]  ;;  %v22558_v36 = vpop.f32.mrf.mxu0 }
 0x677   : > { %17399 = vmatprep.mubr.msk.f32.mxu1 %vm5267_vm0, %v11127_v60  ;;  %v8471_v57 = vpop.f32.mrf.mxu1  ;;  %v8069_v21 = vadd.f32 %v23908_v40, %v23907_v13  ;;  %v23910_v60 = vld [vmem:[#allocation38_spill] sm:$0xff]  ;;  %23912 = vst [vmem:[#allocation129_spill] sm:$0xff] %v22558_v36  ;;  %v11943_v55 = vld [vmem:[#allocation2 + $0x81] sm:$0xff] }
 0x678   : > { %13864 = vst.msk [vmem:[%s21605_s17 + $0x210] sm:$0xff] %vm385_vm2, %v9101_v34  ;;  %v9104_v26 = vmax.f32 %v9064_v62, 0.0  ;;  %v9063_v35 = vadd.f32 %v22254_v22, %v9016_v28  ;;  %v9019_v11 = vadd.f32 %v23902_v31, %v8551_v41  ;;  %v8550_v44 = vadd.f32 %v8471_v57, %v8044_v51  ;;  %v23911_v34 = vld [vmem:[#allocation117_spill] sm:$0xff]  ;;  %v11131_v41 = vld [vmem:[#allocation2 + $0x76] sm:$0xff]  ;;  %v23915_v31 = vld [vmem:[#allocation118_spill] sm:$0xff] }
 0x679   : > { %v17053_v1 = vpop.f32.mrf.mxu1  ;;  %v8064_v62 = vadd.f32 %v23911_v34, %v23910_v60  ;;  %v11133_v13 = vld [vmem:[#allocation2 + $0x86] sm:$0xff]  ;;  %v11941_v45 = vld [vmem:[#allocation2 + $0x71] sm:$0xff] }
 0x67a   : > { %17400 = vmatmul.mubr.msk.f32.gmra.mxu1 %vm5267_vm0, %v11128_v56  ;;  %13867 = vst.msk [vmem:[%s21605_s17 + $0x228] sm:$0xff] %vm385_vm2, %v9104_v26  ;;  %v9103_v46 = vmax.f32 %v9063_v35, 0.0  ;;  %v9066_v3 = vadd.f32 %v22254_v22, %v9019_v11  ;;  %v9018_v9 = vadd.f32 %v23906_v4, %v8550_v44  ;;  %v8553_v15 = vadd.f32 %v17053_v1, %v8059_v54  ;;  %v23913_v54 = vld [vmem:[#allocation26_spill] sm:$0xff]  ;;  %v23914_v35 = vld [vmem:[#allocation84_spill] sm:$0xff] }
 0x67b   : > { %17402 = vmatprep.mubr.msk.f32.mxu1 %vm5267_vm0, %v11129_v37  ;;  %v8481_v2 = vpop.f32.mrf.mxu1  ;;  %v8079_v11 = vadd.f32 %v23915_v31, %v23914_v35  ;;  %v11132_v37 = vld [vmem:[#allocation2 + $0x7e] sm:$0xff]  ;;  %v11135_v31 = vld [vmem:[#allocation2 + $0x96] sm:$0xff] }
 0x67c   : > { %13866 = vst.msk [vmem:[%s21605_s17 + $0x220] sm:$0xff] %vm385_vm2, %v9103_v46  ;;  %v9106_v19 = vmax.f32 %v9066_v3, 0.0  ;;  %v9065_v61 = vadd.f32 %v22254_v22, %v9018_v9  ;;  %v9021_v12 = vadd.f32 %v23909_v23, %v8553_v15  ;;  %v8552_v51 = vadd.f32 %v8481_v2, %v8054_v33  ;;  %v23917_v46 = vld [vmem:[#allocation71_spill] sm:$0xff]  ;;  %v22574_v9 = vpop.f32.mrf.mxu0  ;;  %v23920_v2 = vld [vmem:[#allocation29_spill] sm:$0xff] }
 0x67d   : > { %v17056_v28 = vpop.f32.mrf.mxu1  ;;  %v23918_v3 = vld [vmem:[#allocation119_spill] sm:$0xff]  ;;  %23919 = vst [vmem:[#allocation90_spill] sm:$0xff] %v22574_v9  ;;  %v23921_v23 = vld [vmem:[#allocation41_spill] sm:$0xff] }
 0x67e   : > { %17403 = vmatmul.mubr.msk.f32.gmra.mxu1 %vm5267_vm0, %v11130_v5  ;;  %13869 = vst.msk [vmem:[%s21605_s17 + $0x238] sm:$0xff] %vm385_vm2, %v9106_v19  ;;  %v9105_v7 = vmax.f32 %v9065_v61, 0.0  ;;  %v9068_v25 = vadd.f32 %v22254_v22, %v9021_v12  ;;  %v9020_v57 = vadd.f32 %v23913_v54, %v8552_v51  ;;  %v8555_v26 = vadd.f32 %v17056_v28, %v8069_v21  ;;  %v23922_v12 = vld [vmem:[#allocation120_spill] sm:$0xff]  ;;  %v23925_v54 = vld [vmem:[#allocation122_spill] sm:$0xff] }
 0x67f   : > { %17405 = vmatprep.mubr.msk.f32.mxu1 %vm5267_vm0, %v11131_v41  ;;  %v8491_v44 = vpop.f32.mrf.mxu1  ;;  %v8074_v4 = vadd.f32 %v23918_v3, %v23917_v46  ;;  %v8089_v51 = vadd.f32 %v23922_v12, %v23921_v23  ;;  %v23928_v46 = vld [vmem:[#allocation18_spill] sm:$0xff]  ;;  %v11939_v9 = vld [vmem:[#allocation2 + $0x61] sm:$0xff] }
 0x680   : > { %13868 = vst.msk [vmem:[%s21605_s17 + $0x230] sm:$0xff] %vm385_vm2, %v9105_v7  ;;  %v9108_v56 = vmax.f32 %v9068_v25, 0.0  ;;  %v9067_v42 = vadd.f32 %v22254_v22, %v9020_v57  ;;  %v9023_v33 = vadd.f32 %v23916_v30, %v8555_v26  ;;  %v8554_v1 = vadd.f32 %v8491_v44, %v8064_v62  ;;  %v23923_v62 = vld [vmem:[#allocation16_spill] sm:$0xff]  ;;  %v11134_v7 = vld [vmem:[#allocation2 + $0x8e] sm:$0xff]  ;;  %v22590_v26 = vpop.f32.mrf.mxu0 }
 0x681   : > { %v17059_v15 = vpop.f32.mrf.mxu1  ;;  %v23924_v25 = vld [vmem:[#allocation75_spill] sm:$0xff]  ;;  %23926 = vst [vmem:[#allocation13_spill] sm:$0xff] %v22590_v26 }
 0x682   : > { %17406 = vmatmul.mubr.msk.f32.gmra.mxu1 %vm5267_vm0, %v11132_v37  ;;  %13871 = vst.msk [vmem:[%s21605_s17 + $0x248] sm:$0xff] %vm385_vm2, %v9108_v56  ;;  %v9107_v40 = vmax.f32 %v9067_v42, 0.0  ;;  %v9070_v21 = vadd.f32 %v22254_v22, %v9023_v33  ;;  %v9022_v19 = vadd.f32 %v23920_v2, %v8554_v1  ;;  %v8557_v61 = vadd.f32 %v17059_v15, %v8079_v11  ;;  %v23927_v56 = vld [vmem:[#allocation30_spill] sm:$0xff]  ;;  %v11136_v15 = vld [vmem:[#allocation2 + $0x9e] sm:$0xff] }
 0x683   : > { %17408 = vmatprep.mubr.msk.f32.mxu1 %vm5267_vm0, %v11133_v13  ;;  %v8501_v5 = vpop.f32.mrf.mxu1  ;;  %v8084_v57 = vadd.f32 %v23925_v54, %v23924_v25  ;;  %v22602_v13 = vpop.f32.mrf.mxu0  ;;  %v11140_v25 = vld [vmem:[#allocation2 + $0xbe] sm:$0xff] }
 0x684   : > { %13870 = vst.msk [vmem:[%s21605_s17 + $0x240] sm:$0xff] %vm385_vm2, %v9107_v40  ;;  %v9110_v60 = vmax.f32 %v9070_v21, 0.0  ;;  %v9069_v34 = vadd.f32 %v22254_v22, %v9022_v19  ;;  %v9025_v28 = vadd.f32 %v23923_v62, %v8557_v61  ;;  %v8556_v41 = vadd.f32 %v8501_v5, %v8074_v4  ;;  %23929 = vst [vmem:[#allocation91_spill] sm:$0xff] %v22602_v13  ;;  %v11137_v21 = vld [vmem:[#allocation2 + $0xa6] sm:$0xff]  ;;  %v11937_v13 = vld [vmem:[#allocation2 + $0x51] sm:$0xff] }
 0x685   : > { %v17062_v35 = vpop.f32.mrf.mxu1  ;;  %v23930_v61 = vld [vmem:[#allocation33_spill] sm:$0xff] }
 0x686   : > { %17409 = vmatmul.mubr.msk.f32.gmra.mxu1 %vm5267_vm0, %v11134_v7  ;;  %13873 = vst.msk [vmem:[%s21605_s17 + $0x258] sm:$0xff] %vm385_vm2, %v9110_v60  ;;  %v9109_v11 = vmax.f32 %v9069_v34, 0.0  ;;  %v9072_v44 = vadd.f32 %v22254_v22, %v9025_v28  ;;  %v9024_v42 = vadd.f32 %v23927_v56, %v8556_v41  ;;  %v8559_v30 = vadd.f32 %v17062_v35, %v8089_v51  ;;  %v11138_v60 = vld [vmem:[#allocation2 + $0xae] sm:$0xff]  ;;  %v22617_v34 = vpop.f32.mrf.mxu0  ;;  %v11139_v28 = vld [vmem:[#allocation2 + $0xb6] sm:$0xff] }
 0x687   : > { %17411 = vmatprep.mubr.msk.f32.mxu1 %vm5267_vm0, %v11135_v31  ;;  %v8511_v33 = vpop.f32.mrf.mxu1  ;;  %23931 = vst [vmem:[#allocation15_spill] sm:$0xff] %v22617_v34  ;;  %v11142_v31 = vld [vmem:[#allocation2 + $0xce] sm:$0xff]  ;;  %v11143_v56 = vld [vmem:[#allocation2 + $0xd6] sm:$0xff] }
 0x688   : > { %13872 = vst.msk [vmem:[%s21605_s17 + $0x250] sm:$0xff] %vm385_vm2, %v9109_v11  ;;  %v9112_v1 = vmax.f32 %v9072_v44, 0.0  ;;  %v9071_v37 = vadd.f32 %v22254_v22, %v9024_v42  ;;  %v9027_v3 = vadd.f32 %v23928_v46, %v8559_v30  ;;  %v8558_v4 = vadd.f32 %v8511_v33, %v8084_v57  ;;  %v22629_v54 = vpop.f32.mrf.mxu0  ;;  %v11141_v57 = vld [vmem:[#allocation2 + $0xc6] sm:$0xff]  ;;  %v11144_v30 = vld [vmem:[#allocation2 + $0xde] sm:$0xff] }
 0x689   : > { %v22604_v40 = vpop.f32.mrf.mxu1  ;;  %23932 = vst [vmem:[#allocation92_spill] sm:$0xff] %v22629_v54  ;;  %v11935_v54 = vld [vmem:[#allocation2 + $0x41] sm:$0xff] }
 0x68a   : > { %17412 = vmatmul.mubr.msk.f32.gmra.mxu1 %vm5267_vm0, %v11136_v15  ;;  %13875 = vst.msk [vmem:[%s21605_s17 + $0x268] sm:$0xff] %vm385_vm2, %v9112_v1  ;;  %v9111_v2 = vmax.f32 %v9071_v37, 0.0  ;;  %v9074_v19 = vadd.f32 %v22254_v22, %v9027_v3  ;;  %v9026_v23 = vadd.f32 %v23930_v61, %v8558_v4  ;;  %v22637_v11 = vpop.f32.mrf.mxu0  ;;  %v11145_v37 = vld [vmem:[#allocation2 + $0xe6] sm:$0xff]  ;;  %v11146_v3 = vld [vmem:[#allocation2 + $0xee] sm:$0xff] }
 0x68b   : > { %17414 = vmatprep.mubr.msk.f32.mxu1 %vm5267_vm0, %v11137_v21  ;;  %v22612_v12 = vpop.f32.mrf.mxu1  ;;  %23933 = vst [vmem:[#allocation93_spill] sm:$0xff] %v22637_v11  ;;  %v11147_v21 = vld [vmem:[#allocation2 + $0xf6] sm:$0xff] }
 0x68c   : > { %13874 = vst.msk [vmem:[%s21605_s17 + $0x260] sm:$0xff] %vm385_vm2, %v9111_v2  ;;  %v9114_v51 = vmax.f32 %v9074_v19, 0.0  ;;  %v9073_v5 = vadd.f32 %v22254_v22, %v9026_v23  ;;  %v22645_v33 = vpop.f32.mrf.mxu0  ;;  %v11148_v19 = vld [vmem:[#allocation2 + $0xfe] sm:$0xff] }
 0x68d   : > { %23934 = vst [vmem:[#allocation94_spill] sm:$0xff] %v22645_v33  ;;  %v11933_v33 = vld [vmem:[#allocation2 + $0x31] sm:$0xff] }
 0x68e   : > { %v22619_v62 = vpop.f32.mrf.mxu1  ;;  %17415 = vmatmul.mubr.msk.f32.gmra.mxu1 %vm5267_vm0, %v11138_v60  ;;  %13877 = vst.msk [vmem:[%s21605_s17 + $0x278] sm:$0xff] %vm385_vm2, %v9114_v51  ;;  %v9113_v41 = vmax.f32 %v9073_v5, 0.0  ;;  %v22653_v4 = vpop.f32.mrf.mxu0  ;;  %v11149_v51 = vld [vmem:[#allocation2 + $0x106] sm:$0xff]  ;;  %v11150_v60 = vld [vmem:[#allocation2 + $0x10e] sm:$0xff] }
 0x68f   : > { %17417 = vmatprep.mubr.msk.f32.mxu1 %vm5267_vm0, %v11139_v28  ;;  %23935 = vst [vmem:[#allocation21_spill] sm:$0xff] %v22653_v4 }
 0x690   : > { %v22625_v7 = vpop.f32.mrf.mxu1  ;;  %13876 = vst.msk [vmem:[%s21605_s17 + $0x270] sm:$0xff] %vm385_vm2, %v9113_v41  ;;  %v22661_v61 = vpop.f32.mrf.mxu0 }
 0x691   : > { %23936 = vst [vmem:[#allocation95_spill] sm:$0xff] %v22661_v61  ;;  %v11158_v61 = vld [vmem:[#allocation2 + $0x14e] sm:$0xff] }
 0x692   : > { %v22631_v22 = vpop.f32.mrf.mxu1  ;;  %17418 = vmatmul.mubr.msk.f32.gmra.mxu1 %vm5267_vm0, %v11140_v25  ;;  %v22669_v28 = vpop.f32.mrf.mxu0  ;;  %v11151_v25 = vld [vmem:[#allocation2 + $0x116] sm:$0xff] }
 0x693   : > { %17420 = vmatprep.mubr.msk.f32.mxu1 %vm5267_vm0, %v11141_v57  ;;  %23937 = vst [vmem:[#allocation96_spill] sm:$0xff] %v22669_v28 }
 0x694   : > { %v22635_v35 = vpop.f32.mrf.mxu1 }
 0x696   : > { %v22639_v44 = vpop.f32.mrf.mxu1  ;;  %17421 = vmatmul.mubr.msk.f32.gmra.mxu1 %vm5267_vm0, %v11142_v31  ;;  %v11152_v31 = vld [vmem:[#allocation2 + $0x11e] sm:$0xff] }
 0x697   : > { %17423 = vmatprep.mubr.msk.f32.mxu1 %vm5267_vm0, %v11143_v56  ;;  %v22677_v56 = vpop.f32.mrf.mxu0 }
 0x698   : > { %v22643_v42 = vpop.f32.mrf.mxu1  ;;  %23938 = vst [vmem:[#allocation97_spill] sm:$0xff] %v22677_v56  ;;  %v11156_v56 = vld [vmem:[#allocation2 + $0x13e] sm:$0xff] }
 0x69a   : > { %v22647_v1 = vpop.f32.mrf.mxu1  ;;  %17424 = vmatmul.mubr.msk.f32.gmra.mxu1 %vm5267_vm0, %v11144_v30 }
 0x69b   : > { %17426 = vmatprep.mubr.msk.f32.mxu1 %vm5267_vm0, %v11145_v37  ;;  %v11153_v37 = vld [vmem:[#allocation2 + $0x126] sm:$0xff] }
 0x69c   : > { %v22651_v46 = vpop.f32.mrf.mxu1 }
 0x69e   : > { %v22655_v15 = vpop.f32.mrf.mxu1  ;;  %17427 = vmatmul.mubr.msk.f32.gmra.mxu1 %vm5267_vm0, %v11146_v3 }
 0x69f   : > { %17429 = vmatprep.mubr.msk.f32.mxu1 %vm5267_vm0, %v11147_v21  ;;  %v11154_v21 = vld [vmem:[#allocation2 + $0x12e] sm:$0xff] }
 0x6a0   : > { %v22659_v2 = vpop.f32.mrf.mxu1 }
 0x6a2   : > { %v22663_v23 = vpop.f32.mrf.mxu1  ;;  %17430 = vmatmul.mubr.msk.f32.gmra.mxu1 %vm5267_vm0, %v11148_v19  ;;  %v22685_v19 = vpop.f32.mrf.mxu0 }
 0x6a3   : > { %17432 = vmatprep.mubr.msk.f32.mxu1 %vm5267_vm0, %v11149_v51  ;;  %23939 = vst [vmem:[#allocation98_spill] sm:$0xff] %v22685_v19 }
 0x6a4   : > { %v22667_v5 = vpop.f32.mrf.mxu1  ;;  %v22693_v28 = vpop.f32.mrf.mxu0 }
 0x6a5   : > { %23940 = vst [vmem:[#allocation99_spill] sm:$0xff] %v22693_v28 }
 0x6a6   : > { %v22671_v41 = vpop.f32.mrf.mxu1  ;;  %17433 = vmatmul.mubr.msk.f32.gmra.mxu1 %vm5267_vm0, %v11150_v60  ;;  %v11155_v60 = vld [vmem:[#allocation2 + $0x136] sm:$0xff]  ;;  %v22701_v4 = vpop.f32.mrf.mxu0 }
 0x6a7   : > { %17435 = vmatprep.mubr.msk.f32.mxu1 %vm5267_vm0, %v11151_v25  ;;  %23941 = vst [vmem:[#allocation100_spill] sm:$0xff] %v22701_v4 }
 0x6a8   : > { %v22675_v57 = vpop.f32.mrf.mxu1  ;;  %v22709_v11 = vpop.f32.mrf.mxu0 }
 0x6a9   : > { %23942 = vst [vmem:[#allocation101_spill] sm:$0xff] %v22709_v11 }
 0x6aa   : > { %v22679_v30 = vpop.f32.mrf.mxu1  ;;  %17436 = vmatmul.mubr.msk.f32.gmra.mxu1 %vm5267_vm0, %v11152_v31  ;;  %v22717_v34 = vpop.f32.mrf.mxu0 }
 0x6ab   : > { %17438 = vmatprep.mubr.msk.f32.mxu1 %vm5267_vm0, %v11153_v37  ;;  %v11157_v37 = vld [vmem:[#allocation2 + $0x146] sm:$0xff]  ;;  %23943 = vst [vmem:[#allocation102_spill] sm:$0xff] %v22717_v34 }
 0x6ac   : > { %v22683_v3 = vpop.f32.mrf.mxu1  ;;  %v22725_v26 = vpop.f32.mrf.mxu0 }
 0x6ad   : > { %23944 = vst [vmem:[#allocation103_spill] sm:$0xff] %v22725_v26 }
 0x6ae   : > { %v22687_v51 = vpop.f32.mrf.mxu1  ;;  %17439 = vmatmul.mubr.msk.f32.gmra.mxu1 %vm5267_vm0, %v11154_v21  ;;  %v22733_v36 = vpop.f32.mrf.mxu0 }
 0x6af   : > { %17441 = vmatprep.mubr.msk.f32.mxu1 %vm5267_vm0, %v11155_v60  ;;  %v11932_v60 = vld [vmem:[#allocation2 + $0x29] sm:$0xff]  ;;  %23946 = vst [vmem:[#allocation105_spill] sm:$0xff] %v22733_v36 }
 0x6b0   : > { %v22691_v25 = vpop.f32.mrf.mxu1  ;;  %v22741_v0 = vpop.f32.mrf.mxu0 }
 0x6b1   : > { %23949 = vst [vmem:[#allocation108_spill] sm:$0xff] %v22741_v0 }
 0x6b2   : > { %v22695_v31 = vpop.f32.mrf.mxu1  ;;  %17442 = vmatmul.mubr.msk.f32.gmra.mxu1 %vm5267_vm0, %v11156_v56  ;;  %v22749_v24 = vpop.f32.mrf.mxu0 }
 0x6b3   : > { %17444 = vmatprep.mubr.msk.f32.mxu1 %vm5267_vm0, %v11157_v37  ;;  %v11934_v37 = vld [vmem:[#allocation2 + $0x39] sm:$0xff]  ;;  %23952 = vst [vmem:[#allocation10_spill] sm:$0xff] %v22749_v24 }
 0x6b4   : > { %v22699_v19 = vpop.f32.mrf.mxu1  ;;  %v22757_v52 = vpop.f32.mrf.mxu0 }
 0x6b5   : > { %23955 = vst [vmem:[#allocation19_spill] sm:$0xff] %v22757_v52 }
 0x6b6   : > { %v22703_v21 = vpop.f32.mrf.mxu1  ;;  %17445 = vmatmul.mubr.msk.f32.gmra.mxu1 %vm5267_vm0, %v11158_v61 }
 0x6b7   : > { %17515 = vmatprep.mubr.msk.f32.mxu1 %vm5267_vm0, %v11932_v60  ;;  %v11936_v60 = vld [vmem:[#allocation2 + $0x49] sm:$0xff] }
 0x6b8   : > { %v22707_v28 = vpop.f32.mrf.mxu1 }
 0x6ba   : > { %v22711_v56 = vpop.f32.mrf.mxu1  ;;  %17516 = vmatmul.mubr.msk.f32.vlgmr.msra.gmra.mxu1 %vm5267_vm0, %v11933_v33 }
 0x6bb   : > { %17518 = vmatprep.mubr.msk.f32.mxu1 %vm5267_vm0, %v11934_v37  ;;  %v11938_v37 = vld [vmem:[#allocation2 + $0x59] sm:$0xff] }
 0x6bc   : > { %v22715_v4 = vpop.f32.mrf.mxu1 }
 0x6be   : > { %v22719_v61 = vpop.f32.mrf.mxu1  ;;  %17519 = vmatmul.mubr.msk.f32.gmra.mxu1 %vm5267_vm0, %v11935_v54 }
 0x6bf   : > { %17521 = vmatprep.mubr.msk.f32.mxu1 %vm5267_vm0, %v11936_v60  ;;  %v11940_v60 = vld [vmem:[#allocation2 + $0x69] sm:$0xff] }
 0x6c0   : > { %v22723_v11 = vpop.f32.mrf.mxu1 }
 0x6c2   : > { %v22727_v33 = vpop.f32.mrf.mxu1  ;;  %17522 = vmatmul.mubr.msk.f32.gmra.mxu1 %vm5267_vm0, %v11937_v13 }
 0x6c3   : > { %17524 = vmatprep.mubr.msk.f32.mxu1 %vm5267_vm0, %v11938_v37  ;;  %v11942_v37 = vld [vmem:[#allocation2 + $0x79] sm:$0xff] }
 0x6c4   : > { %v22731_v34 = vpop.f32.mrf.mxu1 }
 0x6c5   : > { %23945 = vst [vmem:[#allocation104_spill] sm:$0xff] %v22731_v34 }
 0x6c6   : > { %v22735_v54 = vpop.f32.mrf.mxu1  ;;  %17525 = vmatmul.mubr.msk.f32.gmra.mxu1 %vm5267_vm0, %v11939_v9 }
 0x6c7   : > { %23947 = vst [vmem:[#allocation106_spill] sm:$0xff] %v22735_v54  ;;  %17527 = vmatprep.mubr.msk.f32.mxu1 %vm5267_vm0, %v11940_v60  ;;  %v11944_v60 = vld [vmem:[#allocation2 + $0x89] sm:$0xff] }
 0x6c8   : > { %v22739_v26 = vpop.f32.mrf.mxu1 }
 0x6c9   : > { %23948 = vst [vmem:[#allocation107_spill] sm:$0xff] %v22739_v26 }
 0x6ca   : > { %v22743_v13 = vpop.f32.mrf.mxu1  ;;  %17528 = vmatmul.mubr.msk.f32.gmra.mxu1 %vm5267_vm0, %v11941_v45 }
 0x6cb   : > { %23950 = vst [vmem:[#allocation109_spill] sm:$0xff] %v22743_v13  ;;  %17530 = vmatprep.mubr.msk.f32.mxu1 %vm5267_vm0, %v11942_v37  ;;  %v11946_v37 = vld [vmem:[#allocation2 + $0x99] sm:$0xff] }
 0x6cc   : > { %v22747_v36 = vpop.f32.mrf.mxu1 }
 0x6cd   : > { %23951 = vst [vmem:[#allocation110_spill] sm:$0xff] %v22747_v36  ;;  %v22765_v36 = vpop.f32.mrf.mxu0 }
 0x6ce   : > { %v22751_v9 = vpop.f32.mrf.mxu1  ;;  %17531 = vmatmul.mubr.msk.f32.gmra.mxu1 %vm5267_vm0, %v11943_v55  ;;  %23958 = vst [vmem:[#allocation11_spill] sm:$0xff] %v22765_v36  ;;  %v23963_v36 = vld [vmem:[#allocation36_spill] sm:$0xff] }
 0x6cf   : > { %23953 = vst [vmem:[#allocation121_spill] sm:$0xff] %v22751_v9  ;;  %17533 = vmatprep.mubr.msk.f32.mxu1 %vm5267_vm0, %v11944_v60  ;;  %v11947_v9 = vld [vmem:[#allocation2 + $0xa1] sm:$0xff]  ;;  %v11948_v60 = vld [vmem:[#allocation2 + $0xa9] sm:$0xff]  ;;  %v22775_v13 = vpop.f32.mrf.mxu0 }
 0x6d0   : > { %v22755_v0 = vpop.f32.mrf.mxu1  ;;  %23962 = vst [vmem:[#allocation22_spill] sm:$0xff] %v22775_v13  ;;  %v11951_v13 = vld [vmem:[#allocation2 + $0xc1] sm:$0xff] }
 0x6d1   : > { %23954 = vst [vmem:[#allocation111_spill] sm:$0xff] %v22755_v0  ;;  %v11949_v0 = vld [vmem:[#allocation2 + $0xb1] sm:$0xff]  ;;  %v22786_v54 = vpop.f32.mrf.mxu0 }
 0x6d2   : > { %v22759_v45 = vpop.f32.mrf.mxu1  ;;  %17534 = vmatmul.mubr.msk.f32.gmra.mxu1 %vm5267_vm0, %v11945_v38  ;;  %23966 = vst [vmem:[#allocation32_spill] sm:$0xff] %v22786_v54 }
 0x6d3   : > { %23956 = vst [vmem:[#allocation74_spill] sm:$0xff] %v22759_v45  ;;  %17536 = vmatprep.mubr.msk.f32.mxu1 %vm5267_vm0, %v11946_v37  ;;  %v23961_v45 = vld [vmem:[#allocation20_spill] sm:$0xff]  ;;  %v22800_v29 = vpop.f32.mrf.mxu0 }
 0x6d4   : > { %v22763_v24 = vpop.f32.mrf.mxu1  ;;  %v9819_v38 = vadd.f32 %v23961_v45, %v22604_v40  ;;  %v23965_v40 = vld [vmem:[#allocation82_spill] sm:$0xff] }
 0x6d5   : > { %23957 = vst [vmem:[#allocation112_spill] sm:$0xff] %v22763_v24  ;;  %v11950_v24 = vld [vmem:[#allocation2 + $0xb9] sm:$0xff] }
 0x6d6   : > { %v22767_v55 = vpop.f32.mrf.mxu1  ;;  %17537 = vmatmul.mubr.msk.f32.gmra.mxu1 %vm5267_vm0, %v11947_v9  ;;  %v22781_v9 = vld [vmem:[#allocation7] ss:$0 sm:$0xff] }
 0x6d7   : > { %23959 = vst [vmem:[#allocation67_spill] sm:$0xff] %v22767_v55  ;;  %17539 = vmatprep.mubr.msk.f32.mxu1 %vm5267_vm0, %v11948_v60  ;;  %v9814_v55 = vadd.f32 %v23963_v36, %v22612_v12  ;;  %v23967_v36 = vld [vmem:[#allocation39_spill] sm:$0xff] }
 0x6d8   : > { %v22771_v52 = vpop.f32.mrf.mxu1  ;;  %v9824_v12 = vadd.f32 %v23967_v36, %v22625_v7  ;;  %v11953_v7 = vld [vmem:[#allocation2 + $0xd1] sm:$0xff] }
 0x6d9   : > { %23960 = vst [vmem:[#allocation113_spill] sm:$0xff] %v22771_v52  ;;  %v23964_v52 = vld [vmem:[#allocation25_spill] sm:$0xff] }
 0x6da   : > { %v17261_v37 = vpop.f32.mrf.mxu1  ;;  %17540 = vmatmul.mubr.msk.f32.gmra.mxu1 %vm5267_vm0, %v11949_v0  ;;  %v9829_v26 = vadd.f32 %v23964_v52, %v22619_v62 }
 0x6db   : > { %v10441_v8 = vadd.f32 %v17261_v37, %v9819_v38  ;;  %17542 = vmatprep.mubr.msk.f32.mxu1 %vm5267_vm0, %v11950_v24  ;;  %v23968_v38 = vld [vmem:[#allocation70_spill] sm:$0xff] }
 0x6dc   : > { %v10241_v60 = vpop.f32.mrf.mxu1 }
 0x6dd   : > { %v10909_v45 = vadd.f32 %v23965_v40, %v10441_v8  ;;  %v10440_v58 = vadd.f32 %v10241_v60, %v9814_v55  ;;  %v23969_v8 = vld [vmem:[#allocation24_spill] sm:$0xff] }
 0x6de   : > { %v17264_v0 = vpop.f32.mrf.mxu1  ;;  %17543 = vmatmul.mubr.msk.f32.gmra.mxu1 %vm5267_vm0, %v11951_v13  ;;  %v9839_v52 = vadd.f32 %v23969_v8, %v22631_v22  ;;  %v23970_v13 = vld [vmem:[#allocation128_spill] sm:$0xff] }
 0x6df   : > { %v10956_v24 = vadd.f32 %v22781_v9, %v10909_v45  ;;  %v10908_v37 = vadd.f32 %v23968_v38, %v10440_v58  ;;  %v10443_v34 = vadd.f32 %v17264_v0, %v9829_v26  ;;  %17545 = vmatprep.mubr.msk.f32.mxu1 %vm5267_vm0, %v11952_v16  ;;  %v23971_v45 = vld [vmem:[#allocation44_spill] sm:$0xff]  ;;  %v23972_v0 = vld [vmem:[#allocation86_spill] sm:$0xff] }
 0x6e0   : > { %v10251_v62 = vpop.f32.mrf.mxu1  ;;  %v9834_v36 = vadd.f32 %v23971_v45, %v22635_v35  ;;  %v11954_v16 = vld [vmem:[#allocation2 + $0xd9] sm:$0xff] }
 0x6e1   : > { %v10996_v55 = vmax.f32 %v10956_v24, 0.0  ;;  %v10955_v60 = vadd.f32 %v22781_v9, %v10908_v37  ;;  %v10911_v40 = vadd.f32 %v23970_v13, %v10443_v34  ;;  %v10442_v54 = vadd.f32 %v10251_v62, %v9824_v12  ;;  %v23973_v12 = vld [vmem:[#allocation27_spill] sm:$0xff]  ;;  %v23974_v62 = vld [vmem:[#allocation73_spill] sm:$0xff] }
 0x6e2   : > { %v17267_v58 = vpop.f32.mrf.mxu1  ;;  %17546 = vmatmul.mubr.msk.f32.gmra.mxu1 %vm5267_vm0, %v11953_v7  ;;  %v9849_v35 = vadd.f32 %v23973_v12, %v22639_v44  ;;  %v11955_v13 = vld [vmem:[#allocation2 + $0xe1] sm:$0xff]  ;;  %v11956_v44 = vld [vmem:[#allocation2 + $0xe9] sm:$0xff] }
 0x6e3   : > { %14048 = vst.msk [vmem:[%s21605_s17 + $0x288] sm:$0xff] %vm385_vm2, %v10996_v55  ;;  %v10995_v26 = vmax.f32 %v10955_v60, 0.0  ;;  %v10958_v22 = vadd.f32 %v22781_v9, %v10911_v40  ;;  %v10910_v24 = vadd.f32 %v23972_v0, %v10442_v54  ;;  %v10445_v34 = vadd.f32 %v17267_v58, %v9839_v52  ;;  %17548 = vmatprep.mubr.msk.f32.mxu1 %vm5267_vm0, %v11954_v16  ;;  %v23975_v54 = vld [vmem:[#allocation45_spill] sm:$0xff]  ;;  %v22816_v52 = vpop.f32.mrf.mxu0  ;;  %v23976_v16 = vld [vmem:[#allocation76_spill] sm:$0xff]  ;;  %v23978_v12 = vld [vmem:[#allocation78_spill] sm:$0xff] }
 0x6e4   : > { %v10261_v38 = vpop.f32.mrf.mxu1  ;;  %v9844_v40 = vadd.f32 %v23975_v54, %v22643_v42 }
 0x6e5   : > { %14047 = vst.msk [vmem:[%s21605_s17 + $0x280] sm:$0xff] %vm385_vm2, %v10995_v26  ;;  %v10998_v37 = vmax.f32 %v10958_v22, 0.0  ;;  %v10957_v8 = vadd.f32 %v22781_v9, %v10910_v24  ;;  %v10913_v55 = vadd.f32 %v23974_v62, %v10445_v34  ;;  %v10444_v60 = vadd.f32 %v10261_v38, %v9834_v36  ;;  %v23977_v36 = vld [vmem:[#allocation28_spill] sm:$0xff]  ;;  %v23979_v62 = vld [vmem:[#allocation47_spill] sm:$0xff] }
 0x6e6   : > { %v17270_v7 = vpop.f32.mrf.mxu1  ;;  %17549 = vmatmul.mubr.msk.f32.gmra.mxu1 %vm5267_vm0, %v11955_v13  ;;  %v9859_v42 = vadd.f32 %v23977_v36, %v22647_v1  ;;  %v11958_v1 = vld [vmem:[#allocation2 + $0xf9] sm:$0xff] }
 0x6e7   : > { %14050 = vst.msk [vmem:[%s21605_s17 + $0x298] sm:$0xff] %vm385_vm2, %v10998_v37  ;;  %v10997_v45 = vmax.f32 %v10957_v8, 0.0  ;;  %v10960_v58 = vadd.f32 %v22781_v9, %v10913_v55  ;;  %v10912_v26 = vadd.f32 %v23976_v16, %v10444_v60  ;;  %v10447_v22 = vadd.f32 %v17270_v7, %v9849_v35  ;;  %17551 = vmatprep.mubr.msk.f32.mxu1 %vm5267_vm0, %v11956_v44  ;;  %v11957_v8 = vld [vmem:[#allocation2 + $0xf1] sm:$0xff]  ;;  %v22832_v35 = vpop.f32.mrf.mxu0  ;;  %v23980_v7 = vld [vmem:[#allocation80_spill] sm:$0xff] }
 0x6e8   : > { %v10271_v0 = vpop.f32.mrf.mxu1  ;;  %v9854_v55 = vadd.f32 %v23979_v62, %v22651_v46 }
 0x6e9   : > { %14049 = vst.msk [vmem:[%s21605_s17 + $0x290] sm:$0xff] %vm385_vm2, %v10997_v45  ;;  %v11000_v24 = vmax.f32 %v10960_v58, 0.0  ;;  %v10959_v34 = vadd.f32 %v22781_v9, %v10912_v26  ;;  %v10915_v38 = vadd.f32 %v23978_v12, %v10447_v22  ;;  %v10446_v37 = vadd.f32 %v10271_v0, %v9844_v40  ;;  %v23981_v40 = vld [vmem:[#allocation31_spill] sm:$0xff]  ;;  %v23982_v22 = vld [vmem:[#allocation81_spill] sm:$0xff] }
 0x6ea   : > { %v17273_v60 = vpop.f32.mrf.mxu1  ;;  %17552 = vmatmul.mubr.msk.f32.gmra.mxu1 %vm5267_vm0, %v11957_v8  ;;  %v9869_v46 = vadd.f32 %v23981_v40, %v22655_v15  ;;  %v11960_v15 = vld [vmem:[#allocation2 + $0x109] sm:$0xff] }
 0x6eb   : > { %14052 = vst.msk [vmem:[%s21605_s17 + $0x2a8] sm:$0xff] %vm385_vm2, %v11000_v24  ;;  %v10999_v13 = vmax.f32 %v10959_v34, 0.0  ;;  %v10962_v54 = vadd.f32 %v22781_v9, %v10915_v38  ;;  %v10914_v44 = vadd.f32 %v23980_v7, %v10446_v37  ;;  %v10449_v45 = vadd.f32 %v17273_v60, %v9859_v42  ;;  %17554 = vmatprep.mubr.msk.f32.mxu1 %vm5267_vm0, %v11958_v1  ;;  %v11959_v24 = vld [vmem:[#allocation2 + $0x101] sm:$0xff]  ;;  %v22848_v42 = vpop.f32.mrf.mxu0 }
 0x6ec   : > { %v10281_v58 = vpop.f32.mrf.mxu1  ;;  %v23983_v34 = vld [vmem:[#allocation49_spill] sm:$0xff]  ;;  %23984 = vst [vmem:[#allocation114_spill] sm:$0xff] %v22848_v42 }
 0x6ed   : > { %14051 = vst.msk [vmem:[%s21605_s17 + $0x2a0] sm:$0xff] %vm385_vm2, %v10999_v13  ;;  %v11002_v16 = vmax.f32 %v10962_v54, 0.0  ;;  %v10961_v26 = vadd.f32 %v22781_v9, %v10914_v44  ;;  %v10917_v36 = vadd.f32 %v23982_v22, %v10449_v45  ;;  %v10448_v0 = vadd.f32 %v10281_v58, %v9854_v55  ;;  %v23985_v55 = vld [vmem:[#allocation34_spill] sm:$0xff] }
 0x6ee   : > { %v9864_v12 = vadd.f32 %v23983_v34, %v22659_v2  ;;  %v17276_v38 = vpop.f32.mrf.mxu1  ;;  %17555 = vmatmul.mubr.msk.f32.gmra.mxu1 %vm5267_vm0, %v11959_v24  ;;  %v9879_v2 = vadd.f32 %v23985_v55, %v22663_v23  ;;  %v11961_v45 = vld [vmem:[#allocation2 + $0x111] sm:$0xff]  ;;  %v11962_v23 = vld [vmem:[#allocation2 + $0x119] sm:$0xff] }
 0x6ef   : > { %14054 = vst.msk [vmem:[%s21605_s17 + $0x2b8] sm:$0xff] %vm385_vm2, %v11002_v16  ;;  %v11001_v37 = vmax.f32 %v10961_v26, 0.0  ;;  %v10964_v8 = vadd.f32 %v22781_v9, %v10917_v36  ;;  %v10916_v62 = vadd.f32 %v22273_v10, %v10448_v0  ;;  %v10451_v60 = vadd.f32 %v17276_v38, %v9869_v46  ;;  %17557 = vmatprep.mubr.msk.f32.mxu1 %vm5267_vm0, %v11960_v15  ;;  %v23986_v10 = vld [vmem:[#allocation51_spill] sm:$0xff]  ;;  %v22864_v46 = vpop.f32.mrf.mxu0  ;;  %v23988_v36 = vld [vmem:[#allocation37_spill] sm:$0xff] }
 0x6f0   : > { %v10291_v1 = vpop.f32.mrf.mxu1  ;;  %v9874_v40 = vadd.f32 %v23986_v10, %v22667_v5  ;;  %23987 = vst [vmem:[#allocation12_spill] sm:$0xff] %v22864_v46  ;;  %v9889_v5 = vadd.f32 %v23988_v36, %v22671_v41  ;;  %v11963_v15 = vld [vmem:[#allocation2 + $0x121] sm:$0xff]  ;;  %v11964_v41 = vld [vmem:[#allocation2 + $0x129] sm:$0xff]  ;;  %v11965_v10 = vld [vmem:[#allocation2 + $0x131] sm:$0xff] }
 0x6f1   : > { %14053 = vst.msk [vmem:[%s21605_s17 + $0x2b0] sm:$0xff] %vm385_vm2, %v11001_v37  ;;  %v11004_v13 = vmax.f32 %v10964_v8, 0.0  ;;  %v10963_v54 = vadd.f32 %v22781_v9, %v10916_v62  ;;  %v10919_v7 = vadd.f32 %v22280_v6, %v10451_v60  ;;  %v10450_v44 = vadd.f32 %v10291_v1, %v9864_v12  ;;  %v22880_v8 = vpop.f32.mrf.mxu0  ;;  %v23991_v1 = vld [vmem:[#allocation42_spill] sm:$0xff] }
 0x6f2   : > { %v17279_v58 = vpop.f32.mrf.mxu1  ;;  %17558 = vmatmul.mubr.msk.f32.gmra.mxu1 %vm5267_vm0, %v11961_v45  ;;  %23990 = vst [vmem:[#allocation79_spill] sm:$0xff] %v22880_v8 }
 0x6f3   : > { %14056 = vst.msk [vmem:[%s21605_s17 + $0x2c8] sm:$0xff] %vm385_vm2, %v11004_v13  ;;  %v11003_v16 = vmax.f32 %v10963_v54, 0.0  ;;  %v10966_v26 = vadd.f32 %v22781_v9, %v10919_v7  ;;  %v10918_v22 = vadd.f32 %v22291_v53, %v10450_v44  ;;  %v10453_v6 = vadd.f32 %v17279_v58, %v9879_v2  ;;  %17560 = vmatprep.mubr.msk.f32.mxu1 %vm5267_vm0, %v11962_v23  ;;  %v23989_v53 = vld [vmem:[#allocation53_spill] sm:$0xff]  ;;  %v22896_v58 = vpop.f32.mrf.mxu0 }
 0x6f4   : > { %v10301_v0 = vpop.f32.mrf.mxu1  ;;  %v9884_v37 = vadd.f32 %v23989_v53, %v22675_v57  ;;  %v9899_v57 = vadd.f32 %v23991_v1, %v22679_v30  ;;  %23993 = vst [vmem:[#allocation115_spill] sm:$0xff] %v22896_v58  ;;  %v11966_v30 = vld [vmem:[#allocation2 + $0x139] sm:$0xff] }
 0x6f5   : > { %14055 = vst.msk [vmem:[%s21605_s17 + $0x2c0] sm:$0xff] %vm385_vm2, %v11003_v16  ;;  %v11006_v24 = vmax.f32 %v10966_v26, 0.0  ;;  %v10965_v34 = vadd.f32 %v22781_v9, %v10918_v22  ;;  %v10921_v12 = vadd.f32 %v22300_v27, %v10453_v6  ;;  %v10452_v38 = vadd.f32 %v10301_v0, %v9874_v40  ;;  %v23994_v6 = vld [vmem:[#allocation43_spill] sm:$0xff] }
 0x6f6   : > { %v17282_v62 = vpop.f32.mrf.mxu1  ;;  %17561 = vmatmul.mubr.msk.f32.gmra.mxu1 %vm5267_vm0, %v11963_v15  ;;  %v22912_v15 = vpop.f32.mrf.mxu0 }
 0x6f7   : > { %14058 = vst.msk [vmem:[%s21605_s17 + $0x2d8] sm:$0xff] %vm385_vm2, %v11006_v24  ;;  %v11005_v60 = vmax.f32 %v10965_v34, 0.0  ;;  %v10968_v55 = vadd.f32 %v22781_v9, %v10921_v12  ;;  %v10920_v2 = vadd.f32 %v22311_v32, %v10452_v38  ;;  %v10455_v27 = vadd.f32 %v17282_v62, %v9889_v5  ;;  %17563 = vmatprep.mubr.msk.f32.mxu1 %vm5267_vm0, %v11964_v41  ;;  %v23992_v32 = vld [vmem:[#allocation55_spill] sm:$0xff]  ;;  %v11967_v12 = vld [vmem:[#allocation2 + $0x141] sm:$0xff] }
 0x6f8   : > { %v10311_v13 = vpop.f32.mrf.mxu1  ;;  %v9894_v40 = vadd.f32 %v23992_v32, %v22683_v3  ;;  %v9909_v3 = vadd.f32 %v23994_v6, %v22687_v51  ;;  %23996 = vst [vmem:[#allocation23_spill] sm:$0xff] %v22912_v15  ;;  %v11968_v51 = vld [vmem:[#allocation2 + $0x149] sm:$0xff] }
 0x6f9   : > { %14057 = vst.msk [vmem:[%s21605_s17 + $0x2d0] sm:$0xff] %vm385_vm2, %v11005_v60  ;;  %v11008_v54 = vmax.f32 %v10968_v55, 0.0  ;;  %v10967_v7 = vadd.f32 %v22781_v9, %v10920_v2  ;;  %v10923_v44 = vadd.f32 %v22320_v47, %v10455_v27  ;;  %v10454_v45 = vadd.f32 %v10311_v13, %v9884_v37  ;;  %v23997_v60 = vld [vmem:[#allocation46_spill] sm:$0xff]  ;;  %v24001_v6 = vld [vmem:[#allocation61_spill] sm:$0xff] }
 0x6fa   : > { %v17285_v23 = vpop.f32.mrf.mxu1  ;;  %17564 = vmatmul.mubr.msk.f32.gmra.mxu1 %vm5267_vm0, %v11965_v10  ;;  %v11969_v13 = vld [vmem:[#allocation2 + $0x151] sm:$0xff] }
 0x6fb   : > { %14060 = vst.msk [vmem:[%s21605_s17 + $0x2e8] sm:$0xff] %vm385_vm2, %v11008_v54  ;;  %v11007_v16 = vmax.f32 %v10967_v7, 0.0  ;;  %v10970_v26 = vadd.f32 %v22781_v9, %v10923_v44  ;;  %v10922_v22 = vadd.f32 %v22331_v48, %v10454_v45  ;;  %v10457_v47 = vadd.f32 %v17285_v23, %v9899_v57  ;;  %17566 = vmatprep.mubr.msk.f32.mxu1 %vm5267_vm0, %v11966_v30  ;;  %v23995_v48 = vld [vmem:[#allocation57_spill] sm:$0xff]  ;;  %v22928_v7 = vpop.f32.mrf.mxu0 }
 0x6fc   : > { %v10321_v36 = vpop.f32.mrf.mxu1  ;;  %v9904_v38 = vadd.f32 %v23995_v48, %v22691_v25  ;;  %v9919_v25 = vadd.f32 %v23997_v60, %v22695_v31  ;;  %23999 = vst [vmem:[#allocation69_spill] sm:$0xff] %v22928_v7  ;;  %v11970_v31 = vld [vmem:[#allocation2 + $0x159] sm:$0xff] }
 0x6fd   : > { %14059 = vst.msk [vmem:[%s21605_s17 + $0x2e0] sm:$0xff] %vm385_vm2, %v11007_v16  ;;  %v11010_v5 = vmax.f32 %v10970_v26, 0.0  ;;  %v10969_v0 = vadd.f32 %v22781_v9, %v10922_v22  ;;  %v10925_v24 = vadd.f32 %v22340_v20, %v10457_v47  ;;  %v10456_v34 = vadd.f32 %v10321_v36, %v9894_v40  ;;  %v24000_v40 = vld [vmem:[#allocation48_spill] sm:$0xff] }
 0x6fe   : > { %v17288_v53 = vpop.f32.mrf.mxu1  ;;  %17567 = vmatmul.mubr.msk.f32.gmra.mxu1 %vm5267_vm0, %v11967_v12  ;;  %v11971_v47 = vld [vmem:[#allocation2 + $0x161] sm:$0xff] }
 0x6ff   : > { %14062 = vst.msk [vmem:[%s21605_s17 + $0x2f8] sm:$0xff] %vm385_vm2, %v11010_v5  ;;  %v11009_v37 = vmax.f32 %v10969_v0, 0.0  ;;  %v10972_v62 = vadd.f32 %v22781_v9, %v10925_v24  ;;  %v10924_v41 = vadd.f32 %v22351_v39, %v10456_v34  ;;  %v10459_v20 = vadd.f32 %v17288_v53, %v9909_v3  ;;  %17569 = vmatprep.mubr.msk.f32.mxu1 %vm5267_vm0, %v11968_v51  ;;  %v23998_v39 = vld [vmem:[#allocation59_spill] sm:$0xff]  ;;  %v22944_v3 = vpop.f32.mrf.mxu0  ;;  %v24004_v51 = vld [vmem:[#allocation52_spill] sm:$0xff] }
 0x700   : > { %v10331_v55 = vpop.f32.mrf.mxu1  ;;  %v9914_v54 = vadd.f32 %v23998_v39, %v22699_v19  ;;  %v9929_v19 = vadd.f32 %v24000_v40, %v22703_v21  ;;  %24002 = vst [vmem:[#allocation116_spill] sm:$0xff] %v22944_v3 }
 0x701   : > { %14061 = vst.msk [vmem:[%s21605_s17 + $0x2f0] sm:$0xff] %vm385_vm2, %v11009_v37  ;;  %v11012_v2 = vmax.f32 %v10972_v62, 0.0  ;;  %v10971_v27 = vadd.f32 %v22781_v9, %v10924_v41  ;;  %v10927_v1 = vadd.f32 %v22360_v59, %v10459_v20  ;;  %v10458_v57 = vadd.f32 %v10331_v55, %v9904_v38  ;;  %v22959_v62 = vpop.f32.mrf.mxu0 }
 0x702   : > { %v17291_v44 = vpop.f32.mrf.mxu1  ;;  %17570 = vmatmul.mubr.msk.f32.gmra.mxu1 %vm5267_vm0, %v11969_v13  ;;  %v9934_v37 = vadd.f32 %v24004_v51, %v22715_v4  ;;  %24005 = vst [vmem:[#allocation17_spill] sm:$0xff] %v22959_v62  ;;  %v24008_v13 = vld [vmem:[#allocation56_spill] sm:$0xff] }
 0x703   : > { %14064 = vst.msk [vmem:[%s21605_s17 + $0x308] sm:$0xff] %vm385_vm2, %v11012_v2  ;;  %v11011_v45 = vmax.f32 %v10971_v27, 0.0  ;;  %v10974_v10 = vadd.f32 %v22781_v9, %v10927_v1  ;;  %v10926_v59 = vadd.f32 %v22371_v14, %v10458_v57  ;;  %v10461_v32 = vadd.f32 %v17291_v44, %v9919_v25  ;;  %17572 = vmatprep.mubr.msk.f32.mxu1 %vm5267_vm0, %v11970_v31  ;;  %v24006_v25 = vld [vmem:[#allocation54_spill] sm:$0xff]  ;;  %v22971_v57 = vpop.f32.mrf.mxu0 }
 0x704   : > { %v10341_v23 = vpop.f32.mrf.mxu1  ;;  %v9924_v14 = vadd.f32 %v24001_v6, %v22707_v28  ;;  %v9949_v55 = vadd.f32 %v24006_v25, %v22719_v61  ;;  %24007 = vst [vmem:[#allocation38_spill] sm:$0xff] %v22971_v57  ;;  %v9944_v39 = vadd.f32 %v24008_v13, %v22723_v11  ;;  %v24022_v25 = vld [vmem:[#allocation109_spill] sm:$0xff] }
 0x705   : > { %14063 = vst.msk [vmem:[%s21605_s17 + $0x300] sm:$0xff] %vm385_vm2, %v11011_v45  ;;  %v11014_v30 = vmax.f32 %v10974_v10, 0.0  ;;  %v10973_v16 = vadd.f32 %v22781_v9, %v10926_v59  ;;  %v10929_v26 = vadd.f32 %v22380_v18, %v10461_v32  ;;  %v10460_v22 = vadd.f32 %v10341_v23, %v9914_v54  ;;  %v24003_v18 = vld [vmem:[#allocation50_spill] sm:$0xff]  ;;  %v24010_v32 = vld [vmem:[#allocation124_spill] sm:$0xff]  ;;  %v22985_v23 = vpop.f32.mrf.mxu0 }
 0x706   : > { %v17294_v36 = vpop.f32.mrf.mxu1  ;;  %17573 = vmatmul.mubr.msk.f32.gmra.mxu1 %vm5267_vm0, %v11971_v47  ;;  %v9939_v34 = vadd.f32 %v24003_v18, %v22711_v56  ;;  %v24009_v45 = vld [vmem:[#allocation58_spill] sm:$0xff]  ;;  %24011 = vst [vmem:[#allocation117_spill] sm:$0xff] %v22985_v23  ;;  %v24014_v47 = vld [vmem:[#allocation83_spill] sm:$0xff] }
 0x707   : > { %14066 = vst.msk [vmem:[%s21605_s17 + $0x318] sm:$0xff] %vm385_vm2, %v11014_v30  ;;  %v11013_v21 = vmax.f32 %v10973_v16, 0.0  ;;  %v10976_v5 = vadd.f32 %v22781_v9, %v10929_v26  ;;  %v10928_v0 = vadd.f32 %v22391_v49, %v10460_v22  ;;  %v10463_v24 = vadd.f32 %v17294_v36, %v9929_v19  ;;  %v24012_v30 = vld [vmem:[#allocation104_spill] sm:$0xff]  ;;  %v24015_v36 = vld [vmem:[#allocation106_spill] sm:$0xff] }
 0x708   : > { %v10351_v12 = vpop.f32.mrf.mxu1  ;;  %v9959_v10 = vadd.f32 %v24009_v45, %v22727_v33  ;;  %v24013_v16 = vld [vmem:[#allocation60_spill] sm:$0xff] }
 0x709   : > { %14065 = vst.msk [vmem:[%s21605_s17 + $0x310] sm:$0xff] %vm385_vm2, %v11013_v21  ;;  %v11016_v28 = vmax.f32 %v10976_v5, 0.0  ;;  %v10975_v48 = vadd.f32 %v22781_v9, %v10928_v0  ;;  %v10931_v38 = vadd.f32 %v22400_v43, %v10463_v24  ;;  %v10462_v53 = vadd.f32 %v10351_v12, %v9924_v14  ;;  %v24016_v21 = vld [vmem:[#allocation62_spill] sm:$0xff] }
 0x70a   : > { %v17297_v49 = vpop.f32.mrf.mxu1  ;;  %v9954_v26 = vadd.f32 %v24013_v16, %v24012_v30  ;;  %v9969_v5 = vadd.f32 %v24016_v21, %v24015_v36 }
 0x70b   : > { %14068 = vst.msk [vmem:[%s21605_s17 + $0x328] sm:$0xff] %vm385_vm2, %v11016_v28  ;;  %v11015_v56 = vmax.f32 %v10975_v48, 0.0  ;;  %v10978_v41 = vadd.f32 %v22781_v9, %v10931_v38  ;;  %v10930_v20 = vadd.f32 %v22410_v50, %v10462_v53  ;;  %v10465_v60 = vadd.f32 %v17297_v49, %v9939_v34  ;;  %v24017_v34 = vld [vmem:[#allocation125_spill] sm:$0xff]  ;;  %v22999_v48 = vpop.f32.mrf.mxu0  ;;  %v24019_v38 = vld [vmem:[#allocation107_spill] sm:$0xff] }
 0x70c   : > { %v10361_v43 = vpop.f32.mrf.mxu1  ;;  %24018 = vst [vmem:[#allocation26_spill] sm:$0xff] %v22999_v48  ;;  %v24020_v53 = vld [vmem:[#allocation63_spill] sm:$0xff] }
 0x70d   : > { %14067 = vst.msk [vmem:[%s21605_s17 + $0x320] sm:$0xff] %vm385_vm2, %v11015_v56  ;;  %v11018_v4 = vmax.f32 %v10978_v41, 0.0  ;;  %v10977_v2 = vadd.f32 %v22781_v9, %v10930_v20  ;;  %v10933_v27 = vadd.f32 %v22419_v17, %v10465_v60  ;;  %v10464_v1 = vadd.f32 %v10361_v43, %v9934_v37  ;;  %v24021_v41 = vld [vmem:[#allocation85_spill] sm:$0xff] }
 0x70e   : > { %v17300_v50 = vpop.f32.mrf.mxu1  ;;  %v9964_v51 = vadd.f32 %v24020_v53, %v24019_v38 }
 0x70f   : > { %14070 = vst.msk [vmem:[%s21605_s17 + $0x338] sm:$0xff] %vm385_vm2, %v11018_v4  ;;  %v11017_v61 = vmax.f32 %v10977_v2, 0.0  ;;  %v10980_v54 = vadd.f32 %v22781_v9, %v10933_v27  ;;  %v10932_v44 = vadd.f32 %v22428_v63, %v10464_v1  ;;  %v10467_v31 = vadd.f32 %v17300_v50, %v9949_v55  ;;  %v24023_v55 = vld [vmem:[#allocation64_spill] sm:$0xff]  ;;  %v24024_v1 = vld [vmem:[#allocation35_spill] sm:$0xff]  ;;  %v23013_v50 = vpop.f32.mrf.mxu0 }
 0x710   : > { %v10371_v17 = vpop.f32.mrf.mxu1  ;;  %v9979_v43 = vadd.f32 %v24023_v55, %v24022_v25  ;;  %24025 = vst [vmem:[#allocation84_spill] sm:$0xff] %v23013_v50  ;;  %v24041_v25 = vld [vmem:[#allocation77_spill] sm:$0xff] }
 0x711   : > { %14069 = vst.msk [vmem:[%s21605_s17 + $0x330] sm:$0xff] %vm385_vm2, %v11017_v61  ;;  %v11020_v59 = vmax.f32 %v10980_v54, 0.0  ;;  %v10979_v11 = vadd.f32 %v22781_v9, %v10932_v44  ;;  %v10935_v40 = vadd.f32 %v24010_v32, %v10467_v31  ;;  %v10466_v19 = vadd.f32 %v10371_v17, %v9944_v39  ;;  %v24026_v61 = vld [vmem:[#allocation110_spill] sm:$0xff]  ;;  %v24027_v54 = vld [vmem:[#allocation65_spill] sm:$0xff]  ;;  %v24028_v17 = vld [vmem:[#allocation87_spill] sm:$0xff] }
 0x712   : > { %v17303_v63 = vpop.f32.mrf.mxu1  ;;  %v9974_v44 = vadd.f32 %v24027_v54, %v24026_v61  ;;  %v24029_v32 = vld [vmem:[#allocation121_spill] sm:$0xff]  ;;  %v24044_v61 = vld [vmem:[#allocation68_spill] sm:$0xff] }
 0x713   : > { %14072 = vst.msk [vmem:[%s21605_s17 + $0x348] sm:$0xff] %vm385_vm2, %v11020_v59  ;;  %v11019_v33 = vmax.f32 %v10979_v11, 0.0  ;;  %v10982_v22 = vadd.f32 %v22781_v9, %v10935_v40  ;;  %v10934_v6 = vadd.f32 %v24014_v47, %v10466_v19  ;;  %v10469_v14 = vadd.f32 %v17303_v63, %v9959_v10  ;;  %v24030_v40 = vld [vmem:[#allocation72_spill] sm:$0xff]  ;;  %v24031_v63 = vld [vmem:[#allocation127_spill] sm:$0xff]  ;;  %v23027_v47 = vpop.f32.mrf.mxu0 }
 0x714   : > { %v10381_v0 = vpop.f32.mrf.mxu1  ;;  %v9989_v19 = vadd.f32 %v24030_v40, %v24029_v32  ;;  %24032 = vst [vmem:[#allocation118_spill] sm:$0xff] %v23027_v47  ;;  %v24047_v32 = vld [vmem:[#allocation113_spill] sm:$0xff]  ;;  %v24048_v40 = vld [vmem:[#allocation126_spill] sm:$0xff] }
 0x715   : > { %14071 = vst.msk [vmem:[%s21605_s17 + $0x340] sm:$0xff] %vm385_vm2, %v11019_v33  ;;  %v11022_v24 = vmax.f32 %v10982_v22, 0.0  ;;  %v10981_v18 = vadd.f32 %v22781_v9, %v10934_v6  ;;  %v10937_v12 = vadd.f32 %v24017_v34, %v10469_v14  ;;  %v10468_v28 = vadd.f32 %v10381_v0, %v9954_v26  ;;  %v24033_v6 = vld [vmem:[#allocation111_spill] sm:$0xff]  ;;  %v24034_v14 = vld [vmem:[#allocation66_spill] sm:$0xff] }
 0x716   : > { %v17306_v37 = vpop.f32.mrf.mxu1  ;;  %v9984_v36 = vadd.f32 %v24034_v14, %v24033_v6 }
 0x717   : > { %14074 = vst.msk [vmem:[%s21605_s17 + $0x358] sm:$0xff] %vm385_vm2, %v11022_v24  ;;  %v11021_v49 = vmax.f32 %v10981_v18, 0.0  ;;  %v10984_v56 = vadd.f32 %v22781_v9, %v10937_v12  ;;  %v10936_v20 = vadd.f32 %v24021_v41, %v10468_v28  ;;  %v10471_v60 = vadd.f32 %v17306_v37, %v9969_v5  ;;  %v24035_v24 = vld [vmem:[#allocation88_spill] sm:$0xff]  ;;  %v24036_v12 = vld [vmem:[#allocation74_spill] sm:$0xff]  ;;  %v24037_v28 = vld [vmem:[#allocation123_spill] sm:$0xff] }
 0x718   : > { %v10391_v4 = vpop.f32.mrf.mxu1  ;;  %v9999_v38 = vadd.f32 %v24037_v28, %v24036_v12  ;;  %v24052_v28 = vld [vmem:[#allocation91_spill] sm:$0xff] }
 0x719   : > { %14073 = vst.msk [vmem:[%s21605_s17 + $0x350] sm:$0xff] %vm385_vm2, %v11021_v49  ;;  %v11024_v2 = vmax.f32 %v10984_v56, 0.0  ;;  %v10983_v27 = vadd.f32 %v22781_v9, %v10936_v20  ;;  %v10939_v13 = vadd.f32 %v24024_v1, %v10471_v60  ;;  %v10470_v39 = vadd.f32 %v10391_v4, %v9964_v51  ;;  %v24038_v49 = vld [vmem:[#allocation40_spill] sm:$0xff]  ;;  %v23041_v20 = vpop.f32.mrf.mxu0 }
 0x71a   : > { %v17309_v31 = vpop.f32.mrf.mxu1  ;;  %24039 = vst [vmem:[#allocation14_spill] sm:$0xff] %v23041_v20  ;;  %v24040_v60 = vld [vmem:[#allocation112_spill] sm:$0xff] }
 0x71b   : > { %14076 = vst.msk [vmem:[%s21605_s17 + $0x368] sm:$0xff] %vm385_vm2, %v11024_v2  ;;  %v11023_v45 = vmax.f32 %v10983_v27, 0.0  ;;  %v10986_v10 = vadd.f32 %v22781_v9, %v10939_v13  ;;  %v10938_v59 = vadd.f32 %v24028_v17, %v10470_v39  ;;  %v10473_v11 = vadd.f32 %v17309_v31, %v9979_v43  ;;  %v24042_v27 = vld [vmem:[#allocation89_spill] sm:$0xff]  ;;  %v24043_v39 = vld [vmem:[#allocation67_spill] sm:$0xff] }
 0x71c   : > { %v10401_v30 = vpop.f32.mrf.mxu1  ;;  %v9994_v55 = vadd.f32 %v24041_v25, %v24040_v60  ;;  %v10009_v54 = vadd.f32 %v24044_v61, %v24043_v39 }
 0x71d   : > { %14075 = vst.msk [vmem:[%s21605_s17 + $0x360] sm:$0xff] %vm385_vm2, %v11023_v45  ;;  %v11026_v16 = vmax.f32 %v10986_v10, 0.0  ;;  %v10985_v26 = vadd.f32 %v22781_v9, %v10938_v59  ;;  %v10941_v33 = vadd.f32 %v24031_v63, %v10473_v11  ;;  %v10472_v22 = vadd.f32 %v10401_v30, %v9974_v44  ;;  %v24045_v10 = vld [vmem:[#allocation129_spill] sm:$0xff]  ;;  %v23055_v11 = vpop.f32.mrf.mxu0  ;;  %v24049_v63 = vld [vmem:[#allocation90_spill] sm:$0xff] }
 0x71e   : > { %v17312_v21 = vpop.f32.mrf.mxu1  ;;  %24046 = vst [vmem:[#allocation71_spill] sm:$0xff] %v23055_v11 }
 0x71f   : > { %14078 = vst.msk [vmem:[%s21605_s17 + $0x378] sm:$0xff] %vm385_vm2, %v11026_v16  ;;  %v11025_v5 = vmax.f32 %v10985_v26, 0.0  ;;  %v10988_v0 = vadd.f32 %v22781_v9, %v10941_v33  ;;  %v10940_v18 = vadd.f32 %v24035_v24, %v10472_v22  ;;  %v10475_v34 = vadd.f32 %v17312_v21, %v9989_v19  ;;  %v24050_v21 = vld [vmem:[#allocation13_spill] sm:$0xff]  ;;  %v23067_v24 = vpop.f32.mrf.mxu0 }
 0x720   : > { %v10411_v53 = vpop.f32.mrf.mxu1  ;;  %v10004_v19 = vadd.f32 %v24048_v40, %v24047_v32  ;;  %24051 = vst [vmem:[#allocation119_spill] sm:$0xff] %v23067_v24 }
 0x721   : > { %14077 = vst.msk [vmem:[%s21605_s17 + $0x370] sm:$0xff] %vm385_vm2, %v11025_v5  ;;  %v11028_v51 = vmax.f32 %v10988_v0, 0.0  ;;  %v10987_v37 = vadd.f32 %v22781_v9, %v10940_v18  ;;  %v10943_v56 = vadd.f32 %v24038_v49, %v10475_v34  ;;  %v10474_v41 = vadd.f32 %v10411_v53, %v9984_v36  ;;  %v23080_v49 = vpop.f32.mrf.mxu0 }
 0x722   : > { %v17315_v43 = vpop.f32.mrf.mxu1 }
 0x723   : > { %14080 = vst.msk [vmem:[%s21605_s17 + $0x388] sm:$0xff] %vm385_vm2, %v11028_v51  ;;  %v11027_v4 = vmax.f32 %v10987_v37, 0.0  ;;  %v10990_v2 = vadd.f32 %v22781_v9, %v10943_v56  ;;  %v10942_v1 = vadd.f32 %v24042_v27, %v10474_v41  ;;  %v10477_v13 = vadd.f32 %v17315_v43, %v9999_v38  ;;  %v23090_v25 = vpop.f32.mrf.mxu0 }
 0x724   : > { %v10421_v44 = vpop.f32.mrf.mxu1 }
 0x725   : > { %14079 = vst.msk [vmem:[%s21605_s17 + $0x380] sm:$0xff] %vm385_vm2, %v11027_v4  ;;  %v11030_v31 = vmax.f32 %v10990_v2, 0.0  ;;  %v10989_v45 = vadd.f32 %v22781_v9, %v10942_v1  ;;  %v10945_v17 = vadd.f32 %v24045_v10, %v10477_v13  ;;  %v10476_v59 = vadd.f32 %v10421_v44, %v9994_v55  ;;  %v23096_v4 = vpop.f32.mrf.mxu0 }
 0x726   : > { %v17318_v30 = vpop.f32.mrf.mxu1 }
 0x727   : > { %14082 = vst.msk [vmem:[%s21605_s17 + $0x398] sm:$0xff] %vm385_vm2, %v11030_v31  ;;  %v11029_v16 = vmax.f32 %v10989_v45, 0.0  ;;  %v10992_v26 = vadd.f32 %v22781_v9, %v10945_v17  ;;  %v10944_v33 = vadd.f32 %v24049_v63, %v10476_v59  ;;  %v10479_v22 = vadd.f32 %v17318_v30, %v10009_v54  ;;  %v23102_v1 = vpop.f32.mrf.mxu0 }
 0x728   : > { %v10431_v6 = vpop.f32.mrf.mxu1 }
 0x729   : > { %14081 = vst.msk [vmem:[%s21605_s17 + $0x390] sm:$0xff] %vm385_vm2, %v11029_v16  ;;  %v11032_v14 = vmax.f32 %v10992_v26, 0.0  ;;  %v10991_v36 = vadd.f32 %v22781_v9, %v10944_v33  ;;  %v10947_v5 = vadd.f32 %v24050_v21, %v10479_v22  ;;  %v10478_v0 = vadd.f32 %v10431_v6, %v10004_v19  ;;  %v23108_v61 = vpop.f32.mrf.mxu0 }
 0x72a   : > { %v23069_v18 = vpop.f32.mrf.mxu1 }
 0x72b   : > { %14084 = vst.msk [vmem:[%s21605_s17 + $0x3a8] sm:$0xff] %vm385_vm2, %v11032_v14  ;;  %v11031_v34 = vmax.f32 %v10991_v36, 0.0  ;;  %v10994_v12 = vadd.f32 %v22781_v9, %v10947_v5  ;;  %v10946_v38 = vadd.f32 %v24052_v28, %v10478_v0  ;;  %v23114_v31 = vpop.f32.mrf.mxu0 }
 0x72c   : > { %v23075_v53 = vpop.f32.mrf.mxu1 }
 0x72d   : > { %14083 = vst.msk [vmem:[%s21605_s17 + $0x3a0] sm:$0xff] %vm385_vm2, %v11031_v34  ;;  %v11034_v51 = vmax.f32 %v10994_v12, 0.0  ;;  %v10993_v37 = vadd.f32 %v22781_v9, %v10946_v38  ;;  %v23120_v17 = vpop.f32.mrf.mxu0 }
 0x72e   : > { %v23082_v56 = vpop.f32.mrf.mxu1 }
 0x72f   : > { %14086 = vst.msk [vmem:[%s21605_s17 + $0x3b8] sm:$0xff] %vm385_vm2, %v11034_v51  ;;  %v11033_v41 = vmax.f32 %v10993_v37, 0.0  ;;  %v23126_v40 = vpop.f32.mrf.mxu0 }
 0x730   : > { %v23086_v60 = vpop.f32.mrf.mxu1 }
 0x731   : > { %14085 = vst.msk [vmem:[%s21605_s17 + $0x3b0] sm:$0xff] %vm385_vm2, %v11033_v41  ;;  %v23132_v16 = vpop.f32.mrf.mxu0 }
 0x732   : > { %v23092_v55 = vpop.f32.mrf.mxu1 }
 0x733   : > { %v23138_v33 = vpop.f32.mrf.mxu0 }
 0x734   : > { %v23094_v43 = vpop.f32.mrf.mxu1 }
 0x735   : > { %v23144_v14 = vpop.f32.mrf.mxu0 }
 0x736   : > { %v23098_v2 = vpop.f32.mrf.mxu1 }
 0x737   : > { %v23150_v5 = vpop.f32.mrf.mxu0 }
 0x738   : > { %v23100_v27 = vpop.f32.mrf.mxu1 }
 0x739   : > { %v23156_v12 = vpop.f32.mrf.mxu0 }
 0x73a   : > { %v23104_v13 = vpop.f32.mrf.mxu1 }
 0x73b   : > { %v23162_v51 = vpop.f32.mrf.mxu0 }
 0x73c   : > { %v23106_v39 = vpop.f32.mrf.mxu1 }
 0x73d   : > { %v23168_v24 = vpop.f32.mrf.mxu0 }
 0x73e   : > { %v23110_v54 = vpop.f32.mrf.mxu1 }
 0x73f   : > { %v23174_v47 = vpop.f32.mrf.mxu0 }
 0x740   : > { %v23112_v44 = vpop.f32.mrf.mxu1 }
 0x741   : > { %v23180_v23 = vpop.f32.mrf.mxu0 }
 0x742   : > { %v23116_v45 = vpop.f32.mrf.mxu1 }
 0x743   : > { %v23186_v3 = vpop.f32.mrf.mxu0 }
 0x744   : > { %v23118_v10 = vpop.f32.mrf.mxu1 }
 0x746   : > { %v23122_v59 = vpop.f32.mrf.mxu1 }
 0x748   : > { %v23124_v32 = vpop.f32.mrf.mxu1 }
 0x74a   : > { %v23128_v19 = vpop.f32.mrf.mxu1 }
 0x74c   : > { %v23130_v30 = vpop.f32.mrf.mxu1 }
 0x74e   : > { %v23134_v26 = vpop.f32.mrf.mxu1 }
 0x750   : > { %v23136_v63 = vpop.f32.mrf.mxu1 }
 0x752   : > { %v23140_v22 = vpop.f32.mrf.mxu1 }
 0x754   : > { %v23142_v6 = vpop.f32.mrf.mxu1 }
 0x756   : > { %v23146_v36 = vpop.f32.mrf.mxu1 }
 0x758   : > { %v23148_v21 = vpop.f32.mrf.mxu1 }
 0x75a   : > { %v23152_v0 = vpop.f32.mrf.mxu1 }
 0x75c   : > { %v23154_v34 = vpop.f32.mrf.mxu1 }
 0x75d   : > { %24053 = vst [vmem:[#allocation29_spill] sm:$0xff] %v23154_v34 }
 0x75e   : > { %v23158_v28 = vpop.f32.mrf.mxu1 }
 0x75f   : > { %24054 = vst [vmem:[#allocation41_spill] sm:$0xff] %v23158_v28 }
 0x760   : > { %v23160_v38 = vpop.f32.mrf.mxu1 }
 0x761   : > { %24055 = vst [vmem:[#allocation120_spill] sm:$0xff] %v23160_v38 }
 0x762   : > { %v23164_v37 = vpop.f32.mrf.mxu1 }
 0x763   : > { %24056 = vst [vmem:[#allocation16_spill] sm:$0xff] %v23164_v37 }
 0x764   : > { %v23166_v41 = vpop.f32.mrf.mxu1 }
 0x765   : > { %24057 = vst [vmem:[#allocation75_spill] sm:$0xff] %v23166_v41 }
 0x766   : > { %v23170_v11 = vpop.f32.mrf.mxu1 }
 0x767   : > { %24058 = vst [vmem:[#allocation122_spill] sm:$0xff] %v23170_v11  ;;  %v23192_v11 = vpop.f32.mrf.mxu0 }
 0x768   : > { %v23172_v20 = vpop.f32.mrf.mxu1 }
 0x769   : > { %24059 = vst [vmem:[#allocation30_spill] sm:$0xff] %v23172_v20  ;;  %v23200_v37 = vpop.f32.mrf.mxu0 }
 0x76a   : > { %v23176_v50 = vpop.f32.mrf.mxu1 }
 0x76b   : > { %24060 = vst [vmem:[#allocation18_spill] sm:$0xff] %v23176_v50 }
 0x76c   : > { %v23178_v48 = vpop.f32.mrf.mxu1 }
 0x76d   : > { %24061 = vst [vmem:[#allocation33_spill] sm:$0xff] %v23178_v48  ;;  %v24068_v48 = vld [vmem:[#allocation15_spill] sm:$0xff] }
 0x76e   : > { %v23182_v57 = vpop.f32.mrf.mxu1  ;;  %v11739_v50 = vadd.f32 %v24068_v48, %v23069_v18  ;;  %v24071_v48 = vld [vmem:[#allocation94_spill] sm:$0xff] }
 0x76f   : > { %24062 = vst [vmem:[#allocation20_spill] sm:$0xff] %v23182_v57  ;;  %v11744_v18 = vadd.f32 %v24071_v48, %v23086_v60  ;;  %v24073_v60 = vld [vmem:[#allocation95_spill] sm:$0xff] }
 0x770   : > { %v23184_v62 = vpop.f32.mrf.mxu1 }
 0x771   : > { %24063 = vst [vmem:[#allocation36_spill] sm:$0xff] %v23184_v62  ;;  %v24069_v62 = vld [vmem:[#allocation92_spill] sm:$0xff] }
 0x772   : > { %v23188_v7 = vpop.f32.mrf.mxu1  ;;  %v11734_v58 = vadd.f32 %v24069_v62, %v23075_v53 }
 0x773   : > { %24064 = vst [vmem:[#allocation25_spill] sm:$0xff] %v23188_v7  ;;  %v24070_v7 = vld [vmem:[#allocation93_spill] sm:$0xff] }
 0x774   : > { %v23190_v41 = vpop.f32.mrf.mxu1 }
 0x775   : > { %24065 = vst [vmem:[#allocation82_spill] sm:$0xff] %v23190_v41  ;;  %v11749_v41 = vadd.f32 %v24070_v7, %v23082_v56 }
 0x776   : > { %v23194_v20 = vpop.f32.mrf.mxu1 }
 0x777   : > { %24066 = vst [vmem:[#allocation39_spill] sm:$0xff] %v23194_v20  ;;  %v23207_v20 = vpop.f32.mrf.mxu0 }
 0x778   : > { %v23196_v15 = vpop.f32.mrf.mxu1 }
 0x779   : > { %24067 = vst [vmem:[#allocation70_spill] sm:$0xff] %v23196_v15  ;;  %v23217_v56 = vpop.f32.mrf.mxu0 }
 0x77a   : > { %v17517_v57 = vpop.f32.mrf.mxu1 }
 0x77b   : > { %v12361_v38 = vadd.f32 %v17517_v57, %v11739_v50  ;;  %v24072_v57 = vld [vmem:[#allocation21_spill] sm:$0xff] }
 0x77c   : > { %v12161_v8 = vpop.f32.mrf.mxu1  ;;  %v11759_v50 = vadd.f32 %v24072_v57, %v23092_v55  ;;  %v24075_v57 = vld [vmem:[#allocation97_spill] sm:$0xff] }
 0x77d   : > { %v12828_v28 = vadd.f32 %v23080_v49, %v12361_v38  ;;  %v12360_v46 = vadd.f32 %v12161_v8, %v11734_v58  ;;  %v11754_v38 = vadd.f32 %v24073_v60, %v23094_v43 }
 0x77e   : > { %v17520_v15 = vpop.f32.mrf.mxu1 }
 0x77f   : > { %v12875_v34 = vadd.f32 %v22781_v9, %v12828_v28  ;;  %v12827_v42 = vadd.f32 %v23090_v25, %v12360_v46  ;;  %v12363_v62 = vadd.f32 %v17520_v15, %v11749_v41 }
 0x780   : > { %v12171_v7 = vpop.f32.mrf.mxu1 }
 0x781   : > { %v12915_v53 = vmax.f32 %v12875_v34, 0.0  ;;  %v12874_v8 = vadd.f32 %v22781_v9, %v12827_v42  ;;  %v12830_v58 = vadd.f32 %v23096_v4, %v12363_v62  ;;  %v12362_v49 = vadd.f32 %v12171_v7, %v11744_v18  ;;  %v24074_v42 = vld [vmem:[#allocation96_spill] sm:$0xff]  ;;  %v23231_v62 = vpop.f32.mrf.mxu0 }
 0x782   : > { %v17523_v28 = vpop.f32.mrf.mxu1  ;;  %v11769_v34 = vadd.f32 %v24074_v42, %v23098_v2  ;;  %v11764_v7 = vadd.f32 %v24075_v57, %v23100_v27 }
 0x783   : > { %14255 = vst.msk [vmem:[%s21605_s17 + $0x3c8] sm:$0xff] %vm385_vm2, %v12915_v53  ;;  %v12914_v46 = vmax.f32 %v12874_v8, 0.0  ;;  %v12877_v15 = vadd.f32 %v22781_v9, %v12830_v58  ;;  %v12829_v25 = vadd.f32 %v23102_v1, %v12362_v49  ;;  %v12365_v55 = vadd.f32 %v17523_v28, %v11759_v50  ;;  %v24076_v58 = vld [vmem:[#allocation98_spill] sm:$0xff] }
 0x784   : > { %v12181_v4 = vpop.f32.mrf.mxu1  ;;  %v11779_v49 = vadd.f32 %v24076_v58, %v23104_v13 }
 0x785   : > { %14254 = vst.msk [vmem:[%s21605_s17 + $0x3c0] sm:$0xff] %vm385_vm2, %v12914_v46  ;;  %v12917_v41 = vmax.f32 %v12877_v15, 0.0  ;;  %v12876_v43 = vadd.f32 %v22781_v9, %v12829_v25  ;;  %v12832_v48 = vadd.f32 %v23108_v61, %v12365_v55  ;;  %v12364_v18 = vadd.f32 %v12181_v4, %v11754_v38  ;;  %v23245_v46 = vpop.f32.mrf.mxu0  ;;  %v24077_v15 = vld [vmem:[#allocation99_spill] sm:$0xff]  ;;  %v24078_v4 = vld [vmem:[#allocation100_spill] sm:$0xff] }
 0x786   : > { %v17526_v1 = vpop.f32.mrf.mxu1  ;;  %v11774_v25 = vadd.f32 %v24077_v15, %v23106_v39 }
 0x787   : > { %14257 = vst.msk [vmem:[%s21605_s17 + $0x3d8] sm:$0xff] %vm385_vm2, %v12917_v41  ;;  %v12916_v2 = vmax.f32 %v12876_v43, 0.0  ;;  %v12879_v50 = vadd.f32 %v22781_v9, %v12832_v48  ;;  %v12831_v53 = vadd.f32 %v23114_v31, %v12364_v18  ;;  %v12367_v8 = vadd.f32 %v17526_v1, %v11769_v34  ;;  %v23259_v57 = vpop.f32.mrf.mxu0 }
 0x788   : > { %v12191_v61 = vpop.f32.mrf.mxu1  ;;  %v11789_v41 = vadd.f32 %v24078_v4, %v23110_v54 }
 0x789   : > { %14256 = vst.msk [vmem:[%s21605_s17 + $0x3d0] sm:$0xff] %vm385_vm2, %v12916_v2  ;;  %v12919_v60 = vmax.f32 %v12879_v50, 0.0  ;;  %v12878_v27 = vadd.f32 %v22781_v9, %v12831_v53  ;;  %v12834_v38 = vadd.f32 %v23120_v17, %v12367_v8  ;;  %v12366_v28 = vadd.f32 %v12191_v61, %v11764_v7  ;;  %v24079_v7 = vld [vmem:[#allocation101_spill] sm:$0xff]  ;;  %v24080_v8 = vld [vmem:[#allocation102_spill] sm:$0xff] }
 0x78a   : > { %v17529_v31 = vpop.f32.mrf.mxu1  ;;  %v11784_v1 = vadd.f32 %v24079_v7, %v23112_v44  ;;  %v11799_v58 = vadd.f32 %v24080_v8, %v23116_v45  ;;  %v24084_v7 = vld [vmem:[#allocation10_spill] sm:$0xff] }
 0x78b   : > { %14259 = vst.msk [vmem:[%s21605_s17 + $0x3e8] sm:$0xff] %vm385_vm2, %v12919_v60  ;;  %v12918_v13 = vmax.f32 %v12878_v27, 0.0  ;;  %v12881_v55 = vadd.f32 %v22781_v9, %v12834_v38  ;;  %v12833_v42 = vadd.f32 %v23126_v40, %v12366_v28  ;;  %v12369_v34 = vadd.f32 %v17529_v31, %v11779_v49  ;;  %v23273_v27 = vpop.f32.mrf.mxu0  ;;  %v24081_v38 = vld [vmem:[#allocation103_spill] sm:$0xff] }
 0x78c   : > { %v12201_v17 = vpop.f32.mrf.mxu1  ;;  %v11794_v28 = vadd.f32 %v24081_v38, %v23118_v10 }
 0x78d   : > { %14258 = vst.msk [vmem:[%s21605_s17 + $0x3e0] sm:$0xff] %vm385_vm2, %v12918_v13  ;;  %v12921_v43 = vmax.f32 %v12881_v55, 0.0  ;;  %v12880_v39 = vadd.f32 %v22781_v9, %v12833_v42  ;;  %v12836_v48 = vadd.f32 %v23132_v16, %v12369_v34  ;;  %v12368_v18 = vadd.f32 %v12201_v17, %v11774_v25  ;;  %v24082_v13 = vld [vmem:[#allocation105_spill] sm:$0xff]  ;;  %v24083_v17 = vld [vmem:[#allocation108_spill] sm:$0xff] }
 0x78e   : > { %v17532_v40 = vpop.f32.mrf.mxu1  ;;  %v11809_v55 = vadd.f32 %v24082_v13, %v23122_v59 }
 0x78f   : > { %14261 = vst.msk [vmem:[%s21605_s17 + $0x3f8] sm:$0xff] %vm385_vm2, %v12921_v43  ;;  %v12920_v54 = vmax.f32 %v12880_v39, 0.0  ;;  %v12883_v2 = vadd.f32 %v22781_v9, %v12836_v48  ;;  %v12835_v50 = vadd.f32 %v23138_v33, %v12368_v18  ;;  %v12371_v53 = vadd.f32 %v17532_v40, %v11789_v41  ;;  %v23287_v41 = vpop.f32.mrf.mxu0 }
 0x790   : > { %v12211_v16 = vpop.f32.mrf.mxu1  ;;  %v11804_v43 = vadd.f32 %v24083_v17, %v23124_v32  ;;  %v11834_v17 = vadd.f32 %v22800_v29, %v23142_v6 }
 0x791   : > { %14260 = vst.msk [vmem:[%s21605_s17 + $0x3f0] sm:$0xff] %vm385_vm2, %v12920_v54  ;;  %v12923_v49 = vmax.f32 %v12883_v2, 0.0  ;;  %v12882_v44 = vadd.f32 %v22781_v9, %v12835_v50  ;;  %v12838_v61 = vadd.f32 %v23144_v14, %v12371_v53  ;;  %v12370_v60 = vadd.f32 %v12211_v16, %v11784_v1  ;;  %v23301_v50 = vpop.f32.mrf.mxu0  ;;  %v24085_v53 = vld [vmem:[#allocation19_spill] sm:$0xff] }
 0x792   : > { %v17535_v33 = vpop.f32.mrf.mxu1  ;;  %v11819_v1 = vadd.f32 %v24084_v7, %v23128_v19  ;;  %v11814_v8 = vadd.f32 %v24085_v53, %v23130_v30 }
 0x793   : > { %14263 = vst.msk [vmem:[%s21605_s17 + $0x408] sm:$0xff] %vm385_vm2, %v12923_v49  ;;  %v12922_v45 = vmax.f32 %v12882_v44, 0.0  ;;  %v12885_v15 = vadd.f32 %v22781_v9, %v12838_v61  ;;  %v12837_v25 = vadd.f32 %v23150_v5, %v12370_v60  ;;  %v12373_v31 = vadd.f32 %v17535_v33, %v11799_v58  ;;  %v23307_v58 = vld [vmem:[#allocation7] ss:$0 sm:$0xff]  ;;  %v23317_v33 = vpop.f32.mrf.mxu0 }
 0x794   : > { %v12221_v14 = vpop.f32.mrf.mxu1 }
 0x795   : > { %14262 = vst.msk [vmem:[%s21605_s17 + $0x400] sm:$0xff] %vm385_vm2, %v12922_v45  ;;  %v12925_v42 = vmax.f32 %v12885_v15, 0.0  ;;  %v12884_v10 = vadd.f32 %v22781_v9, %v12837_v25  ;;  %v12840_v34 = vadd.f32 %v23156_v12, %v12373_v31  ;;  %v12372_v4 = vadd.f32 %v12221_v14, %v11794_v28  ;;  %v24087_v45 = vld [vmem:[#allocation22_spill] sm:$0xff] }
 0x796   : > { %v17538_v5 = vpop.f32.mrf.mxu1  ;;  %v11824_v15 = vadd.f32 %v24087_v45, %v23136_v63 }
 0x797   : > { %14265 = vst.msk [vmem:[%s21605_s17 + $0x418] sm:$0xff] %vm385_vm2, %v12925_v42  ;;  %v12924_v59 = vmax.f32 %v12884_v10, 0.0  ;;  %v12887_v39 = vadd.f32 %v22781_v9, %v12840_v34  ;;  %v12839_v48 = vadd.f32 %v23162_v51, %v12372_v4  ;;  %v12375_v18 = vadd.f32 %v17538_v5, %v11809_v55  ;;  %v24088_v55 = vld [vmem:[#allocation32_spill] sm:$0xff]  ;;  %v23331_v4 = vpop.f32.mrf.mxu0 }
 0x798   : > { %v12231_v12 = vpop.f32.mrf.mxu1  ;;  %v11839_v14 = vadd.f32 %v24088_v55, %v23140_v22 }
 0x799   : > { %14264 = vst.msk [vmem:[%s21605_s17 + $0x410] sm:$0xff] %vm385_vm2, %v12924_v59  ;;  %v12927_v40 = vmax.f32 %v12887_v39, 0.0  ;;  %v12886_v32 = vadd.f32 %v22781_v9, %v12839_v48  ;;  %v12842_v54 = vadd.f32 %v23168_v24, %v12375_v18  ;;  %v12374_v2 = vadd.f32 %v12231_v12, %v11804_v43  ;;  %v24086_v24 = vld [vmem:[#allocation11_spill] sm:$0xff]  ;;  %v23345_v7 = vpop.f32.mrf.mxu0 }
 0x79a   : > { %v17541_v51 = vpop.f32.mrf.mxu1  ;;  %v11829_v44 = vadd.f32 %v24086_v24, %v23134_v26  ;;  %v11849_v39 = vadd.f32 %v22816_v52, %v23146_v36 }
 0x79b   : > { %14267 = vst.msk [vmem:[%s21605_s17 + $0x428] sm:$0xff] %vm385_vm2, %v12927_v40  ;;  %v12926_v19 = vmax.f32 %v12886_v32, 0.0  ;;  %v12889_v16 = vadd.f32 %v23307_v58, %v12842_v54  ;;  %v12841_v49 = vadd.f32 %v23174_v47, %v12374_v2  ;;  %v12377_v9 = vadd.f32 %v17541_v51, %v11819_v1  ;;  %v24089_v32 = vld [vmem:[#allocation114_spill] sm:$0xff]  ;;  %v24090_v51 = vld [vmem:[#allocation29_spill] sm:$0xff] }
 0x79c   : > { %v12241_v61 = vpop.f32.mrf.mxu1  ;;  %v11844_v1 = vadd.f32 %v22832_v35, %v23148_v21  ;;  %v11859_v54 = vadd.f32 %v24089_v32, %v23152_v0  ;;  %v24102_v32 = vld [vmem:[#allocation30_spill] sm:$0xff] }
 0x79d   : > { %14266 = vst.msk [vmem:[%s21605_s17 + $0x420] sm:$0xff] %vm385_vm2, %v12926_v19  ;;  %v12929_v30 = vmax.f32 %v12889_v16, 0.0  ;;  %v12888_v60 = vadd.f32 %v23307_v58, %v12841_v49  ;;  %v12844_v38 = vadd.f32 %v23180_v23, %v12377_v9  ;;  %v12376_v28 = vadd.f32 %v12241_v61, %v11814_v8  ;;  %v23359_v8 = vpop.f32.mrf.mxu0  ;;  %v24091_v19 = vld [vmem:[#allocation12_spill] sm:$0xff]  ;;  %v24093_v61 = vld [vmem:[#allocation79_spill] sm:$0xff] }
 0x79e   : > { %v17544_v47 = vpop.f32.mrf.mxu1  ;;  %v11854_v16 = vadd.f32 %v24091_v19, %v24090_v51  ;;  %v24104_v51 = vld [vmem:[#allocation18_spill] sm:$0xff] }
 0x79f   : > { %14269 = vst.msk [vmem:[%s21605_s17 + $0x438] sm:$0xff] %vm385_vm2, %v12929_v30  ;;  %v12928_v26 = vmax.f32 %v12888_v60, 0.0  ;;  %v12891_v25 = vadd.f32 %v23307_v58, %v12844_v38  ;;  %v12843_v31 = vadd.f32 %v23186_v3, %v12376_v28  ;;  %v12379_v13 = vadd.f32 %v17544_v47, %v11829_v44  ;;  %v24092_v44 = vld [vmem:[#allocation41_spill] sm:$0xff]  ;;  %v24094_v47 = vld [vmem:[#allocation120_spill] sm:$0xff]  ;;  %v24105_v19 = vld [vmem:[#allocation38_spill] sm:$0xff] }
 0x7a0   : > { %v12251_v23 = vpop.f32.mrf.mxu1  ;;  %v11869_v30 = vadd.f32 %v24093_v61, %v24092_v44  ;;  %v24106_v44 = vld [vmem:[#allocation33_spill] sm:$0xff] }
 0x7a1   : > { %14268 = vst.msk [vmem:[%s21605_s17 + $0x430] sm:$0xff] %vm385_vm2, %v12928_v26  ;;  %v12931_v42 = vmax.f32 %v12891_v25, 0.0  ;;  %v12890_v63 = vadd.f32 %v23307_v58, %v12843_v31  ;;  %v12846_v10 = vadd.f32 %v23192_v11, %v12379_v13  ;;  %v12378_v34 = vadd.f32 %v12251_v23, %v11824_v15  ;;  %v17629_v15 = vpop.f32.mrf.mxu0  ;;  %v24095_v26 = vld [vmem:[#allocation115_spill] sm:$0xff]  ;;  %v24096_v23 = vld [vmem:[#allocation16_spill] sm:$0xff]  ;;  %v24107_v61 = vld [vmem:[#allocation117_spill] sm:$0xff] }
 0x7a2   : > { %v17547_v3 = vpop.f32.mrf.mxu1  ;;  %v11864_v25 = vadd.f32 %v24095_v26, %v24094_v47  ;;  %v24109_v47 = vld [vmem:[#allocation26_spill] sm:$0xff] }
 0x7a3   : > { %14271 = vst.msk [vmem:[%s21605_s17 + $0x448] sm:$0xff] %vm385_vm2, %v12931_v42  ;;  %v12930_v22 = vmax.f32 %v12890_v63, 0.0  ;;  %v12893_v43 = vadd.f32 %v23307_v58, %v12846_v10  ;;  %v12845_v5 = vadd.f32 %v23200_v37, %v12378_v34  ;;  %v12381_v59 = vadd.f32 %v17547_v3, %v11839_v14  ;;  %v24097_v42 = vld [vmem:[#allocation23_spill] sm:$0xff] }
 0x7a4   : > { %v12261_v11 = vpop.f32.mrf.mxu1  ;;  %v11879_v63 = vadd.f32 %v24097_v42, %v24096_v23  ;;  %v24111_v23 = vld [vmem:[#allocation84_spill] sm:$0xff] }
 0x7a5   : > { %14270 = vst.msk [vmem:[%s21605_s17 + $0x440] sm:$0xff] %vm385_vm2, %v12930_v22  ;;  %v12933_v48 = vmax.f32 %v12893_v43, 0.0  ;;  %v12892_v29 = vadd.f32 %v23307_v58, %v12845_v5  ;;  %v12848_v6 = vadd.f32 %v23207_v20, %v12381_v59  ;;  %v12380_v18 = vadd.f32 %v12261_v11, %v11834_v17  ;;  %v12788_v22 = vpop.f32.mrf.mxu0  ;;  %v24098_v43 = vld [vmem:[#allocation75_spill] sm:$0xff]  ;;  %v24099_v5 = vld [vmem:[#allocation69_spill] sm:$0xff] }
 0x7a6   : > { %v17550_v37 = vpop.f32.mrf.mxu1  ;;  %v11874_v59 = vadd.f32 %v24099_v5, %v24098_v43 }
 0x7a7   : > { %14273 = vst.msk [vmem:[%s21605_s17 + $0x458] sm:$0xff] %vm385_vm2, %v12933_v48  ;;  %v12932_v52 = vmax.f32 %v12892_v29, 0.0  ;;  %v12895_v36 = vadd.f32 %v23307_v58, %v12848_v6  ;;  %v12847_v12 = vadd.f32 %v23217_v56, %v12380_v18  ;;  %v12383_v40 = vadd.f32 %v17550_v37, %v11849_v39  ;;  %v24100_v6 = vld [vmem:[#allocation122_spill] sm:$0xff]  ;;  %v24101_v18 = vld [vmem:[#allocation116_spill] sm:$0xff] }
 0x7a8   : > { %v12271_v20 = vpop.f32.mrf.mxu1 }
 0x7a9   : > { %14272 = vst.msk [vmem:[%s21605_s17 + $0x450] sm:$0xff] %vm385_vm2, %v12932_v52  ;;  %v12935_v2 = vmax.f32 %v12895_v36, 0.0  ;;  %v12894_v35 = vadd.f32 %v23307_v58, %v12847_v12  ;;  %v12850_v21 = vadd.f32 %v23231_v62, %v12383_v40  ;;  %v12382_v53 = vadd.f32 %v12271_v20, %v11844_v1  ;;  %v17632_v40 = vpop.f32.mrf.mxu0 }
 0x7aa   : > { %v17553_v56 = vpop.f32.mrf.mxu1  ;;  %v11889_v1 = vadd.f32 %v24101_v18, %v24100_v6 }
 0x7ab   : > { %14275 = vst.msk [vmem:[%s21605_s17 + $0x468] sm:$0xff] %vm385_vm2, %v12935_v2  ;;  %v12934_v0 = vmax.f32 %v12894_v35, 0.0  ;;  %v12897_v49 = vadd.f32 %v23307_v58, %v12850_v21  ;;  %v12849_v9 = vadd.f32 %v23245_v46, %v12382_v53  ;;  %v12385_v24 = vadd.f32 %v17553_v56, %v11859_v54  ;;  %v24103_v54 = vld [vmem:[#allocation17_spill] sm:$0xff] }
 0x7ac   : > { %v12281_v62 = vpop.f32.mrf.mxu1  ;;  %v11884_v20 = vadd.f32 %v24103_v54, %v24102_v32 }
 0x7ad   : > { %14274 = vst.msk [vmem:[%s21605_s17 + $0x460] sm:$0xff] %vm385_vm2, %v12934_v0  ;;  %v12937_v60 = vmax.f32 %v12897_v49, 0.0  ;;  %v12896_v38 = vadd.f32 %v23307_v58, %v12849_v9  ;;  %v12852_v28 = vadd.f32 %v23259_v57, %v12385_v24  ;;  %v12384_v45 = vadd.f32 %v12281_v62, %v11854_v16  ;;  %v12798_v24 = vpop.f32.mrf.mxu0 }
 0x7ae   : > { %v17556_v31 = vpop.f32.mrf.mxu1  ;;  %v11899_v16 = vadd.f32 %v24105_v19, %v24104_v51 }
 0x7af   : > { %14277 = vst.msk [vmem:[%s21605_s17 + $0x478] sm:$0xff] %vm385_vm2, %v12937_v60  ;;  %v12936_v46 = vmax.f32 %v12896_v38, 0.0  ;;  %v12899_v13 = vadd.f32 %v23307_v58, %v12852_v28  ;;  %v12851_v55 = vadd.f32 %v23273_v27, %v12384_v45  ;;  %v12387_v14 = vadd.f32 %v17556_v31, %v11869_v30  ;;  %v24108_v45 = vld [vmem:[#allocation20_spill] sm:$0xff] }
 0x7b0   : > { %v12291_v10 = vpop.f32.mrf.mxu1  ;;  %v11894_v30 = vadd.f32 %v24107_v61, %v24106_v44  ;;  %v11909_v26 = vadd.f32 %v24109_v47, %v24108_v45 }
 0x7b1   : > { %14276 = vst.msk [vmem:[%s21605_s17 + $0x470] sm:$0xff] %vm385_vm2, %v12936_v46  ;;  %v12939_v57 = vmax.f32 %v12899_v13, 0.0  ;;  %v12898_v34 = vadd.f32 %v23307_v58, %v12851_v55  ;;  %v12854_v17 = vadd.f32 %v23287_v41, %v12387_v14  ;;  %v12386_v3 = vadd.f32 %v12291_v10, %v11864_v25  ;;  %v17635_v55 = vpop.f32.mrf.mxu0  ;;  %v24110_v14 = vld [vmem:[#allocation36_spill] sm:$0xff] }
 0x7b2   : > { %v17559_v39 = vpop.f32.mrf.mxu1  ;;  %v11904_v42 = vadd.f32 %v24111_v23, %v24110_v14 }
 0x7b3   : > { %14279 = vst.msk [vmem:[%s21605_s17 + $0x488] sm:$0xff] %vm385_vm2, %v12939_v57  ;;  %v12938_v27 = vmax.f32 %v12898_v34, 0.0  ;;  %v12901_v11 = vadd.f32 %v23307_v58, %v12854_v17  ;;  %v12853_v48 = vadd.f32 %v23301_v50, %v12386_v3  ;;  %v12389_v29 = vadd.f32 %v17559_v39, %v11879_v63  ;;  %v24112_v17 = vld [vmem:[#allocation25_spill] sm:$0xff]  ;;  %v24113_v3 = vld [vmem:[#allocation118_spill] sm:$0xff] }
 0x7b4   : > { %v12301_v37 = vpop.f32.mrf.mxu1  ;;  %v11919_v43 = vadd.f32 %v24113_v3, %v24112_v17 }
 0x7b5   : > { %14278 = vst.msk [vmem:[%s21605_s17 + $0x480] sm:$0xff] %vm385_vm2, %v12938_v27  ;;  %v12941_v41 = vmax.f32 %v12901_v11, 0.0  ;;  %v12900_v52 = vadd.f32 %v23307_v58, %v12853_v48  ;;  %v12856_v36 = vadd.f32 %v23317_v33, %v12389_v29  ;;  %v12388_v12 = vadd.f32 %v12301_v37, %v11874_v59  ;;  %v12808_v11 = vpop.f32.mrf.mxu0  ;;  %v24114_v48 = vld [vmem:[#allocation82_spill] sm:$0xff] }
 0x7b6   : > { %v17562_v2 = vpop.f32.mrf.mxu1  ;;  %v24115_v29 = vld [vmem:[#allocation14_spill] sm:$0xff] }
 0x7b7   : > { %14281 = vst.msk [vmem:[%s21605_s17 + $0x498] sm:$0xff] %vm385_vm2, %v12941_v41  ;;  %v12940_v50 = vmax.f32 %v12900_v52, 0.0  ;;  %v12903_v35 = vadd.f32 %v23307_v58, %v12856_v36  ;;  %v12855_v21 = vadd.f32 %v23331_v4, %v12388_v12  ;;  %v12391_v53 = vadd.f32 %v17562_v2, %v11889_v1  ;;  %v24116_v52 = vld [vmem:[#allocation39_spill] sm:$0xff] }
 0x7b8   : > { %v12311_v56 = vpop.f32.mrf.mxu1  ;;  %v11914_v6 = vadd.f32 %v24115_v29, %v24114_v48  ;;  %v24117_v36 = vld [vmem:[#allocation71_spill] sm:$0xff] }
 0x7b9   : > { %14280 = vst.msk [vmem:[%s21605_s17 + $0x490] sm:$0xff] %vm385_vm2, %v12940_v50  ;;  %v12943_v33 = vmax.f32 %v12903_v35, 0.0  ;;  %v12902_v0 = vadd.f32 %v23307_v58, %v12855_v21  ;;  %v12858_v49 = vadd.f32 %v23345_v7, %v12391_v53  ;;  %v12390_v9 = vadd.f32 %v12311_v56, %v11884_v20  ;;  %v17638_v50 = vpop.f32.mrf.mxu0  ;;  %v24118_v35 = vld [vmem:[#allocation70_spill] sm:$0xff]  ;;  %v24119_v21 = vld [vmem:[#allocation119_spill] sm:$0xff] }
 0x7ba   : > { %v17565_v62 = vpop.f32.mrf.mxu1  ;;  %v11929_v12 = vadd.f32 %v24117_v36, %v24116_v52  ;;  %v11924_v53 = vadd.f32 %v24119_v21, %v24118_v35 }
 0x7bb   : > { %14283 = vst.msk [vmem:[%s21605_s17 + $0x4a8] sm:$0xff] %vm385_vm2, %v12943_v33  ;;  %v12942_v4 = vmax.f32 %v12902_v0, 0.0  ;;  %v12905_v60 = vadd.f32 %v23307_v58, %v12858_v49  ;;  %v12857_v38 = vadd.f32 %v23359_v8, %v12390_v9  ;;  %v12393_v28 = vadd.f32 %v17565_v62, %v11899_v16  ;;  %v12818_v61 = vpop.f32.mrf.mxu0 }
 0x7bc   : > { %v12321_v25 = vpop.f32.mrf.mxu1 }
 0x7bd   : > { %14282 = vst.msk [vmem:[%s21605_s17 + $0x4a0] sm:$0xff] %vm385_vm2, %v12942_v4  ;;  %v12945_v7 = vmax.f32 %v12905_v60, 0.0  ;;  %v12904_v31 = vadd.f32 %v23307_v58, %v12857_v38  ;;  %v12860_v46 = vadd.f32 %v17629_v15, %v12393_v28  ;;  %v12392_v13 = vadd.f32 %v12321_v25, %v11894_v30 }
 0x7be   : > { %v17568_v63 = vpop.f32.mrf.mxu1 }
 0x7bf   : > { %14285 = vst.msk [vmem:[%s21605_s17 + $0x4b8] sm:$0xff] %vm385_vm2, %v12945_v7  ;;  %v12944_v8 = vmax.f32 %v12904_v31, 0.0  ;;  %v12907_v10 = vadd.f32 %v23307_v58, %v12860_v46  ;;  %v12859_v57 = vadd.f32 %v12788_v22, %v12392_v13  ;;  %v12395_v34 = vadd.f32 %v17568_v63, %v11909_v26 }
 0x7c0   : > { %v12331_v5 = vpop.f32.mrf.mxu1 }
 0x7c1   : > { %14284 = vst.msk [vmem:[%s21605_s17 + $0x4b0] sm:$0xff] %vm385_vm2, %v12944_v8  ;;  %v12947_v15 = vmax.f32 %v12907_v10, 0.0  ;;  %v12906_v59 = vadd.f32 %v23307_v58, %v12859_v57  ;;  %v12862_v39 = vadd.f32 %v17632_v40, %v12395_v34  ;;  %v12394_v27 = vadd.f32 %v12331_v5, %v11904_v42 }
 0x7c2   : > { %v17571_v18 = vpop.f32.mrf.mxu1 }
 0x7c3   : > { %14287 = vst.msk [vmem:[%s21605_s17 + $0x4c8] sm:$0xff] %vm385_vm2, %v12947_v15  ;;  %v12946_v22 = vmax.f32 %v12906_v59, 0.0  ;;  %v12909_v1 = vadd.f32 %v23307_v58, %v12862_v39  ;;  %v12861_v37 = vadd.f32 %v12798_v24, %v12394_v27  ;;  %v12397_v41 = vadd.f32 %v17571_v18, %v11919_v43 }
 0x7c4   : > { %v12341_v32 = vpop.f32.mrf.mxu1 }
 0x7c5   : > { %14286 = vst.msk [vmem:[%s21605_s17 + $0x4c0] sm:$0xff] %vm385_vm2, %v12946_v22  ;;  %v12949_v40 = vmax.f32 %v12909_v1, 0.0  ;;  %v12908_v54 = vadd.f32 %v23307_v58, %v12861_v37  ;;  %v12864_v20 = vadd.f32 %v17635_v55, %v12397_v41  ;;  %v12396_v2 = vadd.f32 %v12341_v32, %v11914_v6 }
 0x7c6   : > { %v17574_v51 = vpop.f32.mrf.mxu1 }
 0x7c7   : > { %14289 = vst.msk [vmem:[%s21605_s17 + $0x4d8] sm:$0xff] %vm385_vm2, %v12949_v40  ;;  %v12948_v19 = vmax.f32 %v12908_v54, 0.0  ;;  %v12911_v16 = vadd.f32 %v23307_v58, %v12864_v20  ;;  %v12863_v56 = vadd.f32 %v12808_v11, %v12396_v2  ;;  %v12399_v33 = vadd.f32 %v17574_v51, %v11929_v12 }
 0x7c8   : > { %v12351_v0 = vpop.f32.mrf.mxu1 }
 0x7c9   : > { %14288 = vst.msk [vmem:[%s21605_s17 + $0x4d0] sm:$0xff] %vm385_vm2, %v12948_v19  ;;  %v12951_v49 = vmax.f32 %v12911_v16, 0.0  ;;  %v12910_v9 = vadd.f32 %v23307_v58, %v12863_v56  ;;  %v12866_v24 = vadd.f32 %v17638_v50, %v12399_v33  ;;  %v12398_v44 = vadd.f32 %v12351_v0, %v11924_v53 }
 0x7cb   : > { %14291 = vst.msk [vmem:[%s21605_s17 + $0x4e8] sm:$0xff] %vm385_vm2, %v12951_v49  ;;  %v12950_v30 = vmax.f32 %v12910_v9, 0.0  ;;  %v12913_v62 = vadd.f32 %v23307_v58, %v12866_v24  ;;  %v12865_v4 = vadd.f32 %v12818_v61, %v12398_v44 }
 0x7cd   : > { %14290 = vst.msk [vmem:[%s21605_s17 + $0x4e0] sm:$0xff] %vm385_vm2, %v12950_v30  ;;  %v12953_v60 = vmax.f32 %v12913_v62, 0.0  ;;  %v12912_v38 = vadd.f32 %v23307_v58, %v12865_v4 }
 0x7cf   : > { %14293 = vst.msk [vmem:[%s21605_s17 + $0x4f8] sm:$0xff] %vm385_vm2, %v12953_v60  ;;  %v12952_v28 = vmax.f32 %v12912_v38, 0.0 }
 0x7d1   : > { %14292 = vst.msk [vmem:[%s21605_s17 + $0x4f0] sm:$0xff] %vm385_vm2, %v12952_v28 }
 0x7d2 PF: > { %s18_s21 = sadd.s32 1, %s17782_s21  }
 0x7d3   : > { %p15_p8 = scmp.ge.s32.totalorder %s18_s21, 4  }
 0x7d5   :  { %17 = sbr.rel (!%p15_p8) target bundleno = 2 (0x2), region = 113 }
 0x7da   :  { %13016 = vsyncpa [#allocation4], 1 }
 0x7db   :  { %13018 = vsyncpa [#allocation4 + $0x1], 1 }
 0x7dc   :  { %13019 = vsyncpa [#allocation6], 1 }

</bundles_post_ra>
